<compile_context>
chip_gen: v7x
topology: tpu7x:2x2x1
jax: 0.10.0
libtpu: 0.0.40
codegen_flags: <defaults>
</compile_context>

<pallas_src>
import functools
import math

import jax
import jax.numpy as jnp
from jax.experimental import pallas as pl
from jax.experimental.pallas import tpu as pltpu


def _radial_basis_kernel(*refs, e):
    """refs = (d_col_0, ..., d_col_{pack-1}, freq_tiled, out)."""
    *d_refs, f_ref, o_ref = refs
    rows, width = o_ref.shape              # (tile_rows, pack * e)
    pack = len(d_refs)

    # dsel[p, c] = distance of edge (packed row p, slot c // e), lane-dense.
    dsel = jnp.broadcast_to(d_refs[0][...], (rows, width))
    if pack > 1:
        lane = jax.lax.broadcasted_iota(jnp.int32, (rows, width), 1)
        for s in range(1, pack):
            dsel = jnp.where(
                lane >= s * e,
                jnp.broadcast_to(d_refs[s][...], (rows, width)),
                dsel,
            )

    # f_ref is (1, pack*e): frequencies already scaled by 1/cutoff, tiled per
    # slot.  One VPU multiply + one EUP sin per output element, then an
    # unmasked full-lane store.
    o_ref[...] = jnp.sin(dsel * f_ref[...]).astype(o_ref.dtype)


def radial_basis(bond_distances, frequencies, cutoff, *,
                 tile_rows=2048, out_dtype=jnp.float32):
    """bond_distances: (N,), frequencies: (E,)  ->  (N, E) = sin(freq * d / cutoff)."""
    d = bond_distances.astype(jnp.float32).reshape(-1)
    f = frequencies.astype(jnp.float32).reshape(-1)
    n = d.shape[0]
    e = f.shape[0]

    # Pack `pack` edges per 128-lane output row so stores are lane-dense.
    pack = (128 // e) if (e < 128 and 128 % e == 0) else 1
    width = pack * e

    n_rows = pl.cdiv(n, pack)
    # Clamp the tile so tiny inputs are not padded up to a full 2048-row tile.
    # (For production edge counts, keep tile_rows large; on v7x keep the grid
    # length >= 2 so both TensorCores get work.)
    tile_rows = max(8, min(tile_rows, pl.cdiv(n_rows, 8) * 8))
    grid = pl.cdiv(n_rows, tile_rows)
    n_rows_pad = grid * tile_rows
    n_pad = n_rows_pad * pack

    # Host-side padding for ragged N (padded distances are 0 -> sin(0) = 0).
    d_pad = jnp.zeros((n_pad,), jnp.float32).at[:n].set(d)
    d_packed = d_pad.reshape(n_rows_pad, pack)
    # One lane-0 column per packed slot; total copy is only N*4 bytes.
    d_cols = [d_packed[:, s:s + 1] for s in range(pack)]

    # Pre-scale by 1/cutoff on the host (O(E)) and tile across the packed row.
    f_scaled = f * jnp.float32(1.0 / float(cutoff))
    f_tiled = jnp.tile(f_scaled, pack).reshape(1, width)

    kernel = functools.partial(_radial_basis_kernel, e=e)

    in_specs = (
        [pl.BlockSpec((tile_rows, 1), lambda i: (i, 0)) for _ in range(pack)]
        + [pl.BlockSpec((1, width), lambda i: (0, 0))]     # resident freqs
    )

    out_packed = pl.pallas_call(
        kernel,
        out_shape=jax.ShapeDtypeStruct((n_rows_pad, width), out_dtype),
        grid_spec=pltpu.PrefetchScalarGridSpec(
            num_scalar_prefetch=0,
            grid=(grid,),
            in_specs=in_specs,
            out_specs=pl.BlockSpec((tile_rows, width), lambda i: (i, 0)),
        ),
        compiler_params=pltpu.CompilerParams(
            dimension_semantics=("parallel",),
        ),
        cost_estimate=pl.CostEstimate(
            flops=2 * n_rows_pad * width,
            transcendentals=n_rows_pad * width,
            bytes_accessed=4 * (n_rows_pad * width + n_pad + width),
        ),
    )(*d_cols, f_tiled)

    # The packed (n_rows_pad, pack*E) buffer is row-major identical to
    # (n_pad, E): the reshape is free; the slice drops padding rows only.
    out = out_packed.reshape(n_rows_pad * pack, e)
    if n_pad != n:
        out = out[:n]
    return out


if __name__ == "__main__":
    # Deterministic parameter init (matches nn.Module __init__):
    embedding_size = 64
    cutoff = 5.0
    frequencies = math.pi * jnp.arange(1, embedding_size + 1, dtype=jnp.float32)

    # Small example input: ragged edge count to exercise padding + multi-step grid.
    key = jax.random.PRNGKey(0)
    n_edges = 3000
    bond_distances = jax.random.uniform(
        key, (n_edges,), dtype=jnp.float32, minval=0.0, maxval=cutoff
    )

    # tile_rows=512 here just so the small demo runs a multi-step grid;
    # the default (2048) is the production setting.
    out = radial_basis(bond_distances, frequencies, cutoff, tile_rows=512)
    out = jax.block_until_ready(out)

    # Reference check in plain JAX (same math as the PyTorch forward).
    ref = jnp.sin(frequencies[None, :] * (bond_distances * (1.0 / cutoff))[:, None])
    assert out.shape == (n_edges, embedding_size)
    assert jnp.max(jnp.abs(out - ref)) < 2e-4

    print("KERNEL_OK")
</pallas_src>

<mosaic_0001>
module attributes {stable_mosaic.version = 11 : i64} {
  func.func @_radial_basis_kernel(%arg0: i32, %arg1: memref<512x1xf32, #tpu.memory_space<vmem>>, %arg2: memref<512x1xf32, #tpu.memory_space<vmem>>, %arg3: memref<1x128xf32, #tpu.memory_space<vmem>>, %arg4: memref<512x128xf32, #tpu.memory_space<vmem>>) attributes {dimension_semantics = [#tpu.dimension_semantics<parallel>], iteration_bounds = array<i64: 3>, scalar_prefetch = 0 : i64, scratch_operands = 0 : i64, tpu.core_type = #tpu.core_type<tc>, window_params = [{transform_indices = @transform_0, window_bounds = array<i64: 512, 1>}, {transform_indices = @transform_1, window_bounds = array<i64: 512, 1>}, {pipeline_mode = #tpu.pipeline_mode<synchronous>, transform_indices = @transform_2, window_bounds = array<i64: 1, 128>}, {transform_indices = @transform_3, window_bounds = array<i64: 512, 128>}]} {
    %c0 = arith.constant 0 : index
    %c0_0 = arith.constant 0 : index
    %0 = vector.load %arg1[%c0, %c0_0] : memref<512x1xf32, #tpu.memory_space<vmem>>, vector<512x1xf32>
    %1 = vector.shape_cast %0 : vector<512x1xf32> to vector<512x1xf32>
    %2 = vector.broadcast %1 : vector<512x1xf32> to vector<512x128xf32>
    %3 = tpu.iota {dimensions = array<i32: 1>} : vector<512x128xi32>
    %c64_i32 = arith.constant 64 : i32
    %4 = vector.broadcast %c64_i32 : i32 to vector<512x128xi32>
    %5 = arith.cmpi sge, %3, %4 : vector<512x128xi32>
    %c0_1 = arith.constant 0 : index
    %c0_2 = arith.constant 0 : index
    %6 = vector.load %arg2[%c0_1, %c0_2] : memref<512x1xf32, #tpu.memory_space<vmem>>, vector<512x1xf32>
    %7 = vector.shape_cast %6 : vector<512x1xf32> to vector<512x1xf32>
    %8 = vector.broadcast %7 : vector<512x1xf32> to vector<512x128xf32>
    %9 = arith.select %5, %8, %2 : vector<512x128xi1>, vector<512x128xf32>
    %c0_3 = arith.constant 0 : index
    %c0_4 = arith.constant 0 : index
    %10 = vector.load %arg3[%c0_3, %c0_4] : memref<1x128xf32, #tpu.memory_space<vmem>>, vector<1x128xf32>
    %11 = vector.broadcast %10 : vector<1x128xf32> to vector<512x128xf32>
    %12 = arith.mulf %9, %11 : vector<512x128xf32>
    %13 = math.sin %12 : vector<512x128xf32>
    %c0_5 = arith.constant 0 : index
    %c0_6 = arith.constant 0 : index
    %14 = vector.load %arg4[%c0_5, %c0_6] : memref<512x128xf32, #tpu.memory_space<vmem>>, vector<512x128xf32>
    tpu.vector_store %arg4[%c0_5, %c0_6], %13 {strides = array<i32>} : memref<512x128xf32, #tpu.memory_space<vmem>>, vector<512x128xf32>,
    return
  }
  func.func @transform_0(%arg0: i32) -> (i32, i32) {
    %c0_i32 = arith.constant 0 : i32
    %c0_i32_0 = arith.constant 0 : i32
    return %arg0, %c0_i32 : i32, i32
  }
  func.func @transform_1(%arg0: i32) -> (i32, i32) {
    %c0_i32 = arith.constant 0 : i32
    %c0_i32_0 = arith.constant 0 : i32
    return %arg0, %c0_i32 : i32, i32
  }
  func.func @transform_2(%arg0: i32) -> (i32, i32) {
    %c0_i32 = arith.constant 0 : i32
    %c0_i32_0 = arith.constant 0 : i32
    %c0_i32_1 = arith.constant 0 : i32
    return %c0_i32, %c0_i32_0 : i32, i32
  }
  func.func @transform_3(%arg0: i32) -> (i32, i32) {
    %c0_i32 = arith.constant 0 : i32
    %c0_i32_0 = arith.constant 0 : i32
    return %arg0, %c0_i32 : i32, i32
  }
}

</mosaic_0001>

<bundles_post_ra>
// kernel: tpu_custom_call.1
= control target key start
LH: loop header
LB: loop body
LE: loop exit
PB: predicated region body
PF: predicated region fallthrough
CT: control target
= control target key end

     0   :  { %8 = vsyncpa [#allocation3], 0  ;;  %s14906_s0 = inlined_call_operand.vmem [shape: f32[1536,1], index: 0, kind: input, shape index: {}]   ;;  %s14907_s1 = inlined_call_operand.vmem [shape: f32[1536,1], index: 1, kind: input, shape index: {}]   ;;  %s14908_s2 = inlined_call_operand.vmem [shape: f32[1,128], index: 2, kind: input, shape index: {}]   ;;  %s14909_s3 = inlined_call_operand.hbm [shape: f32[1536,128], index: 3, kind: output, shape index: {}]  }
   0x1   :  { %10 = vsyncpa [#allocation3 + $0x1], 0  ;;  %s8848_s12 = smov 0   ;;  %s8850_s13 = smov 0  }
   0x2   :  { %s8852_s14 = smov 0   ;;  %s8854_s15 = smov 0  }
   0x3 LB: > { %s8869_s16 = sadd.s32 4294967295, %s8816_s15   ;;  %s7908_s17 = sadd.s32 4294967294, %s8816_s15   ;;  %s8816_s15 = sphi %s8854_s15, %s15155_s15   ;;  %s8812_s14 = sphi %s8852_s14, %s15154_s14   ;;  %s8808_s13 = sphi %s8850_s13, %s15153_s13   ;;  %s8804_s12 = sphi %s8848_s12, %s15152_s12  }
   0x4   : > { %s8873_s18 = sadd.s32 1, %s8816_s15   ;;  %s96_s19 = sadd.s32 1, %s8812_s14 }
   0x5   : > { %s93_s20 = ssub.s32 %s8816_s15, %s8873_s18  ;;  %p106_p0 = scmp.ne.s32.totalorder %s8812_s14, %s8808_s13 }
   0x6   : > { %p94_p1 = scmp.eq.s32.totalorder %s93_s20, 0  ;;  %p107_p2 = scmp.eq.s32.totalorder %s8869_s16, 2 }
   0x7   : > { %p112_p3 = scmp.ne.s32.totalorder %s8808_s13, %s8804_s12  ;;  %p113_p4 = scmp.eq.s32.totalorder %s7908_s17, 2 }
   0x8   : > { %s8884_s21 = scalar_select %p94_p1, %s8812_s14, %s96_s19  }
   0x9   : > { %p8886_p5 = por %p107_p2, %p106_p0  ;;  %p8890_p6 = por %p113_p4, %p112_p3 }
   0xa   : > { %p7911_p7 = scmp.ge.s32.totalorder %s8816_s15, 1  ;;  %p152_p8 = scmp.lt.s32.totalorder %s8816_s15, 4 }
   0xc   : > { %p153_p9 = pnand %p7911_p7, %p152_p8 }
   0xe   : > { %156 = sbr.rel (%p153_p9) target bundleno = 1942 (0x796), region = 32 }
  0x15   : > { %s7913_s24 = sshll.u32 %s8869_s16, 6  ;;  %v8818_v0 = vmov 0   ;;  %s178_s7 = sand.u32 1, %s8808_s13  }
  0x16   : > { %8485 = vset.pattern.permute.xlu1 %v8818_v0  ;;  %8484 = vset.pattern.permute.xlu0 %v8818_v0  ;;  %p182_p10 = scmp.lt.s32.totalorder %s7913_s24, 191  ;;  %s7912_s8 = sshll.u32 %s178_s7, 9 }
  0x17   : > { %s9477_s9 = scalar_lea.vmem [#allocation2], %s7912_s8  ;;  %s8179_s27 = sshll.u32 %s8869_s16, 13 }
  0x18   : > { %s15157_s24 = smov (!%p182_p10, %s7913_s24), 191  ;;  %s14865_s16 = scalar_lea.sflag [#allocation3], %s178_s7 }
  0x19   : > { %s7914_s25 = sshll.u32 %s15157_s24, 3  ;;  %s8825_s6 = smov [#allocation2]  }
  0x1a   : > { %s8905_s28 = scalar_lea.vmem %s14906_s0, %s7914_s25  ;;  %s8976_s4 = scalar_lea.vmem %s14907_s1, %s7914_s25 }
  0x1b   : > { %v196_v1 = vld [vmem:[%s8905_s28 + $0x10] sm:$0xff]  ;;  %v194_v2 = vld [vmem:[%s8905_s28] sm:$0xff]  ;;  %v197_v3 = vld [vmem:[%s8905_s28 + $0x18] sm:$0xff]  ;;  %s8758_s8 = sshll.u32 %s8825_s6, 4  ;;  %s8759_s8 = int_to_ptr.vmem [resolvable:$false] %s8758_s8 }
  0x1c   : > { %270 = vperm.xlu1 %8485, %v196_v1   ;;  %260 = vperm.xlu0 %8484, %v194_v2   ;;  %v195_v4 = vld [vmem:[%s8905_s28 + $0x8] sm:$0xff]  ;;  %v198_v6 = vld [vmem:[%s8905_s28 + $0x20] sm:$0xff]  ;;  %v201_v7 = vld [vmem:[%s8905_s28 + $0x38] sm:$0xff]  ;;  %s8760_s10 = scalar_lea.vmem %s8759_s8, 16384 }
  0x1d   : > { %v199_v5 = vld [vmem:[%s8905_s28 + $0x28] sm:$0xff]  ;;  %v200_v8 = vld [vmem:[%s8905_s28 + $0x30] sm:$0xff]  ;;  %v202_v10 = vld [vmem:[%s8905_s28 + $0x40] sm:$0xff] }
  0x1e   : > { %v203_v9 = vld [vmem:[%s8905_s28 + $0x48] sm:$0xff]  ;;  %v205_v11 = vld [vmem:[%s8905_s28 + $0x58] sm:$0xff]  ;;  %v204_v12 = vld [vmem:[%s8905_s28 + $0x50] sm:$0xff] }
  0x1f   : > { %v207_v13 = vld [vmem:[%s8905_s28 + $0x68] sm:$0xff]  ;;  %v206_v14 = vld [vmem:[%s8905_s28 + $0x60] sm:$0xff]  ;;  %v209_v15 = vld [vmem:[%s8905_s28 + $0x78] sm:$0xff] }
  0x20   : > { %275 = vperm.xlu1 %8485, %v197_v3   ;;  %265 = vperm.xlu0 %8484, %v195_v4   ;;  %v208_v16 = vld [vmem:[%s8905_s28 + $0x70] sm:$0xff]  ;;  %v211_v17 = vld [vmem:[%s8905_s28 + $0x88] sm:$0xff]  ;;  %v210_v18 = vld [vmem:[%s8905_s28 + $0x80] sm:$0xff] }
  0x21   : > { %v213_v19 = vld [vmem:[%s8905_s28 + $0x98] sm:$0xff]  ;;  %v212_v20 = vld [vmem:[%s8905_s28 + $0x90] sm:$0xff]  ;;  %v215_v21 = vld [vmem:[%s8905_s28 + $0xa8] sm:$0xff] }
  0x22   : > { %v214_v22 = vld [vmem:[%s8905_s28 + $0xa0] sm:$0xff]  ;;  %v217_v23 = vld [vmem:[%s8905_s28 + $0xb8] sm:$0xff]  ;;  %v216_v24 = vld [vmem:[%s8905_s28 + $0xb0] sm:$0xff] }
  0x23   : > { %v219_v25 = vld [vmem:[%s8905_s28 + $0xc8] sm:$0xff]  ;;  %v218_v26 = vld [vmem:[%s8905_s28 + $0xc0] sm:$0xff]  ;;  %v221_v27 = vld [vmem:[%s8905_s28 + $0xd8] sm:$0xff] }
  0x24   : > { %285 = vperm.xlu1 %8485, %v199_v5   ;;  %280 = vperm.xlu0 %8484, %v198_v6   ;;  %v220_v28 = vld [vmem:[%s8905_s28 + $0xd0] sm:$0xff]  ;;  %v223_v29 = vld [vmem:[%s8905_s28 + $0xe8] sm:$0xff]  ;;  %v222_v30 = vld [vmem:[%s8905_s28 + $0xe0] sm:$0xff] }
  0x25   : > { %v225_v31 = vld [vmem:[%s8905_s28 + $0xf8] sm:$0xff]  ;;  %v224_v32 = vld [vmem:[%s8905_s28 + $0xf0] sm:$0xff]  ;;  %v227_v33 = vld [vmem:[%s8905_s28 + $0x108] sm:$0xff] }
  0x26   : > { %v226_v34 = vld [vmem:[%s8905_s28 + $0x100] sm:$0xff]  ;;  %v229_v35 = vld [vmem:[%s8905_s28 + $0x118] sm:$0xff]  ;;  %v228_v36 = vld [vmem:[%s8905_s28 + $0x110] sm:$0xff] }
  0x27   : > { %v231_v37 = vld [vmem:[%s8905_s28 + $0x128] sm:$0xff]  ;;  %v230_v38 = vld [vmem:[%s8905_s28 + $0x120] sm:$0xff]  ;;  %v233_v39 = vld [vmem:[%s8905_s28 + $0x138] sm:$0xff] }
  0x28   : > { %295 = vperm.xlu1 %8485, %v201_v7   ;;  %290 = vperm.xlu0 %8484, %v200_v8   ;;  %v232_v40 = vld [vmem:[%s8905_s28 + $0x130] sm:$0xff]  ;;  %v235_v41 = vld [vmem:[%s8905_s28 + $0x148] sm:$0xff]  ;;  %v234_v42 = vld [vmem:[%s8905_s28 + $0x140] sm:$0xff] }
  0x29   : > { %v237_v43 = vld [vmem:[%s8905_s28 + $0x158] sm:$0xff]  ;;  %v236_v44 = vld [vmem:[%s8905_s28 + $0x150] sm:$0xff]  ;;  %v239_v45 = vld [vmem:[%s8905_s28 + $0x168] sm:$0xff] }
  0x2a   : > { %v238_v46 = vld [vmem:[%s8905_s28 + $0x160] sm:$0xff]  ;;  %v241_v47 = vld [vmem:[%s8905_s28 + $0x178] sm:$0xff]  ;;  %v240_v48 = vld [vmem:[%s8905_s28 + $0x170] sm:$0xff] }
  0x2b   : > { %v243_v49 = vld [vmem:[%s8905_s28 + $0x188] sm:$0xff]  ;;  %v242_v50 = vld [vmem:[%s8905_s28 + $0x180] sm:$0xff]  ;;  %v245_v51 = vld [vmem:[%s8905_s28 + $0x198] sm:$0xff] }
  0x2c   : > { %305 = vperm.xlu1 %8485, %v203_v9   ;;  %300 = vperm.xlu0 %8484, %v202_v10   ;;  %v244_v52 = vld [vmem:[%s8905_s28 + $0x190] sm:$0xff]  ;;  %v247_v53 = vld [vmem:[%s8905_s28 + $0x1a8] sm:$0xff]  ;;  %v246_v54 = vld [vmem:[%s8905_s28 + $0x1a0] sm:$0xff] }
  0x2d   : > { %v249_v55 = vld [vmem:[%s8905_s28 + $0x1b8] sm:$0xff]  ;;  %v248_v56 = vld [vmem:[%s8905_s28 + $0x1b0] sm:$0xff]  ;;  %v251_v57 = vld [vmem:[%s8905_s28 + $0x1c8] sm:$0xff] }
  0x2e   : > { %v250_v58 = vld [vmem:[%s8905_s28 + $0x1c0] sm:$0xff]  ;;  %v253_v59 = vld [vmem:[%s8905_s28 + $0x1d8] sm:$0xff]  ;;  %v252_v60 = vld [vmem:[%s8905_s28 + $0x1d0] sm:$0xff] }
  0x2f   : > { %v255_v61 = vld [vmem:[%s8905_s28 + $0x1e8] sm:$0xff]  ;;  %v254_v62 = vld [vmem:[%s8905_s28 + $0x1e0] sm:$0xff]  ;;  %v257_v63 = vld [vmem:[%s8905_s28 + $0x1f8] sm:$0xff] }
  0x30   : > { %315 = vperm.xlu1 %8485, %v205_v11   ;;  %310 = vperm.xlu0 %8484, %v204_v12   ;;  %v256_v0 = vld [vmem:[%s8905_s28 + $0x1f0] sm:$0xff]  ;;  %v582_v1 = vld [vmem:[%s8976_s4 + $0x8] sm:$0xff]  ;;  %v581_v2 = vld [vmem:[%s8976_s4] sm:$0xff]  ;;  %s7834_s28 = sshll.u32 %s9477_s9, 4  ;;  %s14859_s28 = int_to_ptr.vmem [resolvable:$true] %s7834_s28 }
  0x31   : > { %v584_v5 = vld [vmem:[%s8976_s4 + $0x18] sm:$0xff]  ;;  %v583_v6 = vld [vmem:[%s8976_s4 + $0x10] sm:$0xff]  ;;  %v586_v9 = vld [vmem:[%s8976_s4 + $0x28] sm:$0xff]  ;;  %s8754_s5 = scalar_lea.vmem %s14859_s28, 8192  ;;  %p8761_p0 = scmp.lt.s32.totalorder %s14859_s28, %s8759_s8 }
  0x32   : > { %v585_v10 = vld [vmem:[%s8976_s4 + $0x20] sm:$0xff]  ;;  %p8755_p11 = scmp.ne.s32.totalorder %s14859_s28, %s8754_s5  ;;  %p8762_p1 = scmp.lt.s32.totalorder %s8760_s10, %s8754_s5 }
  0x34   : > { %325 = vperm.xlu1 %8485, %v207_v13   ;;  %320 = vperm.xlu0 %8484, %v206_v14   ;;  %v588_v13 = vld [vmem:[%s8976_s4 + $0x38] sm:$0xff]  ;;  %v587_v14 = vld [vmem:[%s8976_s4 + $0x30] sm:$0xff]  ;;  %p8756_p12 = pnand %p8755_p11, %p8886_p5  ;;  %p8763_p2 = por %p8762_p1, %p8761_p0 }
  0x36   : > { %p8757_p13 = pneg %p8756_p12 }
  0x38   : > { %335 = vperm.xlu1 %8485, %v209_v15   ;;  %330 = vperm.xlu0 %8484, %v208_v16   ;;  %p8764_p3 = pnand %p8763_p2, %p8757_p13 }
  0x3c   : > { %345 = vperm.xlu1 %8485, %v211_v17   ;;  %340 = vperm.xlu0 %8484, %v210_v18   ;;  %v590_v17 = vld [vmem:[%s8976_s4 + $0x48] sm:$0xff]  ;;  %v589_v18 = vld [vmem:[%s8976_s4 + $0x40] sm:$0xff] }
  0x40   : > { %355 = vperm.xlu1 %8485, %v213_v19   ;;  %350 = vperm.xlu0 %8484, %v212_v20  }
  0x44   : > { %365 = vperm.xlu1 %8485, %v215_v21   ;;  %360 = vperm.xlu0 %8484, %v214_v22   ;;  %v592_v21 = vld [vmem:[%s8976_s4 + $0x58] sm:$0xff]  ;;  %v591_v22 = vld [vmem:[%s8976_s4 + $0x50] sm:$0xff] }
  0x48   : > { %375 = vperm.xlu1 %8485, %v217_v23   ;;  %370 = vperm.xlu0 %8484, %v216_v24  }
  0x4c   : > { %385 = vperm.xlu1 %8485, %v219_v25   ;;  %380 = vperm.xlu0 %8484, %v218_v26   ;;  %v594_v25 = vld [vmem:[%s8976_s4 + $0x68] sm:$0xff]  ;;  %v593_v26 = vld [vmem:[%s8976_s4 + $0x60] sm:$0xff] }
  0x50   : > { %395 = vperm.xlu1 %8485, %v221_v27   ;;  %390 = vperm.xlu0 %8484, %v220_v28  }
  0x54   : > { %405 = vperm.xlu1 %8485, %v223_v29   ;;  %400 = vperm.xlu0 %8484, %v222_v30   ;;  %v596_v29 = vld [vmem:[%s8976_s4 + $0x78] sm:$0xff]  ;;  %v595_v30 = vld [vmem:[%s8976_s4 + $0x70] sm:$0xff] }
  0x58   : > { %415 = vperm.xlu1 %8485, %v225_v31   ;;  %410 = vperm.xlu0 %8484, %v224_v32  }
  0x5c   : > { %425 = vperm.xlu1 %8485, %v227_v33   ;;  %420 = vperm.xlu0 %8484, %v226_v34   ;;  %v598_v33 = vld [vmem:[%s8976_s4 + $0x88] sm:$0xff]  ;;  %v597_v34 = vld [vmem:[%s8976_s4 + $0x80] sm:$0xff] }
  0x60   : > { %435 = vperm.xlu1 %8485, %v229_v35   ;;  %430 = vperm.xlu0 %8484, %v228_v36  }
  0x64   : > { %445 = vperm.xlu1 %8485, %v231_v37   ;;  %440 = vperm.xlu0 %8484, %v230_v38   ;;  %v600_v37 = vld [vmem:[%s8976_s4 + $0x98] sm:$0xff]  ;;  %v599_v38 = vld [vmem:[%s8976_s4 + $0x90] sm:$0xff] }
  0x68   : > { %455 = vperm.xlu1 %8485, %v233_v39   ;;  %450 = vperm.xlu0 %8484, %v232_v40  }
  0x6c   : > { %465 = vperm.xlu1 %8485, %v235_v41   ;;  %460 = vperm.xlu0 %8484, %v234_v42   ;;  %v602_v41 = vld [vmem:[%s8976_s4 + $0xa8] sm:$0xff]  ;;  %v601_v42 = vld [vmem:[%s8976_s4 + $0xa0] sm:$0xff] }
  0x70   : > { %475 = vperm.xlu1 %8485, %v237_v43   ;;  %470 = vperm.xlu0 %8484, %v236_v44  }
  0x74   : > { %485 = vperm.xlu1 %8485, %v239_v45   ;;  %480 = vperm.xlu0 %8484, %v238_v46   ;;  %v604_v45 = vld [vmem:[%s8976_s4 + $0xb8] sm:$0xff]  ;;  %v603_v46 = vld [vmem:[%s8976_s4 + $0xb0] sm:$0xff] }
  0x78   : > { %495 = vperm.xlu1 %8485, %v241_v47   ;;  %490 = vperm.xlu0 %8484, %v240_v48  }
  0x7c   : > { %505 = vperm.xlu1 %8485, %v243_v49   ;;  %500 = vperm.xlu0 %8484, %v242_v50   ;;  %v606_v49 = vld [vmem:[%s8976_s4 + $0xc8] sm:$0xff]  ;;  %v605_v50 = vld [vmem:[%s8976_s4 + $0xc0] sm:$0xff] }
  0x80   : > { %515 = vperm.xlu1 %8485, %v245_v51   ;;  %510 = vperm.xlu0 %8484, %v244_v52  }
  0x84   : > { %525 = vperm.xlu1 %8485, %v247_v53   ;;  %520 = vperm.xlu0 %8484, %v246_v54   ;;  %v608_v53 = vld [vmem:[%s8976_s4 + $0xd8] sm:$0xff]  ;;  %v607_v54 = vld [vmem:[%s8976_s4 + $0xd0] sm:$0xff] }
  0x88   : > { %535 = vperm.xlu1 %8485, %v249_v55   ;;  %530 = vperm.xlu0 %8484, %v248_v56  }
  0x8c   : > { %545 = vperm.xlu1 %8485, %v251_v57   ;;  %540 = vperm.xlu0 %8484, %v250_v58   ;;  %v610_v57 = vld [vmem:[%s8976_s4 + $0xe8] sm:$0xff]  ;;  %v609_v58 = vld [vmem:[%s8976_s4 + $0xe0] sm:$0xff] }
  0x90   : > { %555 = vperm.xlu1 %8485, %v253_v59   ;;  %550 = vperm.xlu0 %8484, %v252_v60  }
  0x94   : > { %565 = vperm.xlu1 %8485, %v255_v61   ;;  %560 = vperm.xlu0 %8484, %v254_v62   ;;  %v612_v61 = vld [vmem:[%s8976_s4 + $0xf8] sm:$0xff]  ;;  %v611_v62 = vld [vmem:[%s8976_s4 + $0xf0] sm:$0xff] }
  0x98   : > { %575 = vperm.xlu1 %8485, %v257_v63   ;;  %570 = vperm.xlu0 %8484, %v256_v0  }
  0x9b   : > { %v8980_v3 = vpop.permute.xlu1 %270  ;;  %v8982_v4 = vpop.permute.xlu0 %260 }
  0x9c   : > { %652 = vperm.xlu1 %8485, %v582_v1   ;;  %647 = vperm.xlu0 %8484, %v581_v2   ;;  %v614_v1 = vld [vmem:[%s8976_s4 + $0x108] sm:$0xff]  ;;  %v613_v2 = vld [vmem:[%s8976_s4 + $0x100] sm:$0xff] }
  0x9f   : > { %v8986_v7 = vpop.permute.xlu1 %275  ;;  %v8988_v8 = vpop.permute.xlu0 %265 }
  0xa0   : > { %662 = vperm.xlu1 %8485, %v584_v5   ;;  %657 = vperm.xlu0 %8484, %v583_v6  }
  0xa3   : > { %v8992_v11 = vpop.permute.xlu1 %285  ;;  %v8994_v12 = vpop.permute.xlu0 %280 }
  0xa4   : > { %672 = vperm.xlu1 %8485, %v586_v9   ;;  %667 = vperm.xlu0 %8484, %v585_v10   ;;  %v616_v9 = vld [vmem:[%s8976_s4 + $0x118] sm:$0xff]  ;;  %v615_v10 = vld [vmem:[%s8976_s4 + $0x110] sm:$0xff] }
  0xa7   : > { %v8998_v15 = vpop.permute.xlu1 %295  ;;  %v9000_v16 = vpop.permute.xlu0 %290 }
  0xa8   : > { %682 = vperm.xlu1 %8485, %v588_v13   ;;  %677 = vperm.xlu0 %8484, %v587_v14  }
  0xab   : > { %v9004_v19 = vpop.permute.xlu1 %305  ;;  %v9006_v20 = vpop.permute.xlu0 %300 }
  0xac   : > { %692 = vperm.xlu1 %8485, %v590_v17   ;;  %687 = vperm.xlu0 %8484, %v589_v18   ;;  %v618_v17 = vld [vmem:[%s8976_s4 + $0x128] sm:$0xff]  ;;  %v617_v18 = vld [vmem:[%s8976_s4 + $0x120] sm:$0xff] }
  0xaf   : > { %v9010_v23 = vpop.permute.xlu1 %315  ;;  %v9012_v24 = vpop.permute.xlu0 %310 }
  0xb0   : > { %702 = vperm.xlu1 %8485, %v592_v21   ;;  %697 = vperm.xlu0 %8484, %v591_v22  }
  0xb3   : > { %v9016_v27 = vpop.permute.xlu1 %325  ;;  %v9018_v28 = vpop.permute.xlu0 %320 }
  0xb4   : > { %712 = vperm.xlu1 %8485, %v594_v25   ;;  %707 = vperm.xlu0 %8484, %v593_v26   ;;  %v620_v25 = vld [vmem:[%s8976_s4 + $0x138] sm:$0xff]  ;;  %v619_v26 = vld [vmem:[%s8976_s4 + $0x130] sm:$0xff] }
  0xb7   : > { %v9022_v31 = vpop.permute.xlu1 %335  ;;  %v9024_v32 = vpop.permute.xlu0 %330 }
  0xb8   : > { %722 = vperm.xlu1 %8485, %v596_v29   ;;  %717 = vperm.xlu0 %8484, %v595_v30  }
  0xbb   : > { %v9028_v35 = vpop.permute.xlu1 %345  ;;  %v9030_v36 = vpop.permute.xlu0 %340 }
  0xbc   : > { %732 = vperm.xlu1 %8485, %v598_v33   ;;  %727 = vperm.xlu0 %8484, %v597_v34   ;;  %v622_v33 = vld [vmem:[%s8976_s4 + $0x148] sm:$0xff]  ;;  %v621_v34 = vld [vmem:[%s8976_s4 + $0x140] sm:$0xff] }
  0xbf   : > { %v9034_v39 = vpop.permute.xlu1 %355  ;;  %v9036_v40 = vpop.permute.xlu0 %350 }
  0xc0   : > { %14927 = vst [vmem:[#allocation5_spill] sm:$0xff] %v9036_v40  ;;  %742 = vperm.xlu1 %8485, %v600_v37   ;;  %737 = vperm.xlu0 %8484, %v599_v38  }
  0xc3   : > { %v9040_v43 = vpop.permute.xlu1 %365  ;;  %v9042_v44 = vpop.permute.xlu0 %360 }
  0xc4   : > { %14928 = vst [vmem:[#allocation6_spill] sm:$0xff] %v9040_v43  ;;  %14929 = vst [vmem:[#allocation7_spill] sm:$0xff] %v9042_v44  ;;  %752 = vperm.xlu1 %8485, %v602_v41   ;;  %747 = vperm.xlu0 %8484, %v601_v42   ;;  %v624_v41 = vld [vmem:[%s8976_s4 + $0x158] sm:$0xff]  ;;  %v623_v42 = vld [vmem:[%s8976_s4 + $0x150] sm:$0xff] }
  0xc7   : > { %v9046_v47 = vpop.permute.xlu1 %375  ;;  %v9048_v48 = vpop.permute.xlu0 %370 }
  0xc8   : > { %14930 = vst [vmem:[#allocation8_spill] sm:$0xff] %v9046_v47  ;;  %14931 = vst [vmem:[#allocation9_spill] sm:$0xff] %v9048_v48  ;;  %762 = vperm.xlu1 %8485, %v604_v45   ;;  %757 = vperm.xlu0 %8484, %v603_v46  }
  0xcb   : > { %v9052_v51 = vpop.permute.xlu1 %385  ;;  %v9054_v52 = vpop.permute.xlu0 %380 }
  0xcc   : > { %14932 = vst [vmem:[#allocation10_spill] sm:$0xff] %v9052_v51  ;;  %14933 = vst [vmem:[#allocation11_spill] sm:$0xff] %v9054_v52  ;;  %772 = vperm.xlu1 %8485, %v606_v49   ;;  %767 = vperm.xlu0 %8484, %v605_v50   ;;  %v626_v49 = vld [vmem:[%s8976_s4 + $0x168] sm:$0xff]  ;;  %v625_v50 = vld [vmem:[%s8976_s4 + $0x160] sm:$0xff] }
  0xcf   : > { %v9058_v55 = vpop.permute.xlu1 %395  ;;  %v9060_v56 = vpop.permute.xlu0 %390 }
  0xd0   : > { %14934 = vst [vmem:[#allocation12_spill] sm:$0xff] %v9058_v55  ;;  %14935 = vst [vmem:[#allocation13_spill] sm:$0xff] %v9060_v56  ;;  %782 = vperm.xlu1 %8485, %v608_v53   ;;  %777 = vperm.xlu0 %8484, %v607_v54  }
  0xd3   : > { %v9064_v59 = vpop.permute.xlu1 %405  ;;  %v9066_v60 = vpop.permute.xlu0 %400 }
  0xd4   : > { %14936 = vst [vmem:[#allocation14_spill] sm:$0xff] %v9064_v59  ;;  %14937 = vst [vmem:[#allocation15_spill] sm:$0xff] %v9066_v60  ;;  %792 = vperm.xlu1 %8485, %v610_v57   ;;  %787 = vperm.xlu0 %8484, %v609_v58   ;;  %v628_v57 = vld [vmem:[%s8976_s4 + $0x178] sm:$0xff]  ;;  %v627_v58 = vld [vmem:[%s8976_s4 + $0x170] sm:$0xff] }
  0xd7   : > { %v9070_v63 = vpop.permute.xlu1 %415  ;;  %v9072_v0 = vpop.permute.xlu0 %410 }
  0xd8   : > { %14938 = vst [vmem:[#allocation16_spill] sm:$0xff] %v9070_v63  ;;  %14939 = vst [vmem:[#allocation17_spill] sm:$0xff] %v9072_v0  ;;  %802 = vperm.xlu1 %8485, %v612_v61   ;;  %797 = vperm.xlu0 %8484, %v611_v62  }
  0xdb   : > { %v9076_v5 = vpop.permute.xlu1 %425  ;;  %v9078_v6 = vpop.permute.xlu0 %420 }
  0xdc   : > { %14940 = vst [vmem:[#allocation18_spill] sm:$0xff] %v9076_v5  ;;  %14941 = vst [vmem:[#allocation19_spill] sm:$0xff] %v9078_v6  ;;  %812 = vperm.xlu1 %8485, %v614_v1   ;;  %807 = vperm.xlu0 %8484, %v613_v2   ;;  %v630_v1 = vld [vmem:[%s8976_s4 + $0x188] sm:$0xff]  ;;  %v629_v2 = vld [vmem:[%s8976_s4 + $0x180] sm:$0xff] }
  0xdf   : > { %v9082_v13 = vpop.permute.xlu1 %435  ;;  %v9084_v14 = vpop.permute.xlu0 %430 }
  0xe0   : > { %14942 = vst [vmem:[#allocation20_spill] sm:$0xff] %v9082_v13  ;;  %14943 = vst [vmem:[#allocation21_spill] sm:$0xff] %v9084_v14  ;;  %822 = vperm.xlu1 %8485, %v616_v9   ;;  %817 = vperm.xlu0 %8484, %v615_v10  }
  0xe3   : > { %v9088_v21 = vpop.permute.xlu1 %445  ;;  %v9090_v22 = vpop.permute.xlu0 %440 }
  0xe4   : > { %14944 = vst [vmem:[#allocation22_spill] sm:$0xff] %v9088_v21  ;;  %14945 = vst [vmem:[#allocation23_spill] sm:$0xff] %v9090_v22  ;;  %832 = vperm.xlu1 %8485, %v618_v17   ;;  %827 = vperm.xlu0 %8484, %v617_v18   ;;  %v632_v17 = vld [vmem:[%s8976_s4 + $0x198] sm:$0xff]  ;;  %v631_v18 = vld [vmem:[%s8976_s4 + $0x190] sm:$0xff]  ;;  %v14923_v22 = vmov 1326507024  }
  0xe7   : > { %v9094_v29 = vpop.permute.xlu1 %455  ;;  %v9096_v30 = vpop.permute.xlu0 %450 }
  0xe8   : > { %14946 = vst [vmem:[#allocation24_spill] sm:$0xff] %v9094_v29  ;;  %14947 = vst [vmem:[#allocation25_spill] sm:$0xff] %v9096_v30  ;;  %842 = vperm.xlu1 %8485, %v620_v25   ;;  %837 = vperm.xlu0 %8484, %v619_v26  }
  0xeb   : > { %v9100_v37 = vpop.permute.xlu1 %465  ;;  %v9102_v38 = vpop.permute.xlu0 %460 }
  0xec   : > { %14948 = vst [vmem:[#allocation26_spill] sm:$0xff] %v9100_v37  ;;  %14949 = vst [vmem:[#allocation27_spill] sm:$0xff] %v9102_v38  ;;  %852 = vperm.xlu1 %8485, %v622_v33   ;;  %847 = vperm.xlu0 %8484, %v621_v34   ;;  %v634_v33 = vld [vmem:[%s8976_s4 + $0x1a8] sm:$0xff]  ;;  %v633_v34 = vld [vmem:[%s8976_s4 + $0x1a0] sm:$0xff] }
  0xef   : > { %v9106_v45 = vpop.permute.xlu1 %475  ;;  %v9108_v46 = vpop.permute.xlu0 %470 }
  0xf0   : > { %14950 = vst [vmem:[#allocation28_spill] sm:$0xff] %v9106_v45  ;;  %14951 = vst [vmem:[#allocation29_spill] sm:$0xff] %v9108_v46  ;;  %862 = vperm.xlu1 %8485, %v624_v41   ;;  %857 = vperm.xlu0 %8484, %v623_v42   ;;  %v14921_v45 = vmov 920167782  }
  0xf3   : > { %v9112_v53 = vpop.permute.xlu1 %485  ;;  %v9114_v54 = vpop.permute.xlu0 %480 }
  0xf4   : > { %14952 = vst [vmem:[#allocation30_spill] sm:$0xff] %v9112_v53  ;;  %14953 = vst [vmem:[#allocation31_spill] sm:$0xff] %v9114_v54  ;;  %872 = vperm.xlu1 %8485, %v626_v49   ;;  %867 = vperm.xlu0 %8484, %v625_v50   ;;  %v636_v49 = vld [vmem:[%s8976_s4 + $0x1b8] sm:$0xff]  ;;  %v635_v50 = vld [vmem:[%s8976_s4 + $0x1b0] sm:$0xff] }
  0xf7   : > { %v9118_v61 = vpop.permute.xlu1 %495  ;;  %v9120_v62 = vpop.permute.xlu0 %490 }
  0xf8   : > { %14954 = vst [vmem:[#allocation32_spill] sm:$0xff] %v9118_v61  ;;  %14955 = vst [vmem:[#allocation33_spill] sm:$0xff] %v9120_v62  ;;  %882 = vperm.xlu1 %8485, %v628_v57   ;;  %877 = vperm.xlu0 %8484, %v627_v58  }
  0xfb   : > { %v9124_v9 = vpop.permute.xlu1 %505  ;;  %v9126_v10 = vpop.permute.xlu0 %500 }
  0xfc   : > { %14956 = vst [vmem:[#allocation34_spill] sm:$0xff] %v9124_v9  ;;  %14957 = vst [vmem:[#allocation35_spill] sm:$0xff] %v9126_v10  ;;  %892 = vperm.xlu1 %8485, %v630_v1   ;;  %887 = vperm.xlu0 %8484, %v629_v2   ;;  %v638_v1 = vld [vmem:[%s8976_s4 + $0x1c8] sm:$0xff]  ;;  %v637_v2 = vld [vmem:[%s8976_s4 + $0x1c0] sm:$0xff] }
  0xff   : > { %v9130_v25 = vpop.permute.xlu1 %515  ;;  %v9132_v26 = vpop.permute.xlu0 %510 }
 0x100   : > { %14958 = vst [vmem:[#allocation36_spill] sm:$0xff] %v9130_v25  ;;  %14959 = vst [vmem:[#allocation37_spill] sm:$0xff] %v9132_v26  ;;  %902 = vperm.xlu1 %8485, %v632_v17   ;;  %897 = vperm.xlu0 %8484, %v631_v18  }
 0x103   : > { %v9136_v41 = vpop.permute.xlu1 %525  ;;  %v9138_v42 = vpop.permute.xlu0 %520 }
 0x104   : > { %14960 = vst [vmem:[#allocation38_spill] sm:$0xff] %v9136_v41  ;;  %14961 = vst [vmem:[#allocation39_spill] sm:$0xff] %v9138_v42  ;;  %912 = vperm.xlu1 %8485, %v634_v33   ;;  %907 = vperm.xlu0 %8484, %v633_v34   ;;  %v640_v33 = vld [vmem:[%s8976_s4 + $0x1d8] sm:$0xff]  ;;  %v639_v34 = vld [vmem:[%s8976_s4 + $0x1d0] sm:$0xff] }
 0x107   : > { %v9142_v57 = vpop.permute.xlu1 %535  ;;  %v9144_v58 = vpop.permute.xlu0 %530 }
 0x108   : > { %14962 = vst [vmem:[#allocation40_spill] sm:$0xff] %v9142_v57  ;;  %14963 = vst [vmem:[#allocation41_spill] sm:$0xff] %v9144_v58  ;;  %922 = vperm.xlu1 %8485, %v636_v49   ;;  %917 = vperm.xlu0 %8484, %v635_v50   ;;  %v642_v49 = vld [vmem:[%s8976_s4 + $0x1e8] sm:$0xff]  ;;  %v641_v50 = vld [vmem:[%s8976_s4 + $0x1e0] sm:$0xff]  ;;  %v578_v58 = vlaneseq }
 0x10b   : > { %v9148_v17 = vpop.permute.xlu1 %545  ;;  %v9150_v18 = vpop.permute.xlu0 %540 }
 0x10c   : > { %14964 = vst [vmem:[#allocation42_spill] sm:$0xff] %v9148_v17  ;;  %14965 = vst [vmem:[#allocation43_spill] sm:$0xff] %v9150_v18  ;;  %932 = vperm.xlu1 %8485, %v638_v1   ;;  %927 = vperm.xlu0 %8484, %v637_v2   ;;  %v644_v1 = vld [vmem:[%s8976_s4 + $0x1f8] sm:$0xff]  ;;  %v643_v18 = vld [vmem:[%s8976_s4 + $0x1f0] sm:$0xff]  ;;  %v9166_v2 = vand.u32 127, %v578_v58  ;;  %s14857_s4 = scalar_lea.hbm %s14909_s3, %s8179_s27 }
 0x10e   : > { %vm580_vm0 = vcmp.ge.s32.totalorder %v9166_v2, 64  ;;  %v8753_v2 = vld [vmem:[%s14908_s2] ss:$0 sm:$0xff] }
 0x10f   : > { %v9154_v42 = vpop.permute.xlu1 %555  ;;  %v9156_v57 = vpop.permute.xlu0 %550 }
 0x110   : > { %14966 = vst [vmem:[#allocation44_spill] sm:$0xff] %v9154_v42  ;;  %14967 = vst [vmem:[#allocation45_spill] sm:$0xff] %v9156_v57  ;;  %942 = vperm.xlu1 %8485, %v640_v33   ;;  %937 = vperm.xlu0 %8484, %v639_v34   ;;  %v9176_v33 = vld [vmem:[%s14908_s2] ss:$0 sm:$0xff] }
 0x113   : > { %v9160_v41 = vpop.permute.xlu1 %565  ;;  %v9162_v17 = vpop.permute.xlu0 %560 }
 0x114   : > { %14968 = vst [vmem:[#allocation46_spill] sm:$0xff] %v9160_v41  ;;  %14969 = vst [vmem:[#allocation47_spill] sm:$0xff] %v9162_v17  ;;  %952 = vperm.xlu1 %8485, %v642_v49   ;;  %947 = vperm.xlu0 %8484, %v641_v50  }
 0x117   : > { %v9168_v26 = vpop.permute.xlu1 %575  ;;  %v9170_v42 = vpop.permute.xlu0 %570 }
 0x118   : > { %14970 = vst [vmem:[#allocation48_spill] sm:$0xff] %v9168_v26  ;;  %14971 = vst [vmem:[#allocation49_spill] sm:$0xff] %v9170_v42  ;;  %962 = vperm.xlu1 %8485, %v644_v1   ;;  %957 = vperm.xlu0 %8484, %v643_v18  }
 0x11b   : > { %v653_v34 = vpop.permute.xlu1 %652  ;;  %v648_v49 = vpop.permute.xlu0 %647 }
 0x11c   : > { %v966_v58 = vsel %vm580_vm0, %v653_v34, %v8988_v8  ;;  %v965_v50 = vsel %vm580_vm0, %v648_v49, %v8982_v4 }
 0x11d   : > { %v9185_v1 = vmul.f32 %v9176_v33, %v966_v58  ;;  %v9188_v18 = vmul.f32 %v9176_v33, %v965_v50 }
 0x11f   : > { %v14910_v42 = vand.u32 2147483647, %v9185_v1  ;;  %v1207_v26 = vand.u32 2139095040, %v9185_v1  ;;  %v663_v17 = vpop.permute.xlu1 %662  ;;  %v14911_v41 = vand.u32 2147483647, %v9188_v18  ;;  %v1103_v57 = vand.u32 2139095040, %v9188_v18 }
 0x120   : > { %v968_v4 = vsel %vm580_vm0, %v663_v17, %v8986_v7  ;;  %vm1206_vm14 = vcmp.lt.s32.totalorder %v9185_v1, 0 }
 0x121   : > { %v1208_v8 = vshrl.u32 %v1207_v26, 23  ;;  %v1211_v34 = vand.u32 8388607, %v14910_v42  ;;  %v1104_v49 = vshrl.u32 %v1103_v57, 23  ;;  %v1107_v58 = vand.u32 8388607, %v14911_v41 }
 0x122   : > { %v9202_v50 = vmul.f32 %v9176_v33, %v968_v4 }
 0x123   : > { %v7922_v25 = vadd.s32 4294967169, %v1208_v8  ;;  %v7918_v10 = vadd.s32 4294967169, %v1104_v49  ;;  %v1212_v26 = vor.u32 8388608, %v1211_v34  ;;  %v1108_v61 = vor.u32 8388608, %v1107_v58 }
 0x124   : > { %v1415_v62 = vand.u32 2139095040, %v9202_v50  ;;  %v14912_v7 = vand.u32 2147483647, %v9202_v50  ;;  %v14913_v34 = vmov 683565275  }
 0x125   : > { %v1214_v9 = vadd.s32 1, %v7922_v25  ;;  %v1110_v54 = vadd.s32 1, %v7918_v10  ;;  %v9206_v46 = vshll.u32 %v1212_v26, 8  ;;  %v9208_v4 = vshll.u32 %v1108_v61, 8 }
 0x126   : > { %v1416_v17 = vshrl.u32 %v1415_v62, 23  ;;  %v9214_v25 = vand.u32 8388607, %v14912_v7  ;;  %v14919_v58 = vmov 2475754826  }
 0x127   : > { %vm1215_vm1 = vcmp.gt.s32.totalorder %v1214_v9, 0  ;;  %vm1111_vm2 = vcmp.gt.s32.totalorder %v1110_v54, 0  ;;  %v14917_v26 = vmov 2102212464  }
 0x128   : > { %v1216_v42 = vsel %vm1215_vm1, %v1214_v9, 0  ;;  %v1112_v41 = vsel %vm1111_vm2, %v1110_v54, 0  ;;  %v9210_v8 = vadd.s32 4294967169, %v1416_v17 }
 0x129   : > { %v1217_v57 = vshrl.u32 %v1216_v42, 5  ;;  %v1218_v53 = vand.u32 31, %v1216_v42  ;;  %v9217_v62 = vshrl.u32 %v1112_v41, 5  ;;  %v1114_v9 = vand.u32 31, %v1112_v41 }
 0x12a   : > { %v14915_v42 = vmov 2131351028   ;;  %v14972_v41 = vmov 683565275  }
 0x12b   : > { %v1219_v10 = vsub.s32 32, %v1218_v53  ;;  %v1221_v49 = vshll.u32 %v14913_v34, %v1218_v53  ;;  %v1224_v54 = vshll.u32 %v14919_v58, %v1218_v53  ;;  %v1227_v61 = vshll.u32 %v14915_v42, %v1218_v53 }
 0x12c   : > { %v1230_v17 = vshll.u32 %v14917_v26, %v1218_v53  ;;  %v1233_v7 = vshll.u32 %v14921_v45, %v1218_v53  ;;  %vm1236_vm3 = vcmp.lt.s32.totalorder %v1217_v57, 1  ;;  %vm1237_vm4 = vcmp.lt.s32.totalorder %v1217_v57, 2 }
 0x12d   : > { %v1222_v38 = vshrl.u32 %v14919_v58, %v1219_v10  ;;  %v1225_v37 = vshrl.u32 %v14915_v42, %v1219_v10  ;;  %v1228_v34 = vshrl.u32 %v14917_v26, %v1219_v10  ;;  %v1220_v30 = vshrl.u32 %v14972_v41, %v1219_v10 }
 0x12e   : > { %v1231_v29 = vshrl.u32 %v14921_v45, %v1219_v10  ;;  %v1234_v21 = vshrl.u32 %v14923_v22, %v1219_v10  ;;  %v1115_v5 = vsub.s32 32, %v1114_v9  ;;  %vm1238_vm5 = vcmp.lt.s32.totalorder %v1217_v57, 3 }
 0x12f   : > { %v1223_v14 = vor.u32 %v1222_v38, %v1221_v49  ;;  %v1226_v13 = vor.u32 %v1225_v37, %v1224_v54  ;;  %v1229_v6 = vor.u32 %v1228_v34, %v1227_v61  ;;  %vm1239_vm6 = vcmp.lt.s32.totalorder %v1217_v57, 4 }
 0x130   : > { %v1232_v53 = vor.u32 %v1231_v29, %v1230_v17  ;;  %v1235_v0 = vor.u32 %v1234_v21, %v1233_v7  ;;  %v1117_v10 = vshll.u32 %v14972_v41, %v1114_v9  ;;  %v14973_v34 = vmov 2475754826  }
 0x131   : > { %v1240_v42 = vsel %vm1236_vm3, %v1220_v30, %v1223_v14  ;;  %v1241_v26 = vsel %vm1239_vm6, %v1229_v6, 2102212464  ;;  %v1244_v58 = vsel %vm1236_vm3, %v1223_v14, %v1226_v13  ;;  %v1248_v63 = vsel %vm1236_vm3, %v1226_v13, %v1229_v6 }
 0x132   : > { %v1242_v45 = vsel %vm1238_vm5, %v1226_v13, %v1241_v26  ;;  %v1245_v60 = vsel %vm1239_vm6, %v1232_v53, 920167782  ;;  %v1249_v59 = vsel %vm1239_vm6, %v1235_v0, 1326507024  ;;  %v1118_v49 = vshrl.u32 %v14973_v34, %v1115_v5 }
 0x133   : > { %v1246_v38 = vsel %vm1238_vm5, %v1229_v6, %v1245_v60  ;;  %v1250_v37 = vsel %vm1238_vm5, %v1232_v53, %v1249_v59  ;;  %v1120_v21 = vshll.u32 %v14973_v34, %v1114_v9  ;;  %v1243_v29 = vsel %vm1237_vm4, %v1240_v42, %v1242_v45 }
 0x134   : > { %v1247_v30 = vsel %vm1237_vm4, %v1244_v58, %v1246_v38  ;;  %v1251_v7 = vsel %vm1237_vm4, %v1248_v63, %v1250_v37  ;;  %v14974_v14 = vmov 2131351028   ;;  %v1119_v59 = vor.u32 %v1118_v49, %v1117_v10 }
 0x135   : > { %v1121_v54 = vshrl.u32 %v14974_v14, %v1115_v5  ;;  %v9240_v13 = vmul.u32.u64.low %v9206_v46, %v1251_v7  ;;  %v9241_v61 = vmul.u32.u64.high %v9206_v46, %v1251_v7, %v9240_v13  ;;  %v1123_v26 = vshll.u32 %v14974_v14, %v1114_v9 }
 0x136   : > { %v9244_v0 = vmul.u32.u64.low %v9206_v46, %v1247_v30  ;;  %v9245_v60 = vmul.u32.u64.high %v9206_v46, %v1247_v30, %v9244_v0  ;;  %v14975_v45 = vmov 2102212464   ;;  %v1116_v57 = vshrl.u32 %v14972_v41, %v1115_v5 }
 0x137   : > { %v1122_v6 = vor.u32 %v1121_v54, %v1120_v21  ;;  %v1124_v42 = vshrl.u32 %v14975_v45, %v1115_v5  ;;  %v1126_v63 = vshll.u32 %v14975_v45, %v1114_v9  ;;  %v14976_v58 = vmov 920167782  }
 0x138   : > { %v1127_v17 = vshrl.u32 %v14976_v58, %v1115_v5  ;;  %v1130_v53 = vshrl.u32 %v14923_v22, %v1115_v5  ;;  %v1259_v38 = vmul.u32 %v9206_v46, %v1243_v29  ;;  %v1129_v30 = vshll.u32 %v14976_v58, %v1114_v9 }
 0x139   : > { %v1125_v37 = vor.u32 %v1124_v42, %v1123_v26  ;;  %vm1132_vm7 = vcmp.lt.s32.totalorder %v9217_v62, 1  ;;  %vm1261_vm8 = vc.u32 %v9241_v61, %v9244_v0  ;;  %v1262_v10 = vadd.s32 1, %v9245_v60 }
 0x13a   : > { %v1128_v49 = vor.u32 %v1127_v17, %v1126_v63  ;;  %vm1133_vm9 = vcmp.lt.s32.totalorder %v9217_v62, 2  ;;  %v1131_v21 = vor.u32 %v1130_v53, %v1129_v30  ;;  %vm1134_vm10 = vcmp.lt.s32.totalorder %v9217_v62, 3  ;;  %v658_v30 = vpop.permute.xlu0 %657 }
 0x13b   : > { %vm1135_vm11 = vcmp.lt.s32.totalorder %v9217_v62, 4  ;;  %v1140_v5 = vsel %vm1132_vm7, %v1119_v59, %v1122_v6  ;;  %v1263_v46 = vsel %vm1261_vm8, %v1262_v10, %v9245_v60  ;;  %v1144_v7 = vsel %vm1132_vm7, %v1122_v6, %v1125_v37 }
 0x13c   : > { %v1137_v29 = vsel %vm1135_vm11, %v1125_v37, 2102212464  ;;  %v1141_v9 = vsel %vm1135_vm11, %v1128_v49, 920167782  ;;  %v1264_v54 = vadd.s32 %v1263_v46, %v1259_v38  ;;  %v1136_v13 = vsel %vm1132_vm7, %v1116_v57, %v1119_v59 }
 0x13d   : > { %v1142_v26 = vsel %vm1134_vm10, %v1125_v37, %v1141_v9  ;;  %v1145_v42 = vsel %vm1135_vm11, %v1131_v21, 1326507024  ;;  %v1138_v22 = vsel %vm1134_vm10, %v1122_v6, %v1137_v29  ;;  %v1422_v53 = vadd.s32 1, %v9210_v8 }
 0x13e   : > { %v1143_v63 = vsel %vm1133_vm9, %v1140_v5, %v1142_v26  ;;  %v1146_v17 = vsel %vm1134_vm10, %v1128_v49, %v1145_v42  ;;  %v1265_v56 = vadd.s32 536870912, %v1264_v54  ;;  %v1139_v38 = vsel %vm1133_vm9, %v1136_v13, %v1138_v22  ;;  %v673_v22 = vpop.permute.xlu1 %672 }
 0x13f   : > { %v1147_v55 = vsel %vm1133_vm9, %v1144_v7, %v1146_v17  ;;  %v9270_v60 = vmul.u32.u64.low %v9208_v4, %v1143_v63  ;;  %v9271_v10 = vmul.u32.u64.high %v9208_v4, %v1143_v63, %v9270_v60  ;;  %vm1423_vm12 = vcmp.gt.s32.totalorder %v1422_v53, 0 }
 0x140   : > { %v9275_v59 = vmul.u32.u64.low %v9208_v4, %v1147_v55  ;;  %v9276_v57 = vmul.u32.u64.high %v9208_v4, %v1147_v55, %v9275_v59  ;;  %v1266_v6 = vshrl.u32 %v1265_v56, 30  ;;  %v1424_v8 = vsel %vm1423_vm12, %v1422_v53, 0 }
 0x141   : > { %v967_v37 = vsel %vm580_vm0, %v658_v30, %v8980_v3  ;;  %v1426_v49 = vand.u32 31, %v1424_v8  ;;  %v1158_v5 = vadd.s32 1, %v9271_v10  ;;  %v1420_v46 = vor.u32 8388608, %v9214_v25 }
 0x142   : > { %v1267_v21 = vshll.u32 %v1266_v6, 30  ;;  %v1155_v29 = vmul.u32 %v9208_v4, %v1139_v38  ;;  %vm1157_vm13 = vc.u32 %v9276_v57, %v9270_v60  ;;  %v9289_v56 = vmul.f32 %v9176_v33, %v967_v37 }
 0x143   : > { %v1427_v55 = vsub.s32 32, %v1426_v49  ;;  %v1159_v3 = vsel %vm1157_vm13, %v1158_v5, %v9271_v10  ;;  %v1290_v9 = vsub.s32 4, %v1266_v6  ;;  %v14977_v25 = vand.u32 2147483647, %v9185_v1 }
 0x144   : > { %v9291_v62 = vsub.s32 %v1264_v54, %v1267_v21  ;;  %v1160_v7 = vadd.s32 %v1159_v3, %v1155_v29  ;;  %v9302_v26 = vshll.u32 %v1420_v46, 8  ;;  %v9307_v54 = vsel %vm580_vm0, %v673_v22, %v8992_v11 }
 0x145   : > { %vm9297_vm15 = vcmp.le.f32.partialorder %v14977_v25, 0.7853982  ;;  %v1260_v42 = vadd.s32 %v9244_v0, %v9241_v61  ;;  %v1430_v17 = vshrl.u32 %v14973_v34, %v1427_v55  ;;  %v9314_v10 = vshrl.u32 %v1424_v8, 5 }
 0x146   : > { %v1270_v13 = vsub.s32 0, %v9291_v62  ;;  %v1161_v63 = vadd.s32 536870912, %v1160_v7  ;;  %v1433_v59 = vshrl.u32 %v14974_v14, %v1427_v55  ;;  %v1436_v38 = vshrl.u32 %v14975_v45, %v1427_v55 }
 0x147   : > { %v9320_v11 = vsel %vm1206_vm14, %v1290_v9, %v1266_v6  ;;  %v1429_v61 = vshll.u32 %v14972_v41, %v1426_v49  ;;  %v1439_v0 = vshrl.u32 %v14976_v58, %v1427_v55  ;;  %v1432_v5 = vshll.u32 %v14973_v34, %v1426_v49 }
 0x148   : > { %v7923_v30 = vmin.u32 %v1270_v13, %v9291_v62  ;;  %v9322_v37 = vshrl.u32 %v1161_v63, 30  ;;  %v1435_v8 = vshll.u32 %v14974_v14, %v1426_v49  ;;  %v14980_v46 = vmov 1326507024  }
 0x149   : > { %v1442_v29 = vshrl.u32 %v14980_v46, %v1427_v55  ;;  %v1431_v3 = vor.u32 %v1430_v17, %v1429_v61  ;;  %v1438_v25 = vshll.u32 %v14975_v45, %v1426_v49  ;;  %v1311_v6 = vand.u32 2139095040, %v9289_v56 }
 0x14a   : > { %v1272_v21 = vclz %v7923_v30  ;;  %v1163_v22 = vshll.u32 %v9322_v37, 30  ;;  %v1434_v13 = vor.u32 %v1433_v59, %v1432_v5  ;;  %v1437_v63 = vor.u32 %v1436_v38, %v1435_v8 }
 0x14b   : > { %v1441_v53 = vshll.u32 %v14976_v58, %v1426_v49  ;;  %v1293_v30 = vsel %vm9297_vm15, 0, %v9320_v11  ;;  %v1428_v51 = vshrl.u32 %v14972_v41, %v1427_v55  ;;  %v1440_v48 = vor.u32 %v1439_v0, %v1438_v25 }
 0x14c   : > { %v7924_v9 = vadd.s32 4294967294, %v1272_v21  ;;  %v9336_v52 = vsub.s32 %v1160_v7, %v1163_v22  ;;  %v1186_v17 = vsub.s32 4, %v9322_v37  ;;  %vm1444_vm2 = vcmp.lt.s32.totalorder %v9314_v10, 1 }
 0x14d   : > { %v1443_v61 = vor.u32 %v1442_v29, %v1441_v53  ;;  %vm1446_vm3 = vcmp.lt.s32.totalorder %v9314_v10, 3  ;;  %vm1447_vm4 = vcmp.lt.s32.totalorder %v9314_v10, 4  ;;  %vm1102_vm5 = vcmp.lt.s32.totalorder %v9188_v18, 0 }
 0x14e   : > { %vm7925_vm1 = vcmp.lt.s32.totalorder %v7924_v9, 0  ;;  %v1166_v59 = vsub.s32 0, %v9336_v52  ;;  %v1449_v7 = vsel %vm1447_vm4, %v1437_v63, 2102212464  ;;  %v1452_v55 = vsel %vm1444_vm2, %v1431_v3, %v1434_v13 }
 0x14f   : > { %v1275_v21 = vsel %vm7925_vm1, 0, %v7924_v9  ;;  %v1453_v0 = vsel %vm1447_vm4, %v1440_v48, 920167782  ;;  %v1456_v5 = vsel %vm1444_vm2, %v1434_v13, %v1437_v63  ;;  %v1457_v25 = vsel %vm1447_vm4, %v1443_v61, 1326507024 }
 0x150   : > { %v1276_v49 = vsub.s32 32, %v1275_v21  ;;  %v1280_v38 = vsub.s32 4294967266, %v1275_v21  ;;  %v1277_v11 = vshll.u32 %v9291_v62, %v1275_v21  ;;  %v7919_v53 = vmin.u32 %v1166_v59, %v9336_v52 }
 0x151   : > { %v1454_v22 = vsel %vm1446_vm3, %v1437_v63, %v1453_v0  ;;  %v14981_v9 = vand.u32 2147483647, %v9188_v18  ;;  %vm1445_vm7 = vcmp.lt.s32.totalorder %v9314_v10, 2  ;;  %v1448_v62 = vsel %vm1444_vm2, %v1428_v51, %v1431_v3 }
 0x152   : > { %v1278_v8 = vshrl.u32 %v1260_v42, %v1276_v49  ;;  %v1281_v29 = vadd.s32 127, %v1280_v38  ;;  %v1168_v44 = vclz %v7919_v53  ;;  %v1450_v42 = vsel %vm1446_vm3, %v1434_v13, %v1449_v7 }
 0x153   : > { %vm9355_vm6 = vcmp.le.f32.partialorder %v14981_v9, 0.7853982  ;;  %v1455_v49 = vsel %vm1445_vm7, %v1452_v55, %v1454_v22  ;;  %v1458_v63 = vsel %vm1446_vm3, %v1440_v48, %v1457_v25  ;;  %v14984_v51 = vand.u32 2147483647, %v9289_v56 }
 0x154   : > { %v1279_v21 = vor.u32 %v1278_v8, %v1277_v11  ;;  %v1282_v59 = vshll.u32 %v1281_v29, 23  ;;  %v7920_v61 = vadd.s32 4294967294, %v1168_v44  ;;  %v1459_v38 = vsel %vm1445_vm7, %v1456_v5, %v1458_v63 }
 0x155   : > { %v9367_v0 = vmul.u32.u64.low %v9302_v26, %v1455_v49  ;;  %v9368_v9 = vmul.u32.u64.high %v9302_v26, %v1455_v49, %v9367_v0  ;;  %v9371_v43 = vmul.u32.u64.low %v9302_v26, %v1459_v38  ;;  %v9372_v40 = vmul.u32.u64.high %v9302_v26, %v1459_v38, %v9371_v43 }
 0x156   : > { %v1283_v53 = vor.u32 4788187, %v1282_v59  ;;  %v1315_v3 = vand.u32 8388607, %v14984_v51  ;;  %v1156_v13 = vadd.s32 %v9270_v60, %v9276_v57  ;;  %vm7921_vm8 = vcmp.lt.s32.totalorder %v7920_v61, 0 }
 0x157   : > { %v1451_v10 = vsel %vm1445_vm7, %v1448_v62, %v1450_v42  ;;  %v1312_v48 = vshrl.u32 %v1311_v6, 23  ;;  %v1286_v7 = vcvt.s32.f32 %v1279_v21  ;;  %v1297_v55 = vadd.s32 3, %v1293_v30 }
 0x158   : > { %v1284_v44 = vand.u32 2147483647, %v1283_v53  ;;  %v1171_v11 = vsel %vm7921_vm8, 0, %v7920_v61  ;;  %v1187_v29 = vsel %vm1102_vm5, %v1186_v17, %v9322_v37  ;;  %v1470_v43 = vadd.s32 1, %v9368_v9 }
 0x159   : > { %v1172_v5 = vsub.s32 32, %v1171_v11  ;;  %v1176_v8 = vsub.s32 4294967266, %v1171_v11  ;;  %v1467_v25 = vmul.u32 %v9302_v26, %v1451_v10  ;;  %vm1469_vm9 = vc.u32 %v9372_v40, %v9367_v0 }
 0x15a   : > { %v1287_v22 = vmul.f32 %v1286_v7, %v1284_v44  ;;  %v7926_v60 = vadd.s32 4294967169, %v1312_v48  ;;  %v1173_v57 = vshll.u32 %v9336_v52, %v1171_v11  ;;  %v1471_v30 = vsel %vm1469_vm9, %v1470_v43, %v9368_v9 }
 0x15b   : > { %v1174_v6 = vshrl.u32 %v1156_v13, %v1172_v5  ;;  %v1177_v62 = vadd.s32 127, %v1176_v8  ;;  %v1189_v21 = vsel %vm9355_vm6, 0, %v1187_v29  ;;  %v1472_v59 = vadd.s32 %v1471_v30, %v1467_v25 }
 0x15c   : > { %v1288_v42 = vxor.u32 2147483648, %v1287_v22  ;;  %v1318_v37 = vadd.s32 1, %v7926_v60  ;;  %v9390_v26 = vmul.f32 %v9176_v33, %v9307_v54  ;;  %v9394_v52 = vand.u32 3, %v1297_v55 }
 0x15d   : > { %v1175_v17 = vor.u32 %v1174_v6, %v1173_v57  ;;  %v1178_v49 = vshll.u32 %v1177_v62, 23  ;;  %v1473_v61 = vadd.s32 536870912, %v1472_v59  ;;  %v1193_v53 = vadd.s32 3, %v1189_v21 }
 0x15e   : > { %v1289_v63 = vsel %vm1206_vm14, %v1288_v42, %v1287_v22  ;;  %vm1319_vm10 = vcmp.gt.s32.totalorder %v1318_v37, 0  ;;  %v1316_v10 = vor.u32 8388608, %v1315_v3  ;;  %v9405_v4 = vadd.s32 %v9367_v0, %v9372_v40 }
 0x15f   : > { %v1292_v38 = vsel %vm9297_vm15, %v9185_v1, %v1289_v63  ;;  %v1179_v9 = vor.u32 4788187, %v1178_v49  ;;  %v1320_v51 = vsel %vm1319_vm10, %v1318_v37, 0  ;;  %v9399_v13 = vshrl.u32 %v1473_v61, 30 }
 0x160   : > { %8486 = vcosq.f32 %v1292_v38  ;;  %v1322_v54 = vand.u32 31, %v1320_v51  ;;  %v1182_v44 = vcvt.s32.f32 %v1175_v17  ;;  %v9402_v5 = vand.u32 3, %v1193_v53 }
 0x161   : > { %8488 = vsinq.f32 %v1292_v38  ;;  %v1180_v48 = vand.u32 2147483647, %v1179_v9  ;;  %v1475_v7 = vshll.u32 %v9399_v13, 30  ;;  %vm1303_vm11 = vcmp.eq.s32.totalorder %v9394_v52, 2 }
 0x162   : > { %v1323_v55 = vsub.s32 32, %v1322_v54  ;;  %v9411_v3 = vshll.u32 %v1316_v10, 8  ;;  %v1623_v43 = vand.u32 2139095040, %v9390_v26  ;;  %vm1300_vm12 = vcmp.eq.s32.totalorder %v9394_v52, 0 }
 0x163   : > { %v1183_v11 = vmul.f32 %v1182_v44, %v1180_v48  ;;  %v9408_v8 = vsub.s32 %v1472_v59, %v1475_v7  ;;  %v1325_v25 = vshll.u32 %v14972_v41, %v1322_v54  ;;  %vm1299_vm13 = vcmp.lt.s32.totalorder %v9394_v52, 2 }
 0x164   : > { %v1326_v29 = vshrl.u32 %v14973_v34, %v1323_v55  ;;  %v1329_v60 = vshrl.u32 %v14974_v14, %v1323_v55  ;;  %v1332_v40 = vshrl.u32 %v14975_v45, %v1323_v55  ;;  %v1328_v57 = vshll.u32 %v14973_v34, %v1322_v54 }
 0x165   : > { %v1184_v22 = vxor.u32 2147483648, %v1183_v11  ;;  %v1478_v0 = vsub.s32 0, %v9408_v8  ;;  %v1331_v6 = vshll.u32 %v14974_v14, %v1322_v54  ;;  %v1335_v62 = vshrl.u32 %v14976_v58, %v1323_v55 }
 0x166   : > { %vm1296_vm14 = vweird.f32 %v9185_v1  ;;  %v9426_v42 = vshrl.u32 %v1320_v51, 5  ;;  %v1327_v21 = vor.u32 %v1326_v29, %v1325_v25  ;;  %v1334_v59 = vshll.u32 %v14975_v45, %v1322_v54 }
 0x167   : > { %v1185_v30 = vsel %vm1102_vm5, %v1184_v22, %v1183_v11  ;;  %v7931_v17 = vmin.u32 %v1478_v0, %v9408_v8  ;;  %v1330_v49 = vor.u32 %v1329_v60, %v1328_v57  ;;  %v1333_v63 = vor.u32 %v1332_v40, %v1331_v6 }
 0x168   : > { %v1188_v37 = vsel %vm9355_vm6, %v9188_v18, %v1185_v30  ;;  %v1336_v61 = vor.u32 %v1335_v62, %v1334_v59  ;;  %v1337_v38 = vshll.u32 %v14976_v58, %v1322_v54  ;;  %v1338_v9 = vshrl.u32 %v14980_v46, %v1323_v55 }
 0x169   : > { %8490 = vcosq.f32 %v1188_v37  ;;  %vm1414_vm15 = vcmp.lt.s32.totalorder %v9202_v50, 0  ;;  %v1480_v51 = vclz %v7931_v17  ;;  %v1498_v10 = vsub.s32 4, %v9399_v13 }
 0x16a   : > { %v8487_v53 = vpop.eup %8486  ;;  %8492 = vsinq.f32 %v1188_v37  ;;  %v1624_v47 = vshrl.u32 %v1623_v43, 23  ;;  %v1324_v7 = vshrl.u32 %v14972_v41, %v1323_v55  ;;  %v1339_v11 = vor.u32 %v1338_v9, %v1337_v38 }
 0x16b   : > { %v8489_v48 = vpop.eup %8488  ;;  %v1304_v44 = vxor.u32 2147483648, %v8487_v53  ;;  %vm1340_vm1 = vcmp.lt.s32.totalorder %v9426_v42, 1  ;;  %v7932_v29 = vadd.s32 4294967294, %v1480_v51  ;;  %vm1342_vm2 = vcmp.lt.s32.totalorder %v9426_v42, 3  ;;  %v668_v51 = vpop.permute.xlu0 %667 }
 0x16c   : > { %v1301_v54 = vxor.u32 2147483648, %v8489_v48  ;;  %vm1343_vm3 = vcmp.lt.s32.totalorder %v9426_v42, 4  ;;  %vm1199_vm4 = vcmp.eq.s32.totalorder %v9402_v5, 2  ;;  %v1348_v55 = vsel %vm1340_vm1, %v1327_v21, %v1330_v49 }
 0x16d   : > { %v1305_v22 = vsel %vm1303_vm11, %v1304_v44, %v8489_v48  ;;  %v1345_v43 = vsel %vm1343_vm3, %v1333_v63, 2102212464  ;;  %v1349_v25 = vsel %vm1343_vm3, %v1336_v61, 920167782  ;;  %vm1196_vm5 = vcmp.eq.s32.totalorder %v9402_v5, 0 }
 0x16e   : > { %v1302_v60 = vsel %vm1300_vm12, %v8487_v53, %v1301_v54  ;;  %v14985_v40 = vand.u32 2147483647, %v9202_v50  ;;  %vm7933_vm7 = vcmp.lt.s32.totalorder %v7932_v29, 0  ;;  %vm1341_vm8 = vcmp.lt.s32.totalorder %v9426_v42, 2 }
 0x16f   : > { %v1350_v57 = vsel %vm1342_vm2, %v1333_v63, %v1349_v25  ;;  %v1306_v6 = vsel %vm1299_vm13, %v1302_v60, %v1305_v22  ;;  %vm1195_vm9 = vcmp.lt.s32.totalorder %v9402_v5, 2  ;;  %v1483_v62 = vsel %vm7933_vm7, 0, %v7932_v29 }
 0x170   : > { %vm9458_vm6 = vcmp.le.f32.partialorder %v14985_v40, 0.7853982  ;;  %v1344_v30 = vsel %vm1340_vm1, %v1324_v7, %v1327_v21  ;;  %v1351_v59 = vsel %vm1341_vm8, %v1348_v55, %v1350_v57  ;;  %v1307_v37 = vsel %vm1296_vm14, nan, %v1306_v6 }
 0x171   : > { %vm1192_vm10 = vweird.f32 %v9188_v18  ;;  %v1484_v17 = vsub.s32 32, %v1483_v62  ;;  %v1488_v38 = vsub.s32 4294967266, %v1483_v62  ;;  %v1346_v52 = vsel %vm1342_vm2, %v1330_v49, %v1345_v43  ;;  %7757 = vst [vmem:[%s9477_s9 + $0x8] sm:$0xff] %v1307_v37 }
 0x172   : > { %v1352_v21 = vsel %vm1340_vm1, %v1330_v49, %v1333_v63  ;;  %v1353_v9 = vsel %vm1343_vm3, %v1339_v11, 1326507024  ;;  %v9485_v1 = vmul.u32.u64.low %v9411_v3, %v1351_v59  ;;  %v9486_v53 = vmul.u32.u64.high %v9411_v3, %v1351_v59, %v9485_v1 }
 0x173   : > { %v1485_v48 = vshll.u32 %v9408_v8, %v1483_v62  ;;  %v1486_v44 = vshrl.u32 %v9405_v4, %v1484_v17  ;;  %v1489_v7 = vadd.s32 127, %v1488_v38  ;;  %v1354_v54 = vsel %vm1342_vm2, %v1336_v61, %v1353_v9  ;;  %v8491_v29 = vpop.eup %8490 }
 0x174   : > { %v1499_v49 = vsel %vm1414_vm15, %v1498_v10, %v9399_v13  ;;  %v1355_v63 = vsel %vm1341_vm8, %v1352_v21, %v1354_v54  ;;  %v1620_v11 = vand.u32 2147483647, %v9390_v26  ;;  %v7938_v22 = vadd.s32 4294967169, %v1624_v47  ;;  %v8493_v43 = vpop.eup %8492 }
 0x175   : > { %v1200_v55 = vxor.u32 2147483648, %v8491_v29  ;;  %v1487_v8 = vor.u32 %v1486_v44, %v1485_v48  ;;  %v1490_v25 = vshll.u32 %v1489_v7, 23  ;;  %v969_v4 = vsel %vm580_vm0, %v668_v51, %v8994_v12 }
 0x176   : > { %v1197_v61 = vxor.u32 2147483648, %v8493_v43  ;;  %v1347_v60 = vsel %vm1341_vm8, %v1344_v30, %v1346_v52  ;;  %v9505_v13 = vmul.u32.u64.low %v9411_v3, %v1355_v63  ;;  %v9506_v10 = vmul.u32.u64.high %v9411_v3, %v1355_v63, %v9505_v13 }
 0x177   : > { %v1201_v40 = vsel %vm1199_vm4, %v1200_v55, %v8493_v43  ;;  %v1491_v47 = vor.u32 4788187, %v1490_v25  ;;  %v1366_v57 = vadd.s32 1, %v9486_v53  ;;  %v1630_v6 = vadd.s32 1, %v7938_v22 }
 0x178   : > { %v1198_v62 = vsel %vm1196_vm5, %v8491_v29, %v1197_v61  ;;  %v1501_v12 = vsel %vm9458_vm6, 0, %v1499_v49  ;;  %v1627_v42 = vand.u32 8388607, %v1620_v11  ;;  %v9518_v30 = vmul.f32 %v9176_v33, %v969_v4 }
 0x179   : > { %v1202_v59 = vsel %vm1195_vm9, %v1198_v62, %v1201_v40  ;;  %v1492_v37 = vand.u32 2147483647, %v1491_v47  ;;  %v1494_v17 = vcvt.s32.f32 %v1487_v8  ;;  %vm1631_vm11 = vcmp.gt.s32.totalorder %v1630_v6, 0 }
 0x17a   : > { %v1203_v38 = vsel %vm1192_vm10, nan, %v1202_v59  ;;  %v1363_v52 = vmul.u32 %v9411_v3, %v1347_v60  ;;  %vm1365_vm12 = vc.u32 %v9506_v10, %v9485_v1  ;;  %v1632_v21 = vsel %vm1631_vm11, %v1630_v6, 0 }
 0x17b   : > { %7756 = vst [vmem:[%s9477_s9] sm:$0xff] %v1203_v38  ;;  %v1495_v9 = vmul.f32 %v1494_v17, %v1492_v37  ;;  %v1367_v51 = vsel %vm1365_vm12, %v1366_v57, %v9486_v53  ;;  %v1634_v48 = vand.u32 31, %v1632_v21  ;;  %v1505_v44 = vadd.s32 3, %v1501_v12 }
 0x17c   : > { %v1368_v5 = vadd.s32 %v1367_v51, %v1363_v52  ;;  %v1628_v7 = vor.u32 8388608, %v1627_v42  ;;  %v1519_v54 = vand.u32 2139095040, %v9518_v30  ;;  %v9530_v49 = vshrl.u32 %v1632_v21, 5 }
 0x17d   : > { %v1496_v29 = vxor.u32 2147483648, %v1495_v9  ;;  %v1635_v18 = vsub.s32 32, %v1634_v48  ;;  %v1637_v3 = vshll.u32 %v14972_v41, %v1634_v48  ;;  %v1640_v22 = vshll.u32 %v14973_v34, %v1634_v48 }
 0x17e   : > { %v1369_v63 = vadd.s32 536870912, %v1368_v5  ;;  %v1643_v43 = vshll.u32 %v14974_v14, %v1634_v48  ;;  %v1646_v55 = vshll.u32 %v14975_v45, %v1634_v48  ;;  %v1649_v4 = vshll.u32 %v14976_v58, %v1634_v48 }
 0x17f   : > { %v1497_v53 = vsel %vm1414_vm15, %v1496_v29, %v1495_v9  ;;  %v1638_v8 = vshrl.u32 %v14973_v34, %v1635_v18  ;;  %v1641_v25 = vshrl.u32 %v14974_v14, %v1635_v18  ;;  %v1644_v13 = vshrl.u32 %v14975_v45, %v1635_v18 }
 0x180   : > { %v1500_v61 = vsel %vm9458_vm6, %v9202_v50, %v1497_v53  ;;  %v1370_v60 = vshrl.u32 %v1369_v63, 30  ;;  %v1647_v40 = vshrl.u32 %v14976_v58, %v1635_v18  ;;  %v1650_v6 = vshrl.u32 %v14980_v46, %v1635_v18 }
 0x181   : > { %8494 = vcosq.f32 %v1500_v61  ;;  %v1639_v47 = vor.u32 %v1638_v8, %v1637_v3  ;;  %v1642_v57 = vor.u32 %v1641_v25, %v1640_v22  ;;  %vm1310_vm13 = vcmp.lt.s32.totalorder %v9289_v56, 0 }
 0x182   : > { %8496 = vsinq.f32 %v1500_v61  ;;  %v1371_v62 = vshll.u32 %v1370_v60, 30  ;;  %v1645_v12 = vor.u32 %v1644_v13, %v1643_v43  ;;  %v1648_v42 = vor.u32 %v1647_v40, %v1646_v55 }
 0x183   : > { %v1651_v59 = vor.u32 %v1650_v6, %v1649_v4  ;;  %v1506_v37 = vand.u32 3, %v1505_v44  ;;  %vm1652_vm14 = vcmp.lt.s32.totalorder %v9530_v49, 1  ;;  %v1668_v17 = vshll.u32 %v1628_v7, 8 }
 0x184   : > { %v9548_v0 = vsub.s32 %v1368_v5, %v1371_v62  ;;  %v1636_v38 = vshrl.u32 %v14972_v41, %v1635_v18  ;;  %vm1655_vm15 = vcmp.lt.s32.totalorder %v9530_v49, 4  ;;  %v1660_v52 = vsel %vm1652_vm14, %v1639_v47, %v1642_v57 }
 0x185   : > { %v1520_v21 = vshrl.u32 %v1519_v54, 23  ;;  %v14988_v9 = vand.u32 2147483647, %v9289_v56  ;;  %vm1653_vm2 = vcmp.lt.s32.totalorder %v9530_v49, 2  ;;  %vm1654_vm3 = vcmp.lt.s32.totalorder %v9530_v49, 3 }
 0x186   : > { %v1374_v48 = vsub.s32 0, %v9548_v0  ;;  %v1661_v44 = vsel %vm1655_vm15, %v1648_v42, 920167782  ;;  %v1657_v5 = vsel %vm1655_vm15, %v1645_v12, 2102212464  ;;  %v1664_v54 = vsel %vm1652_vm14, %v1642_v57, %v1645_v12 }
 0x187   : > { %vm9557_vm1 = vcmp.le.f32.partialorder %v14988_v9, 0.7853982  ;;  %v1662_v7 = vsel %vm1654_vm3, %v1645_v12, %v1661_v44  ;;  %v1665_v29 = vsel %vm1655_vm15, %v1651_v59, 1326507024  ;;  %vm1504_vm4 = vweird.f32 %v9202_v50 }
 0x188   : > { %v7927_v18 = vmin.u32 %v1374_v48, %v9548_v0  ;;  %v1394_v3 = vsub.s32 4, %v1370_v60  ;;  %v1663_v63 = vsel %vm1653_vm2, %v1660_v52, %v1662_v7  ;;  %v1666_v22 = vsel %vm1654_vm3, %v1648_v42, %v1665_v29 }
 0x189   : > { %vm1507_vm5 = vcmp.lt.s32.totalorder %v1506_v37, 2  ;;  %v1667_v43 = vsel %vm1653_vm2, %v1664_v54, %v1666_v22  ;;  %v9576_v55 = vmul.u32.u64.low %v1668_v17, %v1663_v63  ;;  %v9577_v53 = vmul.u32.u64.high %v1668_v17, %v1663_v63, %v9576_v55 }
 0x18a   : > { %v1376_v8 = vclz %v7927_v18  ;;  %v1656_v25 = vsel %vm1652_vm14, %v1636_v38, %v1639_v47  ;;  %v1658_v4 = vsel %vm1654_vm3, %v1642_v57, %v1657_v5  ;;  %v1516_v61 = vand.u32 2147483647, %v9518_v30 }
 0x18b   : > { %v8495_v13 = vpop.eup %8494  ;;  %vm1508_vm6 = vcmp.eq.s32.totalorder %v1506_v37, 0  ;;  %v9585_v40 = vmul.u32.u64.low %v1668_v17, %v1667_v43  ;;  %v9586_v6 = vmul.u32.u64.high %v1668_v17, %v1667_v43, %v9585_v40  ;;  %v7934_v62 = vadd.s32 4294967169, %v1520_v21 }
 0x18c   : > { %v8497_v12 = vpop.eup %8496  ;;  %vm1511_vm7 = vcmp.eq.s32.totalorder %v1506_v37, 2  ;;  %v1512_v42 = vxor.u32 2147483648, %v8495_v13  ;;  %v7928_v59 = vadd.s32 4294967294, %v1376_v8  ;;  %v1395_v52 = vsel %vm1310_vm13, %v1394_v3, %v1370_v60 }
 0x18d   : > { %v1509_v9 = vxor.u32 2147483648, %v8497_v12  ;;  %v1659_v47 = vsel %vm1653_vm2, %v1656_v25, %v1658_v4  ;;  %v1678_v57 = vadd.s32 1, %v9577_v53  ;;  %v1526_v38 = vadd.s32 1, %v7934_v62 }
 0x18e   : > { %v1513_v48 = vsel %vm1511_vm7, %v1512_v42, %v8497_v12  ;;  %v1364_v44 = vadd.s32 %v9485_v1, %v9506_v10  ;;  %vm7929_vm8 = vcmp.lt.s32.totalorder %v7928_v59, 0  ;;  %v1523_v21 = vand.u32 8388607, %v1516_v61  ;;  %v683_v1 = vpop.permute.xlu1 %682 }
 0x18f   : > { %v1510_v5 = vsel %vm1508_vm6, %v8495_v13, %v1509_v9  ;;  %v1379_v7 = vsel %vm7929_vm8, 0, %v7928_v59  ;;  %v1397_v60 = vsel %vm9557_vm1, 0, %v1395_v52  ;;  %vm1677_vm9 = vc.u32 %v9586_v6, %v9576_v55 }
 0x190   : > { %v1514_v49 = vsel %vm1507_vm5, %v1510_v5, %v1513_v48  ;;  %v1380_v54 = vsub.s32 32, %v1379_v7  ;;  %v1384_v29 = vsub.s32 4294967266, %v1379_v7  ;;  %v1675_v18 = vmul.u32 %v1668_v17, %v1659_v47 }
 0x191   : > { %v1515_v10 = vsel %vm1504_vm4, nan, %v1514_v49  ;;  %v1381_v3 = vshll.u32 %v9548_v0, %v1379_v7  ;;  %v1679_v63 = vsel %vm1677_vm9, %v1678_v57, %v9577_v53  ;;  %vm1527_vm10 = vcmp.gt.s32.totalorder %v1526_v38, 0 }
 0x192   : > { %7759 = vst [vmem:[%s9477_s9 + $0x18] sm:$0xff] %v1515_v10  ;;  %v1382_v22 = vshrl.u32 %v1364_v44, %v1380_v54  ;;  %v1385_v43 = vadd.s32 127, %v1384_v29  ;;  %v1680_v8 = vadd.s32 %v1679_v63, %v1675_v18  ;;  %v1528_v25 = vsel %vm1527_vm10, %v1526_v38, 0 }
 0x193   : > { %v1530_v4 = vand.u32 31, %v1528_v25  ;;  %v972_v37 = vsel %vm580_vm0, %v683_v1, %v8998_v15  ;;  %v1401_v50 = vadd.s32 3, %v1397_v60  ;;  %v1524_v53 = vor.u32 8388608, %v1523_v21 }
 0x194   : > { %v1383_v17 = vor.u32 %v1382_v22, %v1381_v3  ;;  %v1386_v13 = vshll.u32 %v1385_v43, 23  ;;  %v1681_v40 = vadd.s32 536870912, %v1680_v8  ;;  %v9614_v42 = vmul.f32 %v9176_v33, %v972_v37 }
 0x195   : > { %v1531_v62 = vsub.s32 32, %v1530_v4  ;;  %v1533_v59 = vshll.u32 %v14972_v41, %v1530_v4  ;;  %v1529_v44 = vshrl.u32 %v1528_v25, 5  ;;  %v1536_v21 = vshll.u32 %v14973_v34, %v1530_v4 }
 0x196   : > { %v1387_v12 = vor.u32 4788187, %v1386_v13  ;;  %v9611_v0 = vshrl.u32 %v1681_v40, 30  ;;  %v1390_v57 = vcvt.s32.f32 %v1383_v17  ;;  %v1539_v33 = vshll.u32 %v14974_v14, %v1530_v4 }
 0x197   : > { %v1534_v52 = vshrl.u32 %v14973_v34, %v1531_v62  ;;  %v1537_v9 = vshrl.u32 %v14974_v14, %v1531_v62  ;;  %v1540_v15 = vshrl.u32 %v14975_v45, %v1531_v62  ;;  %v1543_v48 = vshrl.u32 %v14976_v58, %v1531_v62 }
 0x198   : > { %v1388_v47 = vand.u32 2147483647, %v1387_v12  ;;  %v1683_v38 = vshll.u32 %v9611_v0, 30  ;;  %v1542_v5 = vshll.u32 %v14975_v45, %v1530_v4  ;;  %v9625_v60 = vand.u32 3, %v1401_v50 }
 0x199   : > { %v1535_v54 = vor.u32 %v1534_v52, %v1533_v59  ;;  %v1538_v29 = vor.u32 %v1537_v9, %v1536_v21  ;;  %v1541_v18 = vor.u32 %v1540_v15, %v1539_v33  ;;  %v1546_v10 = vshrl.u32 %v14980_v46, %v1531_v62 }
 0x19a   : > { %v1391_v7 = vmul.f32 %v1390_v57, %v1388_v47  ;;  %v9627_v49 = vsub.s32 %v1680_v8, %v1683_v38  ;;  %v1544_v1 = vor.u32 %v1543_v48, %v1542_v5  ;;  %v1545_v22 = vshll.u32 %v14976_v58, %v1530_v4 }
 0x19b   : > { %v9632_v43 = vshll.u32 %v1524_v53, 8  ;;  %vm1622_vm11 = vcmp.lt.s32.totalorder %v9390_v26, 0  ;;  %v1706_v25 = vsub.s32 4, %v9611_v0  ;;  %v1532_v8 = vshrl.u32 %v14972_v41, %v1531_v62 }
 0x19c   : > { %v1392_v3 = vxor.u32 2147483648, %v1391_v7  ;;  %v1686_v63 = vsub.s32 0, %v9627_v49  ;;  %vm1548_vm12 = vcmp.lt.s32.totalorder %v1529_v44, 1  ;;  %v1831_v37 = vand.u32 2139095040, %v9614_v42 }
 0x19d   : > { %v1547_v40 = vor.u32 %v1546_v10, %v1545_v22  ;;  %vm1551_vm14 = vcmp.lt.s32.totalorder %v1529_v44, 4  ;;  %v1556_v12 = vsel %vm1548_vm12, %v1535_v54, %v1538_v29  ;;  %vm1549_vm15 = vcmp.lt.s32.totalorder %v1529_v44, 2 }
 0x19e   : > { %v1393_v17 = vsel %vm1310_vm13, %v1392_v3, %v1391_v7  ;;  %v7939_v13 = vmin.u32 %v1686_v63, %v9627_v49  ;;  %v1553_v50 = vsel %vm1551_vm14, %v1541_v18, 2102212464  ;;  %v1557_v62 = vsel %vm1551_vm14, %v1544_v1, 920167782  ;;  %v678_v3 = vpop.permute.xlu0 %677 }
 0x19f   : > { %v1396_v4 = vsel %vm9557_vm1, %v9289_v56, %v1393_v17  ;;  %vm1550_vm2 = vcmp.lt.s32.totalorder %v1529_v44, 3  ;;  %v1552_v59 = vsel %vm1548_vm12, %v1532_v8, %v1535_v54  ;;  %v1560_v9 = vsel %vm1548_vm12, %v1538_v29, %v1541_v18 }
 0x1a0   : > { %8498 = vcosq.f32 %v1396_v4  ;;  %v1688_v53 = vclz %v7939_v13  ;;  %v1558_v52 = vsel %vm1550_vm2, %v1541_v18, %v1557_v62  ;;  %v1554_v47 = vsel %vm1550_vm2, %v1538_v29, %v1553_v50 }
 0x1a1   : > { %8500 = vsinq.f32 %v1396_v4  ;;  %v1559_v51 = vsel %vm1549_vm15, %v1556_v12, %v1558_v52  ;;  %v1561_v57 = vsel %vm1551_vm14, %v1547_v40, 1326507024  ;;  %v1832_v33 = vshrl.u32 %v1831_v37, 23 }
 0x1a2   : > { %v7940_v15 = vadd.s32 4294967294, %v1688_v53  ;;  %v1562_v38 = vsel %vm1550_vm2, %v1544_v1, %v1561_v57  ;;  %v9652_v48 = vmul.u32.u64.low %v9632_v43, %v1559_v51  ;;  %v9653_v21 = vmul.u32.u64.high %v9632_v43, %v1559_v51, %v9652_v48 }
 0x1a3   : > { %vm9658_vm13 = vcmp.le.f32.partialorder %v1620_v11, 0.7853982  ;;  %v1676_v7 = vadd.s32 %v9576_v55, %v9586_v6  ;;  %v1563_v54 = vsel %vm1549_vm15, %v1560_v9, %v1562_v38  ;;  %v7946_v10 = vadd.s32 4294967169, %v1832_v33 }
 0x1a4   : > { %vm7941_vm1 = vcmp.lt.s32.totalorder %v7940_v15, 0  ;;  %v9666_v18 = vmul.u32.u64.low %v9632_v43, %v1563_v54  ;;  %v9667_v1 = vmul.u32.u64.high %v9632_v43, %v1563_v54, %v9666_v18  ;;  %v1707_v11 = vsel %vm1622_vm11, %v1706_v25, %v9611_v0 }
 0x1a5   : > { %v1691_v29 = vsel %vm7941_vm1, 0, %v7940_v15  ;;  %v1555_v8 = vsel %vm1549_vm15, %v1552_v59, %v1554_v47  ;;  %vm1400_vm3 = vweird.f32 %v9289_v56  ;;  %vm1403_vm4 = vcmp.lt.s32.totalorder %v9625_v60, 2  ;;  %v9693_v47 = vld [vmem:[%s14908_s2] ss:$0 sm:$0xff] }
 0x1a6   : > { %v1692_v63 = vsub.s32 32, %v1691_v29  ;;  %v1696_v22 = vsub.s32 4294967266, %v1691_v29  ;;  %v1574_v55 = vadd.s32 1, %v9653_v21  ;;  %v1828_v6 = vand.u32 2147483647, %v9614_v42 }
 0x1a7   : > { %v1838_v37 = vadd.s32 1, %v7946_v10  ;;  %v1693_v17 = vshll.u32 %v9627_v49, %v1691_v29  ;;  %v971_v4 = vsel %vm580_vm0, %v678_v3, %v9000_v16  ;;  %v1709_v0 = vsel %vm9658_vm13, 0, %v1707_v11 }
 0x1a8   : > { %v1694_v13 = vshrl.u32 %v1676_v7, %v1692_v63  ;;  %v1697_v40 = vadd.s32 127, %v1696_v22  ;;  %v1571_v44 = vmul.u32 %v9632_v43, %v1555_v8  ;;  %vm1573_vm5 = vc.u32 %v9667_v1, %v9652_v48 }
 0x1a9   : > { %vm1839_vm6 = vcmp.gt.s32.totalorder %v1838_v37, 0  ;;  %v1575_v49 = vsel %vm1573_vm5, %v1574_v55, %v9653_v21  ;;  %v1835_v16 = vand.u32 8388607, %v1828_v6  ;;  %vm1407_vm7 = vcmp.eq.s32.totalorder %v9625_v60, 2 }
 0x1aa   : > { %v8499_v25 = vpop.eup %8498  ;;  %v1695_v50 = vor.u32 %v1694_v13, %v1693_v17  ;;  %v1698_v12 = vshll.u32 %v1697_v40, 23  ;;  %v1840_v62 = vsel %vm1839_vm6, %v1838_v37, 0  ;;  %v1576_v52 = vadd.s32 %v1575_v49, %v1571_v44 }
 0x1ab   : > { %v8501_v53 = vpop.eup %8500  ;;  %v1408_v59 = vxor.u32 2147483648, %v8499_v25  ;;  %v1842_v9 = vand.u32 31, %v1840_v62  ;;  %v9696_v51 = vmul.f32 %v9693_v47, %v971_v4  ;;  %vm1404_vm8 = vcmp.eq.s32.totalorder %v9625_v60, 0 }
 0x1ac   : > { %v1405_v15 = vxor.u32 2147483648, %v8501_v53  ;;  %v1699_v43 = vor.u32 4788187, %v1698_v12  ;;  %v1577_v38 = vadd.s32 536870912, %v1576_v52  ;;  %v1702_v54 = vcvt.s32.f32 %v1695_v50 }
 0x1ad   : > { %v1409_v57 = vsel %vm1407_vm7, %v1408_v59, %v8501_v53  ;;  %v1843_v21 = vsub.s32 32, %v1842_v9  ;;  %v1713_v29 = vadd.s32 3, %v1709_v0  ;;  %v1836_v3 = vor.u32 8388608, %v1835_v16 }
 0x1ae   : > { %v1406_v33 = vsel %vm1404_vm8, %v8499_v25, %v1405_v15  ;;  %v1700_v7 = vand.u32 2147483647, %v1699_v43  ;;  %v9701_v10 = vshrl.u32 %v1577_v38, 30  ;;  %v1727_v55 = vand.u32 2139095040, %v9696_v51 }
 0x1af   : > { %v1410_v18 = vsel %vm1403_vm4, %v1406_v33, %v1409_v57  ;;  %v1846_v63 = vshrl.u32 %v14973_v34, %v1843_v21  ;;  %v1849_v8 = vshrl.u32 %v14974_v14, %v1843_v21  ;;  %v1841_v17 = vshrl.u32 %v1840_v62, 5 }
 0x1b0   : > { %v1411_v22 = vsel %vm1400_vm3, nan, %v1410_v18  ;;  %v1703_v11 = vmul.f32 %v1702_v54, %v1700_v7  ;;  %v1579_v37 = vshll.u32 %v9701_v10, 30  ;;  %v1845_v60 = vshll.u32 %v14972_v41, %v1842_v9 }
 0x1b1   : > { %7758 = vst [vmem:[%s9477_s9 + $0x10] sm:$0xff] %v1411_v22  ;;  %v1852_v13 = vshrl.u32 %v14975_v45, %v1843_v21  ;;  %v1848_v4 = vshll.u32 %v14973_v34, %v1842_v9  ;;  %v1854_v0 = vshll.u32 %v14975_v45, %v1842_v9  ;;  %v1855_v56 = vshrl.u32 %v14976_v58, %v1843_v21 }
 0x1b2   : > { %v1704_v40 = vxor.u32 2147483648, %v1703_v11  ;;  %v9715_v44 = vsub.s32 %v1576_v52, %v1579_v37  ;;  %v1847_v25 = vor.u32 %v1846_v63, %v1845_v60  ;;  %v1851_v50 = vshll.u32 %v14974_v14, %v1842_v9 }
 0x1b3   : > { %v1858_v12 = vshrl.u32 %v14980_v46, %v1843_v21  ;;  %v1850_v62 = vor.u32 %v1849_v8, %v1848_v4  ;;  %v1856_v53 = vor.u32 %v1855_v56, %v1854_v0  ;;  %v1857_v59 = vshll.u32 %v14976_v58, %v1842_v9 }
 0x1b4   : > { %v1705_v49 = vsel %vm1622_vm11, %v1704_v40, %v1703_v11  ;;  %v9725_v15 = vand.u32 3, %v1713_v29  ;;  %v1582_v52 = vsub.s32 0, %v9715_v44  ;;  %v1853_v43 = vor.u32 %v1852_v13, %v1851_v50 }
 0x1b5   : > { %v1708_v16 = vsel %vm9658_vm13, %v9390_v26, %v1705_v49  ;;  %v1859_v57 = vor.u32 %v1858_v12, %v1857_v59  ;;  %v1876_v38 = vshll.u32 %v1836_v3, 8  ;;  %v1728_v33 = vshrl.u32 %v1727_v55, 23 }
 0x1b6   : > { %8502 = vcosq.f32 %v1708_v16  ;;  %vm1518_vm9 = vcmp.lt.s32.totalorder %v9518_v30, 0  ;;  %v7935_v7 = vmin.u32 %v1582_v52, %v9715_v44  ;;  %vm1860_vm10 = vcmp.lt.s32.totalorder %v1841_v17, 1 }
 0x1b7   : > { %8504 = vsinq.f32 %v1708_v16  ;;  %vm1863_vm11 = vcmp.lt.s32.totalorder %v1841_v17, 4  ;;  %v1602_v9 = vsub.s32 4, %v9701_v10  ;;  %v1844_v5 = vshrl.u32 %v14972_v41, %v1843_v21 }
 0x1b8   : > { %v1868_v54 = vsel %vm1860_vm10, %v1847_v25, %v1850_v62  ;;  %v1869_v29 = vsel %vm1863_vm11, %v1856_v53, 920167782  ;;  %v1584_v18 = vclz %v7935_v7  ;;  %vm1862_vm12 = vcmp.lt.s32.totalorder %v1841_v17, 3 }
 0x1b9   : > { %v1865_v63 = vsel %vm1863_vm11, %v1853_v43, 2102212464  ;;  %v1872_v3 = vsel %vm1860_vm10, %v1850_v62, %v1853_v43  ;;  %vm1861_vm14 = vcmp.lt.s32.totalorder %v1841_v17, 2  ;;  %v1870_v22 = vsel %vm1862_vm12, %v1853_v43, %v1869_v29 }
 0x1ba   : > { %v1873_v11 = vsel %vm1863_vm11, %v1859_v57, 1326507024  ;;  %v7942_v8 = vadd.s32 4294967169, %v1728_v33  ;;  %vm9736_vm15 = vcmp.le.f32.partialorder %v1516_v61, 0.7853982  ;;  %v7936_v37 = vadd.s32 4294967294, %v1584_v18 }
 0x1bb   : > { %v1864_v21 = vsel %vm1860_vm10, %v1844_v5, %v1847_v25  ;;  %v1871_v60 = vsel %vm1861_vm14, %v1868_v54, %v1870_v22  ;;  %v1874_v13 = vsel %vm1862_vm12, %v1856_v53, %v1873_v11  ;;  %v1866_v40 = vsel %vm1862_vm12, %v1850_v62, %v1865_v63 }
 0x1bc   : > { %v1875_v4 = vsel %vm1861_vm14, %v1872_v3, %v1874_v13  ;;  %v9743_v0 = vmul.u32.u64.low %v1876_v38, %v1871_v60  ;;  %v9744_v56 = vmul.u32.u64.high %v1876_v38, %v1871_v60, %v9743_v0  ;;  %vm1715_vm2 = vcmp.lt.s32.totalorder %v9725_v15, 2 }
 0x1bd   : > { %vm7937_vm13 = vcmp.lt.s32.totalorder %v7936_v37, 0  ;;  %v9748_v61 = vmul.u32.u64.low %v1876_v38, %v1875_v4  ;;  %v9749_v50 = vmul.u32.u64.high %v1876_v38, %v1875_v4, %v9748_v61  ;;  %vm1716_vm1 = vcmp.eq.s32.totalorder %v9725_v15, 0 }
 0x1be   : > { %vm1719_vm3 = vcmp.eq.s32.totalorder %v9725_v15, 2  ;;  %v1587_v25 = vsel %vm7937_vm13, 0, %v7936_v37  ;;  %v1734_v12 = vadd.s32 1, %v7942_v8  ;;  %v1572_v49 = vadd.s32 %v9652_v48, %v9667_v1 }
 0x1bf   : > { %v1588_v62 = vsub.s32 32, %v1587_v25  ;;  %v1592_v53 = vsub.s32 4294967266, %v1587_v25  ;;  %v1867_v59 = vsel %vm1861_vm14, %v1864_v21, %v1866_v40  ;;  %v1603_v52 = vsel %vm1518_vm9, %v1602_v9, %v9701_v10 }
 0x1c0   : > { %v8503_v16 = vpop.eup %8502  ;;  %v1886_v43 = vadd.s32 1, %v9744_v56  ;;  %v1724_v57 = vand.u32 2147483647, %v9696_v51  ;;  %vm1735_vm4 = vcmp.gt.s32.totalorder %v1734_v12, 0  ;;  %v1589_v5 = vshll.u32 %v9715_v44, %v1587_v25 }
 0x1c1   : > { %v8505_v33 = vpop.eup %8504  ;;  %v1720_v7 = vxor.u32 2147483648, %v8503_v16  ;;  %v1590_v54 = vshrl.u32 %v1572_v49, %v1588_v62  ;;  %v1593_v48 = vadd.s32 127, %v1592_v53  ;;  %v1883_v29 = vmul.u32 %v1876_v38, %v1867_v59  ;;  %v693_v53 = vpop.permute.xlu1 %692 }
 0x1c2   : > { %v1717_v1 = vxor.u32 2147483648, %v8505_v33  ;;  %vm1885_vm5 = vc.u32 %v9749_v50, %v9743_v0  ;;  %v1736_v17 = vsel %vm1735_vm4, %v1734_v12, 0  ;;  %v1605_v44 = vsel %vm9736_vm15, 0, %v1603_v52 }
 0x1c3   : > { %v1721_v10 = vsel %vm1719_vm3, %v1720_v7, %v8505_v33  ;;  %v1591_v9 = vor.u32 %v1590_v54, %v1589_v5  ;;  %v1594_v18 = vshll.u32 %v1593_v48, 23  ;;  %v1887_v63 = vsel %vm1885_vm5, %v1886_v43, %v9744_v56 }
 0x1c4   : > { %v1718_v3 = vsel %vm1716_vm1, %v8503_v16, %v1717_v1  ;;  %v1888_v22 = vadd.s32 %v1887_v63, %v1883_v29  ;;  %v1738_v38 = vand.u32 31, %v1736_v17  ;;  %vm1712_vm6 = vweird.f32 %v9390_v26 }
 0x1c5   : > { %v1722_v11 = vsel %vm1715_vm2, %v1718_v3, %v1721_v10  ;;  %v1595_v8 = vor.u32 4788187, %v1594_v18  ;;  %v1598_v40 = vcvt.s32.f32 %v1591_v9  ;;  %v1609_v4 = vadd.s32 3, %v1605_v44 }
 0x1c6   : > { %v1723_v37 = vsel %vm1712_vm6, nan, %v1722_v11  ;;  %v1889_v21 = vadd.s32 536870912, %v1888_v22  ;;  %v1739_v60 = vsub.s32 32, %v1738_v38  ;;  %v1731_v61 = vand.u32 8388607, %v1724_v57 }
 0x1c7   : > { %7761 = vst [vmem:[%s9477_s9 + $0x28] sm:$0xff] %v1723_v37  ;;  %v1596_v13 = vand.u32 2147483647, %v1595_v8  ;;  %v1737_v25 = vshrl.u32 %v1736_v17, 5  ;;  %v1741_v16 = vshll.u32 %v14972_v41, %v1738_v38  ;;  %v1744_v52 = vshll.u32 %v14973_v34, %v1738_v38 }
 0x1c8   : > { %v9775_v56 = vshrl.u32 %v1889_v21, 30  ;;  %v1742_v12 = vshrl.u32 %v14973_v34, %v1739_v60  ;;  %v1745_v15 = vshrl.u32 %v14974_v14, %v1739_v60  ;;  %v1748_v49 = vshrl.u32 %v14975_v45, %v1739_v60 }
 0x1c9   : > { %v1599_v26 = vmul.f32 %v1598_v40, %v1596_v13  ;;  %v1751_v62 = vshrl.u32 %v14976_v58, %v1739_v60  ;;  %v1747_v43 = vshll.u32 %v14974_v14, %v1738_v38  ;;  %v1750_v7 = vshll.u32 %v14975_v45, %v1738_v38 }
 0x1ca   : > { %v1891_v59 = vshll.u32 %v9775_v56, 30  ;;  %v1753_v5 = vshll.u32 %v14976_v58, %v1738_v38  ;;  %v1754_v54 = vshrl.u32 %v14980_v46, %v1739_v60  ;;  %v1743_v1 = vor.u32 %v1742_v12, %v1741_v16 }
 0x1cb   : > { %v1600_v33 = vxor.u32 2147483648, %v1599_v26  ;;  %v1749_v29 = vor.u32 %v1748_v49, %v1747_v43  ;;  %v974_v17 = vsel %vm580_vm0, %v693_v53, %v9004_v19  ;;  %v1746_v9 = vor.u32 %v1745_v15, %v1744_v52  ;;  %v688_v52 = vpop.permute.xlu0 %687 }
 0x1cc   : > { %v9790_v48 = vsub.s32 %v1888_v22, %v1891_v59  ;;  %v1752_v18 = vor.u32 %v1751_v62, %v1750_v7  ;;  %v1755_v63 = vor.u32 %v1754_v54, %v1753_v5  ;;  %v9800_v44 = vand.u32 3, %v1609_v4 }
 0x1cd   : > { %v1601_v10 = vsel %vm1518_vm9, %v1600_v33, %v1599_v26  ;;  %v1732_v38 = vor.u32 8388608, %v1731_v61  ;;  %vm1830_vm7 = vcmp.lt.s32.totalorder %v9614_v42, 0  ;;  %v1740_v19 = vshrl.u32 %v14972_v41, %v1739_v60 }
 0x1ce   : > { %v1604_v3 = vsel %vm9736_vm15, %v9518_v30, %v1601_v10  ;;  %v1894_v22 = vsub.s32 0, %v9790_v48  ;;  %vm1759_vm8 = vcmp.lt.s32.totalorder %v1737_v25, 4  ;;  %v9806_v11 = vmul.f32 %v9693_v47, %v974_v17 }
 0x1cf   : > { %8506 = vcosq.f32 %v1604_v3  ;;  %vm1756_vm9 = vcmp.lt.s32.totalorder %v1737_v25, 1  ;;  %v1761_v55 = vsel %vm1759_vm8, %v1749_v29, 2102212464  ;;  %v1765_v21 = vsel %vm1759_vm8, %v1752_v18, 920167782 }
 0x1d0   : > { %8508 = vsinq.f32 %v1604_v3  ;;  %v7947_v8 = vmin.u32 %v1894_v22, %v9790_v48  ;;  %v1764_v37 = vsel %vm1756_vm9, %v1743_v1, %v1746_v9  ;;  %v1768_v13 = vsel %vm1756_vm9, %v1746_v9, %v1749_v29 }
 0x1d1   : > { %v1769_v40 = vsel %vm1759_vm8, %v1755_v63, 1326507024  ;;  %vm9811_vm10 = vcmp.le.f32.partialorder %v1828_v6, 0.7853982  ;;  %vm1757_vm11 = vcmp.lt.s32.totalorder %v1737_v25, 2  ;;  %vm1758_vm12 = vcmp.lt.s32.totalorder %v1737_v25, 3 }
 0x1d2   : > { %v1896_v60 = vclz %v7947_v8  ;;  %v1772_v61 = vshll.u32 %v1732_v38, 8  ;;  %v1760_v12 = vsel %vm1756_vm9, %v1740_v19, %v1743_v1  ;;  %v1762_v26 = vsel %vm1758_vm12, %v1746_v9, %v1761_v55 }
 0x1d3   : > { %v1766_v15 = vsel %vm1758_vm12, %v1749_v29, %v1765_v21  ;;  %v1770_v49 = vsel %vm1758_vm12, %v1752_v18, %v1769_v40  ;;  %v1914_v53 = vsub.s32 4, %v9775_v56  ;;  %vm1612_vm14 = vcmp.eq.s32.totalorder %v9800_v44, 0 }
 0x1d4   : > { %v7948_v62 = vadd.s32 4294967294, %v1896_v60  ;;  %v1767_v59 = vsel %vm1757_vm11, %v1764_v37, %v1766_v15  ;;  %v1771_v16 = vsel %vm1757_vm11, %v1768_v13, %v1770_v49  ;;  %v1763_v5 = vsel %vm1757_vm11, %v1760_v12, %v1762_v26 }
 0x1d5   : > { %v9818_v6 = vmul.u32.u64.low %v1772_v61, %v1771_v16  ;;  %v9819_v43 = vmul.u32.u64.high %v1772_v61, %v1771_v16, %v9818_v6  ;;  %v9821_v33 = vmul.u32.u64.low %v1772_v61, %v1767_v59  ;;  %v9822_v7 = vmul.u32.u64.high %v1772_v61, %v1767_v59, %v9821_v33 }
 0x1d6   : > { %vm7949_vm15 = vcmp.lt.s32.totalorder %v7948_v62, 0  ;;  %v2039_v54 = vand.u32 2139095040, %v9806_v11  ;;  %vm1615_vm2 = vcmp.eq.s32.totalorder %v9800_v44, 2  ;;  %v1884_v1 = vadd.s32 %v9743_v0, %v9749_v50 }
 0x1d7   : > { %v1899_v29 = vsel %vm7949_vm15, 0, %v7948_v62  ;;  %v973_v17 = vsel %vm580_vm0, %v688_v52, %v9006_v20  ;;  %v1915_v18 = vsel %vm1830_vm7, %v1914_v53, %v9775_v56  ;;  %v1779_v22 = vmul.u32 %v1772_v61, %v1763_v5 }
 0x1d8   : > { %v1900_v10 = vsub.s32 32, %v1899_v29  ;;  %v1904_v9 = vsub.s32 4294967266, %v1899_v29  ;;  %v2040_v25 = vshrl.u32 %v2039_v54, 23  ;;  %v1901_v3 = vshll.u32 %v9790_v48, %v1899_v29 }
 0x1d9   : > { %v8507_v63 = vpop.eup %8506  ;;  %vm1781_vm13 = vc.u32 %v9819_v43, %v9821_v33  ;;  %v1782_v0 = vadd.s32 1, %v9822_v7  ;;  %v1917_v37 = vsel %vm9811_vm10, 0, %v1915_v18  ;;  %v2036_v21 = vand.u32 2147483647, %v9806_v11 }
 0x1da   : > { %v8509_v50 = vpop.eup %8508  ;;  %v1616_v38 = vxor.u32 2147483648, %v8507_v63  ;;  %v1902_v19 = vshrl.u32 %v1884_v1, %v1900_v10  ;;  %v1905_v20 = vadd.s32 127, %v1904_v9  ;;  %v7954_v8 = vadd.s32 4294967169, %v2040_v25 }
 0x1db   : > { %v1613_v55 = vxor.u32 2147483648, %v8509_v50  ;;  %v1783_v56 = vsel %vm1781_vm13, %v1782_v0, %v9822_v7  ;;  %vm1608_vm1 = vweird.f32 %v9518_v30  ;;  %vm1611_vm3 = vcmp.lt.s32.totalorder %v9800_v44, 2  ;;  %v703_v7 = vpop.permute.xlu1 %702 }
 0x1dc   : > { %v1617_v48 = vsel %vm1615_vm2, %v1616_v38, %v8509_v50  ;;  %v1903_v13 = vor.u32 %v1902_v19, %v1901_v3  ;;  %v1906_v40 = vshll.u32 %v1905_v20, 23  ;;  %v1784_v60 = vadd.s32 %v1783_v56, %v1779_v22 }
 0x1dd   : > { %v1614_v61 = vsel %vm1612_vm14, %v8507_v63, %v1613_v55  ;;  %v2046_v12 = vadd.s32 1, %v7954_v8  ;;  %v1921_v49 = vadd.s32 3, %v1917_v37  ;;  %v2043_v59 = vand.u32 8388607, %v2036_v21 }
 0x1de   : > { %v1618_v26 = vsel %vm1611_vm3, %v1614_v61, %v1617_v48  ;;  %v1907_v15 = vor.u32 4788187, %v1906_v40  ;;  %v1785_v62 = vadd.s32 536870912, %v1784_v60  ;;  %v9854_v16 = vmul.f32 %v9693_v47, %v973_v17 }
 0x1df   : > { %v1619_v53 = vsel %vm1608_vm1, nan, %v1618_v26  ;;  %vm2047_vm4 = vcmp.gt.s32.totalorder %v2046_v12, 0  ;;  %v1910_v52 = vcvt.s32.f32 %v1903_v13  ;;  %v9860_v29 = vand.u32 3, %v1921_v49 }
 0x1e0   : > { %7760 = vst [vmem:[%s9477_s9 + $0x20] sm:$0xff] %v1619_v53  ;;  %v1908_v30 = vand.u32 2147483647, %v1907_v15  ;;  %v9857_v6 = vshrl.u32 %v1785_v62, 30  ;;  %v2048_v44 = vsel %vm2047_vm4, %v2046_v12, 0  ;;  %v2044_v10 = vor.u32 8388608, %v2043_v59 }
 0x1e1   : > { %v2050_v5 = vand.u32 31, %v2048_v44  ;;  %v9865_v17 = vsel %vm580_vm0, %v703_v7, %v9010_v23  ;;  %v9869_v63 = vshrl.u32 %v2048_v44, 5  ;;  %v1935_v3 = vand.u32 2139095040, %v9854_v16 }
 0x1e2   : > { %v1911_v54 = vmul.f32 %v1910_v52, %v1908_v30  ;;  %v1787_v1 = vshll.u32 %v9857_v6, 30  ;;  %vm1726_vm5 = vcmp.lt.s32.totalorder %v9696_v51, 0  ;;  %v1780_v4 = vadd.s32 %v9821_v33, %v9819_v43 }
 0x1e3   : > { %v2051_v9 = vsub.s32 32, %v2050_v5  ;;  %v2053_v22 = vshll.u32 %v14972_v41, %v2050_v5  ;;  %v2056_v50 = vshll.u32 %v14973_v34, %v2050_v5  ;;  %v2059_v20 = vshll.u32 %v14974_v14, %v2050_v5 }
 0x1e4   : > { %v1912_v18 = vxor.u32 2147483648, %v1911_v54  ;;  %v9867_v25 = vsub.s32 %v1784_v60, %v1787_v1  ;;  %v2062_v56 = vshll.u32 %v14975_v45, %v2050_v5  ;;  %v2065_v12 = vshll.u32 %v14976_v58, %v2050_v5 }
 0x1e5   : > { %v2054_v0 = vshrl.u32 %v14973_v34, %v2051_v9  ;;  %v2057_v38 = vshrl.u32 %v14974_v14, %v2051_v9  ;;  %v2060_v8 = vshrl.u32 %v14975_v45, %v2051_v9  ;;  %v2063_v48 = vshrl.u32 %v14976_v58, %v2051_v9 }
 0x1e6   : > { %v1913_v19 = vsel %vm1830_vm7, %v1912_v18, %v1911_v54  ;;  %v1790_v23 = vsub.s32 0, %v9867_v25  ;;  %v2066_v26 = vshrl.u32 %v14980_v46, %v2051_v9  ;;  %v9892_v49 = vshll.u32 %v2044_v10, 8 }
 0x1e7   : > { %v1916_v55 = vsel %vm9811_vm10, %v9614_v42, %v1913_v19  ;;  %v2055_v37 = vor.u32 %v2054_v0, %v2053_v22  ;;  %v2058_v40 = vor.u32 %v2057_v38, %v2056_v50  ;;  %v2061_v60 = vor.u32 %v2060_v8, %v2059_v20 }
 0x1e8   : > { %8510 = vcosq.f32 %v1916_v55  ;;  %v7943_v13 = vmin.u32 %v1790_v23, %v9867_v25  ;;  %v2064_v61 = vor.u32 %v2063_v48, %v2062_v56  ;;  %v1932_v62 = vand.u32 2147483647, %v9854_v16 }
 0x1e9   : > { %8512 = vsinq.f32 %v1916_v55  ;;  %v2052_v53 = vshrl.u32 %v14972_v41, %v2051_v9  ;;  %v2067_v59 = vor.u32 %v2066_v26, %v2065_v12  ;;  %vm2068_vm6 = vcmp.lt.s32.totalorder %v9869_v63, 1 }
 0x1ea   : > { %v1792_v15 = vclz %v7943_v13  ;;  %v1936_v30 = vshrl.u32 %v1935_v3, 23  ;;  %vm1927_vm7 = vcmp.eq.s32.totalorder %v9860_v29, 2  ;;  %vm2070_vm8 = vcmp.lt.s32.totalorder %v9869_v63, 3 }
 0x1eb   : > { %vm2071_vm9 = vcmp.lt.s32.totalorder %v9869_v63, 4  ;;  %v2076_v43 = vsel %vm2068_vm6, %v2055_v37, %v2058_v40  ;;  %vm1924_vm10 = vcmp.eq.s32.totalorder %v9860_v29, 0  ;;  %v2080_v7 = vsel %vm2068_vm6, %v2058_v40, %v2061_v60 }
 0x1ec   : > { %v7944_v52 = vadd.s32 4294967294, %v1792_v15  ;;  %v2073_v33 = vsel %vm2071_vm9, %v2061_v60, 2102212464  ;;  %v2077_v44 = vsel %vm2071_vm9, %v2064_v61, 920167782  ;;  %vm1923_vm11 = vcmp.lt.s32.totalorder %v9860_v29, 2 }
 0x1ed   : > { %v2081_v5 = vsel %vm2071_vm9, %v2067_v59, 1326507024  ;;  %vm9908_vm12 = vcmp.le.f32.partialorder %v1724_v57, 0.7853982  ;;  %vm2069_vm15 = vcmp.lt.s32.totalorder %v9869_v63, 2  ;;  %v2078_v1 = vsel %vm2070_vm8, %v2061_v60, %v2077_v44 }
 0x1ee   : > { %vm7945_vm14 = vcmp.lt.s32.totalorder %v7944_v52, 0  ;;  %v2082_v10 = vsel %vm2070_vm8, %v2064_v61, %v2081_v5  ;;  %vm1920_vm2 = vweird.f32 %v9614_v42  ;;  %v1810_v18 = vsub.s32 4, %v9857_v6 }
 0x1ef   : > { %v1795_v9 = vsel %vm7945_vm14, 0, %v7944_v52  ;;  %v2079_v57 = vsel %vm2069_vm15, %v2076_v43, %v2078_v1  ;;  %v2083_v3 = vsel %vm2069_vm15, %v2080_v7, %v2082_v10  ;;  %v2072_v50 = vsel %vm2068_vm6, %v2052_v53, %v2055_v37 }
 0x1f0   : > { %v1796_v22 = vsub.s32 32, %v1795_v9  ;;  %v1800_v0 = vsub.s32 4294967266, %v1795_v9  ;;  %v2074_v38 = vsel %vm2070_vm8, %v2058_v40, %v2073_v33  ;;  %v1797_v56 = vshll.u32 %v9867_v25, %v1795_v9 }
 0x1f1   : > { %v9928_v19 = vmul.u32.u64.low %v9892_v49, %v2083_v3  ;;  %v9929_v23 = vmul.u32.u64.high %v9892_v49, %v2083_v3, %v9928_v19  ;;  %v9932_v20 = vmul.u32.u64.low %v9892_v49, %v2079_v57  ;;  %v9933_v8 = vmul.u32.u64.high %v9892_v49, %v2079_v57, %v9932_v20 }
 0x1f2   : > { %v8511_v55 = vpop.eup %8510  ;;  %v1798_v48 = vshrl.u32 %v1780_v4, %v1796_v22  ;;  %v1801_v13 = vadd.s32 127, %v1800_v0  ;;  %v7950_v60 = vadd.s32 4294967169, %v1936_v30  ;;  %v1811_v40 = vsel %vm1726_vm5, %v1810_v18, %v9857_v6 }
 0x1f3   : > { %v8513_v61 = vpop.eup %8512  ;;  %v1928_v37 = vxor.u32 2147483648, %v8511_v55  ;;  %v2075_v12 = vsel %vm2069_vm15, %v2072_v50, %v2074_v38  ;;  %v9944_v26 = vand.u32 8388607, %v1932_v62  ;;  %vm2093_vm13 = vc.u32 %v9929_v23, %v9932_v20 }
 0x1f4   : > { %v1925_v15 = vxor.u32 2147483648, %v8513_v61  ;;  %v1799_v53 = vor.u32 %v1798_v48, %v1797_v56  ;;  %v1802_v59 = vshll.u32 %v1801_v13, 23  ;;  %v1942_v25 = vadd.s32 1, %v7950_v60 }
 0x1f5   : > { %v1929_v4 = vsel %vm1927_vm7, %v1928_v37, %v8513_v61  ;;  %v2094_v6 = vadd.s32 1, %v9933_v8  ;;  %v9953_v63 = vmul.f32 %v9693_v47, %v9865_v17  ;;  %v2091_v43 = vmul.u32 %v9892_v49, %v2075_v12 }
 0x1f6   : > { %v1926_v30 = vsel %vm1924_vm10, %v8511_v55, %v1925_v15  ;;  %v1803_v52 = vor.u32 4788187, %v1802_v59  ;;  %vm1943_vm1 = vcmp.gt.s32.totalorder %v1942_v25, 0  ;;  %v1813_v44 = vsel %vm9908_vm12, 0, %v1811_v40 }
 0x1f7   : > { %v1930_v33 = vsel %vm1923_vm11, %v1926_v30, %v1929_v4  ;;  %v2095_v7 = vsel %vm2093_vm13, %v2094_v6, %v9933_v8  ;;  %v1944_v5 = vsel %vm1943_vm1, %v1942_v25, 0  ;;  %v1806_v10 = vcvt.s32.f32 %v1799_v53 }
 0x1f8   : > { %v1931_v17 = vsel %vm1920_vm2, nan, %v1930_v33  ;;  %v1804_v1 = vand.u32 2147483647, %v1803_v52  ;;  %v2096_v9 = vadd.s32 %v2095_v7, %v2091_v43  ;;  %v1946_v18 = vand.u32 31, %v1944_v5 }
 0x1f9   : > { %7763 = vst [vmem:[%s9477_s9 + $0x38] sm:$0xff] %v1931_v17  ;;  %v1940_v3 = vor.u32 8388608, %v9944_v26  ;;  %v1817_v29 = vadd.s32 3, %v1813_v44  ;;  %v1945_v22 = vshrl.u32 %v1944_v5, 5  ;;  %v2247_v50 = vand.u32 2139095040, %v9953_v63 }
 0x1fa   : > { %v1807_v57 = vmul.f32 %v1806_v10, %v1804_v1  ;;  %v2097_v49 = vadd.s32 536870912, %v2096_v9  ;;  %v1947_v0 = vsub.s32 32, %v1946_v18  ;;  %v1949_v42 = vshll.u32 %v14972_v41, %v1946_v18 }
 0x1fb   : > { %v1952_v8 = vshll.u32 %v14973_v34, %v1946_v18  ;;  %v1955_v48 = vshll.u32 %v14974_v14, %v1946_v18  ;;  %v1958_v37 = vshll.u32 %v14975_v45, %v1946_v18  ;;  %v9984_v59 = vand.u32 3, %v1817_v29 }
 0x1fc   : > { %v1808_v38 = vxor.u32 2147483648, %v1807_v57  ;;  %v9968_v19 = vshrl.u32 %v2097_v49, 30  ;;  %v1950_v55 = vshrl.u32 %v14973_v34, %v1947_v0  ;;  %v1953_v56 = vshrl.u32 %v14974_v14, %v1947_v0 }
 0x1fd   : > { %v1956_v13 = vshrl.u32 %v14975_v45, %v1947_v0  ;;  %v1959_v40 = vshrl.u32 %v14976_v58, %v1947_v0  ;;  %v1961_v6 = vshll.u32 %v14976_v58, %v1946_v18  ;;  %v1962_v30 = vshrl.u32 %v14980_v46, %v1947_v0 }
 0x1fe   : > { %v1809_v60 = vsel %vm1726_vm5, %v1808_v38, %v1807_v57  ;;  %v2099_v61 = vshll.u32 %v9968_v19, 30  ;;  %v1951_v26 = vor.u32 %v1950_v55, %v1949_v42  ;;  %v1954_v15 = vor.u32 %v1953_v56, %v1952_v8 }
 0x1ff   : > { %v1812_v12 = vsel %vm9908_vm12, %v9696_v51, %v1809_v60  ;;  %v1957_v53 = vor.u32 %v1956_v13, %v1955_v48  ;;  %v1960_v4 = vor.u32 %v1959_v40, %v1958_v37  ;;  %v2248_v52 = vshrl.u32 %v2247_v50, 23 }
 0x200   : > { %8514 = vcosq.f32 %v1812_v12  ;;  %v9986_v25 = vsub.s32 %v2096_v9, %v2099_v61  ;;  %vm2038_vm3 = vcmp.lt.s32.totalorder %v9806_v11, 0  ;;  %vm1964_vm4 = vcmp.lt.s32.totalorder %v1945_v22, 1 }
 0x201   : > { %8516 = vsinq.f32 %v1812_v12  ;;  %vm1966_vm5 = vcmp.lt.s32.totalorder %v1945_v22, 3  ;;  %vm1967_vm6 = vcmp.lt.s32.totalorder %v1945_v22, 4  ;;  %v1963_v43 = vor.u32 %v1962_v30, %v1961_v6 }
 0x202   : > { %v2102_v54 = vsub.s32 0, %v9986_v25  ;;  %v1969_v33 = vsel %vm1967_vm6, %v1957_v53, 2102212464  ;;  %v1972_v44 = vsel %vm1964_vm4, %v1951_v26, %v1954_v15  ;;  %v1973_v7 = vsel %vm1967_vm6, %v1960_v4, 920167782 }
 0x203   : > { %v1948_v17 = vshrl.u32 %v14972_v41, %v1947_v0  ;;  %vm1965_vm7 = vcmp.lt.s32.totalorder %v1945_v22, 2  ;;  %v1974_v1 = vsel %vm1966_vm5, %v1957_v53, %v1973_v7  ;;  %v1976_v9 = vsel %vm1964_vm4, %v1954_v15, %v1957_v53 }
 0x204   : > { %v7955_v5 = vmin.u32 %v2102_v54, %v9986_v25  ;;  %v1975_v10 = vsel %vm1965_vm7, %v1972_v44, %v1974_v1  ;;  %v1977_v18 = vsel %vm1967_vm6, %v1963_v43, 1326507024  ;;  %v1980_v57 = vshll.u32 %v1940_v3, 8 }
 0x205   : > { %vm1819_vm8 = vcmp.lt.s32.totalorder %v9984_v59, 2  ;;  %vm10001_vm9 = vcmp.le.f32.partialorder %v2036_v21, 0.7853982  ;;  %v1968_v0 = vsel %vm1964_vm4, %v1948_v17, %v1951_v26  ;;  %v1970_v50 = vsel %vm1966_vm5, %v1954_v15, %v1969_v33  ;;  %v698_v33 = vpop.permute.xlu0 %697 }
 0x206   : > { %v2104_v29 = vclz %v7955_v5  ;;  %v2244_v38 = vand.u32 2147483647, %v9953_v63  ;;  %vm1816_vm10 = vweird.f32 %v9696_v51  ;;  %v2122_v42 = vsub.s32 4, %v9968_v19 }
 0x207   : > { %v1978_v3 = vsel %vm1966_vm5, %v1960_v4, %v1977_v18  ;;  %v10011_v8 = vmul.u32.u64.low %v1980_v57, %v1975_v10  ;;  %v10012_v55 = vmul.u32.u64.high %v1980_v57, %v1975_v10, %v10011_v8  ;;  %vm1820_vm11 = vcmp.eq.s32.totalorder %v9984_v59, 0 }
 0x208   : > { %v7956_v21 = vadd.s32 4294967294, %v2104_v29  ;;  %v1979_v56 = vsel %vm1965_vm7, %v1976_v9, %v1978_v3  ;;  %v7962_v48 = vadd.s32 4294967169, %v2248_v52  ;;  %vm1823_vm12 = vcmp.eq.s32.totalorder %v9984_v59, 2 }
 0x209   : > { %v1971_v13 = vsel %vm1965_vm7, %v1968_v0, %v1970_v50  ;;  %v10019_v60 = vmul.u32.u64.low %v1980_v57, %v1979_v56  ;;  %v10020_v61 = vmul.u32.u64.high %v1980_v57, %v1979_v56, %v10019_v60  ;;  %v2092_v40 = vadd.s32 %v9932_v20, %v9929_v23 }
 0x20a   : > { %v8515_v37 = vpop.eup %8514  ;;  %vm7957_vm14 = vcmp.lt.s32.totalorder %v7956_v21, 0  ;;  %v2251_v12 = vand.u32 8388607, %v2244_v38  ;;  %v2254_v26 = vadd.s32 1, %v7962_v48  ;;  %v2123_v22 = vsel %vm2038_vm3, %v2122_v42, %v9968_v19 }
 0x20b   : > { %v8517_v15 = vpop.eup %8516  ;;  %v1824_v53 = vxor.u32 2147483648, %v8515_v37  ;;  %v2107_v4 = vsel %vm7957_vm14, 0, %v7956_v21  ;;  %v1990_v6 = vadd.s32 1, %v10012_v55  ;;  %v1987_v43 = vmul.u32 %v1980_v57, %v1971_v13 }
 0x20c   : > { %v1821_v30 = vxor.u32 2147483648, %v8517_v15  ;;  %v2108_v52 = vsub.s32 32, %v2107_v4  ;;  %v2112_v54 = vsub.s32 4294967266, %v2107_v4  ;;  %v2109_v20 = vshll.u32 %v9986_v25, %v2107_v4 }
 0x20d   : > { %v1825_v23 = vsel %vm1823_vm12, %v1824_v53, %v8517_v15  ;;  %vm1989_vm15 = vc.u32 %v10020_v61, %v10011_v8  ;;  %vm2255_vm2 = vcmp.gt.s32.totalorder %v2254_v26, 0  ;;  %v2125_v1 = vsel %vm10001_vm9, 0, %v2123_v22 }
 0x20e   : > { %v1822_v19 = vsel %vm1820_vm11, %v8515_v37, %v1821_v30  ;;  %v2110_v44 = vshrl.u32 %v2092_v40, %v2108_v52  ;;  %v2113_v7 = vadd.s32 127, %v2112_v54  ;;  %v1991_v5 = vsel %vm1989_vm15, %v1990_v6, %v10012_v55 }
 0x20f   : > { %v1826_v17 = vsel %vm1819_vm8, %v1822_v19, %v1825_v23  ;;  %v1992_v25 = vadd.s32 %v1991_v5, %v1987_v43  ;;  %v2256_v10 = vsel %vm2255_vm2, %v2254_v26, 0  ;;  %v975_v29 = vsel %vm580_vm0, %v698_v33, %v9012_v24 }
 0x210   : > { %v1827_v9 = vsel %vm1816_vm10, nan, %v1826_v17  ;;  %v2111_v18 = vor.u32 %v2110_v44, %v2109_v20  ;;  %v2114_v57 = vshll.u32 %v2113_v7, 23  ;;  %v2258_v50 = vand.u32 31, %v2256_v10 }
 0x211   : > { %7762 = vst [vmem:[%s9477_s9 + $0x30] sm:$0xff] %v1827_v9  ;;  %v1993_v0 = vadd.s32 536870912, %v1992_v25  ;;  %v2129_v59 = vadd.s32 3, %v2125_v1  ;;  %v2252_v55 = vor.u32 8388608, %v2251_v12  ;;  %v10049_v56 = vmul.f32 %v9693_v47, %v975_v29 }
 0x212   : > { %v2115_v42 = vor.u32 4788187, %v2114_v57  ;;  %v2259_v21 = vsub.s32 32, %v2258_v50  ;;  %v2118_v51 = vcvt.s32.f32 %v2111_v18  ;;  %v10051_v13 = vshrl.u32 %v2256_v10, 5 }
 0x213   : > { %v1994_v3 = vshrl.u32 %v1993_v0, 30  ;;  %v2261_v60 = vshll.u32 %v14972_v41, %v2258_v50  ;;  %v2264_v40 = vshll.u32 %v14973_v34, %v2258_v50  ;;  %v2267_v26 = vshll.u32 %v14974_v14, %v2258_v50 }
 0x214   : > { %v2116_v48 = vand.u32 2147483647, %v2115_v42  ;;  %v2262_v24 = vshrl.u32 %v14973_v34, %v2259_v21  ;;  %v2265_v12 = vshrl.u32 %v14974_v14, %v2259_v21  ;;  %v2268_v53 = vshrl.u32 %v14975_v45, %v2259_v21 }
 0x215   : > { %v1995_v37 = vshll.u32 %v1994_v3, 30  ;;  %v2271_v4 = vshrl.u32 %v14976_v58, %v2259_v21  ;;  %v10060_v22 = vand.u32 3, %v2129_v59  ;;  %v2270_v30 = vshll.u32 %v14975_v45, %v2258_v50 }
 0x216   : > { %v2119_v15 = vmul.f32 %v2118_v51, %v2116_v48  ;;  %v2274_v52 = vshrl.u32 %v14980_v46, %v2259_v21  ;;  %vm1934_vm13 = vcmp.lt.s32.totalorder %v9854_v16, 0  ;;  %v2263_v43 = vor.u32 %v2262_v24, %v2261_v60 }
 0x217   : > { %v10062_v6 = vsub.s32 %v1992_v25, %v1995_v37  ;;  %v2266_v23 = vor.u32 %v2265_v12, %v2264_v40  ;;  %v2269_v20 = vor.u32 %v2268_v53, %v2267_v26  ;;  %v2272_v19 = vor.u32 %v2271_v4, %v2270_v30 }
 0x218   : > { %v2120_v54 = vxor.u32 2147483648, %v2119_v15  ;;  %v2273_v44 = vshll.u32 %v14976_v58, %v2258_v50  ;;  %v10069_v7 = vshll.u32 %v2252_v55, 8  ;;  %v2260_v17 = vshrl.u32 %v14972_v41, %v2259_v21  ;;  %v713_v55 = vpop.permute.xlu1 %712 }
 0x219   : > { %v1998_v33 = vsub.s32 0, %v10062_v6  ;;  %vm2276_vm1 = vcmp.lt.s32.totalorder %v10051_v13, 1  ;;  %v2143_v1 = vand.u32 2139095040, %v10049_v56  ;;  %vm2279_vm4 = vcmp.lt.s32.totalorder %v10051_v13, 4 }
 0x21a   : > { %v2121_v5 = vsel %vm2038_vm3, %v2120_v54, %v2119_v15  ;;  %v2275_v9 = vor.u32 %v2274_v52, %v2273_v44  ;;  %vm10083_vm5 = vcmp.le.f32.partialorder %v1932_v62, 0.7853982  ;;  %v2281_v57 = vsel %vm2279_vm4, %v2269_v20, 2102212464 }
 0x21b   : > { %v2124_v25 = vsel %vm10001_vm9, %v9806_v11, %v2121_v5  ;;  %v7951_v10 = vmin.u32 %v1998_v33, %v10062_v6  ;;  %v2284_v29 = vsel %vm2276_vm1, %v2263_v43, %v2266_v23  ;;  %v2285_v49 = vsel %vm2279_vm4, %v2272_v19, 920167782 }
 0x21c   : > { %8518 = vcosq.f32 %v2124_v25  ;;  %v2018_v50 = vsub.s32 4, %v1994_v3  ;;  %vm2278_vm3 = vcmp.lt.s32.totalorder %v10051_v13, 3  ;;  %vm2277_vm6 = vcmp.lt.s32.totalorder %v10051_v13, 2 }
 0x21d   : > { %8520 = vsinq.f32 %v2124_v25  ;;  %v2000_v0 = vclz %v7951_v10  ;;  %v2280_v62 = vsel %vm2276_vm1, %v2260_v17, %v2263_v43  ;;  %v2286_v42 = vsel %vm2278_vm3, %v2269_v20, %v2285_v49 }
 0x21e   : > { %v2288_v59 = vsel %vm2276_vm1, %v2266_v23, %v2269_v20  ;;  %v2282_v48 = vsel %vm2278_vm3, %v2266_v23, %v2281_v57  ;;  %v2287_v51 = vsel %vm2277_vm6, %v2284_v29, %v2286_v42  ;;  %v2289_v60 = vsel %vm2279_vm4, %v2275_v9, 1326507024 }
 0x21f   : > { %v7952_v21 = vadd.s32 4294967294, %v2000_v0  ;;  %v2290_v37 = vsel %vm2278_vm3, %v2272_v19, %v2289_v60  ;;  %v10104_v24 = vmul.u32.u64.low %v10069_v7, %v2287_v51  ;;  %v10105_v40 = vmul.u32.u64.high %v10069_v7, %v2287_v51, %v10104_v24 }
 0x220   : > { %v2144_v26 = vshrl.u32 %v2143_v1, 23  ;;  %vm2132_vm7 = vcmp.eq.s32.totalorder %v10060_v22, 0  ;;  %v2019_v15 = vsel %vm1934_vm13, %v2018_v50, %v1994_v3  ;;  %v2291_v12 = vsel %vm2277_vm6, %v2288_v59, %v2290_v37 }
 0x221   : > { %vm7953_vm8 = vcmp.lt.s32.totalorder %v7952_v21, 0  ;;  %v978_v53 = vsel %vm580_vm0, %v713_v55, %v9016_v27  ;;  %v10117_v30 = vmul.u32.u64.low %v10069_v7, %v2291_v12  ;;  %v10118_v52 = vmul.u32.u64.high %v10069_v7, %v2291_v12, %v10117_v30 }
 0x222   : > { %v2003_v4 = vsel %vm7953_vm8, 0, %v7952_v21  ;;  %v7958_v54 = vadd.s32 4294967169, %v2144_v26  ;;  %v1988_v43 = vadd.s32 %v10011_v8, %v10020_v61  ;;  %v2283_v3 = vsel %vm2277_vm6, %v2280_v62, %v2282_v48 }
 0x223   : > { %v2004_v23 = vsub.s32 32, %v2003_v4  ;;  %v2008_v20 = vsub.s32 4294967266, %v2003_v4  ;;  %v2302_v33 = vadd.s32 1, %v10105_v40  ;;  %v2140_v19 = vand.u32 2147483647, %v10049_v56 }
 0x224   : > { %v2150_v44 = vadd.s32 1, %v7958_v54  ;;  %v10127_v27 = vmul.f32 %v9693_v47, %v978_v53  ;;  %v2005_v5 = vshll.u32 %v10062_v6, %v2003_v4  ;;  %v2021_v8 = vsel %vm10083_vm5, 0, %v2019_v15 }
 0x225   : > { %v2006_v17 = vshrl.u32 %v1988_v43, %v2004_v23  ;;  %v2009_v1 = vadd.s32 127, %v2008_v20  ;;  %vm2135_vm9 = vcmp.eq.s32.totalorder %v10060_v22, 2  ;;  %v2299_v13 = vmul.u32 %v10069_v7, %v2283_v3 }
 0x226   : > { %v8519_v61 = vpop.eup %8518  ;;  %vm2301_vm10 = vc.u32 %v10118_v52, %v10104_v24  ;;  %vm2151_vm11 = vcmp.gt.s32.totalorder %v2150_v44, 0  ;;  %v2025_v29 = vadd.s32 3, %v2021_v8  ;;  %v2147_v7 = vand.u32 8388607, %v2140_v19 }
 0x227   : > { %v8521_v25 = vpop.eup %8520  ;;  %v2136_v10 = vxor.u32 2147483648, %v8519_v61  ;;  %v2007_v47 = vor.u32 %v2006_v17, %v2005_v5  ;;  %v2010_v9 = vshll.u32 %v2009_v1, 23  ;;  %v2303_v6 = vsel %vm2301_vm10, %v2302_v33, %v10105_v40 }
 0x228   : > { %v2133_v57 = vxor.u32 2147483648, %v8521_v25  ;;  %v2304_v49 = vadd.s32 %v2303_v6, %v2299_v13  ;;  %v2152_v0 = vsel %vm2151_vm11, %v2150_v44, 0  ;;  %v2455_v42 = vand.u32 2139095040, %v10127_v27 }
 0x229   : > { %v2137_v50 = vsel %vm2135_vm9, %v2136_v10, %v8521_v25  ;;  %v2011_v62 = vor.u32 4788187, %v2010_v9  ;;  %vm2131_vm12 = vcmp.lt.s32.totalorder %v10060_v22, 2  ;;  %v2154_v21 = vand.u32 31, %v2152_v0 }
 0x22a   : > { %v2134_v59 = vsel %vm2132_vm7, %v8519_v61, %v2133_v57  ;;  %v2305_v55 = vadd.s32 536870912, %v2304_v49  ;;  %vm2128_vm14 = vweird.f32 %v9806_v11  ;;  %v2014_v60 = vcvt.s32.f32 %v2007_v47 }
 0x22b   : > { %v2138_v48 = vsel %vm2131_vm12, %v2134_v59, %v2137_v50  ;;  %v2012_v51 = vand.u32 2147483647, %v2011_v62  ;;  %v2155_v26 = vsub.s32 32, %v2154_v21  ;;  %v10147_v12 = vand.u32 3, %v2025_v29 }
 0x22c   : > { %v2139_v37 = vsel %vm2128_vm14, nan, %v2138_v48  ;;  %v10144_v40 = vshrl.u32 %v2305_v55, 30  ;;  %v2148_v53 = vor.u32 8388608, %v2147_v7  ;;  %v2456_v4 = vshrl.u32 %v2455_v42, 23 }
 0x22d   : > { %7765 = vst [vmem:[%s9477_s9 + $0x48] sm:$0xff] %v2139_v37  ;;  %v2015_v15 = vmul.f32 %v2014_v60, %v2012_v51  ;;  %v2157_v30 = vshll.u32 %v14972_v41, %v2154_v21  ;;  %v2158_v54 = vshrl.u32 %v14973_v34, %v2155_v26  ;;  %v2160_v11 = vshll.u32 %v14973_v34, %v2154_v21 }
 0x22e   : > { %v2307_v22 = vshll.u32 %v10144_v40, 30  ;;  %v2161_v23 = vshrl.u32 %v14974_v14, %v2155_v26  ;;  %v2164_v20 = vshrl.u32 %v14975_v45, %v2155_v26  ;;  %v2167_v3 = vshrl.u32 %v14976_v58, %v2155_v26 }
 0x22f   : > { %v2016_v43 = vxor.u32 2147483648, %v2015_v15  ;;  %v2153_v44 = vshrl.u32 %v2152_v0, 5  ;;  %v2163_v5 = vshll.u32 %v14974_v14, %v2154_v21  ;;  %v2166_v17 = vshll.u32 %v14975_v45, %v2154_v21 }
 0x230   : > { %v10156_v33 = vsub.s32 %v2304_v49, %v2307_v22  ;;  %v2159_v8 = vor.u32 %v2158_v54, %v2157_v30  ;;  %v2162_v61 = vor.u32 %v2161_v23, %v2160_v11  ;;  %v10162_v13 = vshll.u32 %v2148_v53, 8 }
 0x231   : > { %v2017_v1 = vsel %vm1934_vm13, %v2016_v43, %v2015_v15  ;;  %v2165_v47 = vor.u32 %v2164_v20, %v2163_v5  ;;  %v2168_v9 = vor.u32 %v2167_v3, %v2166_v17  ;;  %v2169_v6 = vshll.u32 %v14976_v58, %v2154_v21 }
 0x232   : > { %v2020_v25 = vsel %vm10083_vm5, %v9854_v16, %v2017_v1  ;;  %v2310_v10 = vsub.s32 0, %v10156_v33  ;;  %v2170_v57 = vshrl.u32 %v14980_v46, %v2155_v26  ;;  %v7970_v29 = vadd.s32 4294967169, %v2456_v4 }
 0x233   : > { %8522 = vcosq.f32 %v2020_v25  ;;  %vm2246_vm15 = vcmp.lt.s32.totalorder %v9953_v63, 0  ;;  %vm2172_vm2 = vcmp.lt.s32.totalorder %v2153_v44, 1  ;;  %vm2175_vm13 = vcmp.lt.s32.totalorder %v2153_v44, 4 }
 0x234   : > { %8524 = vsinq.f32 %v2020_v25  ;;  %v7963_v49 = vmin.u32 %v2310_v10, %v10156_v33  ;;  %v2171_v0 = vor.u32 %v2170_v57, %v2169_v6  ;;  %vm2173_vm1 = vcmp.lt.s32.totalorder %v2153_v44, 2 }
 0x235   : > { %v2180_v18 = vsel %vm2172_vm2, %v2159_v8, %v2162_v61  ;;  %v2181_v50 = vsel %vm2175_vm13, %v2168_v9, 920167782  ;;  %v2156_v7 = vshrl.u32 %v14972_v41, %v2155_v26  ;;  %vm2174_vm4 = vcmp.lt.s32.totalorder %v2153_v44, 3 }
 0x236   : > { %v2312_v62 = vclz %v7963_v49  ;;  %v2177_v42 = vsel %vm2175_vm13, %v2165_v47, 2102212464  ;;  %v2330_v59 = vsub.s32 4, %v10144_v40  ;;  %v2182_v55 = vsel %vm2174_vm4, %v2165_v47, %v2181_v50 }
 0x237   : > { %v2184_v21 = vsel %vm2172_vm2, %v2162_v61, %v2165_v47  ;;  %v2185_v48 = vsel %vm2175_vm13, %v2171_v0, 1326507024  ;;  %vm10178_vm5 = vcmp.le.f32.partialorder %v2244_v38, 0.7853982  ;;  %v2176_v37 = vsel %vm2172_vm2, %v2156_v7, %v2159_v8 }
 0x238   : > { %v7964_v60 = vadd.s32 4294967294, %v2312_v62  ;;  %v2183_v15 = vsel %vm2173_vm1, %v2180_v18, %v2182_v55  ;;  %v2186_v26 = vsel %vm2174_vm4, %v2168_v9, %v2185_v48  ;;  %v2178_v53 = vsel %vm2174_vm4, %v2162_v61, %v2177_v42 }
 0x239   : > { %v2187_v4 = vsel %vm2173_vm1, %v2184_v21, %v2186_v26  ;;  %v10186_v22 = vmul.u32.u64.low %v10162_v13, %v2183_v15  ;;  %v10187_v30 = vmul.u32.u64.high %v10162_v13, %v2183_v15, %v10186_v22  ;;  %vm2027_vm3 = vcmp.lt.s32.totalorder %v10147_v12, 2 }
 0x23a   : > { %vm7965_vm6 = vcmp.lt.s32.totalorder %v7964_v60, 0  ;;  %v10192_v38 = vmul.u32.u64.low %v10162_v13, %v2187_v4  ;;  %v10193_v54 = vmul.u32.u64.high %v10162_v13, %v2187_v4, %v10192_v38  ;;  %vm2028_vm7 = vcmp.eq.s32.totalorder %v10147_v12, 0 }
 0x23b   : > { %vm2031_vm8 = vcmp.eq.s32.totalorder %v10147_v12, 2  ;;  %v2315_v11 = vsel %vm7965_vm6, 0, %v7964_v60  ;;  %v2462_v43 = vadd.s32 1, %v7970_v29  ;;  %v2300_v23 = vadd.s32 %v10104_v24, %v10118_v52 }
 0x23c   : > { %v2316_v20 = vsub.s32 32, %v2315_v11  ;;  %v2320_v3 = vsub.s32 4294967266, %v2315_v11  ;;  %v2179_v5 = vsel %vm2173_vm1, %v2176_v37, %v2178_v53  ;;  %v2331_v1 = vsel %vm2246_vm15, %v2330_v59, %v10144_v40 }
 0x23d   : > { %v8523_v17 = vpop.eup %8522  ;;  %v2198_v8 = vadd.s32 1, %v10187_v30  ;;  %v2452_v61 = vand.u32 2147483647, %v10127_v27  ;;  %vm2463_vm9 = vcmp.gt.s32.totalorder %v2462_v43, 0  ;;  %v2317_v47 = vshll.u32 %v10156_v33, %v2315_v11 }
 0x23e   : > { %v8525_v25 = vpop.eup %8524  ;;  %v2032_v10 = vxor.u32 2147483648, %v8523_v17  ;;  %v2318_v9 = vshrl.u32 %v2300_v23, %v2316_v20  ;;  %v2321_v24 = vadd.s32 127, %v2320_v3  ;;  %v2195_v44 = vmul.u32 %v10162_v13, %v2179_v5 }
 0x23f   : > { %v2029_v52 = vxor.u32 2147483648, %v8525_v25  ;;  %vm2197_vm10 = vc.u32 %v10193_v54, %v10186_v22  ;;  %v2464_v6 = vsel %vm2463_vm9, %v2462_v43, 0  ;;  %v2333_v0 = vsel %vm10178_vm5, 0, %v2331_v1 }
 0x240   : > { %v2033_v40 = vsel %vm2031_vm8, %v2032_v10, %v8525_v25  ;;  %v2319_v57 = vor.u32 %v2318_v9, %v2317_v47  ;;  %v2322_v29 = vshll.u32 %v2321_v24, 23  ;;  %v2199_v49 = vsel %vm2197_vm10, %v2198_v8, %v10187_v30  ;;  %v708_v30 = vpop.permute.xlu0 %707 }
 0x241   : > { %v2030_v33 = vsel %vm2028_vm7, %v8523_v17, %v2029_v52  ;;  %v2200_v18 = vadd.s32 %v2199_v49, %v2195_v44  ;;  %v2466_v13 = vand.u32 31, %v2464_v6  ;;  %vm2024_vm11 = vweird.f32 %v9854_v16 }
 0x242   : > { %v2034_v50 = vsel %vm2027_vm3, %v2030_v33, %v2033_v40  ;;  %v2323_v62 = vor.u32 4788187, %v2322_v29  ;;  %v2326_v21 = vcvt.s32.f32 %v2319_v57  ;;  %v2337_v48 = vadd.s32 3, %v2333_v0  ;;  %v10253_v29 = vld [vmem:[%s14908_s2] ss:$0 sm:$0xff] }
 0x243   : > { %v2035_v7 = vsel %vm2024_vm11, nan, %v2034_v50  ;;  %v2201_v42 = vadd.s32 536870912, %v2200_v18  ;;  %v2467_v59 = vsub.s32 32, %v2466_v13  ;;  %v2459_v37 = vand.u32 8388607, %v2452_v61 }
 0x244   : > { %7764 = vst [vmem:[%s9477_s9 + $0x40] sm:$0xff] %v2035_v7  ;;  %v2324_v55 = vand.u32 2147483647, %v2323_v62  ;;  %v2465_v15 = vshrl.u32 %v2464_v6, 5  ;;  %v2469_v11 = vshll.u32 %v14972_v41, %v2466_v13  ;;  %v2472_v43 = vshll.u32 %v14973_v34, %v2466_v13 }
 0x245   : > { %v10220_v60 = vshrl.u32 %v2201_v42, 30  ;;  %v2470_v26 = vshrl.u32 %v14973_v34, %v2467_v59  ;;  %v2473_v12 = vshrl.u32 %v14974_v14, %v2467_v59  ;;  %v2476_v53 = vshrl.u32 %v14975_v45, %v2467_v59 }
 0x246   : > { %v2327_v16 = vmul.f32 %v2326_v21, %v2324_v55  ;;  %v2479_v4 = vshrl.u32 %v14976_v58, %v2467_v59  ;;  %v2475_v23 = vshll.u32 %v14974_v14, %v2466_v13  ;;  %v2478_v3 = vshll.u32 %v14975_v45, %v2466_v13 }
 0x247   : > { %v2203_v38 = vshll.u32 %v10220_v60, 30  ;;  %v2481_v5 = vshll.u32 %v14976_v58, %v2466_v13  ;;  %v2482_v17 = vshrl.u32 %v14980_v46, %v2467_v59  ;;  %v2471_v8 = vor.u32 %v2470_v26, %v2469_v11 }
 0x248   : > { %v2328_v20 = vxor.u32 2147483648, %v2327_v16  ;;  %v2477_v25 = vor.u32 %v2476_v53, %v2475_v23  ;;  %v977_v10 = vsel %vm580_vm0, %v708_v30, %v9018_v28  ;;  %v2474_v9 = vor.u32 %v2473_v12, %v2472_v43  ;;  %v723_v53 = vpop.permute.xlu1 %722 }
 0x249   : > { %v10235_v1 = vsub.s32 %v2200_v18, %v2203_v38  ;;  %v2480_v24 = vor.u32 %v2479_v4, %v2478_v3  ;;  %v2483_v52 = vor.u32 %v2482_v17, %v2481_v5  ;;  %v10245_v6 = vand.u32 3, %v2337_v48 }
 0x24a   : > { %v2329_v47 = vsel %vm2246_vm15, %v2328_v20, %v2327_v16  ;;  %v2460_v57 = vor.u32 8388608, %v2459_v37  ;;  %vm2142_vm12 = vcmp.lt.s32.totalorder %v10049_v56, 0  ;;  %v2468_v28 = vshrl.u32 %v14972_v41, %v2467_v59 }
 0x24b   : > { %v2332_v44 = vsel %vm10178_vm5, %v9953_v63, %v2329_v47  ;;  %v2206_v40 = vsub.s32 0, %v10235_v1  ;;  %vm2487_vm14 = vcmp.lt.s32.totalorder %v2465_v15, 4  ;;  %v10256_v49 = vmul.f32 %v10253_v29, %v977_v10 }
 0x24c   : > { %8526 = vcosq.f32 %v2332_v44  ;;  %vm2484_vm15 = vcmp.lt.s32.totalorder %v2465_v15, 1  ;;  %v2489_v33 = vsel %vm2487_vm14, %v2477_v25, 2102212464  ;;  %v2493_v18 = vsel %vm2487_vm14, %v2480_v24, 920167782 }
 0x24d   : > { %8528 = vsinq.f32 %v2332_v44  ;;  %v7959_v51 = vmin.u32 %v2206_v40, %v10235_v1  ;;  %v2492_v0 = vsel %vm2484_vm15, %v2471_v8, %v2474_v9  ;;  %v2496_v13 = vsel %vm2484_vm15, %v2474_v9, %v2477_v25 }
 0x24e   : > { %v2497_v50 = vsel %vm2487_vm14, %v2483_v52, 1326507024  ;;  %vm10261_vm2 = vcmp.le.f32.partialorder %v2140_v19, 0.7853982  ;;  %vm2485_vm13 = vcmp.lt.s32.totalorder %v2465_v15, 2  ;;  %vm2486_vm1 = vcmp.lt.s32.totalorder %v2465_v15, 3 }
 0x24f   : > { %v2208_v7 = vclz %v7959_v51  ;;  %v2500_v42 = vshll.u32 %v2460_v57, 8  ;;  %v2488_v59 = vsel %vm2484_vm15, %v2468_v28, %v2471_v8  ;;  %v2490_v55 = vsel %vm2486_vm1, %v2474_v9, %v2489_v33 }
 0x250   : > { %v2494_v21 = vsel %vm2486_vm1, %v2477_v25, %v2493_v18  ;;  %v2498_v48 = vsel %vm2486_vm1, %v2480_v24, %v2497_v50  ;;  %v2226_v26 = vsub.s32 4, %v10220_v60  ;;  %vm2340_vm4 = vcmp.eq.s32.totalorder %v10245_v6, 0 }
 0x251   : > { %v7960_v37 = vadd.s32 4294967294, %v2208_v7  ;;  %v2495_v16 = vsel %vm2485_vm13, %v2492_v0, %v2494_v21  ;;  %v2499_v12 = vsel %vm2485_vm13, %v2496_v13, %v2498_v48  ;;  %v2491_v11 = vsel %vm2485_vm13, %v2488_v59, %v2490_v55 }
 0x252   : > { %v10268_v19 = vmul.u32.u64.low %v2500_v42, %v2499_v12  ;;  %v10269_v4 = vmul.u32.u64.high %v2500_v42, %v2499_v12, %v10268_v19  ;;  %v10271_v30 = vmul.u32.u64.low %v2500_v42, %v2495_v16  ;;  %v10272_v38 = vmul.u32.u64.high %v2500_v42, %v2495_v16, %v10271_v30 }
 0x253   : > { %vm7961_vm5 = vcmp.lt.s32.totalorder %v7960_v37, 0  ;;  %v2351_v43 = vand.u32 2139095040, %v10256_v49  ;;  %vm2343_vm3 = vcmp.eq.s32.totalorder %v10245_v6, 2  ;;  %v2196_v23 = vadd.s32 %v10186_v22, %v10193_v54 }
 0x254   : > { %v2211_v20 = vsel %vm7961_vm5, 0, %v7960_v37  ;;  %v980_v3 = vsel %vm580_vm0, %v723_v53, %v9022_v31  ;;  %v2227_v8 = vsel %vm2142_vm12, %v2226_v26, %v10220_v60  ;;  %v2507_v47 = vmul.u32 %v2500_v42, %v2491_v11  ;;  %v718_v26 = vpop.permute.xlu0 %717 }
 0x255   : > { %v2212_v5 = vsub.s32 32, %v2211_v20  ;;  %v2216_v17 = vsub.s32 4294967266, %v2211_v20  ;;  %v2352_v15 = vshrl.u32 %v2351_v43, 23  ;;  %v2213_v10 = vshll.u32 %v10235_v1, %v2211_v20 }
 0x256   : > { %v8527_v25 = vpop.eup %8526  ;;  %vm2509_vm6 = vc.u32 %v10269_v4, %v10271_v30  ;;  %v2510_v22 = vadd.s32 1, %v10272_v38  ;;  %v2229_v40 = vsel %vm10261_vm2, 0, %v2227_v8  ;;  %v2348_v57 = vand.u32 2147483647, %v10256_v49 }
 0x257   : > { %v8529_v54 = vpop.eup %8528  ;;  %v2344_v9 = vxor.u32 2147483648, %v8527_v25  ;;  %v2214_v24 = vshrl.u32 %v2196_v23, %v2212_v5  ;;  %v2217_v31 = vadd.s32 127, %v2216_v17  ;;  %v7966_v52 = vadd.s32 4294967169, %v2352_v15 }
 0x258   : > { %v2341_v44 = vxor.u32 2147483648, %v8529_v54  ;;  %v2511_v60 = vsel %vm2509_vm6, %v2510_v22, %v10272_v38  ;;  %vm2336_vm7 = vweird.f32 %v9953_v63  ;;  %vm2339_vm8 = vcmp.lt.s32.totalorder %v10245_v6, 2 }
 0x259   : > { %v2345_v1 = vsel %vm2343_vm3, %v2344_v9, %v8529_v54  ;;  %v2215_v28 = vor.u32 %v2214_v24, %v2213_v10  ;;  %v2218_v51 = vshll.u32 %v2217_v31, 23  ;;  %v2512_v33 = vadd.s32 %v2511_v60, %v2507_v47 }
 0x25a   : > { %v2342_v0 = vsel %vm2340_vm4, %v8527_v25, %v2341_v44  ;;  %v2358_v18 = vadd.s32 1, %v7966_v52  ;;  %v2233_v7 = vadd.s32 3, %v2229_v40  ;;  %v2355_v55 = vand.u32 8388607, %v2348_v57 }
 0x25b   : > { %v2346_v13 = vsel %vm2339_vm8, %v2342_v0, %v2345_v1  ;;  %v2219_v50 = vor.u32 4788187, %v2218_v51  ;;  %v2513_v42 = vadd.s32 536870912, %v2512_v33  ;;  %v10304_v21 = vmul.f32 %v10253_v29, %v980_v3 }
 0x25c   : > { %v2347_v59 = vsel %vm2336_vm7, nan, %v2346_v13  ;;  %vm2359_vm9 = vcmp.gt.s32.totalorder %v2358_v18, 0  ;;  %v2222_v48 = vcvt.s32.f32 %v2215_v28  ;;  %v10310_v19 = vand.u32 3, %v2233_v7 }
 0x25d   : > { %7767 = vst [vmem:[%s9477_s9 + $0x58] sm:$0xff] %v2347_v59  ;;  %v2220_v63 = vand.u32 2147483647, %v2219_v50  ;;  %v10307_v37 = vshrl.u32 %v2513_v42, 30  ;;  %v2360_v6 = vsel %vm2359_vm9, %v2358_v18, 0  ;;  %v2356_v38 = vor.u32 8388608, %v2355_v55 }
 0x25e   : > { %v2362_v16 = vand.u32 31, %v2360_v6  ;;  %v10315_v43 = vsel %vm580_vm0, %v718_v26, %v9024_v32  ;;  %v10319_v3 = vshrl.u32 %v2360_v6, 5  ;;  %v2663_v5 = vand.u32 2139095040, %v10304_v21 }
 0x25f   : > { %v2223_v12 = vmul.f32 %v2222_v48, %v2220_v63  ;;  %v2515_v53 = vshll.u32 %v10307_v37, 30  ;;  %vm2454_vm10 = vcmp.lt.s32.totalorder %v10127_v27, 0  ;;  %v2508_v62 = vadd.s32 %v10271_v30, %v10269_v4 }
 0x260   : > { %v2363_v11 = vsub.s32 32, %v2362_v16  ;;  %v2365_v17 = vshll.u32 %v14972_v41, %v2362_v16  ;;  %v2368_v15 = vshll.u32 %v14973_v34, %v2362_v16  ;;  %v2371_v47 = vshll.u32 %v14974_v14, %v2362_v16 }
 0x261   : > { %v2224_v23 = vxor.u32 2147483648, %v2223_v12  ;;  %v10317_v20 = vsub.s32 %v2512_v33, %v2515_v53  ;;  %v2374_v24 = vshll.u32 %v14975_v45, %v2362_v16  ;;  %v2377_v1 = vshll.u32 %v14976_v58, %v2362_v16 }
 0x262   : > { %v2366_v8 = vshrl.u32 %v14973_v34, %v2363_v11  ;;  %v2369_v25 = vshrl.u32 %v14974_v14, %v2363_v11  ;;  %v2372_v22 = vshrl.u32 %v14975_v45, %v2363_v11  ;;  %v2375_v31 = vshrl.u32 %v14976_v58, %v2363_v11 }
 0x263   : > { %v2225_v10 = vsel %vm2142_vm12, %v2224_v23, %v2223_v12  ;;  %v2518_v32 = vsub.s32 0, %v10317_v20  ;;  %v2378_v28 = vshrl.u32 %v14980_v46, %v2363_v11  ;;  %v10342_v33 = vshll.u32 %v2356_v38, 8 }
 0x264   : > { %v2228_v54 = vsel %vm10261_vm2, %v10049_v56, %v2225_v10  ;;  %v2367_v9 = vor.u32 %v2366_v8, %v2365_v17  ;;  %v2370_v44 = vor.u32 %v2369_v25, %v2368_v15  ;;  %v2373_v40 = vor.u32 %v2372_v22, %v2371_v47 }
 0x265   : > { %8530 = vcosq.f32 %v2228_v54  ;;  %v7971_v52 = vmin.u32 %v2518_v32, %v10317_v20  ;;  %v2376_v60 = vor.u32 %v2375_v31, %v2374_v24  ;;  %v2660_v0 = vand.u32 2147483647, %v10304_v21 }
 0x266   : > { %8532 = vsinq.f32 %v2228_v54  ;;  %v2364_v18 = vshrl.u32 %v14972_v41, %v2363_v11  ;;  %v2379_v13 = vor.u32 %v2378_v28, %v2377_v1  ;;  %vm2380_vm11 = vcmp.lt.s32.totalorder %v10319_v3, 1 }
 0x267   : > { %v2520_v51 = vclz %v7971_v52  ;;  %v2664_v50 = vshrl.u32 %v2663_v5, 23  ;;  %vm2239_vm12 = vcmp.eq.s32.totalorder %v10310_v19, 2  ;;  %vm2382_vm14 = vcmp.lt.s32.totalorder %v10319_v3, 3 }
 0x268   : > { %vm2383_vm15 = vcmp.lt.s32.totalorder %v10319_v3, 4  ;;  %v2388_v4 = vsel %vm2380_vm11, %v2367_v9, %v2370_v44  ;;  %vm2236_vm2 = vcmp.eq.s32.totalorder %v10310_v19, 0  ;;  %v2392_v59 = vsel %vm2380_vm11, %v2370_v44, %v2373_v40 }
 0x269   : > { %v7972_v7 = vadd.s32 4294967294, %v2520_v51  ;;  %v2385_v30 = vsel %vm2383_vm15, %v2373_v40, 2102212464  ;;  %v2389_v42 = vsel %vm2383_vm15, %v2376_v60, 920167782  ;;  %vm2235_vm13 = vcmp.lt.s32.totalorder %v10310_v19, 2 }
 0x26a   : > { %v2393_v55 = vsel %vm2383_vm15, %v2379_v13, 1326507024  ;;  %vm10358_vm1 = vcmp.le.f32.partialorder %v2452_v61, 0.7853982  ;;  %vm2381_vm5 = vcmp.lt.s32.totalorder %v10319_v3, 2  ;;  %v2390_v48 = vsel %vm2382_vm14, %v2373_v40, %v2389_v42 }
 0x26b   : > { %vm7973_vm4 = vcmp.lt.s32.totalorder %v7972_v7, 0  ;;  %v2394_v6 = vsel %vm2382_vm14, %v2376_v60, %v2393_v55  ;;  %vm2232_vm3 = vweird.f32 %v10049_v56  ;;  %v2538_v16 = vsub.s32 4, %v10307_v37 }
 0x26c   : > { %v2523_v26 = vsel %vm7973_vm4, 0, %v7972_v7  ;;  %v2391_v61 = vsel %vm2381_vm5, %v2388_v4, %v2390_v48  ;;  %v2395_v12 = vsel %vm2381_vm5, %v2392_v59, %v2394_v6  ;;  %v2384_v11 = vsel %vm2380_vm11, %v2364_v18, %v2367_v9 }
 0x26d   : > { %v2524_v53 = vsub.s32 32, %v2523_v26  ;;  %v2528_v38 = vsub.s32 4294967266, %v2523_v26  ;;  %v2386_v23 = vsel %vm2382_vm14, %v2370_v44, %v2385_v30  ;;  %v2525_v10 = vshll.u32 %v10317_v20, %v2523_v26 }
 0x26e   : > { %v10378_v5 = vmul.u32.u64.low %v10342_v33, %v2395_v12  ;;  %v10379_v17 = vmul.u32.u64.high %v10342_v33, %v2395_v12, %v10378_v5  ;;  %v10382_v8 = vmul.u32.u64.low %v10342_v33, %v2391_v61  ;;  %v10383_v15 = vmul.u32.u64.high %v10342_v33, %v2391_v61, %v10382_v8 }
 0x26f   : > { %v8531_v25 = vpop.eup %8530  ;;  %v2526_v32 = vshrl.u32 %v2508_v62, %v2524_v53  ;;  %v2529_v47 = vadd.s32 127, %v2528_v38  ;;  %v7978_v22 = vadd.s32 4294967169, %v2664_v50  ;;  %v2539_v24 = vsel %vm2454_vm10, %v2538_v16, %v10307_v37 }
 0x270   : > { %v8533_v54 = vpop.eup %8532  ;;  %v2240_v9 = vxor.u32 2147483648, %v8531_v25  ;;  %v2387_v31 = vsel %vm2381_vm5, %v2384_v11, %v2386_v23  ;;  %v10394_v52 = vand.u32 8388607, %v2660_v0  ;;  %vm2405_vm6 = vc.u32 %v10379_v17, %v10382_v8 }
 0x271   : > { %v2237_v44 = vxor.u32 2147483648, %v8533_v54  ;;  %v2527_v40 = vor.u32 %v2526_v32, %v2525_v10  ;;  %v2530_v60 = vshll.u32 %v2529_v47, 23  ;;  %v2670_v20 = vadd.s32 1, %v7978_v22 }
 0x272   : > { %v2241_v1 = vsel %vm2239_vm12, %v2240_v9, %v8533_v54  ;;  %v2406_v37 = vadd.s32 1, %v10383_v15  ;;  %v10403_v3 = vmul.f32 %v10253_v29, %v10315_v43  ;;  %v2403_v51 = vmul.u32 %v10342_v33, %v2387_v31 }
 0x273   : > { %v2238_v28 = vsel %vm2236_vm2, %v8531_v25, %v2237_v44  ;;  %v2531_v62 = vor.u32 4788187, %v2530_v60  ;;  %vm2671_vm7 = vcmp.gt.s32.totalorder %v2670_v20, 0  ;;  %v2541_v13 = vsel %vm10358_vm1, 0, %v2539_v24 }
 0x274   : > { %v2242_v18 = vsel %vm2235_vm13, %v2238_v28, %v2241_v1  ;;  %v2407_v50 = vsel %vm2405_vm6, %v2406_v37, %v10383_v15  ;;  %v2672_v7 = vsel %vm2671_vm7, %v2670_v20, 0  ;;  %v2534_v30 = vcvt.s32.f32 %v2527_v40 }
 0x275   : > { %v2243_v43 = vsel %vm2232_vm3, nan, %v2242_v18  ;;  %v2532_v4 = vand.u32 2147483647, %v2531_v62  ;;  %v2408_v42 = vadd.s32 %v2407_v50, %v2403_v51  ;;  %v2674_v59 = vand.u32 31, %v2672_v7 }
 0x276   : > { %7766 = vst [vmem:[%s9477_s9 + $0x50] sm:$0xff] %v2243_v43  ;;  %v2668_v48 = vor.u32 8388608, %v10394_v52  ;;  %v2545_v19 = vadd.s32 3, %v2541_v13  ;;  %v2673_v6 = vshrl.u32 %v2672_v7, 5  ;;  %v2559_v16 = vand.u32 2139095040, %v10403_v3 }
 0x277   : > { %v2535_v55 = vmul.f32 %v2534_v30, %v2532_v4  ;;  %v2409_v33 = vadd.s32 536870912, %v2408_v42  ;;  %v2675_v26 = vsub.s32 32, %v2674_v59  ;;  %v2677_v56 = vshll.u32 %v14972_v41, %v2674_v59 }
 0x278   : > { %v2680_v53 = vshll.u32 %v14973_v34, %v2674_v59  ;;  %v2683_v23 = vshll.u32 %v14974_v14, %v2674_v59  ;;  %v2686_v10 = vshll.u32 %v14975_v45, %v2674_v59  ;;  %v10434_v24 = vand.u32 3, %v2545_v19 }
 0x279   : > { %v2536_v61 = vxor.u32 2147483648, %v2535_v55  ;;  %v10418_v12 = vshrl.u32 %v2409_v33, 30  ;;  %v2678_v38 = vshrl.u32 %v14973_v34, %v2675_v26  ;;  %v2681_v11 = vshrl.u32 %v14974_v14, %v2675_v26 }
 0x27a   : > { %v2684_v5 = vshrl.u32 %v14975_v45, %v2675_v26  ;;  %v2687_v32 = vshrl.u32 %v14976_v58, %v2675_v26  ;;  %v2689_v44 = vshll.u32 %v14976_v58, %v2674_v59  ;;  %v2690_v40 = vshrl.u32 %v14980_v46, %v2675_v26 }
 0x27b   : > { %v2537_v15 = vsel %vm2454_vm10, %v2536_v61, %v2535_v55  ;;  %v2411_v25 = vshll.u32 %v10418_v12, 30  ;;  %v2679_v22 = vor.u32 %v2678_v38, %v2677_v56  ;;  %v2682_v54 = vor.u32 %v2681_v11, %v2680_v53 }
 0x27c   : > { %v2540_v47 = vsel %vm10358_vm1, %v10127_v27, %v2537_v15  ;;  %v2685_v9 = vor.u32 %v2684_v5, %v2683_v23  ;;  %v2688_v52 = vor.u32 %v2687_v32, %v2686_v10  ;;  %v2560_v60 = vshrl.u32 %v2559_v16, 23 }
 0x27d   : > { %8534 = vcosq.f32 %v2540_v47  ;;  %v10436_v31 = vsub.s32 %v2408_v42, %v2411_v25  ;;  %vm2350_vm8 = vcmp.lt.s32.totalorder %v10256_v49, 0  ;;  %vm2692_vm9 = vcmp.lt.s32.totalorder %v2673_v6, 1 }
 0x27e   : > { %8536 = vsinq.f32 %v2540_v47  ;;  %vm2694_vm10 = vcmp.lt.s32.totalorder %v2673_v6, 3  ;;  %vm2695_vm11 = vcmp.lt.s32.totalorder %v2673_v6, 4  ;;  %v2691_v20 = vor.u32 %v2690_v40, %v2689_v44  ;;  %v733_v44 = vpop.permute.xlu1 %732 }
 0x27f   : > { %v2414_v63 = vsub.s32 0, %v10436_v31  ;;  %v2697_v1 = vsel %vm2695_vm11, %v2685_v9, 2102212464  ;;  %v2700_v37 = vsel %vm2692_vm9, %v2679_v22, %v2682_v54  ;;  %v2701_v28 = vsel %vm2695_vm11, %v2688_v52, 920167782 }
 0x280   : > { %v2676_v51 = vshrl.u32 %v14972_v41, %v2675_v26  ;;  %vm2693_vm12 = vcmp.lt.s32.totalorder %v2673_v6, 2  ;;  %v2702_v18 = vsel %vm2694_vm10, %v2685_v9, %v2701_v28  ;;  %v2704_v50 = vsel %vm2692_vm9, %v2682_v54, %v2685_v9 }
 0x281   : > { %v7967_v62 = vmin.u32 %v2414_v63, %v10436_v31  ;;  %v2703_v13 = vsel %vm2693_vm12, %v2700_v37, %v2702_v18  ;;  %v2705_v7 = vsel %vm2695_vm11, %v2691_v20, 1326507024  ;;  %v2708_v43 = vshll.u32 %v2668_v48, 8 }
 0x282   : > { %vm2547_vm14 = vcmp.lt.s32.totalorder %v10434_v24, 2  ;;  %vm10451_vm15 = vcmp.le.f32.partialorder %v2348_v57, 0.7853982  ;;  %v2696_v42 = vsel %vm2692_vm9, %v2676_v51, %v2679_v22  ;;  %v2698_v59 = vsel %vm2694_vm10, %v2682_v54, %v2697_v1 }
 0x283   : > { %v2416_v30 = vclz %v7967_v62  ;;  %v2556_v55 = vand.u32 2147483647, %v10403_v3  ;;  %vm2544_vm2 = vweird.f32 %v10127_v27  ;;  %v2434_v33 = vsub.s32 4, %v10418_v12 }
 0x284   : > { %v2706_v48 = vsel %vm2694_vm10, %v2688_v52, %v2705_v7  ;;  %v10461_v19 = vmul.u32.u64.low %v2708_v43, %v2703_v13  ;;  %v10462_v26 = vmul.u32.u64.high %v2708_v43, %v2703_v13, %v10461_v19  ;;  %vm2548_vm13 = vcmp.eq.s32.totalorder %v10434_v24, 0 }
 0x285   : > { %v7968_v57 = vadd.s32 4294967294, %v2416_v30  ;;  %v2707_v16 = vsel %vm2693_vm12, %v2704_v50, %v2706_v48  ;;  %v7974_v61 = vadd.s32 4294967169, %v2560_v60  ;;  %vm2551_vm1 = vcmp.eq.s32.totalorder %v10434_v24, 2 }
 0x286   : > { %v2699_v56 = vsel %vm2693_vm12, %v2696_v42, %v2698_v59  ;;  %v10469_v53 = vmul.u32.u64.low %v2708_v43, %v2707_v16  ;;  %v10470_v38 = vmul.u32.u64.high %v2708_v43, %v2707_v16, %v10469_v53  ;;  %v2404_v23 = vadd.s32 %v10382_v8, %v10379_v17 }
 0x287   : > { %v8535_v11 = vpop.eup %8534  ;;  %vm7969_vm4 = vcmp.lt.s32.totalorder %v7968_v57, 0  ;;  %v2563_v5 = vand.u32 8388607, %v2556_v55  ;;  %v2566_v15 = vadd.s32 1, %v7974_v61  ;;  %v2435_v6 = vsel %vm2350_vm8, %v2434_v33, %v10418_v12 }
 0x288   : > { %v8537_v25 = vpop.eup %8536  ;;  %v2552_v10 = vxor.u32 2147483648, %v8535_v11  ;;  %v2419_v32 = vsel %vm7969_vm4, 0, %v7968_v57  ;;  %v2718_v47 = vadd.s32 1, %v10462_v26  ;;  %v2715_v52 = vmul.u32 %v2708_v43, %v2699_v56 }
 0x289   : > { %v2549_v22 = vxor.u32 2147483648, %v8537_v25  ;;  %v2420_v54 = vsub.s32 32, %v2419_v32  ;;  %v2424_v9 = vsub.s32 4294967266, %v2419_v32  ;;  %v2421_v8 = vshll.u32 %v10436_v31, %v2419_v32 }
 0x28a   : > { %v2553_v17 = vsel %vm2551_vm1, %v2552_v10, %v8537_v25  ;;  %vm2717_vm5 = vc.u32 %v10470_v38, %v10461_v19  ;;  %vm2567_vm3 = vcmp.gt.s32.totalorder %v2566_v15, 0  ;;  %v2437_v1 = vsel %vm10451_vm15, 0, %v2435_v6 }
 0x28b   : > { %v2550_v12 = vsel %vm2548_vm13, %v8535_v11, %v2549_v22  ;;  %v2422_v40 = vshrl.u32 %v2404_v23, %v2420_v54  ;;  %v2425_v60 = vadd.s32 127, %v2424_v9  ;;  %v2719_v63 = vsel %vm2717_vm5, %v2718_v47, %v10462_v26 }
 0x28c   : > { %v2554_v20 = vsel %vm2547_vm14, %v2550_v12, %v2553_v17  ;;  %v2720_v31 = vadd.s32 %v2719_v63, %v2715_v52  ;;  %v2568_v37 = vsel %vm2567_vm3, %v2566_v15, 0  ;;  %v982_v18 = vsel %vm580_vm0, %v733_v44, %v9028_v35 }
 0x28d   : > { %v2555_v28 = vsel %vm2544_vm2, nan, %v2554_v20  ;;  %v2423_v62 = vor.u32 %v2422_v40, %v2421_v8  ;;  %v2426_v51 = vshll.u32 %v2425_v60, 23  ;;  %v2570_v50 = vand.u32 31, %v2568_v37 }
 0x28e   : > { %7769 = vst [vmem:[%s9477_s9 + $0x68] sm:$0xff] %v2555_v28  ;;  %v2721_v13 = vadd.s32 536870912, %v2720_v31  ;;  %v2441_v24 = vadd.s32 3, %v2437_v1  ;;  %v2564_v30 = vor.u32 8388608, %v2563_v5  ;;  %v10499_v59 = vmul.f32 %v10253_v29, %v982_v18  ;;  %v728_v18 = vpop.permute.xlu0 %727 }
 0x28f   : > { %v2427_v7 = vor.u32 4788187, %v2426_v51  ;;  %v2571_v42 = vsub.s32 32, %v2570_v50  ;;  %v2430_v27 = vcvt.s32.f32 %v2423_v62  ;;  %v10501_v48 = vshrl.u32 %v2568_v37, 5 }
 0x290   : > { %v2722_v43 = vshrl.u32 %v2721_v13, 30  ;;  %v2573_v26 = vshll.u32 %v14972_v41, %v2570_v50  ;;  %v2576_v16 = vshll.u32 %v14973_v34, %v2570_v50  ;;  %v2579_v61 = vshll.u32 %v14974_v14, %v2570_v50 }
 0x291   : > { %v2428_v33 = vand.u32 2147483647, %v2427_v7  ;;  %v2574_v35 = vshrl.u32 %v14973_v34, %v2571_v42  ;;  %v2577_v53 = vshrl.u32 %v14974_v14, %v2571_v42  ;;  %v2580_v11 = vshrl.u32 %v14975_v45, %v2571_v42 }
 0x292   : > { %v2723_v57 = vshll.u32 %v2722_v43, 30  ;;  %v2583_v23 = vshrl.u32 %v14976_v58, %v2571_v42  ;;  %v10510_v5 = vand.u32 3, %v2441_v24  ;;  %v2582_v25 = vshll.u32 %v14975_v45, %v2570_v50 }
 0x293   : > { %v2431_v56 = vmul.f32 %v2430_v27, %v2428_v33  ;;  %v2586_v10 = vshrl.u32 %v14980_v46, %v2571_v42  ;;  %vm2662_vm6 = vcmp.lt.s32.totalorder %v10304_v21, 0  ;;  %v2575_v6 = vor.u32 %v2574_v35, %v2573_v26 }
 0x294   : > { %v10512_v15 = vsub.s32 %v2720_v31, %v2723_v57  ;;  %v2578_v47 = vor.u32 %v2577_v53, %v2576_v16  ;;  %v2581_v22 = vor.u32 %v2580_v11, %v2579_v61  ;;  %v2584_v9 = vor.u32 %v2583_v23, %v2582_v25 }
 0x295   : > { %v2432_v32 = vxor.u32 2147483648, %v2431_v56  ;;  %v2585_v52 = vshll.u32 %v14976_v58, %v2570_v50  ;;  %v10519_v17 = vshll.u32 %v2564_v30, 8  ;;  %v2572_v44 = vshrl.u32 %v14972_v41, %v2571_v42 }
 0x296   : > { %v2726_v54 = vsub.s32 0, %v10512_v15  ;;  %vm2588_vm7 = vcmp.lt.s32.totalorder %v10501_v48, 1  ;;  %v2871_v12 = vand.u32 2139095040, %v10499_v59  ;;  %vm2591_vm9 = vcmp.lt.s32.totalorder %v10501_v48, 4 }
 0x297   : > { %v2433_v8 = vsel %vm2350_vm8, %v2432_v32, %v2431_v56  ;;  %v2587_v63 = vor.u32 %v2586_v10, %v2585_v52  ;;  %vm10533_vm10 = vcmp.le.f32.partialorder %v2660_v0, 0.7853982  ;;  %v2593_v1 = vsel %vm2591_vm9, %v2581_v22, 2102212464 }
 0x298   : > { %v2436_v40 = vsel %vm10451_vm15, %v10256_v49, %v2433_v8  ;;  %v7979_v60 = vmin.u32 %v2726_v54, %v10512_v15  ;;  %v2596_v31 = vsel %vm2588_vm7, %v2575_v6, %v2578_v47  ;;  %v2597_v4 = vsel %vm2591_vm9, %v2584_v9, 920167782 }
 0x299   : > { %8538 = vcosq.f32 %v2436_v40  ;;  %v2746_v28 = vsub.s32 4, %v2722_v43  ;;  %vm2590_vm8 = vcmp.lt.s32.totalorder %v10501_v48, 3  ;;  %vm2589_vm11 = vcmp.lt.s32.totalorder %v10501_v48, 2 }
 0x29a   : > { %8540 = vsinq.f32 %v2436_v40  ;;  %v2728_v37 = vclz %v7979_v60  ;;  %v2592_v0 = vsel %vm2588_vm7, %v2572_v44, %v2575_v6  ;;  %v2598_v62 = vsel %vm2590_vm8, %v2581_v22, %v2597_v4 }
 0x29b   : > { %v2600_v51 = vsel %vm2588_vm7, %v2578_v47, %v2581_v22  ;;  %v2594_v50 = vsel %vm2590_vm8, %v2578_v47, %v2593_v1  ;;  %v2599_v7 = vsel %vm2589_vm11, %v2596_v31, %v2598_v62  ;;  %v2601_v24 = vsel %vm2591_vm9, %v2587_v63, 1326507024 }
 0x29c   : > { %v7980_v13 = vadd.s32 4294967294, %v2728_v37  ;;  %v2602_v30 = vsel %vm2590_vm8, %v2584_v9, %v2601_v24  ;;  %v10554_v42 = vmul.u32.u64.low %v10519_v17, %v2599_v7  ;;  %v10555_v33 = vmul.u32.u64.high %v10519_v17, %v2599_v7, %v10554_v42 }
 0x29d   : > { %v2872_v27 = vshrl.u32 %v2871_v12, 23  ;;  %vm2444_vm12 = vcmp.eq.s32.totalorder %v10510_v5, 0  ;;  %v2747_v26 = vsel %vm2662_vm6, %v2746_v28, %v2722_v43  ;;  %v2603_v57 = vsel %vm2589_vm11, %v2600_v51, %v2602_v30 }
 0x29e   : > { %vm7981_vm14 = vcmp.lt.s32.totalorder %v7980_v13, 0  ;;  %v981_v35 = vsel %vm580_vm0, %v728_v18, %v9030_v36  ;;  %v10567_v61 = vmul.u32.u64.low %v10519_v17, %v2603_v57  ;;  %v10568_v56 = vmul.u32.u64.high %v10519_v17, %v2603_v57, %v10567_v61 }
 0x29f   : > { %v2731_v16 = vsel %vm7981_vm14, 0, %v7980_v13  ;;  %v7986_v53 = vadd.s32 4294967169, %v2872_v27  ;;  %v2716_v11 = vadd.s32 %v10461_v19, %v10470_v38  ;;  %v2595_v43 = vsel %vm2589_vm11, %v2592_v0, %v2594_v50 }
 0x2a0   : > { %v2732_v23 = vsub.s32 32, %v2731_v16  ;;  %v2736_v25 = vsub.s32 4294967266, %v2731_v16  ;;  %v2614_v10 = vadd.s32 1, %v10555_v33  ;;  %v2868_v32 = vand.u32 2147483647, %v10499_v59 }
 0x2a1   : > { %v2878_v6 = vadd.s32 1, %v7986_v53  ;;  %v10577_v36 = vmul.f32 %v10253_v29, %v981_v35  ;;  %v2733_v47 = vshll.u32 %v10512_v15, %v2731_v16  ;;  %v2749_v19 = vsel %vm10533_vm10, 0, %v2747_v26 }
 0x2a2   : > { %v2734_v22 = vshrl.u32 %v2716_v11, %v2732_v23  ;;  %v2737_v54 = vadd.s32 127, %v2736_v25  ;;  %vm2447_vm15 = vcmp.eq.s32.totalorder %v10510_v5, 2  ;;  %v2611_v48 = vmul.u32 %v10519_v17, %v2595_v43 }
 0x2a3   : > { %v8539_v38 = vpop.eup %8538  ;;  %vm2613_vm2 = vc.u32 %v10568_v56, %v10554_v42  ;;  %vm2879_vm13 = vcmp.gt.s32.totalorder %v2878_v6, 0  ;;  %v2753_v12 = vadd.s32 3, %v2749_v19  ;;  %v2875_v17 = vand.u32 8388607, %v2868_v32 }
 0x2a4   : > { %v8541_v9 = vpop.eup %8540  ;;  %v2448_v52 = vxor.u32 2147483648, %v8539_v38  ;;  %v2735_v29 = vor.u32 %v2734_v22, %v2733_v47  ;;  %v2738_v8 = vshll.u32 %v2737_v54, 23  ;;  %v2615_v15 = vsel %vm2613_vm2, %v2614_v10, %v10555_v33 }
 0x2a5   : > { %v2445_v44 = vxor.u32 2147483648, %v8541_v9  ;;  %v2616_v40 = vadd.s32 %v2615_v15, %v2611_v48  ;;  %v2880_v60 = vsel %vm2879_vm13, %v2878_v6, 0  ;;  %v2767_v31 = vand.u32 2139095040, %v10577_v36 }
 0x2a6   : > { %v2449_v63 = vsel %vm2447_vm15, %v2448_v52, %v8541_v9  ;;  %v2739_v1 = vor.u32 4788187, %v2738_v8  ;;  %vm2443_vm1 = vcmp.lt.s32.totalorder %v10510_v5, 2  ;;  %v2882_v28 = vand.u32 31, %v2880_v60 }
 0x2a7   : > { %v2446_v4 = vsel %vm2444_vm12, %v8539_v38, %v2445_v44  ;;  %v2617_v37 = vadd.s32 536870912, %v2616_v40  ;;  %vm2440_vm4 = vweird.f32 %v10256_v49  ;;  %v2742_v51 = vcvt.s32.f32 %v2735_v29 }
 0x2a8   : > { %v2450_v0 = vsel %vm2443_vm1, %v2446_v4, %v2449_v63  ;;  %v2740_v62 = vand.u32 2147483647, %v2739_v1  ;;  %v2883_v50 = vsub.s32 32, %v2882_v28  ;;  %v10597_v24 = vand.u32 3, %v2753_v12 }
 0x2a9   : > { %v2451_v18 = vsel %vm2440_vm4, nan, %v2450_v0  ;;  %v10594_v13 = vshrl.u32 %v2617_v37, 30  ;;  %v2876_v30 = vor.u32 8388608, %v2875_v17  ;;  %v2768_v33 = vshrl.u32 %v2767_v31, 23 }
 0x2aa   : > { %7768 = vst [vmem:[%s9477_s9 + $0x60] sm:$0xff] %v2451_v18  ;;  %v2743_v7 = vmul.f32 %v2742_v51, %v2740_v62  ;;  %v2885_v27 = vshll.u32 %v14972_v41, %v2882_v28  ;;  %v2886_v26 = vshrl.u32 %v14973_v34, %v2883_v50  ;;  %v2888_v49 = vshll.u32 %v14973_v34, %v2882_v28 }
 0x2ab   : > { %v2619_v5 = vshll.u32 %v10594_v13, 30  ;;  %v2889_v35 = vshrl.u32 %v14974_v14, %v2883_v50  ;;  %v2892_v16 = vshrl.u32 %v14975_v45, %v2883_v50  ;;  %v2895_v61 = vshrl.u32 %v14976_v58, %v2883_v50 }
 0x2ac   : > { %v2744_v57 = vxor.u32 2147483648, %v2743_v7  ;;  %v2881_v11 = vshrl.u32 %v2880_v60, 5  ;;  %v2891_v23 = vshll.u32 %v14974_v14, %v2882_v28  ;;  %v2894_v25 = vshll.u32 %v14975_v45, %v2882_v28 }
 0x2ad   : > { %v10606_v53 = vsub.s32 %v2616_v40, %v2619_v5  ;;  %v2887_v10 = vor.u32 %v2886_v26, %v2885_v27  ;;  %v2890_v6 = vor.u32 %v2889_v35, %v2888_v49  ;;  %v10612_v47 = vshll.u32 %v2876_v30, 8 }
 0x2ae   : > { %v2745_v43 = vsel %vm2662_vm6, %v2744_v57, %v2743_v7  ;;  %v2893_v19 = vor.u32 %v2892_v16, %v2891_v23  ;;  %v2896_v38 = vor.u32 %v2895_v61, %v2894_v25  ;;  %v2897_v48 = vshll.u32 %v14976_v58, %v2882_v28 }
 0x2af   : > { %v2748_v22 = vsel %vm10533_vm10, %v10304_v21, %v2745_v43  ;;  %v2622_v54 = vsub.s32 0, %v10606_v53  ;;  %v2898_v9 = vshrl.u32 %v14980_v46, %v2883_v50  ;;  %v7982_v52 = vadd.s32 4294967169, %v2768_v33 }
 0x2b0   : > { %8542 = vcosq.f32 %v2748_v22  ;;  %vm2558_vm5 = vcmp.lt.s32.totalorder %v10403_v3, 0  ;;  %vm2900_vm3 = vcmp.lt.s32.totalorder %v2881_v11, 1  ;;  %vm2903_vm6 = vcmp.lt.s32.totalorder %v2881_v11, 4 }
 0x2b1   : > { %8544 = vsinq.f32 %v2748_v22  ;;  %v7975_v29 = vmin.u32 %v2622_v54, %v10606_v53  ;;  %v2899_v8 = vor.u32 %v2898_v9, %v2897_v48  ;;  %vm2901_vm7 = vcmp.lt.s32.totalorder %v2881_v11, 2 }
 0x2b2   : > { %v2908_v20 = vsel %vm2900_vm3, %v2887_v10, %v2890_v6  ;;  %v2909_v15 = vsel %vm2903_vm6, %v2896_v38, 920167782  ;;  %v2884_v12 = vshrl.u32 %v14972_v41, %v2883_v50  ;;  %vm2902_vm9 = vcmp.lt.s32.totalorder %v2881_v11, 3 }
 0x2b3   : > { %v2624_v44 = vclz %v7975_v29  ;;  %v2905_v40 = vsel %vm2903_vm6, %v2893_v19, 2102212464  ;;  %v2642_v60 = vsub.s32 4, %v10594_v13  ;;  %v2910_v63 = vsel %vm2902_vm9, %v2893_v19, %v2909_v15 }
 0x2b4   : > { %v2912_v1 = vsel %vm2900_vm3, %v2890_v6, %v2893_v19  ;;  %v2913_v17 = vsel %vm2903_vm6, %v2899_v8, 1326507024  ;;  %vm10628_vm10 = vcmp.le.f32.partialorder %v2556_v55, 0.7853982  ;;  %v2904_v37 = vsel %vm2900_vm3, %v2884_v12, %v2887_v10 }
 0x2b5   : > { %v7976_v4 = vadd.s32 4294967294, %v2624_v44  ;;  %v2911_v28 = vsel %vm2901_vm7, %v2908_v20, %v2910_v63  ;;  %v2914_v0 = vsel %vm2902_vm9, %v2896_v38, %v2913_v17  ;;  %v2906_v62 = vsel %vm2902_vm9, %v2890_v6, %v2905_v40 }
 0x2b6   : > { %v2915_v51 = vsel %vm2901_vm7, %v2912_v1, %v2914_v0  ;;  %v10636_v18 = vmul.u32.u64.low %v10612_v47, %v2911_v28  ;;  %v10637_v50 = vmul.u32.u64.high %v10612_v47, %v2911_v28, %v10636_v18  ;;  %vm2755_vm8 = vcmp.lt.s32.totalorder %v10597_v24, 2 }
 0x2b7   : > { %vm7977_vm11 = vcmp.lt.s32.totalorder %v7976_v4, 0  ;;  %v10642_v55 = vmul.u32.u64.low %v10612_v47, %v2915_v51  ;;  %v10643_v7 = vmul.u32.u64.high %v10612_v47, %v2915_v51, %v10642_v55  ;;  %vm2756_vm12 = vcmp.eq.s32.totalorder %v10597_v24, 0 }
 0x2b8   : > { %vm2759_vm14 = vcmp.eq.s32.totalorder %v10597_v24, 2  ;;  %v2627_v30 = vsel %vm7977_vm11, 0, %v7976_v4  ;;  %v2774_v33 = vadd.s32 1, %v7982_v52  ;;  %v2612_v5 = vadd.s32 %v10554_v42, %v10568_v56 }
 0x2b9   : > { %v2628_v27 = vsub.s32 32, %v2627_v30  ;;  %v2632_v26 = vsub.s32 4294967266, %v2627_v30  ;;  %v2907_v49 = vsel %vm2901_vm7, %v2904_v37, %v2906_v62  ;;  %v2643_v35 = vsel %vm2558_vm5, %v2642_v60, %v10594_v13  ;;  %v743_v37 = vpop.permute.xlu1 %742 }
 0x2ba   : > { %v8543_v57 = vpop.eup %8542  ;;  %v2926_v16 = vadd.s32 1, %v10637_v50  ;;  %v2764_v61 = vand.u32 2147483647, %v10577_v36  ;;  %vm2775_vm15 = vcmp.gt.s32.totalorder %v2774_v33, 0  ;;  %v2629_v43 = vshll.u32 %v10606_v53, %v2627_v30 }
 0x2bb   : > { %v8545_v23 = vpop.eup %8544  ;;  %v2760_v25 = vxor.u32 2147483648, %v8543_v57  ;;  %v2630_v10 = vshrl.u32 %v2612_v5, %v2628_v27  ;;  %v2633_v42 = vadd.s32 127, %v2632_v26  ;;  %v2923_v11 = vmul.u32 %v10612_v47, %v2907_v49 }
 0x2bc   : > { %v2757_v56 = vxor.u32 2147483648, %v8545_v23  ;;  %vm2925_vm2 = vc.u32 %v10643_v7, %v10636_v18  ;;  %v2776_v6 = vsel %vm2775_vm15, %v2774_v33, 0  ;;  %v2645_v38 = vsel %vm10628_vm10, 0, %v2643_v35 }
 0x2bd   : > { %v2761_v13 = vsel %vm2759_vm14, %v2760_v25, %v8545_v23  ;;  %v2631_v22 = vor.u32 %v2630_v10, %v2629_v43  ;;  %v2634_v54 = vshll.u32 %v2633_v42, 23  ;;  %v2927_v19 = vsel %vm2925_vm2, %v2926_v16, %v10637_v50 }
 0x2be   : > { %v2758_v53 = vsel %vm2756_vm12, %v8543_v57, %v2757_v56  ;;  %v2928_v48 = vadd.s32 %v2927_v19, %v2923_v11  ;;  %v2778_v47 = vand.u32 31, %v2776_v6  ;;  %vm2752_vm13 = vweird.f32 %v10304_v21  ;;  %v10703_v56 = vld [vmem:[%s14908_s2] ss:$0 sm:$0xff] }
 0x2bf   : > { %v2762_v9 = vsel %vm2755_vm8, %v2758_v53, %v2761_v13  ;;  %v2635_v52 = vor.u32 4788187, %v2634_v54  ;;  %v2638_v44 = vcvt.s32.f32 %v2631_v22  ;;  %v2649_v12 = vadd.s32 3, %v2645_v38 }
 0x2c0   : > { %v2763_v29 = vsel %vm2752_vm13, nan, %v2762_v9  ;;  %v2929_v8 = vadd.s32 536870912, %v2928_v48  ;;  %v2779_v20 = vsub.s32 32, %v2778_v47  ;;  %v2771_v60 = vand.u32 8388607, %v2764_v61 }
 0x2c1   : > { %7771 = vst [vmem:[%s9477_s9 + $0x78] sm:$0xff] %v2763_v29  ;;  %v2636_v15 = vand.u32 2147483647, %v2635_v52  ;;  %v2777_v63 = vshrl.u32 %v2776_v6, 5  ;;  %v2781_v0 = vshll.u32 %v14972_v41, %v2778_v47  ;;  %v2784_v62 = vshll.u32 %v14973_v34, %v2778_v47 }
 0x2c2   : > { %v10670_v40 = vshrl.u32 %v2929_v8, 30  ;;  %v2782_v1 = vshrl.u32 %v14973_v34, %v2779_v20  ;;  %v2785_v24 = vshrl.u32 %v14974_v14, %v2779_v20  ;;  %v2788_v17 = vshrl.u32 %v14975_v45, %v2779_v20 }
 0x2c3   : > { %v2639_v21 = vmul.f32 %v2638_v44, %v2636_v15  ;;  %v2791_v4 = vshrl.u32 %v14976_v58, %v2779_v20  ;;  %v2787_v51 = vshll.u32 %v14974_v14, %v2778_v47  ;;  %v2790_v55 = vshll.u32 %v14975_v45, %v2778_v47 }
 0x2c4   : > { %v2931_v28 = vshll.u32 %v10670_v40, 30  ;;  %v2793_v30 = vshll.u32 %v14976_v58, %v2778_v47  ;;  %v2794_v33 = vshrl.u32 %v14980_v46, %v2779_v20  ;;  %v2783_v27 = vor.u32 %v2782_v1, %v2781_v0 }
 0x2c5   : > { %v2640_v50 = vxor.u32 2147483648, %v2639_v21  ;;  %v2789_v26 = vor.u32 %v2788_v17, %v2787_v51  ;;  %v984_v49 = vsel %vm580_vm0, %v743_v37, %v9034_v39  ;;  %v2786_v35 = vor.u32 %v2785_v24, %v2784_v62 }
 0x2c6   : > { %v10685_v5 = vsub.s32 %v2928_v48, %v2931_v28  ;;  %v2792_v16 = vor.u32 %v2791_v4, %v2790_v55  ;;  %v2795_v23 = vor.u32 %v2794_v33, %v2793_v30  ;;  %v10695_v43 = vand.u32 3, %v2649_v12  ;;  %v738_v12 = vpop.permute.xlu0 %737  ;;  %v15017_v28 = vld [vmem:[#allocation5_spill] sm:$0xff] }
 0x2c7   : > { %v2641_v57 = vsel %vm2558_vm5, %v2640_v50, %v2639_v21  ;;  %v2772_v42 = vor.u32 8388608, %v2771_v60  ;;  %vm2870_vm1 = vcmp.lt.s32.totalorder %v10499_v59, 0  ;;  %v2780_v39 = vshrl.u32 %v14972_v41, %v2779_v20 }
 0x2c8   : > { %v2644_v25 = vsel %vm10628_vm10, %v10403_v3, %v2641_v57  ;;  %v2934_v10 = vsub.s32 0, %v10685_v5  ;;  %vm2799_vm4 = vcmp.lt.s32.totalorder %v2777_v63, 4  ;;  %v10706_v11 = vmul.f32 %v10703_v56, %v984_v49 }
 0x2c9   : > { %8546 = vcosq.f32 %v2644_v25  ;;  %vm2796_vm5 = vcmp.lt.s32.totalorder %v2777_v63, 1  ;;  %v2801_v6 = vsel %vm2799_vm4, %v2789_v26, 2102212464  ;;  %v2805_v22 = vsel %vm2799_vm4, %v2792_v16, 920167782 }
 0x2ca   : > { %8548 = vsinq.f32 %v2644_v25  ;;  %v7987_v31 = vmin.u32 %v2934_v10, %v10685_v5  ;;  %v2804_v13 = vsel %vm2796_vm5, %v2783_v27, %v2786_v35  ;;  %v2808_v54 = vsel %vm2796_vm5, %v2786_v35, %v2789_v26 }
 0x2cb   : > { %v2809_v19 = vsel %vm2799_vm4, %v2795_v23, 1326507024  ;;  %vm10711_vm3 = vcmp.le.f32.partialorder %v2868_v32, 0.7853982  ;;  %vm2797_vm6 = vcmp.lt.s32.totalorder %v2777_v63, 2  ;;  %vm2798_vm7 = vcmp.lt.s32.totalorder %v2777_v63, 3 }
 0x2cc   : > { %v2936_v38 = vclz %v7987_v31  ;;  %v2812_v48 = vshll.u32 %v2772_v42, 8  ;;  %v2800_v47 = vsel %vm2796_vm5, %v2780_v39, %v2783_v27  ;;  %v2802_v9 = vsel %vm2798_vm7, %v2786_v35, %v2801_v6 }
 0x2cd   : > { %v2806_v52 = vsel %vm2798_vm7, %v2789_v26, %v2805_v22  ;;  %v2810_v29 = vsel %vm2798_vm7, %v2792_v16, %v2809_v19  ;;  %v2954_v20 = vsub.s32 4, %v10670_v40  ;;  %vm2652_vm9 = vcmp.eq.s32.totalorder %v10695_v43, 0 }
 0x2ce   : > { %v7988_v8 = vadd.s32 4294967294, %v2936_v38  ;;  %v2807_v15 = vsel %vm2797_vm6, %v2804_v13, %v2806_v52  ;;  %v2811_v44 = vsel %vm2797_vm6, %v2808_v54, %v2810_v29  ;;  %v2803_v24 = vsel %vm2797_vm6, %v2800_v47, %v2802_v9  ;;  %v753_v52 = vpop.permute.xlu1 %752 }
 0x2cf   : > { %v10718_v32 = vmul.u32.u64.low %v2812_v48, %v2811_v44  ;;  %v10719_v60 = vmul.u32.u64.high %v2812_v48, %v2811_v44, %v10718_v32  ;;  %v10721_v1 = vmul.u32.u64.low %v2812_v48, %v2807_v15  ;;  %v10722_v21 = vmul.u32.u64.high %v2812_v48, %v2807_v15, %v10721_v1 }
 0x2d0   : > { %vm7989_vm10 = vcmp.lt.s32.totalorder %v7988_v8, 0  ;;  %v3079_v17 = vand.u32 2139095040, %v10706_v11  ;;  %vm2655_vm8 = vcmp.eq.s32.totalorder %v10695_v43, 2  ;;  %v2924_v4 = vadd.s32 %v10636_v18, %v10643_v7  ;;  %v15018_v32 = vld [vmem:[#allocation6_spill] sm:$0xff] }
 0x2d1   : > { %v2939_v37 = vsel %vm7989_vm10, 0, %v7988_v8  ;;  %v983_v0 = vsel %vm580_vm0, %v738_v12, %v15017_v28  ;;  %v2955_v50 = vsel %vm2870_vm1, %v2954_v20, %v10670_v40  ;;  %v2819_v33 = vmul.u32 %v2812_v48, %v2803_v24 }
 0x2d2   : > { %v2940_v62 = vsub.s32 32, %v2939_v37  ;;  %v2944_v51 = vsub.s32 4294967266, %v2939_v37  ;;  %v3080_v63 = vshrl.u32 %v3079_v17, 23  ;;  %v2941_v30 = vshll.u32 %v10685_v5, %v2939_v37 }
 0x2d3   : > { %v8547_v55 = vpop.eup %8546  ;;  %vm2821_vm11 = vc.u32 %v10719_v60, %v10721_v1  ;;  %v2822_v18 = vadd.s32 1, %v10722_v21  ;;  %v2957_v16 = vsel %vm10711_vm3, 0, %v2955_v50  ;;  %v3076_v23 = vand.u32 2147483647, %v10706_v11 }
 0x2d4   : > { %v8549_v7 = vpop.eup %8548  ;;  %v2656_v27 = vxor.u32 2147483648, %v8547_v55  ;;  %v2942_v26 = vshrl.u32 %v2924_v4, %v2940_v62  ;;  %v2945_v49 = vadd.s32 127, %v2944_v51  ;;  %v7994_v57 = vadd.s32 4294967169, %v3080_v63 }
 0x2d5   : > { %v2653_v35 = vxor.u32 2147483648, %v8549_v7  ;;  %v2823_v40 = vsel %vm2821_vm11, %v2822_v18, %v10722_v21  ;;  %vm2648_vm12 = vweird.f32 %v10403_v3  ;;  %vm2651_vm14 = vcmp.lt.s32.totalorder %v10695_v43, 2 }
 0x2d6   : > { %v2657_v5 = vsel %vm2655_vm8, %v2656_v27, %v8549_v7  ;;  %v2943_v25 = vor.u32 %v2942_v26, %v2941_v30  ;;  %v2946_v10 = vshll.u32 %v2945_v49, 23  ;;  %v2824_v42 = vadd.s32 %v2823_v40, %v2819_v33 }
 0x2d7   : > { %v2654_v39 = vsel %vm2652_vm9, %v8547_v55, %v2653_v35  ;;  %v3086_v31 = vadd.s32 1, %v7994_v57  ;;  %v2961_v22 = vadd.s32 3, %v2957_v16  ;;  %v3083_v38 = vand.u32 8388607, %v3076_v23 }
 0x2d8   : > { %v2658_v6 = vsel %vm2651_vm14, %v2654_v39, %v2657_v5  ;;  %v2947_v13 = vor.u32 4788187, %v2946_v10  ;;  %v2825_v54 = vadd.s32 536870912, %v2824_v42  ;;  %v10754_v48 = vmul.f32 %v10703_v56, %v983_v0 }
 0x2d9   : > { %v2659_v19 = vsel %vm2648_vm12, nan, %v2658_v6  ;;  %vm3087_vm15 = vcmp.gt.s32.totalorder %v3086_v31, 0  ;;  %v2950_v47 = vcvt.s32.f32 %v2943_v25  ;;  %v10760_v15 = vand.u32 3, %v2961_v22 }
 0x2da   : > { %7770 = vst [vmem:[%s9477_s9 + $0x70] sm:$0xff] %v2659_v19  ;;  %v2948_v3 = vand.u32 2147483647, %v2947_v13  ;;  %v10757_v9 = vshrl.u32 %v2825_v54, 30  ;;  %v3088_v43 = vsel %vm3087_vm15, %v3086_v31, 0  ;;  %v3084_v44 = vor.u32 8388608, %v3083_v38 }
 0x2db   : > { %v3090_v29 = vand.u32 31, %v3088_v43  ;;  %v10765_v21 = vsel %vm580_vm0, %v753_v52, %v15018_v32  ;;  %v10769_v4 = vshrl.u32 %v3088_v43, 5  ;;  %v2975_v37 = vand.u32 2139095040, %v10754_v48 }
 0x2dc   : > { %v2951_v8 = vmul.f32 %v2950_v47, %v2948_v3  ;;  %v2827_v20 = vshll.u32 %v10757_v9, 30  ;;  %vm2766_vm2 = vcmp.lt.s32.totalorder %v10577_v36, 0  ;;  %v2820_v53 = vadd.s32 %v10721_v1, %v10719_v60 }
 0x2dd   : > { %v3091_v12 = vsub.s32 32, %v3090_v29  ;;  %v3093_v28 = vshll.u32 %v14972_v41, %v3090_v29  ;;  %v3096_v62 = vshll.u32 %v14973_v34, %v3090_v29  ;;  %v3099_v55 = vshll.u32 %v14974_v14, %v3090_v29 }
 0x2de   : > { %v2952_v24 = vxor.u32 2147483648, %v2951_v8  ;;  %v10767_v17 = vsub.s32 %v2824_v42, %v2827_v20  ;;  %v3102_v7 = vshll.u32 %v14975_v45, %v3090_v29  ;;  %v3105_v16 = vshll.u32 %v14976_v58, %v3090_v29 }
 0x2df   : > { %v3094_v0 = vshrl.u32 %v14973_v34, %v3091_v12  ;;  %v3097_v51 = vshrl.u32 %v14974_v14, %v3091_v12  ;;  %v3100_v30 = vshrl.u32 %v14975_v45, %v3091_v12  ;;  %v3103_v27 = vshrl.u32 %v14976_v58, %v3091_v12 }
 0x2e0   : > { %v2953_v50 = vsel %vm2870_vm1, %v2952_v24, %v2951_v8  ;;  %v2830_v63 = vsub.s32 0, %v10767_v17  ;;  %v3106_v40 = vshrl.u32 %v14980_v46, %v3091_v12  ;;  %v10792_v25 = vshll.u32 %v3084_v44, 8 }
 0x2e1   : > { %v2956_v33 = vsel %vm10711_vm3, %v10499_v59, %v2953_v50  ;;  %v3095_v18 = vor.u32 %v3094_v0, %v3093_v28  ;;  %v3098_v49 = vor.u32 %v3097_v51, %v3096_v62  ;;  %v3101_v57 = vor.u32 %v3100_v30, %v3099_v55 }
 0x2e2   : > { %8550 = vcosq.f32 %v2956_v33  ;;  %v7983_v26 = vmin.u32 %v2830_v63, %v10767_v17  ;;  %v3104_v35 = vor.u32 %v3103_v27, %v3102_v7  ;;  %v2972_v10 = vand.u32 2147483647, %v10754_v48 }
 0x2e3   : > { %8552 = vsinq.f32 %v2956_v33  ;;  %v3092_v42 = vshrl.u32 %v14972_v41, %v3091_v12  ;;  %v3107_v39 = vor.u32 %v3106_v40, %v3105_v16  ;;  %vm3108_vm13 = vcmp.lt.s32.totalorder %v10769_v4, 1 }
 0x2e4   : > { %v2832_v5 = vclz %v7983_v26  ;;  %v2976_v31 = vshrl.u32 %v2975_v37, 23  ;;  %vm2967_vm1 = vcmp.eq.s32.totalorder %v10760_v15, 2  ;;  %vm3110_vm4 = vcmp.lt.s32.totalorder %v10769_v4, 3 }
 0x2e5   : > { %vm3111_vm5 = vcmp.lt.s32.totalorder %v10769_v4, 4  ;;  %v3116_v60 = vsel %vm3108_vm13, %v3095_v18, %v3098_v49  ;;  %vm2964_vm3 = vcmp.eq.s32.totalorder %v10760_v15, 0  ;;  %v3120_v22 = vsel %vm3108_vm13, %v3098_v49, %v3101_v57 }
 0x2e6   : > { %v7984_v6 = vadd.s32 4294967294, %v2832_v5  ;;  %v3113_v1 = vsel %vm3111_vm5, %v3101_v57, 2102212464  ;;  %v3117_v13 = vsel %vm3111_vm5, %v3104_v35, 920167782  ;;  %vm2963_vm6 = vcmp.lt.s32.totalorder %v10760_v15, 2 }
 0x2e7   : > { %v3121_v54 = vsel %vm3111_vm5, %v3107_v39, 1326507024  ;;  %vm10808_vm7 = vcmp.le.f32.partialorder %v2764_v61, 0.7853982  ;;  %vm3109_vm10 = vcmp.lt.s32.totalorder %v10769_v4, 2  ;;  %v3118_v38 = vsel %vm3110_vm4, %v3101_v57, %v3117_v13 }
 0x2e8   : > { %vm7985_vm9 = vcmp.lt.s32.totalorder %v7984_v6, 0  ;;  %v3122_v3 = vsel %vm3110_vm4, %v3104_v35, %v3121_v54  ;;  %vm2960_vm8 = vweird.f32 %v10499_v59  ;;  %v2850_v43 = vsub.s32 4, %v10757_v9 }
 0x2e9   : > { %v2835_v47 = vsel %vm7985_vm9, 0, %v7984_v6  ;;  %v3119_v61 = vsel %vm3109_vm10, %v3116_v60, %v3118_v38  ;;  %v3123_v52 = vsel %vm3109_vm10, %v3120_v22, %v3122_v3  ;;  %v3112_v20 = vsel %vm3108_vm13, %v3092_v42, %v3095_v18 }
 0x2ea   : > { %v2836_v29 = vsub.s32 32, %v2835_v47  ;;  %v2840_v8 = vsub.s32 4294967266, %v2835_v47  ;;  %v3114_v44 = vsel %vm3110_vm4, %v3098_v49, %v3113_v1  ;;  %v2837_v0 = vshll.u32 %v10767_v17, %v2835_v47 }
 0x2eb   : > { %v10828_v12 = vmul.u32.u64.low %v10792_v25, %v3123_v52  ;;  %v10829_v32 = vmul.u32.u64.high %v10792_v25, %v3123_v52, %v10828_v12  ;;  %v10832_v24 = vmul.u32.u64.low %v10792_v25, %v3119_v61  ;;  %v10833_v37 = vmul.u32.u64.high %v10792_v25, %v3119_v61, %v10832_v24 }
 0x2ec   : > { %v8551_v28 = vpop.eup %8550  ;;  %v2838_v62 = vshrl.u32 %v2820_v53, %v2836_v29  ;;  %v2841_v51 = vadd.s32 127, %v2840_v8  ;;  %v7990_v50 = vadd.s32 4294967169, %v2976_v31  ;;  %v2851_v30 = vsel %vm2766_vm2, %v2850_v43, %v10757_v9 }
 0x2ed   : > { %v8553_v63 = vpop.eup %8552  ;;  %v2968_v55 = vxor.u32 2147483648, %v8551_v28  ;;  %v3115_v33 = vsel %vm3109_vm10, %v3112_v20, %v3114_v44  ;;  %v10844_v18 = vand.u32 8388607, %v2972_v10  ;;  %vm3133_vm11 = vc.u32 %v10829_v32, %v10832_v24 }
 0x2ee   : > { %v2965_v7 = vxor.u32 2147483648, %v8553_v63  ;;  %v2839_v27 = vor.u32 %v2838_v62, %v2837_v0  ;;  %v2842_v26 = vshll.u32 %v2841_v51, 23  ;;  %v2982_v17 = vadd.s32 1, %v7990_v50 }
 0x2ef   : > { %v2969_v49 = vsel %vm2967_vm1, %v2968_v55, %v8553_v63  ;;  %v3134_v9 = vadd.s32 1, %v10833_v37  ;;  %v10853_v4 = vmul.f32 %v10703_v56, %v10765_v21  ;;  %v3131_v16 = vmul.u32 %v10792_v25, %v3115_v33 }
 0x2f0   : > { %v2966_v57 = vsel %vm2964_vm3, %v8551_v28, %v2965_v7  ;;  %v2843_v35 = vor.u32 4788187, %v2842_v26  ;;  %vm2983_vm12 = vcmp.gt.s32.totalorder %v2982_v17, 0  ;;  %v2853_v53 = vsel %vm10808_vm7, 0, %v2851_v30 }
 0x2f1   : > { %v2970_v40 = vsel %vm2963_vm6, %v2966_v57, %v2969_v49  ;;  %v3135_v5 = vsel %vm3133_vm11, %v3134_v9, %v10833_v37  ;;  %v2984_v42 = vsel %vm2983_vm12, %v2982_v17, 0  ;;  %v2846_v31 = vcvt.s32.f32 %v2839_v27 }
 0x2f2   : > { %v2971_v21 = vsel %vm2960_vm8, nan, %v2970_v40  ;;  %v2844_v39 = vand.u32 2147483647, %v2843_v35  ;;  %v3136_v6 = vadd.s32 %v3135_v5, %v3131_v16  ;;  %v2986_v60 = vand.u32 31, %v2984_v42 }
 0x2f3   : > { %7773 = vst [vmem:[%s9477_s9 + $0x88] sm:$0xff] %v2971_v21  ;;  %v2980_v13 = vor.u32 8388608, %v10844_v18  ;;  %v2857_v15 = vadd.s32 3, %v2853_v53  ;;  %v2985_v22 = vshrl.u32 %v2984_v42, 5  ;;  %v3287_v38 = vand.u32 2139095040, %v10853_v4 }
 0x2f4   : > { %v2847_v1 = vmul.f32 %v2846_v31, %v2844_v39  ;;  %v3137_v25 = vadd.s32 536870912, %v3136_v6  ;;  %v2987_v54 = vsub.s32 32, %v2986_v60  ;;  %v2989_v59 = vshll.u32 %v14972_v41, %v2986_v60 }
 0x2f5   : > { %v2992_v43 = vshll.u32 %v14973_v34, %v2986_v60  ;;  %v2995_v29 = vshll.u32 %v14974_v14, %v2986_v60  ;;  %v2998_v12 = vshll.u32 %v14975_v45, %v2986_v60  ;;  %v10884_v50 = vand.u32 3, %v2857_v15 }
 0x2f6   : > { %v2848_v3 = vxor.u32 2147483648, %v2847_v1  ;;  %v10868_v47 = vshrl.u32 %v3137_v25, 30  ;;  %v2990_v61 = vshrl.u32 %v14973_v34, %v2987_v54  ;;  %v2993_v52 = vshrl.u32 %v14974_v14, %v2987_v54 }
 0x2f7   : > { %v2996_v8 = vshrl.u32 %v14975_v45, %v2987_v54  ;;  %v2999_v37 = vshrl.u32 %v14976_v58, %v2987_v54  ;;  %v3001_v30 = vshll.u32 %v14976_v58, %v2986_v60  ;;  %v3002_v33 = vshrl.u32 %v14980_v46, %v2987_v54 }
 0x2f8   : > { %v2849_v20 = vsel %vm2766_vm2, %v2848_v3, %v2847_v1  ;;  %v3139_v44 = vshll.u32 %v10868_v47, 30  ;;  %v2991_v0 = vor.u32 %v2990_v61, %v2989_v59  ;;  %v2994_v62 = vor.u32 %v2993_v52, %v2992_v43 }
 0x2f9   : > { %v2852_v28 = vsel %vm10808_vm7, %v10577_v36, %v2849_v20  ;;  %v2997_v51 = vor.u32 %v2996_v8, %v2995_v29  ;;  %v3000_v55 = vor.u32 %v2999_v37, %v2998_v12  ;;  %v3288_v18 = vshrl.u32 %v3287_v38, 23 }
 0x2fa   : > { %8554 = vcosq.f32 %v2852_v28  ;;  %v10886_v63 = vsub.s32 %v3136_v6, %v3139_v44  ;;  %vm3078_vm14 = vcmp.lt.s32.totalorder %v10706_v11, 0  ;;  %vm3004_vm15 = vcmp.lt.s32.totalorder %v2985_v22, 1 }
 0x2fb   : > { %8556 = vsinq.f32 %v2852_v28  ;;  %vm3006_vm2 = vcmp.lt.s32.totalorder %v2985_v22, 3  ;;  %vm3007_vm13 = vcmp.lt.s32.totalorder %v2985_v22, 4  ;;  %v3003_v7 = vor.u32 %v3002_v33, %v3001_v30 }
 0x2fc   : > { %v3142_v19 = vsub.s32 0, %v10886_v63  ;;  %v3009_v27 = vsel %vm3007_vm13, %v2997_v51, 2102212464  ;;  %v3012_v26 = vsel %vm3004_vm15, %v2991_v0, %v2994_v62  ;;  %v3013_v17 = vsel %vm3007_vm13, %v3000_v55, 920167782 }
 0x2fd   : > { %v2988_v9 = vshrl.u32 %v14972_v41, %v2987_v54  ;;  %vm3005_vm1 = vcmp.lt.s32.totalorder %v2985_v22, 2  ;;  %v3014_v57 = vsel %vm3006_vm2, %v2997_v51, %v3013_v17  ;;  %v3016_v16 = vsel %vm3004_vm15, %v2994_v62, %v2997_v51  ;;  %v15023_v17 = vld [vmem:[#allocation7_spill] sm:$0xff] }
 0x2fe   : > { %v7995_v49 = vmin.u32 %v3142_v19, %v10886_v63  ;;  %v3015_v35 = vsel %vm3005_vm1, %v3012_v26, %v3014_v57  ;;  %v3017_v40 = vsel %vm3007_vm13, %v3003_v7, 1326507024  ;;  %v3020_v53 = vshll.u32 %v2980_v13, 8 }
 0x2ff   : > { %vm2859_vm4 = vcmp.lt.s32.totalorder %v10884_v50, 2  ;;  %vm10901_vm5 = vcmp.le.f32.partialorder %v3076_v23, 0.7853982  ;;  %v3008_v21 = vsel %vm3004_vm15, %v2988_v9, %v2991_v0  ;;  %v3010_v39 = vsel %vm3006_vm2, %v2994_v62, %v3009_v27  ;;  %v748_v62 = vpop.permute.xlu0 %747 }
 0x300   : > { %v3144_v42 = vclz %v7995_v49  ;;  %v3284_v31 = vand.u32 2147483647, %v10853_v4  ;;  %vm2856_vm3 = vweird.f32 %v10577_v36  ;;  %v3162_v6 = vsub.s32 4, %v10868_v47 }
 0x301   : > { %v3018_v60 = vsel %vm3006_vm2, %v3000_v55, %v3017_v40  ;;  %v10911_v1 = vmul.u32.u64.low %v3020_v53, %v3015_v35  ;;  %v10912_v25 = vmul.u32.u64.high %v3020_v53, %v3015_v35, %v10911_v1  ;;  %vm2860_vm6 = vcmp.eq.s32.totalorder %v10884_v50, 0 }
 0x302   : > { %v7996_v23 = vadd.s32 4294967294, %v3144_v42  ;;  %v3019_v13 = vsel %vm3005_vm1, %v3016_v16, %v3018_v60  ;;  %v8002_v15 = vadd.s32 4294967169, %v3288_v18  ;;  %vm2863_vm7 = vcmp.eq.s32.totalorder %v10884_v50, 2 }
 0x303   : > { %v3011_v54 = vsel %vm3005_vm1, %v3008_v21, %v3010_v39  ;;  %v10919_v38 = vmul.u32.u64.low %v3020_v53, %v3019_v13  ;;  %v10920_v3 = vmul.u32.u64.high %v3020_v53, %v3019_v13, %v10919_v38  ;;  %v3132_v43 = vadd.s32 %v10832_v24, %v10829_v32 }
 0x304   : > { %v8555_v59 = vpop.eup %8554  ;;  %vm7997_vm9 = vcmp.lt.s32.totalorder %v7996_v23, 0  ;;  %v3291_v61 = vand.u32 8388607, %v3284_v31  ;;  %v3294_v52 = vadd.s32 1, %v8002_v15  ;;  %v3163_v22 = vsel %vm3078_vm14, %v3162_v6, %v10868_v47 }
 0x305   : > { %v8557_v29 = vpop.eup %8556  ;;  %v2864_v8 = vxor.u32 2147483648, %v8555_v59  ;;  %v3147_v20 = vsel %vm7997_vm9, 0, %v7996_v23  ;;  %v3030_v44 = vadd.s32 1, %v10912_v25  ;;  %v3027_v0 = vmul.u32 %v3020_v53, %v3011_v54 }
 0x306   : > { %v2861_v12 = vxor.u32 2147483648, %v8557_v29  ;;  %v3148_v37 = vsub.s32 32, %v3147_v20  ;;  %v3152_v28 = vsub.s32 4294967266, %v3147_v20  ;;  %v3149_v24 = vshll.u32 %v10886_v63, %v3147_v20 }
 0x307   : > { %v2865_v32 = vsel %vm2863_vm7, %v2864_v8, %v8557_v29  ;;  %vm3029_vm10 = vc.u32 %v10920_v3, %v10911_v1  ;;  %vm3295_vm8 = vcmp.gt.s32.totalorder %v3294_v52, 0  ;;  %v3165_v18 = vsel %vm10901_vm5, 0, %v3163_v22 }
 0x308   : > { %v2862_v47 = vsel %vm2860_vm6, %v8555_v59, %v2861_v12  ;;  %v3150_v51 = vshrl.u32 %v3132_v43, %v3148_v37  ;;  %v3153_v55 = vadd.s32 127, %v3152_v28  ;;  %v3031_v30 = vsel %vm3029_vm10, %v3030_v44, %v10912_v25 }
 0x309   : > { %v2866_v33 = vsel %vm2859_vm4, %v2862_v47, %v2865_v32  ;;  %v3032_v63 = vadd.s32 %v3031_v30, %v3027_v0  ;;  %v3296_v19 = vsel %vm3295_vm8, %v3294_v52, 0  ;;  %v985_v49 = vsel %vm580_vm0, %v748_v62, %v15023_v17 }
 0x30a   : > { %v2867_v7 = vsel %vm2856_vm3, nan, %v2866_v33  ;;  %v3151_v27 = vor.u32 %v3150_v51, %v3149_v24  ;;  %v3154_v26 = vshll.u32 %v3153_v55, 23  ;;  %v3298_v57 = vand.u32 31, %v3296_v19 }
 0x30b   : > { %7772 = vst [vmem:[%s9477_s9 + $0x80] sm:$0xff] %v2867_v7  ;;  %v3033_v9 = vadd.s32 536870912, %v3032_v63  ;;  %v3169_v50 = vadd.s32 3, %v3165_v18  ;;  %v3292_v40 = vor.u32 8388608, %v3291_v61  ;;  %v10949_v42 = vmul.f32 %v10703_v56, %v985_v49 }
 0x30c   : > { %v3155_v35 = vor.u32 4788187, %v3154_v26  ;;  %v3299_v53 = vsub.s32 32, %v3298_v57  ;;  %v3158_v36 = vcvt.s32.f32 %v3151_v27  ;;  %v10951_v39 = vshrl.u32 %v3296_v19, 5  ;;  %v763_v26 = vpop.permute.xlu1 %762 }
 0x30d   : > { %v3034_v16 = vshrl.u32 %v3033_v9, 30  ;;  %v3301_v6 = vshll.u32 %v14972_v41, %v3298_v57  ;;  %v3304_v23 = vshll.u32 %v14973_v34, %v3298_v57  ;;  %v3307_v13 = vshll.u32 %v14974_v14, %v3298_v57 }
 0x30e   : > { %v3156_v21 = vand.u32 2147483647, %v3155_v35  ;;  %v3302_v25 = vshrl.u32 %v14973_v34, %v3299_v53  ;;  %v3305_v54 = vshrl.u32 %v14974_v14, %v3299_v53  ;;  %v3308_v38 = vshrl.u32 %v14975_v45, %v3299_v53 }
 0x30f   : > { %v3035_v60 = vshll.u32 %v3034_v16, 30  ;;  %v3311_v59 = vshrl.u32 %v14976_v58, %v3299_v53  ;;  %v10960_v43 = vand.u32 3, %v3169_v50  ;;  %v3310_v52 = vshll.u32 %v14975_v45, %v3298_v57 }
 0x310   : > { %v3159_v15 = vmul.f32 %v3158_v36, %v3156_v21  ;;  %v3314_v29 = vshrl.u32 %v14980_v46, %v3299_v53  ;;  %vm2974_vm11 = vcmp.lt.s32.totalorder %v10754_v48, 0  ;;  %v3303_v20 = vor.u32 %v3302_v25, %v3301_v6  ;;  %v15026_v6 = vld [vmem:[#allocation8_spill] sm:$0xff] }
 0x311   : > { %v10962_v61 = vsub.s32 %v3032_v63, %v3035_v60  ;;  %v3306_v22 = vor.u32 %v3305_v54, %v3304_v23  ;;  %v3309_v44 = vor.u32 %v3308_v38, %v3307_v13  ;;  %v3312_v37 = vor.u32 %v3311_v59, %v3310_v52 }
 0x312   : > { %v3160_v8 = vxor.u32 2147483648, %v3159_v15  ;;  %v3313_v28 = vshll.u32 %v14976_v58, %v3298_v57  ;;  %v10969_v0 = vshll.u32 %v3292_v40, 8  ;;  %v3300_v24 = vshrl.u32 %v14972_v41, %v3299_v53 }
 0x313   : > { %v3038_v12 = vsub.s32 0, %v10962_v61  ;;  %vm3316_vm12 = vcmp.lt.s32.totalorder %v10951_v39, 1  ;;  %v3183_v62 = vand.u32 2139095040, %v10949_v42  ;;  %vm3319_vm15 = vcmp.lt.s32.totalorder %v10951_v39, 4 }
 0x314   : > { %v3161_v32 = vsel %vm3078_vm14, %v3160_v8, %v3159_v15  ;;  %v3315_v55 = vor.u32 %v3314_v29, %v3313_v28  ;;  %vm10983_vm2 = vcmp.le.f32.partialorder %v2972_v10, 0.7853982  ;;  %v3321_v33 = vsel %vm3319_vm15, %v3309_v44, 2102212464 }
 0x315   : > { %v3164_v47 = vsel %vm10901_vm5, %v10706_v11, %v3161_v32  ;;  %v7991_v51 = vmin.u32 %v3038_v12, %v10962_v61  ;;  %v3324_v18 = vsel %vm3316_vm12, %v3303_v20, %v3306_v22  ;;  %v3325_v5 = vsel %vm3319_vm15, %v3312_v37, 920167782 }
 0x316   : > { %8558 = vcosq.f32 %v3164_v47  ;;  %v3058_v19 = vsub.s32 4, %v3034_v16  ;;  %vm3318_vm14 = vcmp.lt.s32.totalorder %v10951_v39, 3  ;;  %vm3317_vm13 = vcmp.lt.s32.totalorder %v10951_v39, 2 }
 0x317   : > { %8560 = vsinq.f32 %v3164_v47  ;;  %v3040_v63 = vclz %v7991_v51  ;;  %v3320_v10 = vsel %vm3316_vm12, %v3300_v24, %v3303_v20  ;;  %v3326_v7 = vsel %vm3318_vm14, %v3309_v44, %v3325_v5 }
 0x318   : > { %v3328_v27 = vsel %vm3316_vm12, %v3306_v22, %v3309_v44  ;;  %v3322_v49 = vsel %vm3318_vm14, %v3306_v22, %v3321_v33  ;;  %v3327_v9 = vsel %vm3317_vm13, %v3324_v18, %v3326_v7  ;;  %v3329_v57 = vsel %vm3319_vm15, %v3315_v55, 1326507024 }
 0x319   : > { %v7992_v17 = vadd.s32 4294967294, %v3040_v63  ;;  %v3330_v35 = vsel %vm3318_vm14, %v3312_v37, %v3329_v57  ;;  %v11004_v50 = vmul.u32.u64.low %v10969_v0, %v3327_v9  ;;  %v11005_v40 = vmul.u32.u64.high %v10969_v0, %v3327_v9, %v11004_v50 }
 0x31a   : > { %v3184_v53 = vshrl.u32 %v3183_v62, 23  ;;  %vm3172_vm1 = vcmp.eq.s32.totalorder %v10960_v43, 0  ;;  %v3059_v21 = vsel %vm2974_vm11, %v3058_v19, %v3034_v16  ;;  %v3331_v36 = vsel %vm3317_vm13, %v3328_v27, %v3330_v35 }
 0x31b   : > { %vm7993_vm4 = vcmp.lt.s32.totalorder %v7992_v17, 0  ;;  %v988_v60 = vsel %vm580_vm0, %v763_v26, %v15026_v6  ;;  %v11017_v23 = vmul.u32.u64.low %v10969_v0, %v3331_v36  ;;  %v11018_v13 = vmul.u32.u64.high %v10969_v0, %v3331_v36, %v11017_v23 }
 0x31c   : > { %v3043_v25 = vsel %vm7993_vm4, 0, %v7992_v17  ;;  %v7998_v15 = vadd.s32 4294967169, %v3184_v53  ;;  %v3028_v54 = vadd.s32 %v10911_v1, %v10920_v3  ;;  %v3323_v16 = vsel %vm3317_vm13, %v3320_v10, %v3322_v49 }
 0x31d   : > { %v3044_v38 = vsub.s32 32, %v3043_v25  ;;  %v3048_v59 = vsub.s32 4294967266, %v3043_v25  ;;  %v3342_v52 = vadd.s32 1, %v11005_v40  ;;  %v3180_v29 = vand.u32 2147483647, %v10949_v42 }
 0x31e   : > { %v3190_v8 = vadd.s32 1, %v7998_v15  ;;  %v11027_v20 = vmul.f32 %v10703_v56, %v988_v60  ;;  %v3045_v22 = vshll.u32 %v10962_v61, %v3043_v25  ;;  %v3061_v1 = vsel %vm10983_vm2, 0, %v3059_v21 }
 0x31f   : > { %v3046_v44 = vshrl.u32 %v3028_v54, %v3044_v38  ;;  %v3049_v12 = vadd.s32 127, %v3048_v59  ;;  %vm3175_vm5 = vcmp.eq.s32.totalorder %v10960_v43, 2  ;;  %v3339_v39 = vmul.u32 %v10969_v0, %v3323_v16 }
 0x320   : > { %v8559_v3 = vpop.eup %8558  ;;  %vm3341_vm3 = vc.u32 %v11018_v13, %v11004_v50  ;;  %vm3191_vm6 = vcmp.gt.s32.totalorder %v3190_v8, 0  ;;  %v3065_v62 = vadd.s32 3, %v3061_v1  ;;  %v3187_v0 = vand.u32 8388607, %v3180_v29 }
 0x321   : > { %v8561_v37 = vpop.eup %8560  ;;  %v3176_v28 = vxor.u32 2147483648, %v8559_v3  ;;  %v3047_v56 = vor.u32 %v3046_v44, %v3045_v22  ;;  %v3050_v32 = vshll.u32 %v3049_v12, 23  ;;  %v3343_v61 = vsel %vm3341_vm3, %v3342_v52, %v11005_v40 }
 0x322   : > { %v3173_v24 = vxor.u32 2147483648, %v8561_v37  ;;  %v3344_v47 = vadd.s32 %v3343_v61, %v3339_v39  ;;  %v3192_v51 = vsel %vm3191_vm6, %v3190_v8, 0  ;;  %v3495_v18 = vand.u32 2139095040, %v11027_v20 }
 0x323   : > { %v3177_v55 = vsel %vm3175_vm5, %v3176_v28, %v8561_v37  ;;  %v3051_v33 = vor.u32 4788187, %v3050_v32  ;;  %vm3171_vm7 = vcmp.lt.s32.totalorder %v10960_v43, 2  ;;  %v3194_v19 = vand.u32 31, %v3192_v51 }
 0x324   : > { %v3174_v5 = vsel %vm3172_vm1, %v8559_v3, %v3173_v24  ;;  %v3345_v63 = vadd.s32 536870912, %v3344_v47  ;;  %vm3168_vm9 = vweird.f32 %v10706_v11  ;;  %v3054_v27 = vcvt.s32.f32 %v3047_v56 }
 0x325   : > { %v3178_v10 = vsel %vm3171_vm7, %v3174_v5, %v3177_v55  ;;  %v3052_v7 = vand.u32 2147483647, %v3051_v33  ;;  %v3195_v49 = vsub.s32 32, %v3194_v19  ;;  %v11047_v57 = vand.u32 3, %v3065_v62 }
 0x326   : > { %v3179_v26 = vsel %vm3168_vm9, nan, %v3178_v10  ;;  %v11044_v17 = vshrl.u32 %v3345_v63, 30  ;;  %v3188_v35 = vor.u32 8388608, %v3187_v0  ;;  %v3496_v40 = vshrl.u32 %v3495_v18, 23 }
 0x327   : > { %7775 = vst [vmem:[%s9477_s9 + $0x98] sm:$0xff] %v3179_v26  ;;  %v3055_v9 = vmul.f32 %v3054_v27, %v3052_v7  ;;  %v3197_v53 = vshll.u32 %v14972_v41, %v3194_v19  ;;  %v3198_v21 = vshrl.u32 %v14973_v34, %v3195_v49  ;;  %v3200_v11 = vshll.u32 %v14973_v34, %v3194_v19 }
 0x328   : > { %v3347_v43 = vshll.u32 %v11044_v17, 30  ;;  %v3201_v6 = vshrl.u32 %v14974_v14, %v3195_v49  ;;  %v3204_v60 = vshrl.u32 %v14975_v45, %v3195_v49  ;;  %v3207_v25 = vshrl.u32 %v14976_v58, %v3195_v49 }
 0x329   : > { %v3056_v36 = vxor.u32 2147483648, %v3055_v9  ;;  %v3193_v15 = vshrl.u32 %v3192_v51, 5  ;;  %v3203_v54 = vshll.u32 %v14974_v14, %v3194_v19  ;;  %v3206_v38 = vshll.u32 %v14975_v45, %v3194_v19 }
 0x32a   : > { %v11056_v23 = vsub.s32 %v3344_v47, %v3347_v43  ;;  %v3199_v16 = vor.u32 %v3198_v21, %v3197_v53  ;;  %v3202_v52 = vor.u32 %v3201_v6, %v3200_v11  ;;  %v11062_v8 = vshll.u32 %v3188_v35, 8 }
 0x32b   : > { %v3057_v59 = vsel %vm2974_vm11, %v3056_v36, %v3055_v9  ;;  %v3205_v12 = vor.u32 %v3204_v60, %v3203_v54  ;;  %v3208_v1 = vor.u32 %v3207_v25, %v3206_v38  ;;  %v3209_v3 = vshll.u32 %v14976_v58, %v3194_v19 }
 0x32c   : > { %v3060_v22 = vsel %vm10983_vm2, %v10754_v48, %v3057_v59  ;;  %v3350_v44 = vsub.s32 0, %v11056_v23  ;;  %v3210_v39 = vshrl.u32 %v14980_v46, %v3195_v49  ;;  %v8010_v37 = vadd.s32 4294967169, %v3496_v40 }
 0x32d   : > { %8562 = vcosq.f32 %v3060_v22  ;;  %vm3286_vm10 = vcmp.lt.s32.totalorder %v10853_v4, 0  ;;  %vm3212_vm8 = vcmp.lt.s32.totalorder %v3193_v15, 1  ;;  %vm3215_vm11 = vcmp.lt.s32.totalorder %v3193_v15, 4 }
 0x32e   : > { %8564 = vsinq.f32 %v3060_v22  ;;  %v8003_v28 = vmin.u32 %v3350_v44, %v11056_v23  ;;  %v3211_v56 = vor.u32 %v3210_v39, %v3209_v3  ;;  %vm3213_vm12 = vcmp.lt.s32.totalorder %v3193_v15, 2 }
 0x32f   : > { %v3220_v30 = vsel %vm3212_vm8, %v3199_v16, %v3202_v52  ;;  %v3221_v32 = vsel %vm3215_vm11, %v3208_v1, 920167782  ;;  %v3196_v24 = vshrl.u32 %v14972_v41, %v3195_v49  ;;  %vm3214_vm15 = vcmp.lt.s32.totalorder %v3193_v15, 3 }
 0x330   : > { %v3352_v61 = vclz %v8003_v28  ;;  %v3217_v62 = vsel %vm3215_vm11, %v3205_v12, 2102212464  ;;  %v3370_v47 = vsub.s32 4, %v11044_v17  ;;  %v3222_v51 = vsel %vm3214_vm15, %v3205_v12, %v3221_v32 }
 0x331   : > { %v3224_v55 = vsel %vm3212_vm8, %v3202_v52, %v3205_v12  ;;  %v3225_v33 = vsel %vm3215_vm11, %v3211_v56, 1326507024  ;;  %vm11078_vm2 = vcmp.le.f32.partialorder %v3284_v31, 0.7853982  ;;  %v3216_v5 = vsel %vm3212_vm8, %v3196_v24, %v3199_v16 }
 0x332   : > { %v8004_v18 = vadd.s32 4294967294, %v3352_v61  ;;  %v3223_v63 = vsel %vm3213_vm12, %v3220_v30, %v3222_v51  ;;  %v3226_v19 = vsel %vm3214_vm15, %v3208_v1, %v3225_v33  ;;  %v3218_v10 = vsel %vm3214_vm15, %v3202_v52, %v3217_v62 }
 0x333   : > { %v3227_v7 = vsel %vm3213_vm12, %v3224_v55, %v3226_v19  ;;  %v11086_v27 = vmul.u32.u64.low %v11062_v8, %v3223_v63  ;;  %v11087_v26 = vmul.u32.u64.high %v11062_v8, %v3223_v63, %v11086_v27  ;;  %vm3067_vm14 = vcmp.lt.s32.totalorder %v11047_v57, 2 }
 0x334   : > { %vm8005_vm13 = vcmp.lt.s32.totalorder %v8004_v18, 0  ;;  %v11092_v31 = vmul.u32.u64.low %v11062_v8, %v3227_v7  ;;  %v11093_v49 = vmul.u32.u64.high %v11062_v8, %v3227_v7, %v11092_v31  ;;  %vm3068_vm1 = vcmp.eq.s32.totalorder %v11047_v57, 0 }
 0x335   : > { %vm3071_vm4 = vcmp.eq.s32.totalorder %v11047_v57, 2  ;;  %v3355_v9 = vsel %vm8005_vm13, 0, %v8004_v18  ;;  %v3502_v35 = vadd.s32 1, %v8010_v37  ;;  %v3340_v40 = vadd.s32 %v11004_v50, %v11018_v13  ;;  %v758_v18 = vpop.permute.xlu0 %757 }
 0x336   : > { %v3356_v43 = vsub.s32 32, %v3355_v9  ;;  %v3360_v53 = vsub.s32 4294967266, %v3355_v9  ;;  %v3219_v21 = vsel %vm3213_vm12, %v3216_v5, %v3218_v10  ;;  %v3371_v36 = vsel %vm3286_vm10, %v3370_v47, %v11044_v17 }
 0x337   : > { %v8563_v11 = vpop.eup %8562  ;;  %v3238_v6 = vadd.s32 1, %v11087_v26  ;;  %v3492_v60 = vand.u32 2147483647, %v11027_v20  ;;  %vm3503_vm5 = vcmp.gt.s32.totalorder %v3502_v35, 0  ;;  %v3357_v38 = vshll.u32 %v11056_v23, %v3355_v9 }
 0x338   : > { %v8565_v25 = vpop.eup %8564  ;;  %v3072_v54 = vxor.u32 2147483648, %v8563_v11  ;;  %v3358_v59 = vshrl.u32 %v3340_v40, %v3356_v43  ;;  %v3361_v50 = vadd.s32 127, %v3360_v53  ;;  %v3235_v15 = vmul.u32 %v11062_v8, %v3219_v21  ;;  %v15029_v53 = vld [vmem:[#allocation9_spill] sm:$0xff] }
 0x339   : > { %v3069_v13 = vxor.u32 2147483648, %v8565_v25  ;;  %vm3237_vm3 = vc.u32 %v11093_v49, %v11086_v27  ;;  %v3504_v16 = vsel %vm3503_vm5, %v3502_v35, 0  ;;  %v3373_v12 = vsel %vm11078_vm2, 0, %v3371_v36 }
 0x33a   : > { %v3073_v17 = vsel %vm3071_vm4, %v3072_v54, %v8565_v25  ;;  %v3359_v52 = vor.u32 %v3358_v59, %v3357_v38  ;;  %v3362_v22 = vshll.u32 %v3361_v50, 23  ;;  %v3239_v44 = vsel %vm3237_vm3, %v3238_v6, %v11087_v26 }
 0x33b   : > { %v3070_v23 = vsel %vm3068_vm1, %v8563_v11, %v3069_v13  ;;  %v3240_v1 = vadd.s32 %v3239_v44, %v3235_v15  ;;  %v3506_v8 = vand.u32 31, %v3504_v16  ;;  %vm3064_vm6 = vweird.f32 %v10754_v48  ;;  %v11153_v15 = vld [vmem:[%s14908_s2] ss:$0 sm:$0xff] }
 0x33c   : > { %v3074_v3 = vsel %vm3067_vm14, %v3070_v23, %v3073_v17  ;;  %v3363_v39 = vor.u32 4788187, %v3362_v22  ;;  %v3366_v32 = vcvt.s32.f32 %v3359_v52  ;;  %v3377_v61 = vadd.s32 3, %v3373_v12 }
 0x33d   : > { %v3075_v37 = vsel %vm3064_vm6, nan, %v3074_v3  ;;  %v3241_v28 = vadd.s32 536870912, %v3240_v1  ;;  %v3507_v56 = vsub.s32 32, %v3506_v8  ;;  %v3499_v62 = vand.u32 8388607, %v3492_v60 }
 0x33e   : > { %7774 = vst [vmem:[%s9477_s9 + $0x90] sm:$0xff] %v3075_v37  ;;  %v3364_v30 = vand.u32 2147483647, %v3363_v39  ;;  %v3505_v47 = vshrl.u32 %v3504_v16, 5  ;;  %v3509_v63 = vshll.u32 %v14972_v41, %v3506_v8  ;;  %v3512_v19 = vshll.u32 %v14973_v34, %v3506_v8 }
 0x33f   : > { %v11120_v24 = vshrl.u32 %v3241_v28, 30  ;;  %v3510_v51 = vshrl.u32 %v14973_v34, %v3507_v56  ;;  %v3513_v57 = vshrl.u32 %v14974_v14, %v3507_v56  ;;  %v3516_v55 = vshrl.u32 %v14975_v45, %v3507_v56 }
 0x340   : > { %v3367_v48 = vmul.f32 %v3366_v32, %v3364_v30  ;;  %v3519_v33 = vshrl.u32 %v14976_v58, %v3507_v56  ;;  %v3515_v10 = vshll.u32 %v14974_v14, %v3506_v8  ;;  %v3518_v26 = vshll.u32 %v14975_v45, %v3506_v8 }
 0x341   : > { %v3243_v5 = vshll.u32 %v11120_v24, 30  ;;  %v3521_v31 = vshll.u32 %v14976_v58, %v3506_v8  ;;  %v3522_v9 = vshrl.u32 %v14980_v46, %v3507_v56  ;;  %v3511_v40 = vor.u32 %v3510_v51, %v3509_v63  ;;  %v15032_v63 = vld [vmem:[#allocation10_spill] sm:$0xff] }
 0x342   : > { %v3368_v7 = vxor.u32 2147483648, %v3367_v48  ;;  %v3517_v43 = vor.u32 %v3516_v55, %v3515_v10  ;;  %v987_v21 = vsel %vm580_vm0, %v758_v18, %v15029_v53  ;;  %v3514_v36 = vor.u32 %v3513_v57, %v3512_v19 }
 0x343   : > { %v11135_v35 = vsub.s32 %v3240_v1, %v3243_v5  ;;  %v3520_v6 = vor.u32 %v3519_v33, %v3518_v26  ;;  %v3523_v25 = vor.u32 %v3522_v9, %v3521_v31  ;;  %v11145_v38 = vand.u32 3, %v3377_v61 }
 0x344   : > { %v3369_v11 = vsel %vm3286_vm10, %v3368_v7, %v3367_v48  ;;  %v3500_v50 = vor.u32 8388608, %v3499_v62  ;;  %vm3182_vm7 = vcmp.lt.s32.totalorder %v10949_v42, 0  ;;  %v3508_v13 = vshrl.u32 %v14972_v41, %v3507_v56  ;;  %v773_v62 = vpop.permute.xlu1 %772 }
 0x345   : > { %v3372_v54 = vsel %vm11078_vm2, %v10853_v4, %v3369_v11  ;;  %v3246_v59 = vsub.s32 0, %v11135_v35  ;;  %vm3527_vm9 = vcmp.lt.s32.totalorder %v3505_v47, 4  ;;  %v11156_v16 = vmul.f32 %v11153_v15, %v987_v21 }
 0x346   : > { %8566 = vcosq.f32 %v3372_v54  ;;  %vm3524_vm10 = vcmp.lt.s32.totalorder %v3505_v47, 1  ;;  %v3529_v17 = vsel %vm3527_vm9, %v3517_v43, 2102212464  ;;  %v3533_v22 = vsel %vm3527_vm9, %v3520_v6, 920167782 }
 0x347   : > { %8568 = vsinq.f32 %v3372_v54  ;;  %v7999_v0 = vmin.u32 %v3246_v59, %v11135_v35  ;;  %v3532_v52 = vsel %vm3524_vm10, %v3511_v40, %v3514_v36  ;;  %v3536_v44 = vsel %vm3524_vm10, %v3514_v36, %v3517_v43 }
 0x348   : > { %v3537_v23 = vsel %vm3527_vm9, %v3523_v25, 1326507024  ;;  %vm11161_vm8 = vcmp.le.f32.partialorder %v3180_v29, 0.7853982  ;;  %vm3525_vm11 = vcmp.lt.s32.totalorder %v3505_v47, 2  ;;  %vm3526_vm12 = vcmp.lt.s32.totalorder %v3505_v47, 3 }
 0x349   : > { %v3248_v1 = vclz %v7999_v0  ;;  %v3540_v8 = vshll.u32 %v3500_v50, 8  ;;  %v3528_v3 = vsel %vm3524_vm10, %v3508_v13, %v3511_v40  ;;  %v3530_v39 = vsel %vm3526_vm12, %v3514_v36, %v3529_v17 }
 0x34a   : > { %v3534_v37 = vsel %vm3526_vm12, %v3517_v43, %v3533_v22  ;;  %v3538_v28 = vsel %vm3526_vm12, %v3520_v6, %v3537_v23  ;;  %v3266_v30 = vsub.s32 4, %v11120_v24  ;;  %vm3380_vm15 = vcmp.eq.s32.totalorder %v11145_v38, 0 }
 0x34b   : > { %v8000_v56 = vadd.s32 4294967294, %v3248_v1  ;;  %v3535_v32 = vsel %vm3525_vm11, %v3532_v52, %v3534_v37  ;;  %v3539_v61 = vsel %vm3525_vm11, %v3536_v44, %v3538_v28  ;;  %v3531_v55 = vsel %vm3525_vm11, %v3528_v3, %v3530_v39  ;;  %v768_v37 = vpop.permute.xlu0 %767 }
 0x34c   : > { %v11168_v29 = vmul.u32.u64.low %v3540_v8, %v3539_v61  ;;  %v11169_v51 = vmul.u32.u64.high %v3540_v8, %v3539_v61, %v11168_v29  ;;  %v11171_v48 = vmul.u32.u64.low %v3540_v8, %v3535_v32  ;;  %v11172_v57 = vmul.u32.u64.high %v3540_v8, %v3535_v32, %v11171_v48 }
 0x34d   : > { %vm8001_vm2 = vcmp.lt.s32.totalorder %v8000_v56, 0  ;;  %v3391_v33 = vand.u32 2139095040, %v11156_v16  ;;  %vm3383_vm14 = vcmp.eq.s32.totalorder %v11145_v38, 2  ;;  %v3236_v18 = vadd.s32 %v11086_v27, %v11093_v49  ;;  %v15033_v29 = vld [vmem:[#allocation11_spill] sm:$0xff] }
 0x34e   : > { %v3251_v5 = vsel %vm8001_vm2, 0, %v8000_v56  ;;  %v990_v19 = vsel %vm580_vm0, %v773_v62, %v15032_v63  ;;  %v3267_v26 = vsel %vm3182_vm7, %v3266_v30, %v11120_v24  ;;  %v3547_v40 = vmul.u32 %v3540_v8, %v3531_v55 }
 0x34f   : > { %v3252_v10 = vsub.s32 32, %v3251_v5  ;;  %v3256_v7 = vsub.s32 4294967266, %v3251_v5  ;;  %v3392_v47 = vshrl.u32 %v3391_v33, 23  ;;  %v3253_v9 = vshll.u32 %v11135_v35, %v3251_v5 }
 0x350   : > { %v8567_v31 = vpop.eup %8566  ;;  %vm3549_vm13 = vc.u32 %v11169_v51, %v11171_v48  ;;  %v3550_v27 = vadd.s32 1, %v11172_v57  ;;  %v3269_v6 = vsel %vm11161_vm8, 0, %v3267_v26  ;;  %v3388_v25 = vand.u32 2147483647, %v11156_v16 }
 0x351   : > { %v8569_v49 = vpop.eup %8568  ;;  %v3384_v43 = vxor.u32 2147483648, %v8567_v31  ;;  %v3254_v53 = vshrl.u32 %v3236_v18, %v3252_v10  ;;  %v3257_v21 = vadd.s32 127, %v3256_v7  ;;  %v8006_v11 = vadd.s32 4294967169, %v3392_v47 }
 0x352   : > { %v3381_v36 = vxor.u32 2147483648, %v8569_v49  ;;  %v3551_v24 = vsel %vm3549_vm13, %v3550_v27, %v11172_v57  ;;  %vm3376_vm1 = vweird.f32 %v10853_v4  ;;  %vm3379_vm4 = vcmp.lt.s32.totalorder %v11145_v38, 2 }
 0x353   : > { %v3385_v35 = vsel %vm3383_vm14, %v3384_v43, %v8569_v49  ;;  %v3255_v54 = vor.u32 %v3254_v53, %v3253_v9  ;;  %v3258_v59 = vshll.u32 %v3257_v21, 23  ;;  %v3552_v50 = vadd.s32 %v3551_v24, %v3547_v40 }
 0x354   : > { %v3382_v13 = vsel %vm3380_vm15, %v8567_v31, %v3381_v36  ;;  %v3398_v0 = vadd.s32 1, %v8006_v11  ;;  %v3273_v22 = vadd.s32 3, %v3269_v6  ;;  %v3395_v1 = vand.u32 8388607, %v3388_v25 }
 0x355   : > { %v3386_v17 = vsel %vm3379_vm4, %v3382_v13, %v3385_v35  ;;  %v3259_v52 = vor.u32 4788187, %v3258_v59  ;;  %v3553_v44 = vadd.s32 536870912, %v3552_v50  ;;  %v11204_v8 = vmul.f32 %v11153_v15, %v990_v19 }
 0x356   : > { %v3387_v23 = vsel %vm3376_vm1, nan, %v3386_v17  ;;  %vm3399_vm5 = vcmp.gt.s32.totalorder %v3398_v0, 0  ;;  %v3262_v3 = vcvt.s32.f32 %v3255_v54  ;;  %v11210_v32 = vand.u32 3, %v3273_v22 }
 0x357   : > { %7777 = vst [vmem:[%s9477_s9 + $0xa8] sm:$0xff] %v3387_v23  ;;  %v3260_v4 = vand.u32 2147483647, %v3259_v52  ;;  %v11207_v39 = vshrl.u32 %v3553_v44, 30  ;;  %v3400_v38 = vsel %vm3399_vm5, %v3398_v0, 0  ;;  %v3396_v61 = vor.u32 8388608, %v3395_v1 }
 0x358   : > { %v3402_v28 = vand.u32 31, %v3400_v38  ;;  %v11215_v57 = vsel %vm580_vm0, %v768_v37, %v15033_v29  ;;  %v11219_v18 = vshrl.u32 %v3400_v38, 5  ;;  %v3703_v5 = vand.u32 2139095040, %v11204_v8 }
 0x359   : > { %v3263_v56 = vmul.f32 %v3262_v3, %v3260_v4  ;;  %v3555_v30 = vshll.u32 %v11207_v39, 30  ;;  %vm3494_vm3 = vcmp.lt.s32.totalorder %v11027_v20, 0  ;;  %v3548_v12 = vadd.s32 %v11171_v48, %v11169_v51 }
 0x35a   : > { %v3403_v62 = vsub.s32 32, %v3402_v28  ;;  %v3405_v63 = vshll.u32 %v14972_v41, %v3402_v28  ;;  %v3408_v10 = vshll.u32 %v14973_v34, %v3402_v28  ;;  %v3411_v31 = vshll.u32 %v14974_v14, %v3402_v28 }
 0x35b   : > { %v3264_v55 = vxor.u32 2147483648, %v3263_v56  ;;  %v11217_v33 = vsub.s32 %v3552_v50, %v3555_v30  ;;  %v3414_v49 = vshll.u32 %v14975_v45, %v3402_v28  ;;  %v3417_v6 = vshll.u32 %v14976_v58, %v3402_v28 }
 0x35c   : > { %v3406_v19 = vshrl.u32 %v14973_v34, %v3403_v62  ;;  %v3409_v7 = vshrl.u32 %v14974_v14, %v3403_v62  ;;  %v3412_v9 = vshrl.u32 %v14975_v45, %v3403_v62  ;;  %v3415_v43 = vshrl.u32 %v14976_v58, %v3403_v62 }
 0x35d   : > { %v3265_v26 = vsel %vm3182_vm7, %v3264_v55, %v3263_v56  ;;  %v3558_v47 = vsub.s32 0, %v11217_v33  ;;  %v3418_v24 = vshrl.u32 %v14980_v46, %v3403_v62  ;;  %v11242_v54 = vshll.u32 %v3396_v61, 8 }
 0x35e   : > { %v3268_v40 = vsel %vm11161_vm8, %v10949_v42, %v3265_v26  ;;  %v3407_v27 = vor.u32 %v3406_v19, %v3405_v63  ;;  %v3410_v21 = vor.u32 %v3409_v7, %v3408_v10  ;;  %v3413_v11 = vor.u32 %v3412_v9, %v3411_v31 }
 0x35f   : > { %8570 = vcosq.f32 %v3268_v40  ;;  %v8011_v53 = vmin.u32 %v3558_v47, %v11217_v33  ;;  %v3416_v36 = vor.u32 %v3415_v43, %v3414_v49  ;;  %v3700_v59 = vand.u32 2147483647, %v11204_v8 }
 0x360   : > { %8572 = vsinq.f32 %v3268_v40  ;;  %v3404_v50 = vshrl.u32 %v14972_v41, %v3403_v62  ;;  %v3419_v13 = vor.u32 %v3418_v24, %v3417_v6  ;;  %vm3420_vm6 = vcmp.lt.s32.totalorder %v11219_v18, 1 }
 0x361   : > { %v3560_v35 = vclz %v8011_v53  ;;  %v3704_v0 = vshrl.u32 %v3703_v5, 23  ;;  %vm3279_vm7 = vcmp.eq.s32.totalorder %v11210_v32, 2  ;;  %vm3422_vm9 = vcmp.lt.s32.totalorder %v11219_v18, 3 }
 0x362   : > { %vm3423_vm10 = vcmp.lt.s32.totalorder %v11219_v18, 4  ;;  %v3428_v51 = vsel %vm3420_vm6, %v3407_v27, %v3410_v21  ;;  %vm3276_vm8 = vcmp.eq.s32.totalorder %v11210_v32, 0  ;;  %v3432_v22 = vsel %vm3420_vm6, %v3410_v21, %v3413_v11 }
 0x363   : > { %v8012_v17 = vadd.s32 4294967294, %v3560_v35  ;;  %v3425_v48 = vsel %vm3423_vm10, %v3413_v11, 2102212464  ;;  %v3429_v52 = vsel %vm3423_vm10, %v3416_v36, 920167782  ;;  %vm3275_vm11 = vcmp.lt.s32.totalorder %v11210_v32, 2 }
 0x364   : > { %v3433_v44 = vsel %vm3423_vm10, %v3419_v13, 1326507024  ;;  %vm11258_vm12 = vcmp.le.f32.partialorder %v3492_v60, 0.7853982  ;;  %vm3421_vm2 = vcmp.lt.s32.totalorder %v11219_v18, 2  ;;  %v3430_v1 = vsel %vm3422_vm9, %v3413_v11, %v3429_v52 }
 0x365   : > { %vm8013_vm15 = vcmp.lt.s32.totalorder %v8012_v17, 0  ;;  %v3434_v4 = vsel %vm3422_vm9, %v3416_v36, %v3433_v44  ;;  %vm3272_vm14 = vweird.f32 %v10949_v42  ;;  %v3578_v38 = vsub.s32 4, %v11207_v39 }
 0x366   : > { %v3563_v3 = vsel %vm8013_vm15, 0, %v8012_v17  ;;  %v3431_v60 = vsel %vm3421_vm2, %v3428_v51, %v3430_v1  ;;  %v3435_v37 = vsel %vm3421_vm2, %v3432_v22, %v3434_v4  ;;  %v3424_v30 = vsel %vm3420_vm6, %v3404_v50, %v3407_v27 }
 0x367   : > { %v3564_v28 = vsub.s32 32, %v3563_v3  ;;  %v3568_v56 = vsub.s32 4294967266, %v3563_v3  ;;  %v3426_v61 = vsel %vm3422_vm9, %v3410_v21, %v3425_v48  ;;  %v3565_v19 = vshll.u32 %v11217_v33, %v3563_v3 }
 0x368   : > { %v11278_v62 = vmul.u32.u64.low %v11242_v54, %v3435_v37  ;;  %v11279_v29 = vmul.u32.u64.high %v11242_v54, %v3435_v37, %v11278_v62  ;;  %v11282_v55 = vmul.u32.u64.low %v11242_v54, %v3431_v60  ;;  %v11283_v5 = vmul.u32.u64.high %v11242_v54, %v3431_v60, %v11282_v55 }
 0x369   : > { %v8571_v63 = vpop.eup %8570  ;;  %v3566_v10 = vshrl.u32 %v3548_v12, %v3564_v28  ;;  %v3569_v7 = vadd.s32 127, %v3568_v56  ;;  %v8018_v26 = vadd.s32 4294967169, %v3704_v0  ;;  %v3579_v9 = vsel %vm3494_vm3, %v3578_v38, %v11207_v39 }
 0x36a   : > { %v8573_v47 = vpop.eup %8572  ;;  %v3280_v31 = vxor.u32 2147483648, %v8571_v63  ;;  %v3427_v40 = vsel %vm3421_vm2, %v3424_v30, %v3426_v61  ;;  %v11294_v27 = vand.u32 8388607, %v3700_v59  ;;  %vm3445_vm13 = vc.u32 %v11279_v29, %v11282_v55 }
 0x36b   : > { %v3277_v49 = vxor.u32 2147483648, %v8573_v47  ;;  %v3567_v43 = vor.u32 %v3566_v10, %v3565_v19  ;;  %v3570_v53 = vshll.u32 %v3569_v7, 23  ;;  %v3710_v33 = vadd.s32 1, %v8018_v26 }
 0x36c   : > { %v3281_v21 = vsel %vm3279_vm7, %v3280_v31, %v8573_v47  ;;  %v3446_v39 = vadd.s32 1, %v11283_v5  ;;  %v11303_v18 = vmul.f32 %v11153_v15, %v11215_v57  ;;  %v3443_v6 = vmul.u32 %v11242_v54, %v3427_v40 }
 0x36d   : > { %v3278_v11 = vsel %vm3276_vm8, %v8571_v63, %v3277_v49  ;;  %v3571_v36 = vor.u32 4788187, %v3570_v53  ;;  %vm3711_vm1 = vcmp.gt.s32.totalorder %v3710_v33, 0  ;;  %v3581_v12 = vsel %vm11258_vm12, 0, %v3579_v9 }
 0x36e   : > { %v3282_v24 = vsel %vm3275_vm11, %v3278_v11, %v3281_v21  ;;  %v3447_v35 = vsel %vm3445_vm13, %v3446_v39, %v11283_v5  ;;  %v3712_v50 = vsel %vm3711_vm1, %v3710_v33, 0  ;;  %v3574_v0 = vcvt.s32.f32 %v3567_v43 }
 0x36f   : > { %v3283_v57 = vsel %vm3272_vm14, nan, %v3282_v24  ;;  %v3572_v13 = vand.u32 2147483647, %v3571_v36  ;;  %v3448_v17 = vadd.s32 %v3447_v35, %v3443_v6  ;;  %v3714_v51 = vand.u32 31, %v3712_v50 }
 0x370   : > { %7776 = vst [vmem:[%s9477_s9 + $0xa0] sm:$0xff] %v3283_v57  ;;  %v3708_v52 = vor.u32 8388608, %v11294_v27  ;;  %v3585_v32 = vadd.s32 3, %v3581_v12  ;;  %v3713_v22 = vshrl.u32 %v3712_v50, 5  ;;  %v3599_v1 = vand.u32 2139095040, %v11303_v18 }
 0x371   : > { %v3575_v48 = vmul.f32 %v3574_v0, %v3572_v13  ;;  %v3449_v54 = vadd.s32 536870912, %v3448_v17  ;;  %v3715_v44 = vsub.s32 32, %v3714_v51  ;;  %v3717_v42 = vshll.u32 %v14972_v41, %v3714_v51 }
 0x372   : > { %v3720_v38 = vshll.u32 %v14973_v34, %v3714_v51  ;;  %v3723_v28 = vshll.u32 %v14974_v14, %v3714_v51  ;;  %v3726_v62 = vshll.u32 %v14975_v45, %v3714_v51  ;;  %v11334_v26 = vand.u32 3, %v3585_v32 }
 0x373   : > { %v3576_v4 = vxor.u32 2147483648, %v3575_v48  ;;  %v11318_v3 = vshrl.u32 %v3449_v54, 30  ;;  %v3718_v60 = vshrl.u32 %v14973_v34, %v3715_v44  ;;  %v3721_v37 = vshrl.u32 %v14974_v14, %v3715_v44 }
 0x374   : > { %v3724_v56 = vshrl.u32 %v14975_v45, %v3715_v44  ;;  %v3727_v5 = vshrl.u32 %v14976_v58, %v3715_v44  ;;  %v3729_v9 = vshll.u32 %v14976_v58, %v3714_v51  ;;  %v3730_v40 = vshrl.u32 %v14980_v46, %v3715_v44 }
 0x375   : > { %v3577_v30 = vsel %vm3494_vm3, %v3576_v4, %v3575_v48  ;;  %v3451_v61 = vshll.u32 %v11318_v3, 30  ;;  %v3719_v19 = vor.u32 %v3718_v60, %v3717_v42  ;;  %v3722_v10 = vor.u32 %v3721_v37, %v3720_v38 }
 0x376   : > { %v3580_v63 = vsel %vm11258_vm12, %v11027_v20, %v3577_v30  ;;  %v3725_v7 = vor.u32 %v3724_v56, %v3723_v28  ;;  %v3728_v31 = vor.u32 %v3727_v5, %v3726_v62  ;;  %v3600_v27 = vshrl.u32 %v3599_v1, 23 }
 0x377   : > { %8574 = vcosq.f32 %v3580_v63  ;;  %v11336_v47 = vsub.s32 %v3448_v17, %v3451_v61  ;;  %vm3390_vm4 = vcmp.lt.s32.totalorder %v11156_v16, 0  ;;  %vm3732_vm5 = vcmp.lt.s32.totalorder %v3713_v22, 1 }
 0x378   : > { %8576 = vsinq.f32 %v3580_v63  ;;  %vm3734_vm3 = vcmp.lt.s32.totalorder %v3713_v22, 3  ;;  %vm3735_vm6 = vcmp.lt.s32.totalorder %v3713_v22, 4  ;;  %v3731_v49 = vor.u32 %v3730_v40, %v3729_v9 }
 0x379   : > { %v3454_v23 = vsub.s32 0, %v11336_v47  ;;  %v3737_v43 = vsel %vm3735_vm6, %v3725_v7, 2102212464  ;;  %v3740_v53 = vsel %vm3732_vm5, %v3719_v19, %v3722_v10  ;;  %v3741_v33 = vsel %vm3735_vm6, %v3728_v31, 920167782 }
 0x37a   : > { %v3716_v39 = vshrl.u32 %v14972_v41, %v3715_v44  ;;  %vm3733_vm7 = vcmp.lt.s32.totalorder %v3713_v22, 2  ;;  %v3742_v11 = vsel %vm3734_vm3, %v3725_v7, %v3741_v33  ;;  %v3744_v6 = vsel %vm3732_vm5, %v3722_v10, %v3725_v7  ;;  %v15038_v33 = vld [vmem:[#allocation12_spill] sm:$0xff] }
 0x37b   : > { %v8007_v21 = vmin.u32 %v3454_v23, %v11336_v47  ;;  %v3743_v36 = vsel %vm3733_vm7, %v3740_v53, %v3742_v11  ;;  %v3745_v24 = vsel %vm3735_vm6, %v3731_v49, 1326507024  ;;  %v3748_v12 = vshll.u32 %v3708_v52, 8 }
 0x37c   : > { %vm3587_vm9 = vcmp.lt.s32.totalorder %v11334_v26, 2  ;;  %vm11351_vm10 = vcmp.le.f32.partialorder %v3388_v25, 0.7853982  ;;  %v3736_v57 = vsel %vm3732_vm5, %v3716_v39, %v3719_v19  ;;  %v3738_v13 = vsel %vm3734_vm3, %v3722_v10, %v3737_v43  ;;  %v783_v10 = vpop.permute.xlu1 %782 }
 0x37d   : > { %v3456_v50 = vclz %v8007_v21  ;;  %v3596_v0 = vand.u32 2147483647, %v11303_v18  ;;  %vm3584_vm8 = vweird.f32 %v11027_v20  ;;  %v3474_v17 = vsub.s32 4, %v11318_v3 }
 0x37e   : > { %v3746_v51 = vsel %vm3734_vm3, %v3728_v31, %v3745_v24  ;;  %v11361_v48 = vmul.u32.u64.low %v3748_v12, %v3743_v36  ;;  %v11362_v54 = vmul.u32.u64.high %v3748_v12, %v3743_v36, %v11361_v48  ;;  %vm3588_vm11 = vcmp.eq.s32.totalorder %v11334_v26, 0 }
 0x37f   : > { %v8008_v25 = vadd.s32 4294967294, %v3456_v50  ;;  %v3747_v52 = vsel %vm3733_vm7, %v3744_v6, %v3746_v51  ;;  %v8014_v32 = vadd.s32 4294967169, %v3600_v27  ;;  %vm3591_vm12 = vcmp.eq.s32.totalorder %v11334_v26, 2 }
 0x380   : > { %v3739_v44 = vsel %vm3733_vm7, %v3736_v57, %v3738_v13  ;;  %v11369_v1 = vmul.u32.u64.low %v3748_v12, %v3747_v52  ;;  %v11370_v4 = vmul.u32.u64.high %v3748_v12, %v3747_v52, %v11369_v1  ;;  %v3444_v38 = vadd.s32 %v11282_v55, %v11279_v29 }
 0x381   : > { %v8575_v42 = vpop.eup %8574  ;;  %vm8009_vm15 = vcmp.lt.s32.totalorder %v8008_v25, 0  ;;  %v3603_v60 = vand.u32 8388607, %v3596_v0  ;;  %v3606_v37 = vadd.s32 1, %v8014_v32  ;;  %v3475_v22 = vsel %vm3390_vm4, %v3474_v17, %v11318_v3 }
 0x382   : > { %v8577_v28 = vpop.eup %8576  ;;  %v3592_v56 = vxor.u32 2147483648, %v8575_v42  ;;  %v3459_v30 = vsel %vm8009_vm15, 0, %v8008_v25  ;;  %v3758_v61 = vadd.s32 1, %v11362_v54  ;;  %v3755_v19 = vmul.u32 %v3748_v12, %v3739_v44 }
 0x383   : > { %v3589_v62 = vxor.u32 2147483648, %v8577_v28  ;;  %v3460_v5 = vsub.s32 32, %v3459_v30  ;;  %v3464_v63 = vsub.s32 4294967266, %v3459_v30  ;;  %v3461_v55 = vshll.u32 %v11336_v47, %v3459_v30 }
 0x384   : > { %v3593_v29 = vsel %vm3591_vm12, %v3592_v56, %v8577_v28  ;;  %vm3757_vm2 = vc.u32 %v11370_v4, %v11361_v48  ;;  %vm3607_vm14 = vcmp.gt.s32.totalorder %v3606_v37, 0  ;;  %v3477_v27 = vsel %vm11351_vm10, 0, %v3475_v22 }
 0x385   : > { %v3590_v3 = vsel %vm3588_vm11, %v8575_v42, %v3589_v62  ;;  %v3462_v7 = vshrl.u32 %v3444_v38, %v3460_v5  ;;  %v3465_v31 = vadd.s32 127, %v3464_v63  ;;  %v3759_v9 = vsel %vm3757_vm2, %v3758_v61, %v11362_v54 }
 0x386   : > { %v3594_v40 = vsel %vm3587_vm9, %v3590_v3, %v3593_v29  ;;  %v3760_v47 = vadd.s32 %v3759_v9, %v3755_v19  ;;  %v3608_v23 = vsel %vm3607_vm14, %v3606_v37, 0  ;;  %v992_v21 = vsel %vm580_vm0, %v783_v10, %v15038_v33 }
 0x387   : > { %v3595_v49 = vsel %vm3584_vm8, nan, %v3594_v40  ;;  %v3463_v43 = vor.u32 %v3462_v7, %v3461_v55  ;;  %v3466_v53 = vshll.u32 %v3465_v31, 23  ;;  %v3610_v11 = vand.u32 31, %v3608_v23 }
 0x388   : > { %7779 = vst [vmem:[%s9477_s9 + $0xb8] sm:$0xff] %v3595_v49  ;;  %v3761_v39 = vadd.s32 536870912, %v3760_v47  ;;  %v3481_v26 = vadd.s32 3, %v3477_v27  ;;  %v3604_v24 = vor.u32 8388608, %v3603_v60  ;;  %v11399_v50 = vmul.f32 %v11153_v15, %v992_v21 }
 0x389   : > { %v3467_v36 = vor.u32 4788187, %v3466_v53  ;;  %v3611_v12 = vsub.s32 32, %v3610_v11  ;;  %v3470_v20 = vcvt.s32.f32 %v3463_v43  ;;  %v11401_v13 = vshrl.u32 %v3608_v23, 5  ;;  %v778_v53 = vpop.permute.xlu0 %777 }
 0x38a   : > { %v3762_v6 = vshrl.u32 %v3761_v39, 30  ;;  %v3613_v17 = vshll.u32 %v14972_v41, %v3610_v11  ;;  %v3616_v25 = vshll.u32 %v14973_v34, %v3610_v11  ;;  %v3619_v52 = vshll.u32 %v14974_v14, %v3610_v11 }
 0x38b   : > { %v3468_v57 = vand.u32 2147483647, %v3467_v36  ;;  %v3614_v54 = vshrl.u32 %v14973_v34, %v3611_v12  ;;  %v3617_v44 = vshrl.u32 %v14974_v14, %v3611_v12  ;;  %v3620_v1 = vshrl.u32 %v14975_v45, %v3611_v12 }
 0x38c   : > { %v3763_v51 = vshll.u32 %v3762_v6, 30  ;;  %v3623_v42 = vshrl.u32 %v14976_v58, %v3611_v12  ;;  %v11410_v38 = vand.u32 3, %v3481_v26  ;;  %v3622_v37 = vshll.u32 %v14975_v45, %v3610_v11 }
 0x38d   : > { %v3471_v32 = vmul.f32 %v3470_v20, %v3468_v57  ;;  %v3626_v28 = vshrl.u32 %v14980_v46, %v3611_v12  ;;  %vm3702_vm13 = vcmp.lt.s32.totalorder %v11204_v8, 0  ;;  %v3615_v30 = vor.u32 %v3614_v54, %v3613_v17  ;;  %v15041_v17 = vld [vmem:[#allocation13_spill] sm:$0xff] }
 0x38e   : > { %v11412_v60 = vsub.s32 %v3760_v47, %v3763_v51  ;;  %v3618_v22 = vor.u32 %v3617_v44, %v3616_v25  ;;  %v3621_v61 = vor.u32 %v3620_v1, %v3619_v52  ;;  %v3624_v5 = vor.u32 %v3623_v42, %v3622_v37 }
 0x38f   : > { %v3472_v56 = vxor.u32 2147483648, %v3471_v32  ;;  %v3625_v63 = vshll.u32 %v14976_v58, %v3610_v11  ;;  %v11419_v19 = vshll.u32 %v3604_v24, 8  ;;  %v3612_v55 = vshrl.u32 %v14972_v41, %v3611_v12 }
 0x390   : > { %v3766_v62 = vsub.s32 0, %v11412_v60  ;;  %vm3628_vm1 = vcmp.lt.s32.totalorder %v11401_v13, 1  ;;  %v3911_v10 = vand.u32 2139095040, %v11399_v50  ;;  %vm3631_vm5 = vcmp.lt.s32.totalorder %v11401_v13, 4 }
 0x391   : > { %v3473_v29 = vsel %vm3390_vm4, %v3472_v56, %v3471_v32  ;;  %v3627_v31 = vor.u32 %v3626_v28, %v3625_v63  ;;  %vm11433_vm3 = vcmp.le.f32.partialorder %v3700_v59, 0.7853982  ;;  %v3633_v40 = vsel %vm3631_vm5, %v3621_v61, 2102212464 }
 0x392   : > { %v3476_v3 = vsel %vm11351_vm10, %v11156_v16, %v3473_v29  ;;  %v8019_v7 = vmin.u32 %v3766_v62, %v11412_v60  ;;  %v3636_v27 = vsel %vm3628_vm1, %v3615_v30, %v3618_v22  ;;  %v3637_v35 = vsel %vm3631_vm5, %v3624_v5, 920167782 }
 0x393   : > { %8578 = vcosq.f32 %v3476_v3  ;;  %v3786_v23 = vsub.s32 4, %v3762_v6  ;;  %vm3630_vm4 = vcmp.lt.s32.totalorder %v11401_v13, 3  ;;  %vm3629_vm6 = vcmp.lt.s32.totalorder %v11401_v13, 2 }
 0x394   : > { %8580 = vsinq.f32 %v3476_v3  ;;  %v3768_v47 = vclz %v8019_v7  ;;  %v3632_v59 = vsel %vm3628_vm1, %v3612_v55, %v3615_v30  ;;  %v3638_v49 = vsel %vm3630_vm4, %v3621_v61, %v3637_v35 }
 0x395   : > { %v3640_v43 = vsel %vm3628_vm1, %v3618_v22, %v3621_v61  ;;  %v3634_v21 = vsel %vm3630_vm4, %v3618_v22, %v3633_v40  ;;  %v3639_v39 = vsel %vm3629_vm6, %v3636_v27, %v3638_v49  ;;  %v3641_v11 = vsel %vm3631_vm5, %v3627_v31, 1326507024 }
 0x396   : > { %v8020_v33 = vadd.s32 4294967294, %v3768_v47  ;;  %v3642_v36 = vsel %vm3630_vm4, %v3624_v5, %v3641_v11  ;;  %v11454_v26 = vmul.u32.u64.low %v11419_v19, %v3639_v39  ;;  %v11455_v24 = vmul.u32.u64.high %v11419_v19, %v3639_v39, %v11454_v26 }
 0x397   : > { %v3912_v12 = vshrl.u32 %v3911_v10, 23  ;;  %vm3484_vm7 = vcmp.eq.s32.totalorder %v11410_v38, 0  ;;  %v3787_v57 = vsel %vm3702_vm13, %v3786_v23, %v3762_v6  ;;  %v3643_v20 = vsel %vm3629_vm6, %v3640_v43, %v3642_v36 }
 0x398   : > { %vm8021_vm9 = vcmp.lt.s32.totalorder %v8020_v33, 0  ;;  %v991_v51 = vsel %vm580_vm0, %v778_v53, %v15041_v17  ;;  %v11467_v25 = vmul.u32.u64.low %v11419_v19, %v3643_v20  ;;  %v11468_v52 = vmul.u32.u64.high %v11419_v19, %v3643_v20, %v11467_v25 }
 0x399   : > { %v3771_v54 = vsel %vm8021_vm9, 0, %v8020_v33  ;;  %v8026_v32 = vadd.s32 4294967169, %v3912_v12  ;;  %v3756_v44 = vadd.s32 %v11361_v48, %v11370_v4  ;;  %v3635_v6 = vsel %vm3629_vm6, %v3632_v59, %v3634_v21 }
 0x39a   : > { %v3772_v1 = vsub.s32 32, %v3771_v54  ;;  %v3776_v42 = vsub.s32 4294967266, %v3771_v54  ;;  %v3654_v37 = vadd.s32 1, %v11455_v24  ;;  %v3908_v28 = vand.u32 2147483647, %v11399_v50 }
 0x39b   : > { %v3918_v56 = vadd.s32 1, %v8026_v32  ;;  %v11477_v30 = vmul.f32 %v11153_v15, %v991_v51  ;;  %v3773_v22 = vshll.u32 %v11412_v60, %v3771_v54  ;;  %v3789_v48 = vsel %vm11433_vm3, 0, %v3787_v57 }
 0x39c   : > { %v3774_v61 = vshrl.u32 %v3756_v44, %v3772_v1  ;;  %v3777_v62 = vadd.s32 127, %v3776_v42  ;;  %vm3487_vm10 = vcmp.eq.s32.totalorder %v11410_v38, 2  ;;  %v3651_v13 = vmul.u32 %v11419_v19, %v3635_v6 }
 0x39d   : > { %v8579_v4 = vpop.eup %8578  ;;  %vm3653_vm8 = vc.u32 %v11468_v52, %v11454_v26  ;;  %vm3919_vm11 = vcmp.gt.s32.totalorder %v3918_v56, 0  ;;  %v3793_v10 = vadd.s32 3, %v3789_v48  ;;  %v3915_v19 = vand.u32 8388607, %v3908_v28 }
 0x39e   : > { %v8581_v5 = vpop.eup %8580  ;;  %v3488_v63 = vxor.u32 2147483648, %v8579_v4  ;;  %v3775_v15 = vor.u32 %v3774_v61, %v3773_v22  ;;  %v3778_v29 = vshll.u32 %v3777_v62, 23  ;;  %v3655_v60 = vsel %vm3653_vm8, %v3654_v37, %v11455_v24 }
 0x39f   : > { %v3485_v55 = vxor.u32 2147483648, %v8581_v5  ;;  %v3656_v3 = vadd.s32 %v3655_v60, %v3651_v13  ;;  %v3920_v7 = vsel %vm3919_vm11, %v3918_v56, 0  ;;  %v3807_v27 = vand.u32 2139095040, %v11477_v30 }
 0x3a0   : > { %v3489_v31 = vsel %vm3487_vm10, %v3488_v63, %v8581_v5  ;;  %v3779_v40 = vor.u32 4788187, %v3778_v29  ;;  %vm3483_vm12 = vcmp.lt.s32.totalorder %v11410_v38, 2  ;;  %v3922_v23 = vand.u32 31, %v3920_v7 }
 0x3a1   : > { %v3486_v35 = vsel %vm3484_vm7, %v8579_v4, %v3485_v55  ;;  %v3657_v47 = vadd.s32 536870912, %v3656_v3  ;;  %vm3480_vm15 = vweird.f32 %v11156_v16  ;;  %v3782_v43 = vcvt.s32.f32 %v3775_v15 }
 0x3a2   : > { %v3490_v59 = vsel %vm3483_vm12, %v3486_v35, %v3489_v31  ;;  %v3780_v49 = vand.u32 2147483647, %v3779_v40  ;;  %v3923_v21 = vsub.s32 32, %v3922_v23  ;;  %v11497_v11 = vand.u32 3, %v3793_v10 }
 0x3a3   : > { %v3491_v53 = vsel %vm3480_vm15, nan, %v3490_v59  ;;  %v11494_v33 = vshrl.u32 %v3657_v47, 30  ;;  %v3916_v36 = vor.u32 8388608, %v3915_v19  ;;  %v3808_v24 = vshrl.u32 %v3807_v27, 23 }
 0x3a4   : > { %7778 = vst [vmem:[%s9477_s9 + $0xb0] sm:$0xff] %v3491_v53  ;;  %v3783_v39 = vmul.f32 %v3782_v43, %v3780_v49  ;;  %v3925_v12 = vshll.u32 %v14972_v41, %v3922_v23  ;;  %v3926_v57 = vshrl.u32 %v14973_v34, %v3923_v21  ;;  %v3928_v16 = vshll.u32 %v14973_v34, %v3922_v23 }
 0x3a5   : > { %v3659_v38 = vshll.u32 %v11494_v33, 30  ;;  %v3929_v17 = vshrl.u32 %v14974_v14, %v3923_v21  ;;  %v3932_v51 = vshrl.u32 %v14975_v45, %v3923_v21  ;;  %v3935_v54 = vshrl.u32 %v14976_v58, %v3923_v21 }
 0x3a6   : > { %v3784_v20 = vxor.u32 2147483648, %v3783_v39  ;;  %v3921_v32 = vshrl.u32 %v3920_v7, 5  ;;  %v3931_v44 = vshll.u32 %v14974_v14, %v3922_v23  ;;  %v3934_v1 = vshll.u32 %v14975_v45, %v3922_v23 }
 0x3a7   : > { %v11506_v25 = vsub.s32 %v3656_v3, %v3659_v38  ;;  %v3927_v6 = vor.u32 %v3926_v57, %v3925_v12  ;;  %v3930_v37 = vor.u32 %v3929_v17, %v3928_v16  ;;  %v11512_v56 = vshll.u32 %v3916_v36, 8 }
 0x3a8   : > { %v3785_v42 = vsel %vm3702_vm13, %v3784_v20, %v3783_v39  ;;  %v3933_v62 = vor.u32 %v3932_v51, %v3931_v44  ;;  %v3936_v48 = vor.u32 %v3935_v54, %v3934_v1  ;;  %v3937_v4 = vshll.u32 %v14976_v58, %v3922_v23 }
 0x3a9   : > { %v3788_v22 = vsel %vm11433_vm3, %v11204_v8, %v3785_v42  ;;  %v3662_v61 = vsub.s32 0, %v11506_v25  ;;  %v3938_v13 = vshrl.u32 %v14980_v46, %v3923_v21  ;;  %v8022_v5 = vadd.s32 4294967169, %v3808_v24 }
 0x3aa   : > { %8582 = vcosq.f32 %v3788_v22  ;;  %vm3598_vm2 = vcmp.lt.s32.totalorder %v11303_v18, 0  ;;  %vm3940_vm14 = vcmp.lt.s32.totalorder %v3921_v32, 1  ;;  %vm3943_vm13 = vcmp.lt.s32.totalorder %v3921_v32, 4 }
 0x3ab   : > { %8584 = vsinq.f32 %v3788_v22  ;;  %v8015_v63 = vmin.u32 %v3662_v61, %v11506_v25  ;;  %v3939_v15 = vor.u32 %v3938_v13, %v3937_v4  ;;  %vm3941_vm1 = vcmp.lt.s32.totalorder %v3921_v32, 2 }
 0x3ac   : > { %v3948_v9 = vsel %vm3940_vm14, %v3927_v6, %v3930_v37  ;;  %v3949_v29 = vsel %vm3943_vm13, %v3936_v48, 920167782  ;;  %v3924_v55 = vshrl.u32 %v14972_v41, %v3923_v21  ;;  %vm3942_vm5 = vcmp.lt.s32.totalorder %v3921_v32, 3 }
 0x3ad   : > { %v3664_v60 = vclz %v8015_v63  ;;  %v3945_v10 = vsel %vm3943_vm13, %v3933_v62, 2102212464  ;;  %v3682_v3 = vsub.s32 4, %v11494_v33  ;;  %v3950_v7 = vsel %vm3942_vm5, %v3933_v62, %v3949_v29 }
 0x3ae   : > { %v3952_v31 = vsel %vm3940_vm14, %v3930_v37, %v3933_v62  ;;  %v3953_v40 = vsel %vm3943_vm13, %v3939_v15, 1326507024  ;;  %vm11528_vm3 = vcmp.le.f32.partialorder %v3596_v0, 0.7853982  ;;  %v3944_v35 = vsel %vm3940_vm14, %v3924_v55, %v3927_v6 }
 0x3af   : > { %v8016_v27 = vadd.s32 4294967294, %v3664_v60  ;;  %v3951_v47 = vsel %vm3941_vm1, %v3948_v9, %v3950_v7  ;;  %v3954_v23 = vsel %vm3942_vm5, %v3936_v48, %v3953_v40  ;;  %v3946_v59 = vsel %vm3942_vm5, %v3930_v37, %v3945_v10 }
 0x3b0   : > { %v3955_v49 = vsel %vm3941_vm1, %v3952_v31, %v3954_v23  ;;  %v11536_v43 = vmul.u32.u64.low %v11512_v56, %v3951_v47  ;;  %v11537_v53 = vmul.u32.u64.high %v11512_v56, %v3951_v47, %v11536_v43  ;;  %vm3795_vm4 = vcmp.lt.s32.totalorder %v11497_v11, 2 }
 0x3b1   : > { %vm8017_vm6 = vcmp.lt.s32.totalorder %v8016_v27, 0  ;;  %v11542_v0 = vmul.u32.u64.low %v11512_v56, %v3955_v49  ;;  %v11543_v21 = vmul.u32.u64.high %v11512_v56, %v3955_v49, %v11542_v0  ;;  %vm3796_vm7 = vcmp.eq.s32.totalorder %v11497_v11, 0 }
 0x3b2   : > { %vm3799_vm9 = vcmp.eq.s32.totalorder %v11497_v11, 2  ;;  %v3667_v39 = vsel %vm8017_vm6, 0, %v8016_v27  ;;  %v3814_v36 = vadd.s32 1, %v8022_v5  ;;  %v3652_v24 = vadd.s32 %v11454_v26, %v11468_v52  ;;  %v793_v27 = vpop.permute.xlu1 %792 }
 0x3b3   : > { %v3668_v38 = vsub.s32 32, %v3667_v39  ;;  %v3672_v12 = vsub.s32 4294967266, %v3667_v39  ;;  %v3947_v57 = vsel %vm3941_vm1, %v3944_v35, %v3946_v59  ;;  %v3683_v20 = vsel %vm3598_vm2, %v3682_v3, %v11494_v33 }
 0x3b4   : > { %v8583_v16 = vpop.eup %8582  ;;  %v3966_v17 = vadd.s32 1, %v11537_v53  ;;  %v3804_v51 = vand.u32 2147483647, %v11477_v30  ;;  %vm3815_vm10 = vcmp.gt.s32.totalorder %v3814_v36, 0  ;;  %v3669_v1 = vshll.u32 %v11506_v25, %v3667_v39 }
 0x3b5   : > { %v8585_v54 = vpop.eup %8584  ;;  %v3800_v44 = vxor.u32 2147483648, %v8583_v16  ;;  %v3670_v42 = vshrl.u32 %v3652_v24, %v3668_v38  ;;  %v3673_v26 = vadd.s32 127, %v3672_v12  ;;  %v3963_v32 = vmul.u32 %v11512_v56, %v3947_v57  ;;  %v15044_v12 = vld [vmem:[#allocation14_spill] sm:$0xff] }
 0x3b6   : > { %v3797_v52 = vxor.u32 2147483648, %v8585_v54  ;;  %vm3965_vm8 = vc.u32 %v11543_v21, %v11536_v43  ;;  %v3816_v6 = vsel %vm3815_vm10, %v3814_v36, 0  ;;  %v3685_v62 = vsel %vm11528_vm3, 0, %v3683_v20 }
 0x3b7   : > { %v3801_v33 = vsel %vm3799_vm9, %v3800_v44, %v8585_v54  ;;  %v3671_v37 = vor.u32 %v3670_v42, %v3669_v1  ;;  %v3674_v22 = vshll.u32 %v3673_v26, 23  ;;  %v3967_v61 = vsel %vm3965_vm8, %v3966_v17, %v11537_v53 }
 0x3b8   : > { %v3798_v25 = vsel %vm3796_vm7, %v8583_v16, %v3797_v52  ;;  %v3968_v48 = vadd.s32 %v3967_v61, %v3963_v32  ;;  %v3818_v56 = vand.u32 31, %v3816_v6  ;;  %vm3792_vm11 = vweird.f32 %v11204_v8  ;;  %v11603_v32 = vld [vmem:[%s14908_s2] ss:$0 sm:$0xff] }
 0x3b9   : > { %v3802_v4 = vsel %vm3795_vm4, %v3798_v25, %v3801_v33  ;;  %v3675_v13 = vor.u32 4788187, %v3674_v22  ;;  %v3678_v29 = vcvt.s32.f32 %v3671_v37  ;;  %v3689_v60 = vadd.s32 3, %v3685_v62 }
 0x3ba   : > { %v3803_v5 = vsel %vm3792_vm11, nan, %v3802_v4  ;;  %v3969_v63 = vadd.s32 536870912, %v3968_v48  ;;  %v3819_v15 = vsub.s32 32, %v3818_v56  ;;  %v3811_v10 = vand.u32 8388607, %v3804_v51 }
 0x3bb   : > { %7781 = vst [vmem:[%s9477_s9 + $0xc8] sm:$0xff] %v3803_v5  ;;  %v3676_v9 = vand.u32 2147483647, %v3675_v13  ;;  %v3817_v3 = vshrl.u32 %v3816_v6, 5  ;;  %v3821_v47 = vshll.u32 %v14972_v41, %v3818_v56  ;;  %v3824_v23 = vshll.u32 %v14973_v34, %v3818_v56 }
 0x3bc   : > { %v11570_v55 = vshrl.u32 %v3969_v63, 30  ;;  %v3822_v7 = vshrl.u32 %v14973_v34, %v3819_v15  ;;  %v3825_v11 = vshrl.u32 %v14974_v14, %v3819_v15  ;;  %v3828_v31 = vshrl.u32 %v14975_v45, %v3819_v15 }
 0x3bd   : > { %v3679_v8 = vmul.f32 %v3678_v29, %v3676_v9  ;;  %v3831_v40 = vshrl.u32 %v14976_v58, %v3819_v15  ;;  %v3827_v59 = vshll.u32 %v14974_v14, %v3818_v56  ;;  %v3830_v53 = vshll.u32 %v14975_v45, %v3818_v56 }
 0x3be   : > { %v3971_v35 = vshll.u32 %v11570_v55, 30  ;;  %v3833_v0 = vshll.u32 %v14976_v58, %v3818_v56  ;;  %v3834_v39 = vshrl.u32 %v14980_v46, %v3819_v15  ;;  %v3823_v24 = vor.u32 %v3822_v7, %v3821_v47  ;;  %v15047_v47 = vld [vmem:[#allocation15_spill] sm:$0xff] }
 0x3bf   : > { %v3680_v49 = vxor.u32 2147483648, %v3679_v8  ;;  %v3829_v38 = vor.u32 %v3828_v31, %v3827_v59  ;;  %v994_v57 = vsel %vm580_vm0, %v793_v27, %v15044_v12  ;;  %v3826_v20 = vor.u32 %v3825_v11, %v3824_v23 }
 0x3c0   : > { %v11585_v36 = vsub.s32 %v3968_v48, %v3971_v35  ;;  %v3832_v17 = vor.u32 %v3831_v40, %v3830_v53  ;;  %v3835_v54 = vor.u32 %v3834_v39, %v3833_v0  ;;  %v11595_v1 = vand.u32 3, %v3689_v60 }
 0x3c1   : > { %v3681_v16 = vsel %vm3598_vm2, %v3680_v49, %v3679_v8  ;;  %v3812_v26 = vor.u32 8388608, %v3811_v10  ;;  %vm3910_vm12 = vcmp.lt.s32.totalorder %v11399_v50, 0  ;;  %v3820_v52 = vshrl.u32 %v14972_v41, %v3819_v15  ;;  %v788_v10 = vpop.permute.xlu0 %787 }
 0x3c2   : > { %v3684_v44 = vsel %vm11528_vm3, %v11303_v18, %v3681_v16  ;;  %v3974_v42 = vsub.s32 0, %v11585_v36  ;;  %vm3839_vm15 = vcmp.lt.s32.totalorder %v3817_v3, 4  ;;  %v11606_v6 = vmul.f32 %v11603_v32, %v994_v57 }
 0x3c3   : > { %8586 = vcosq.f32 %v3684_v44  ;;  %vm3836_vm2 = vcmp.lt.s32.totalorder %v3817_v3, 1  ;;  %v3841_v33 = vsel %vm3839_vm15, %v3829_v38, 2102212464  ;;  %v3845_v22 = vsel %vm3839_vm15, %v3832_v17, 920167782 }
 0x3c4   : > { %8588 = vsinq.f32 %v3684_v44  ;;  %v8027_v19 = vmin.u32 %v3974_v42, %v11585_v36  ;;  %v3844_v37 = vsel %vm3836_vm2, %v3823_v24, %v3826_v20  ;;  %v3848_v61 = vsel %vm3836_vm2, %v3826_v20, %v3829_v38 }
 0x3c5   : > { %v3849_v25 = vsel %vm3839_vm15, %v3835_v54, 1326507024  ;;  %vm11611_vm14 = vcmp.le.f32.partialorder %v3908_v28, 0.7853982  ;;  %vm3837_vm13 = vcmp.lt.s32.totalorder %v3817_v3, 2  ;;  %vm3838_vm1 = vcmp.lt.s32.totalorder %v3817_v3, 3 }
 0x3c6   : > { %v3976_v48 = vclz %v8027_v19  ;;  %v3852_v56 = vshll.u32 %v3812_v26, 8  ;;  %v3840_v4 = vsel %vm3836_vm2, %v3820_v52, %v3823_v24  ;;  %v3842_v13 = vsel %vm3838_vm1, %v3826_v20, %v3841_v33 }
 0x3c7   : > { %v3846_v5 = vsel %vm3838_vm1, %v3829_v38, %v3845_v22  ;;  %v3850_v63 = vsel %vm3838_vm1, %v3832_v17, %v3849_v25  ;;  %v3994_v9 = vsub.s32 4, %v11570_v55  ;;  %vm3692_vm5 = vcmp.eq.s32.totalorder %v11595_v1, 0 }
 0x3c8   : > { %v8028_v15 = vadd.s32 4294967294, %v3976_v48  ;;  %v3847_v29 = vsel %vm3837_vm13, %v3844_v37, %v3846_v5  ;;  %v3851_v60 = vsel %vm3837_vm13, %v3848_v61, %v3850_v63  ;;  %v3843_v31 = vsel %vm3837_vm13, %v3840_v4, %v3842_v13  ;;  %v803_v5 = vpop.permute.xlu1 %802 }
 0x3c9   : > { %v11618_v28 = vmul.u32.u64.low %v3852_v56, %v3851_v60  ;;  %v11619_v7 = vmul.u32.u64.high %v3852_v56, %v3851_v60, %v11618_v28  ;;  %v11621_v8 = vmul.u32.u64.low %v3852_v56, %v3847_v29  ;;  %v11622_v11 = vmul.u32.u64.high %v3852_v56, %v3847_v29, %v11621_v8 }
 0x3ca   : > { %vm8029_vm3 = vcmp.lt.s32.totalorder %v8028_v15, 0  ;;  %v4119_v40 = vand.u32 2139095040, %v11606_v6  ;;  %vm3695_vm4 = vcmp.eq.s32.totalorder %v11595_v1, 2  ;;  %v3964_v27 = vadd.s32 %v11536_v43, %v11543_v21  ;;  %v15048_v28 = vld [vmem:[#allocation16_spill] sm:$0xff] }
 0x3cb   : > { %v3979_v35 = vsel %vm8029_vm3, 0, %v8028_v15  ;;  %v993_v23 = vsel %vm580_vm0, %v788_v10, %v15047_v47  ;;  %v3995_v53 = vsel %vm3910_vm12, %v3994_v9, %v11570_v55  ;;  %v3859_v24 = vmul.u32 %v3852_v56, %v3843_v31 }
 0x3cc   : > { %v3980_v59 = vsub.s32 32, %v3979_v35  ;;  %v3984_v49 = vsub.s32 4294967266, %v3979_v35  ;;  %v4120_v3 = vshrl.u32 %v4119_v40, 23  ;;  %v3981_v39 = vshll.u32 %v11585_v36, %v3979_v35 }
 0x3cd   : > { %v8587_v0 = vpop.eup %8586  ;;  %vm3861_vm6 = vc.u32 %v11619_v7, %v11621_v8  ;;  %v3862_v43 = vadd.s32 1, %v11622_v11  ;;  %v3997_v17 = vsel %vm11611_vm14, 0, %v3995_v53  ;;  %v4116_v54 = vand.u32 2147483647, %v11606_v6 }
 0x3ce   : > { %v8589_v21 = vpop.eup %8588  ;;  %v3696_v38 = vxor.u32 2147483648, %v8587_v0  ;;  %v3982_v12 = vshrl.u32 %v3964_v27, %v3980_v59  ;;  %v3985_v57 = vadd.s32 127, %v3984_v49  ;;  %v8034_v16 = vadd.s32 4294967169, %v4120_v3 }
 0x3cf   : > { %v3693_v20 = vxor.u32 2147483648, %v8589_v21  ;;  %v3863_v55 = vsel %vm3861_vm6, %v3862_v43, %v11622_v11  ;;  %vm3688_vm7 = vweird.f32 %v11303_v18  ;;  %vm3691_vm9 = vcmp.lt.s32.totalorder %v11595_v1, 2 }
 0x3d0   : > { %v3697_v36 = vsel %vm3695_vm4, %v3696_v38, %v8589_v21  ;;  %v3983_v44 = vor.u32 %v3982_v12, %v3981_v39  ;;  %v3986_v42 = vshll.u32 %v3985_v57, 23  ;;  %v3864_v26 = vadd.s32 %v3863_v55, %v3859_v24 }
 0x3d1   : > { %v3694_v52 = vsel %vm3692_vm5, %v8587_v0, %v3693_v20  ;;  %v4126_v19 = vadd.s32 1, %v8034_v16  ;;  %v4001_v22 = vadd.s32 3, %v3997_v17  ;;  %v4123_v48 = vand.u32 8388607, %v4116_v54 }
 0x3d2   : > { %v3698_v33 = vsel %vm3691_vm9, %v3694_v52, %v3697_v36  ;;  %v3987_v37 = vor.u32 4788187, %v3986_v42  ;;  %v3865_v61 = vadd.s32 536870912, %v3864_v26  ;;  %v11654_v56 = vmul.f32 %v11603_v32, %v993_v23 }
 0x3d3   : > { %v3699_v25 = vsel %vm3688_vm7, nan, %v3698_v33  ;;  %vm4127_vm10 = vcmp.gt.s32.totalorder %v4126_v19, 0  ;;  %v3990_v4 = vcvt.s32.f32 %v3983_v44  ;;  %v11660_v29 = vand.u32 3, %v4001_v22 }
 0x3d4   : > { %7780 = vst [vmem:[%s9477_s9 + $0xc0] sm:$0xff] %v3699_v25  ;;  %v3988_v18 = vand.u32 2147483647, %v3987_v37  ;;  %v11657_v13 = vshrl.u32 %v3865_v61, 30  ;;  %v4128_v1 = vsel %vm4127_vm10, %v4126_v19, 0  ;;  %v4124_v60 = vor.u32 8388608, %v4123_v48 }
 0x3d5   : > { %v4130_v63 = vand.u32 31, %v4128_v1  ;;  %v11665_v11 = vsel %vm580_vm0, %v803_v5, %v15048_v28  ;;  %v11669_v27 = vshrl.u32 %v4128_v1, 5  ;;  %v4015_v35 = vand.u32 2139095040, %v11654_v56 }
 0x3d6   : > { %v3991_v15 = vmul.f32 %v3990_v4, %v3988_v18  ;;  %v3867_v9 = vshll.u32 %v11657_v13, 30  ;;  %vm3806_vm8 = vcmp.lt.s32.totalorder %v11477_v30, 0  ;;  %v3860_v62 = vadd.s32 %v11621_v8, %v11619_v7 }
 0x3d7   : > { %v4131_v10 = vsub.s32 32, %v4130_v63  ;;  %v4133_v47 = vshll.u32 %v14972_v41, %v4130_v63  ;;  %v4136_v59 = vshll.u32 %v14973_v34, %v4130_v63  ;;  %v4139_v0 = vshll.u32 %v14974_v14, %v4130_v63 }
 0x3d8   : > { %v3992_v31 = vxor.u32 2147483648, %v3991_v15  ;;  %v11667_v40 = vsub.s32 %v3864_v26, %v3867_v9  ;;  %v4142_v21 = vshll.u32 %v14975_v45, %v4130_v63  ;;  %v4145_v17 = vshll.u32 %v14976_v58, %v4130_v63 }
 0x3d9   : > { %v4134_v23 = vshrl.u32 %v14973_v34, %v4131_v10  ;;  %v4137_v49 = vshrl.u32 %v14974_v14, %v4131_v10  ;;  %v4140_v39 = vshrl.u32 %v14975_v45, %v4131_v10  ;;  %v4143_v38 = vshrl.u32 %v14976_v58, %v4131_v10 }
 0x3da   : > { %v3993_v53 = vsel %vm3910_vm12, %v3992_v31, %v3991_v15  ;;  %v3870_v3 = vsub.s32 0, %v11667_v40  ;;  %v4146_v55 = vshrl.u32 %v14980_v46, %v4131_v10  ;;  %v11692_v44 = vshll.u32 %v4124_v60, 8 }
 0x3db   : > { %v3996_v24 = vsel %vm11611_vm14, %v11399_v50, %v3993_v53  ;;  %v4135_v43 = vor.u32 %v4134_v23, %v4133_v47  ;;  %v4138_v57 = vor.u32 %v4137_v49, %v4136_v59  ;;  %v4141_v16 = vor.u32 %v4140_v39, %v4139_v0 }
 0x3dc   : > { %8590 = vcosq.f32 %v3996_v24  ;;  %v8023_v12 = vmin.u32 %v3870_v3, %v11667_v40  ;;  %v4144_v20 = vor.u32 %v4143_v38, %v4142_v21  ;;  %v4012_v42 = vand.u32 2147483647, %v11654_v56 }
 0x3dd   : > { %8592 = vsinq.f32 %v3996_v24  ;;  %v4132_v26 = vshrl.u32 %v14972_v41, %v4131_v10  ;;  %v4147_v52 = vor.u32 %v4146_v55, %v4145_v17  ;;  %vm4148_vm11 = vcmp.lt.s32.totalorder %v11669_v27, 1 }
 0x3de   : > { %v3872_v36 = vclz %v8023_v12  ;;  %v4016_v19 = vshrl.u32 %v4015_v35, 23  ;;  %vm4007_vm12 = vcmp.eq.s32.totalorder %v11660_v29, 2  ;;  %vm4150_vm15 = vcmp.lt.s32.totalorder %v11669_v27, 3 }
 0x3df   : > { %vm4151_vm2 = vcmp.lt.s32.totalorder %v11669_v27, 4  ;;  %v4156_v7 = vsel %vm4148_vm11, %v4135_v43, %v4138_v57  ;;  %vm4004_vm14 = vcmp.eq.s32.totalorder %v11660_v29, 0  ;;  %v4160_v22 = vsel %vm4148_vm11, %v4138_v57, %v4141_v16 }
 0x3e0   : > { %v8024_v33 = vadd.s32 4294967294, %v3872_v36  ;;  %v4153_v8 = vsel %vm4151_vm2, %v4141_v16, 2102212464  ;;  %v4157_v37 = vsel %vm4151_vm2, %v4144_v20, 920167782  ;;  %vm4003_vm13 = vcmp.lt.s32.totalorder %v11660_v29, 2 }
 0x3e1   : > { %v4161_v61 = vsel %vm4151_vm2, %v4147_v52, 1326507024  ;;  %vm11708_vm1 = vcmp.le.f32.partialorder %v3804_v51, 0.7853982  ;;  %vm4149_vm3 = vcmp.lt.s32.totalorder %v11669_v27, 2  ;;  %v4158_v48 = vsel %vm4150_vm15, %v4141_v16, %v4157_v37 }
 0x3e2   : > { %vm8025_vm5 = vcmp.lt.s32.totalorder %v8024_v33, 0  ;;  %v4162_v18 = vsel %vm4150_vm15, %v4144_v20, %v4161_v61  ;;  %vm4000_vm4 = vweird.f32 %v11399_v50  ;;  %v3890_v1 = vsub.s32 4, %v11657_v13 }
 0x3e3   : > { %v3875_v4 = vsel %vm8025_vm5, 0, %v8024_v33  ;;  %v4159_v51 = vsel %vm4149_vm3, %v4156_v7, %v4158_v48  ;;  %v4163_v5 = vsel %vm4149_vm3, %v4160_v22, %v4162_v18  ;;  %v4152_v9 = vsel %vm4148_vm11, %v4132_v26, %v4135_v43 }
 0x3e4   : > { %v3876_v63 = vsub.s32 32, %v3875_v4  ;;  %v3880_v15 = vsub.s32 4294967266, %v3875_v4  ;;  %v4154_v60 = vsel %vm4150_vm15, %v4138_v57, %v4153_v8  ;;  %v3877_v23 = vshll.u32 %v11667_v40, %v3875_v4 }
 0x3e5   : > { %v11728_v10 = vmul.u32.u64.low %v11692_v44, %v4163_v5  ;;  %v11729_v28 = vmul.u32.u64.high %v11692_v44, %v4163_v5, %v11728_v10  ;;  %v11732_v31 = vmul.u32.u64.low %v11692_v44, %v4159_v51  ;;  %v11733_v35 = vmul.u32.u64.high %v11692_v44, %v4159_v51, %v11732_v31 }
 0x3e6   : > { %v8591_v47 = vpop.eup %8590  ;;  %v3878_v59 = vshrl.u32 %v3860_v62, %v3876_v63  ;;  %v3881_v49 = vadd.s32 127, %v3880_v15  ;;  %v8030_v53 = vadd.s32 4294967169, %v4016_v19  ;;  %v3891_v39 = vsel %vm3806_vm8, %v3890_v1, %v11657_v13 }
 0x3e7   : > { %v8593_v3 = vpop.eup %8592  ;;  %v4008_v0 = vxor.u32 2147483648, %v8591_v47  ;;  %v4155_v24 = vsel %vm4149_vm3, %v4152_v9, %v4154_v60  ;;  %v11744_v43 = vand.u32 8388607, %v4012_v42  ;;  %vm4173_vm6 = vc.u32 %v11729_v28, %v11732_v31 }
 0x3e8   : > { %v4005_v21 = vxor.u32 2147483648, %v8593_v3  ;;  %v3879_v38 = vor.u32 %v3878_v59, %v3877_v23  ;;  %v3882_v12 = vshll.u32 %v3881_v49, 23  ;;  %v4022_v40 = vadd.s32 1, %v8030_v53 }
 0x3e9   : > { %v4009_v57 = vsel %vm4007_vm12, %v4008_v0, %v8593_v3  ;;  %v4174_v13 = vadd.s32 1, %v11733_v35  ;;  %v11753_v27 = vmul.f32 %v11603_v32, %v11665_v11  ;;  %v4171_v17 = vmul.u32 %v11692_v44, %v4155_v24 }
 0x3ea   : > { %v4006_v16 = vsel %vm4004_vm14, %v8591_v47, %v4005_v21  ;;  %v3883_v20 = vor.u32 4788187, %v3882_v12  ;;  %vm4023_vm7 = vcmp.gt.s32.totalorder %v4022_v40, 0  ;;  %v3893_v62 = vsel %vm11708_vm1, 0, %v3891_v39 }
 0x3eb   : > { %v4010_v55 = vsel %vm4003_vm13, %v4006_v16, %v4009_v57  ;;  %v4175_v36 = vsel %vm4173_vm6, %v4174_v13, %v11733_v35  ;;  %v4024_v26 = vsel %vm4023_vm7, %v4022_v40, 0  ;;  %v3886_v19 = vcvt.s32.f32 %v3879_v38 }
 0x3ec   : > { %v4011_v11 = vsel %vm4000_vm4, nan, %v4010_v55  ;;  %v3884_v52 = vand.u32 2147483647, %v3883_v20  ;;  %v4176_v33 = vadd.s32 %v4175_v36, %v4171_v17  ;;  %v4026_v7 = vand.u32 31, %v4024_v26 }
 0x3ed   : > { %7783 = vst [vmem:[%s9477_s9 + $0xd8] sm:$0xff] %v4011_v11  ;;  %v4020_v37 = vor.u32 8388608, %v11744_v43  ;;  %v3897_v29 = vadd.s32 3, %v3893_v62  ;;  %v4025_v22 = vshrl.u32 %v4024_v26, 5  ;;  %v4327_v48 = vand.u32 2139095040, %v11753_v27 }
 0x3ee   : > { %v3887_v8 = vmul.f32 %v3886_v19, %v3884_v52  ;;  %v4177_v44 = vadd.s32 536870912, %v4176_v33  ;;  %v4027_v61 = vsub.s32 32, %v4026_v7  ;;  %v4029_v50 = vshll.u32 %v14972_v41, %v4026_v7 }
 0x3ef   : > { %v4032_v1 = vshll.u32 %v14973_v34, %v4026_v7  ;;  %v4035_v63 = vshll.u32 %v14974_v14, %v4026_v7  ;;  %v4038_v10 = vshll.u32 %v14975_v45, %v4026_v7  ;;  %v11784_v53 = vand.u32 3, %v3897_v29 }
 0x3f0   : > { %v3888_v18 = vxor.u32 2147483648, %v3887_v8  ;;  %v11768_v4 = vshrl.u32 %v4177_v44, 30  ;;  %v4030_v51 = vshrl.u32 %v14973_v34, %v4027_v61  ;;  %v4033_v5 = vshrl.u32 %v14974_v14, %v4027_v61 }
 0x3f1   : > { %v4036_v15 = vshrl.u32 %v14975_v45, %v4027_v61  ;;  %v4039_v35 = vshrl.u32 %v14976_v58, %v4027_v61  ;;  %v4041_v39 = vshll.u32 %v14976_v58, %v4026_v7  ;;  %v4042_v24 = vshrl.u32 %v14980_v46, %v4027_v61 }
 0x3f2   : > { %v3889_v9 = vsel %vm3806_vm8, %v3888_v18, %v3887_v8  ;;  %v4179_v60 = vshll.u32 %v11768_v4, 30  ;;  %v4031_v23 = vor.u32 %v4030_v51, %v4029_v50  ;;  %v4034_v59 = vor.u32 %v4033_v5, %v4032_v1 }
 0x3f3   : > { %v3892_v47 = vsel %vm11708_vm1, %v11477_v30, %v3889_v9  ;;  %v4037_v49 = vor.u32 %v4036_v15, %v4035_v63  ;;  %v4040_v0 = vor.u32 %v4039_v35, %v4038_v10  ;;  %v4328_v43 = vshrl.u32 %v4327_v48, 23 }
 0x3f4   : > { %8594 = vcosq.f32 %v3892_v47  ;;  %v11786_v3 = vsub.s32 %v4176_v33, %v4179_v60  ;;  %vm4118_vm9 = vcmp.lt.s32.totalorder %v11606_v6, 0  ;;  %vm4044_vm10 = vcmp.lt.s32.totalorder %v4025_v22, 1 }
 0x3f5   : > { %8596 = vsinq.f32 %v3892_v47  ;;  %vm4046_vm8 = vcmp.lt.s32.totalorder %v4025_v22, 3  ;;  %vm4047_vm11 = vcmp.lt.s32.totalorder %v4025_v22, 4  ;;  %v4043_v21 = vor.u32 %v4042_v24, %v4041_v39 }
 0x3f6   : > { %v4182_v25 = vsub.s32 0, %v11786_v3  ;;  %v4049_v38 = vsel %vm4047_vm11, %v4037_v49, 2102212464  ;;  %v4052_v12 = vsel %vm4044_vm10, %v4031_v23, %v4034_v59  ;;  %v4053_v40 = vsel %vm4047_vm11, %v4040_v0, 920167782 }
 0x3f7   : > { %v4028_v13 = vshrl.u32 %v14972_v41, %v4027_v61  ;;  %vm4045_vm12 = vcmp.lt.s32.totalorder %v4025_v22, 2  ;;  %v4054_v16 = vsel %vm4046_vm8, %v4037_v49, %v4053_v40  ;;  %v4056_v17 = vsel %vm4044_vm10, %v4034_v59, %v4037_v49  ;;  %v15053_v40 = vld [vmem:[#allocation17_spill] sm:$0xff] }
 0x3f8   : > { %v8035_v57 = vmin.u32 %v4182_v25, %v11786_v3  ;;  %v4055_v20 = vsel %vm4045_vm12, %v4052_v12, %v4054_v16  ;;  %v4057_v55 = vsel %vm4047_vm11, %v4043_v21, 1326507024  ;;  %v4060_v62 = vshll.u32 %v4020_v37, 8 }
 0x3f9   : > { %vm3899_vm15 = vcmp.lt.s32.totalorder %v11784_v53, 2  ;;  %vm11801_vm2 = vcmp.le.f32.partialorder %v4116_v54, 0.7853982  ;;  %v4048_v11 = vsel %vm4044_vm10, %v4028_v13, %v4031_v23  ;;  %v4050_v52 = vsel %vm4046_vm8, %v4034_v59, %v4049_v38  ;;  %v798_v59 = vpop.permute.xlu0 %797 }
 0x3fa   : > { %v4184_v26 = vclz %v8035_v57  ;;  %v4324_v19 = vand.u32 2147483647, %v11753_v27  ;;  %vm3896_vm14 = vweird.f32 %v11477_v30  ;;  %v4202_v33 = vsub.s32 4, %v11768_v4 }
 0x3fb   : > { %v4058_v7 = vsel %vm4046_vm8, %v4040_v0, %v4057_v55  ;;  %v11811_v8 = vmul.u32.u64.low %v4060_v62, %v4055_v20  ;;  %v11812_v44 = vmul.u32.u64.high %v4060_v62, %v4055_v20, %v11811_v8  ;;  %vm3900_vm13 = vcmp.eq.s32.totalorder %v11784_v53, 0 }
 0x3fc   : > { %v8036_v54 = vadd.s32 4294967294, %v4184_v26  ;;  %v4059_v37 = vsel %vm4045_vm12, %v4056_v17, %v4058_v7  ;;  %v8042_v29 = vadd.s32 4294967169, %v4328_v43  ;;  %vm3903_vm1 = vcmp.eq.s32.totalorder %v11784_v53, 2 }
 0x3fd   : > { %v4051_v61 = vsel %vm4045_vm12, %v4048_v11, %v4050_v52  ;;  %v11819_v48 = vmul.u32.u64.low %v4060_v62, %v4059_v37  ;;  %v11820_v18 = vmul.u32.u64.high %v4060_v62, %v4059_v37, %v11819_v48  ;;  %v4172_v1 = vadd.s32 %v11732_v31, %v11729_v28 }
 0x3fe   : > { %v8595_v50 = vpop.eup %8594  ;;  %vm8037_vm5 = vcmp.lt.s32.totalorder %v8036_v54, 0  ;;  %v4331_v51 = vand.u32 8388607, %v4324_v19  ;;  %v4334_v5 = vadd.s32 1, %v8042_v29  ;;  %v4203_v22 = vsel %vm4118_vm9, %v4202_v33, %v11768_v4 }
 0x3ff   : > { %v8597_v63 = vpop.eup %8596  ;;  %v3904_v15 = vxor.u32 2147483648, %v8595_v50  ;;  %v4187_v9 = vsel %vm8037_vm5, 0, %v8036_v54  ;;  %v4070_v60 = vadd.s32 1, %v11812_v44  ;;  %v4067_v23 = vmul.u32 %v4060_v62, %v4051_v61 }
 0x400   : > { %v3901_v10 = vxor.u32 2147483648, %v8597_v63  ;;  %v4188_v35 = vsub.s32 32, %v4187_v9  ;;  %v4192_v47 = vsub.s32 4294967266, %v4187_v9  ;;  %v4189_v31 = vshll.u32 %v11786_v3, %v4187_v9 }
 0x401   : > { %v3905_v28 = vsel %vm3903_vm1, %v3904_v15, %v8597_v63  ;;  %vm4069_vm3 = vc.u32 %v11820_v18, %v11811_v8  ;;  %vm4335_vm4 = vcmp.gt.s32.totalorder %v4334_v5, 0  ;;  %v4205_v43 = vsel %vm11801_vm2, 0, %v4203_v22 }
 0x402   : > { %v3902_v4 = vsel %vm3900_vm13, %v8595_v50, %v3901_v10  ;;  %v4190_v49 = vshrl.u32 %v4172_v1, %v4188_v35  ;;  %v4193_v0 = vadd.s32 127, %v4192_v47  ;;  %v4071_v39 = vsel %vm4069_vm3, %v4070_v60, %v11812_v44 }
 0x403   : > { %v3906_v24 = vsel %vm3899_vm15, %v3902_v4, %v3905_v28  ;;  %v4072_v3 = vadd.s32 %v4071_v39, %v4067_v23  ;;  %v4336_v25 = vsel %vm4335_vm4, %v4334_v5, 0  ;;  %v995_v57 = vsel %vm580_vm0, %v798_v59, %v15053_v40 }
 0x404   : > { %v3907_v21 = vsel %vm3896_vm14, nan, %v3906_v24  ;;  %v4191_v38 = vor.u32 %v4190_v49, %v4189_v31  ;;  %v4194_v12 = vshll.u32 %v4193_v0, 23  ;;  %v4338_v16 = vand.u32 31, %v4336_v25 }
 0x405   : > { %7782 = vst [vmem:[%s9477_s9 + $0xd0] sm:$0xff] %v3907_v21  ;;  %v4073_v13 = vadd.s32 536870912, %v4072_v3  ;;  %v4209_v53 = vadd.s32 3, %v4205_v43  ;;  %v4332_v55 = vor.u32 8388608, %v4331_v51  ;;  %v11849_v26 = vmul.f32 %v11603_v32, %v995_v57 }
 0x406   : > { %v4195_v20 = vor.u32 4788187, %v4194_v12  ;;  %v4339_v62 = vsub.s32 32, %v4338_v16  ;;  %v4198_v30 = vcvt.s32.f32 %v4191_v38  ;;  %v11851_v52 = vshrl.u32 %v4336_v25, 5  ;;  %v813_v12 = vpop.permute.xlu1 %812 }
 0x407   : > { %v4074_v17 = vshrl.u32 %v4073_v13, 30  ;;  %v4341_v33 = vshll.u32 %v14972_v41, %v4338_v16  ;;  %v4344_v54 = vshll.u32 %v14973_v34, %v4338_v16  ;;  %v4347_v37 = vshll.u32 %v14974_v14, %v4338_v16 }
 0x408   : > { %v4196_v11 = vand.u32 2147483647, %v4195_v20  ;;  %v4342_v44 = vshrl.u32 %v14973_v34, %v4339_v62  ;;  %v4345_v61 = vshrl.u32 %v14974_v14, %v4339_v62  ;;  %v4348_v48 = vshrl.u32 %v14975_v45, %v4339_v62 }
 0x409   : > { %v4075_v7 = vshll.u32 %v4074_v17, 30  ;;  %v4351_v50 = vshrl.u32 %v14976_v58, %v4339_v62  ;;  %v11860_v1 = vand.u32 3, %v4209_v53  ;;  %v4350_v5 = vshll.u32 %v14975_v45, %v4338_v16 }
 0x40a   : > { %v4199_v29 = vmul.f32 %v4198_v30, %v4196_v11  ;;  %v4354_v63 = vshrl.u32 %v14980_v46, %v4339_v62  ;;  %vm4014_vm6 = vcmp.lt.s32.totalorder %v11654_v56, 0  ;;  %v4343_v9 = vor.u32 %v4342_v44, %v4341_v33  ;;  %v15056_v33 = vld [vmem:[#allocation18_spill] sm:$0xff] }
 0x40b   : > { %v11862_v51 = vsub.s32 %v4072_v3, %v4075_v7  ;;  %v4346_v22 = vor.u32 %v4345_v61, %v4344_v54  ;;  %v4349_v60 = vor.u32 %v4348_v48, %v4347_v37  ;;  %v4352_v35 = vor.u32 %v4351_v50, %v4350_v5 }
 0x40c   : > { %v4200_v15 = vxor.u32 2147483648, %v4199_v29  ;;  %v4353_v47 = vshll.u32 %v14976_v58, %v4338_v16  ;;  %v11869_v23 = vshll.u32 %v4332_v55, 8  ;;  %v4340_v31 = vshrl.u32 %v14972_v41, %v4339_v62 }
 0x40d   : > { %v4078_v10 = vsub.s32 0, %v11862_v51  ;;  %vm4356_vm7 = vcmp.lt.s32.totalorder %v11851_v52, 1  ;;  %v4223_v59 = vand.u32 2139095040, %v11849_v26  ;;  %vm4359_vm10 = vcmp.lt.s32.totalorder %v11851_v52, 4 }
 0x40e   : > { %v4201_v28 = vsel %vm4118_vm9, %v4200_v15, %v4199_v29  ;;  %v4355_v0 = vor.u32 %v4354_v63, %v4353_v47  ;;  %vm11883_vm8 = vcmp.le.f32.partialorder %v4012_v42, 0.7853982  ;;  %v4361_v24 = vsel %vm4359_vm10, %v4349_v60, 2102212464 }
 0x40f   : > { %v4204_v4 = vsel %vm11801_vm2, %v11606_v6, %v4201_v28  ;;  %v8031_v49 = vmin.u32 %v4078_v10, %v11862_v51  ;;  %v4364_v43 = vsel %vm4356_vm7, %v4343_v9, %v4346_v22  ;;  %v4365_v36 = vsel %vm4359_vm10, %v4352_v35, 920167782 }
 0x410   : > { %8598 = vcosq.f32 %v4204_v4  ;;  %v4098_v25 = vsub.s32 4, %v4074_v17  ;;  %vm4358_vm9 = vcmp.lt.s32.totalorder %v11851_v52, 3  ;;  %vm4357_vm11 = vcmp.lt.s32.totalorder %v11851_v52, 2 }
 0x411   : > { %8600 = vsinq.f32 %v4204_v4  ;;  %v4080_v3 = vclz %v8031_v49  ;;  %v4360_v42 = vsel %vm4356_vm7, %v4340_v31, %v4343_v9  ;;  %v4366_v21 = vsel %vm4358_vm9, %v4349_v60, %v4365_v36 }
 0x412   : > { %v4368_v38 = vsel %vm4356_vm7, %v4346_v22, %v4349_v60  ;;  %v4362_v57 = vsel %vm4358_vm9, %v4346_v22, %v4361_v24  ;;  %v4367_v13 = vsel %vm4357_vm11, %v4364_v43, %v4366_v21  ;;  %v4369_v16 = vsel %vm4359_vm10, %v4355_v0, 1326507024 }
 0x413   : > { %v8032_v40 = vadd.s32 4294967294, %v4080_v3  ;;  %v4370_v20 = vsel %vm4358_vm9, %v4352_v35, %v4369_v16  ;;  %v11904_v53 = vmul.u32.u64.low %v11869_v23, %v4367_v13  ;;  %v11905_v55 = vmul.u32.u64.high %v11869_v23, %v4367_v13, %v11904_v53 }
 0x414   : > { %v4224_v62 = vshrl.u32 %v4223_v59, 23  ;;  %vm4212_vm12 = vcmp.eq.s32.totalorder %v11860_v1, 0  ;;  %v4099_v11 = vsel %vm4014_vm6, %v4098_v25, %v4074_v17  ;;  %v4371_v30 = vsel %vm4357_vm11, %v4368_v38, %v4370_v20 }
 0x415   : > { %vm8033_vm15 = vcmp.lt.s32.totalorder %v8032_v40, 0  ;;  %v998_v7 = vsel %vm580_vm0, %v813_v12, %v15056_v33  ;;  %v11917_v54 = vmul.u32.u64.low %v11869_v23, %v4371_v30  ;;  %v11918_v37 = vmul.u32.u64.high %v11869_v23, %v4371_v30, %v11917_v54 }
 0x416   : > { %v4083_v44 = vsel %vm8033_vm15, 0, %v8032_v40  ;;  %v8038_v29 = vadd.s32 4294967169, %v4224_v62  ;;  %v4068_v61 = vadd.s32 %v11811_v8, %v11820_v18  ;;  %v4363_v17 = vsel %vm4357_vm11, %v4360_v42, %v4362_v57 }
 0x417   : > { %v4084_v48 = vsub.s32 32, %v4083_v44  ;;  %v4088_v50 = vsub.s32 4294967266, %v4083_v44  ;;  %v4382_v5 = vadd.s32 1, %v11905_v55  ;;  %v4220_v63 = vand.u32 2147483647, %v11849_v26 }
 0x418   : > { %v4230_v15 = vadd.s32 1, %v8038_v29  ;;  %v11927_v9 = vmul.f32 %v11603_v32, %v998_v7  ;;  %v4085_v22 = vshll.u32 %v11862_v51, %v4083_v44  ;;  %v4101_v8 = vsel %vm11883_vm8, 0, %v4099_v11 }
 0x419   : > { %v4086_v60 = vshrl.u32 %v4068_v61, %v4084_v48  ;;  %v4089_v10 = vadd.s32 127, %v4088_v50  ;;  %vm4215_vm2 = vcmp.eq.s32.totalorder %v11860_v1, 2  ;;  %v4379_v52 = vmul.u32 %v11869_v23, %v4363_v17 }
 0x41a   : > { %v8599_v18 = vpop.eup %8598  ;;  %vm4381_vm14 = vc.u32 %v11918_v37, %v11904_v53  ;;  %vm4231_vm13 = vcmp.gt.s32.totalorder %v4230_v15, 0  ;;  %v4105_v59 = vadd.s32 3, %v4101_v8  ;;  %v4227_v23 = vand.u32 8388607, %v4220_v63 }
 0x41b   : > { %v8601_v35 = vpop.eup %8600  ;;  %v4216_v47 = vxor.u32 2147483648, %v8599_v18  ;;  %v4087_v32 = vor.u32 %v4086_v60, %v4085_v22  ;;  %v4090_v28 = vshll.u32 %v4089_v10, 23  ;;  %v4383_v51 = vsel %vm4381_vm14, %v4382_v5, %v11905_v55 }
 0x41c   : > { %v4213_v31 = vxor.u32 2147483648, %v8601_v35  ;;  %v4384_v4 = vadd.s32 %v4383_v51, %v4379_v52  ;;  %v4232_v49 = vsel %vm4231_vm13, %v4230_v15, 0  ;;  %v4535_v43 = vand.u32 2139095040, %v11927_v9 }
 0x41d   : > { %v4217_v0 = vsel %vm4215_vm2, %v4216_v47, %v8601_v35  ;;  %v4091_v24 = vor.u32 4788187, %v4090_v28  ;;  %vm4211_vm1 = vcmp.lt.s32.totalorder %v11860_v1, 2  ;;  %v4234_v25 = vand.u32 31, %v4232_v49 }
 0x41e   : > { %v4214_v36 = vsel %vm4212_vm12, %v8599_v18, %v4213_v31  ;;  %v4385_v3 = vadd.s32 536870912, %v4384_v4  ;;  %vm4208_vm5 = vweird.f32 %v11606_v6  ;;  %v4094_v38 = vcvt.s32.f32 %v4087_v32 }
 0x41f   : > { %v4218_v42 = vsel %vm4211_vm1, %v4214_v36, %v4217_v0  ;;  %v4092_v21 = vand.u32 2147483647, %v4091_v24  ;;  %v4235_v57 = vsub.s32 32, %v4234_v25  ;;  %v11947_v16 = vand.u32 3, %v4105_v59 }
 0x420   : > { %v4219_v12 = vsel %vm4208_vm5, nan, %v4218_v42  ;;  %v11944_v40 = vshrl.u32 %v4385_v3, 30  ;;  %v4228_v20 = vor.u32 8388608, %v4227_v23  ;;  %v4536_v55 = vshrl.u32 %v4535_v43, 23 }
 0x421   : > { %7785 = vst [vmem:[%s9477_s9 + $0xe8] sm:$0xff] %v4219_v12  ;;  %v4095_v13 = vmul.f32 %v4094_v38, %v4092_v21  ;;  %v4237_v62 = vshll.u32 %v14972_v41, %v4234_v25  ;;  %v4238_v11 = vshrl.u32 %v14973_v34, %v4235_v57  ;;  %v4240_v6 = vshll.u32 %v14973_v34, %v4234_v25 }
 0x422   : > { %v4387_v1 = vshll.u32 %v11944_v40, 30  ;;  %v4241_v33 = vshrl.u32 %v14974_v14, %v4235_v57  ;;  %v4244_v7 = vshrl.u32 %v14975_v45, %v4235_v57  ;;  %v4247_v44 = vshrl.u32 %v14976_v58, %v4235_v57 }
 0x423   : > { %v4096_v30 = vxor.u32 2147483648, %v4095_v13  ;;  %v4233_v29 = vshrl.u32 %v4232_v49, 5  ;;  %v4243_v61 = vshll.u32 %v14974_v14, %v4234_v25  ;;  %v4246_v48 = vshll.u32 %v14975_v45, %v4234_v25 }
 0x424   : > { %v11956_v54 = vsub.s32 %v4384_v4, %v4387_v1  ;;  %v4239_v17 = vor.u32 %v4238_v11, %v4237_v62  ;;  %v4242_v5 = vor.u32 %v4241_v33, %v4240_v6  ;;  %v11962_v15 = vshll.u32 %v4228_v20, 8 }
 0x425   : > { %v4097_v50 = vsel %vm4014_vm6, %v4096_v30, %v4095_v13  ;;  %v4245_v10 = vor.u32 %v4244_v7, %v4243_v61  ;;  %v4248_v8 = vor.u32 %v4247_v44, %v4246_v48  ;;  %v4249_v18 = vshll.u32 %v14976_v58, %v4234_v25 }
 0x426   : > { %v4100_v22 = vsel %vm11883_vm8, %v11654_v56, %v4097_v50  ;;  %v4390_v60 = vsub.s32 0, %v11956_v54  ;;  %v4250_v52 = vshrl.u32 %v14980_v46, %v4235_v57  ;;  %v8050_v35 = vadd.s32 4294967169, %v4536_v55 }
 0x427   : > { %8602 = vcosq.f32 %v4100_v22  ;;  %vm4326_vm3 = vcmp.lt.s32.totalorder %v11753_v27, 0  ;;  %vm4252_vm4 = vcmp.lt.s32.totalorder %v4233_v29, 1  ;;  %vm4255_vm6 = vcmp.lt.s32.totalorder %v4233_v29, 4 }
 0x428   : > { %8604 = vsinq.f32 %v4100_v22  ;;  %v8043_v47 = vmin.u32 %v4390_v60, %v11956_v54  ;;  %v4251_v32 = vor.u32 %v4250_v52, %v4249_v18  ;;  %vm4253_vm7 = vcmp.lt.s32.totalorder %v4233_v29, 2 }
 0x429   : > { %v4260_v39 = vsel %vm4252_vm4, %v4239_v17, %v4242_v5  ;;  %v4261_v28 = vsel %vm4255_vm6, %v4248_v8, 920167782  ;;  %v4236_v31 = vshrl.u32 %v14972_v41, %v4235_v57  ;;  %vm4254_vm10 = vcmp.lt.s32.totalorder %v4233_v29, 3 }
 0x42a   : > { %v4392_v51 = vclz %v8043_v47  ;;  %v4257_v59 = vsel %vm4255_vm6, %v4245_v10, 2102212464  ;;  %v4410_v4 = vsub.s32 4, %v11944_v40  ;;  %v4262_v49 = vsel %vm4254_vm10, %v4245_v10, %v4261_v28 }
 0x42b   : > { %v4264_v0 = vsel %vm4252_vm4, %v4242_v5, %v4245_v10  ;;  %v4265_v24 = vsel %vm4255_vm6, %v4251_v32, 1326507024  ;;  %vm11978_vm8 = vcmp.le.f32.partialorder %v4324_v19, 0.7853982  ;;  %v4256_v36 = vsel %vm4252_vm4, %v4236_v31, %v4239_v17 }
 0x42c   : > { %v8044_v43 = vadd.s32 4294967294, %v4392_v51  ;;  %v4263_v3 = vsel %vm4253_vm7, %v4260_v39, %v4262_v49  ;;  %v4266_v25 = vsel %vm4254_vm10, %v4248_v8, %v4265_v24  ;;  %v4258_v42 = vsel %vm4254_vm10, %v4242_v5, %v4257_v59 }
 0x42d   : > { %v4267_v21 = vsel %vm4253_vm7, %v4264_v0, %v4266_v25  ;;  %v11986_v38 = vmul.u32.u64.low %v11962_v15, %v4263_v3  ;;  %v11987_v12 = vmul.u32.u64.high %v11962_v15, %v4263_v3, %v11986_v38  ;;  %vm4107_vm9 = vcmp.lt.s32.totalorder %v11947_v16, 2 }
 0x42e   : > { %vm8045_vm11 = vcmp.lt.s32.totalorder %v8044_v43, 0  ;;  %v11992_v19 = vmul.u32.u64.low %v11962_v15, %v4267_v21  ;;  %v11993_v57 = vmul.u32.u64.high %v11962_v15, %v4267_v21, %v11992_v19  ;;  %vm4108_vm12 = vcmp.eq.s32.totalorder %v11947_v16, 0 }
 0x42f   : > { %vm4111_vm15 = vcmp.eq.s32.totalorder %v11947_v16, 2  ;;  %v4395_v13 = vsel %vm8045_vm11, 0, %v8044_v43  ;;  %v4542_v20 = vadd.s32 1, %v8050_v35  ;;  %v4380_v55 = vadd.s32 %v11904_v53, %v11918_v37  ;;  %v808_v43 = vpop.permute.xlu0 %807 }
 0x430   : > { %v4396_v1 = vsub.s32 32, %v4395_v13  ;;  %v4400_v62 = vsub.s32 4294967266, %v4395_v13  ;;  %v4259_v11 = vsel %vm4253_vm7, %v4256_v36, %v4258_v42  ;;  %v4411_v30 = vsel %vm4326_vm3, %v4410_v4, %v11944_v40 }
 0x431   : > { %v8603_v6 = vpop.eup %8602  ;;  %v4278_v33 = vadd.s32 1, %v11987_v12  ;;  %v4532_v7 = vand.u32 2147483647, %v11927_v9  ;;  %vm4543_vm2 = vcmp.gt.s32.totalorder %v4542_v20, 0  ;;  %v4397_v48 = vshll.u32 %v11956_v54, %v4395_v13 }
 0x432   : > { %v8605_v44 = vpop.eup %8604  ;;  %v4112_v61 = vxor.u32 2147483648, %v8603_v6  ;;  %v4398_v50 = vshrl.u32 %v4380_v55, %v4396_v1  ;;  %v4401_v53 = vadd.s32 127, %v4400_v62  ;;  %v4275_v29 = vmul.u32 %v11962_v15, %v4259_v11  ;;  %v15059_v62 = vld [vmem:[#allocation19_spill] sm:$0xff] }
 0x433   : > { %v4109_v37 = vxor.u32 2147483648, %v8605_v44  ;;  %vm4277_vm14 = vc.u32 %v11993_v57, %v11986_v38  ;;  %v4544_v17 = vsel %vm4543_vm2, %v4542_v20, 0  ;;  %v4413_v10 = vsel %vm11978_vm8, 0, %v4411_v30 }
 0x434   : > { %v4113_v40 = vsel %vm4111_vm15, %v4112_v61, %v8605_v44  ;;  %v4399_v5 = vor.u32 %v4398_v50, %v4397_v48  ;;  %v4402_v22 = vshll.u32 %v4401_v53, 23  ;;  %v4279_v60 = vsel %vm4277_vm14, %v4278_v33, %v11987_v12 }
 0x435   : > { %v4110_v54 = vsel %vm4108_vm12, %v8603_v6, %v4109_v37  ;;  %v4280_v8 = vadd.s32 %v4279_v60, %v4275_v29  ;;  %v4546_v15 = vand.u32 31, %v4544_v17  ;;  %vm4104_vm13 = vweird.f32 %v11654_v56  ;;  %v12053_v29 = vld [vmem:[%s14908_s2] ss:$0 sm:$0xff] }
 0x436   : > { %v4114_v18 = vsel %vm4107_vm9, %v4110_v54, %v4113_v40  ;;  %v4403_v52 = vor.u32 4788187, %v4402_v22  ;;  %v4406_v28 = vcvt.s32.f32 %v4399_v5  ;;  %v4417_v51 = vadd.s32 3, %v4413_v10 }
 0x437   : > { %v4115_v35 = vsel %vm4104_vm13, nan, %v4114_v18  ;;  %v4281_v47 = vadd.s32 536870912, %v4280_v8  ;;  %v4547_v32 = vsub.s32 32, %v4546_v15  ;;  %v4539_v59 = vand.u32 8388607, %v4532_v7 }
 0x438   : > { %7784 = vst [vmem:[%s9477_s9 + $0xe0] sm:$0xff] %v4115_v35  ;;  %v4404_v39 = vand.u32 2147483647, %v4403_v52  ;;  %v4545_v4 = vshrl.u32 %v4544_v17, 5  ;;  %v4549_v3 = vshll.u32 %v14972_v41, %v4546_v15  ;;  %v4552_v25 = vshll.u32 %v14973_v34, %v4546_v15 }
 0x439   : > { %v12020_v31 = vshrl.u32 %v4281_v47, 30  ;;  %v4550_v49 = vshrl.u32 %v14973_v34, %v4547_v32  ;;  %v4553_v16 = vshrl.u32 %v14974_v14, %v4547_v32  ;;  %v4556_v0 = vshrl.u32 %v14975_v45, %v4547_v32 }
 0x43a   : > { %v4407_v56 = vmul.f32 %v4406_v28, %v4404_v39  ;;  %v4559_v24 = vshrl.u32 %v14976_v58, %v4547_v32  ;;  %v4555_v42 = vshll.u32 %v14974_v14, %v4546_v15  ;;  %v4558_v12 = vshll.u32 %v14975_v45, %v4546_v15 }
 0x43b   : > { %v4283_v36 = vshll.u32 %v12020_v31, 30  ;;  %v4561_v19 = vshll.u32 %v14976_v58, %v4546_v15  ;;  %v4562_v13 = vshrl.u32 %v14980_v46, %v4547_v32  ;;  %v4551_v55 = vor.u32 %v4550_v49, %v4549_v3  ;;  %v15062_v3 = vld [vmem:[#allocation20_spill] sm:$0xff] }
 0x43c   : > { %v4408_v21 = vxor.u32 2147483648, %v4407_v56  ;;  %v4557_v1 = vor.u32 %v4556_v0, %v4555_v42  ;;  %v997_v11 = vsel %vm580_vm0, %v808_v43, %v15059_v62  ;;  %v4554_v30 = vor.u32 %v4553_v16, %v4552_v25 }
 0x43d   : > { %v12035_v20 = vsub.s32 %v4280_v8, %v4283_v36  ;;  %v4560_v33 = vor.u32 %v4559_v24, %v4558_v12  ;;  %v4563_v44 = vor.u32 %v4562_v13, %v4561_v19  ;;  %v12045_v48 = vand.u32 3, %v4417_v51 }
 0x43e   : > { %v4409_v6 = vsel %vm4326_vm3, %v4408_v21, %v4407_v56  ;;  %v4540_v53 = vor.u32 8388608, %v4539_v59  ;;  %vm4222_vm1 = vcmp.lt.s32.totalorder %v11849_v26, 0  ;;  %v4548_v37 = vshrl.u32 %v14972_v41, %v4547_v32  ;;  %v823_v59 = vpop.permute.xlu1 %822 }
 0x43f   : > { %v4412_v61 = vsel %vm11978_vm8, %v11753_v27, %v4409_v6  ;;  %v4286_v50 = vsub.s32 0, %v12035_v20  ;;  %vm4567_vm5 = vcmp.lt.s32.totalorder %v4545_v4, 4  ;;  %v12056_v17 = vmul.f32 %v12053_v29, %v997_v11 }
 0x440   : > { %8606 = vcosq.f32 %v4412_v61  ;;  %vm4564_vm3 = vcmp.lt.s32.totalorder %v4545_v4, 1  ;;  %v4569_v40 = vsel %vm4567_vm5, %v4557_v1, 2102212464  ;;  %v4573_v22 = vsel %vm4567_vm5, %v4560_v33, 920167782 }
 0x441   : > { %8608 = vsinq.f32 %v4412_v61  ;;  %v8039_v23 = vmin.u32 %v4286_v50, %v12035_v20  ;;  %v4572_v5 = vsel %vm4564_vm3, %v4551_v55, %v4554_v30  ;;  %v4576_v60 = vsel %vm4564_vm3, %v4554_v30, %v4557_v1 }
 0x442   : > { %v4577_v54 = vsel %vm4567_vm5, %v4563_v44, 1326507024  ;;  %vm12061_vm4 = vcmp.le.f32.partialorder %v4220_v63, 0.7853982  ;;  %vm4565_vm6 = vcmp.lt.s32.totalorder %v4545_v4, 2  ;;  %vm4566_vm7 = vcmp.lt.s32.totalorder %v4545_v4, 3 }
 0x443   : > { %v4288_v8 = vclz %v8039_v23  ;;  %v4580_v15 = vshll.u32 %v4540_v53, 8  ;;  %v4568_v18 = vsel %vm4564_vm3, %v4548_v37, %v4551_v55  ;;  %v4570_v52 = vsel %vm4566_vm7, %v4554_v30, %v4569_v40 }
 0x444   : > { %v4574_v35 = vsel %vm4566_vm7, %v4557_v1, %v4573_v22  ;;  %v4578_v47 = vsel %vm4566_vm7, %v4560_v33, %v4577_v54  ;;  %v4306_v39 = vsub.s32 4, %v12020_v31  ;;  %vm4420_vm10 = vcmp.eq.s32.totalorder %v12045_v48, 0 }
 0x445   : > { %v8040_v32 = vadd.s32 4294967294, %v4288_v8  ;;  %v4575_v28 = vsel %vm4565_vm6, %v4572_v5, %v4574_v35  ;;  %v4579_v51 = vsel %vm4565_vm6, %v4576_v60, %v4578_v47  ;;  %v4571_v0 = vsel %vm4565_vm6, %v4568_v18, %v4570_v52  ;;  %v818_v35 = vpop.permute.xlu0 %817 }
 0x446   : > { %v12068_v63 = vmul.u32.u64.low %v4580_v15, %v4579_v51  ;;  %v12069_v49 = vmul.u32.u64.high %v4580_v15, %v4579_v51, %v12068_v63  ;;  %v12071_v56 = vmul.u32.u64.low %v4580_v15, %v4575_v28  ;;  %v12072_v16 = vmul.u32.u64.high %v4580_v15, %v4575_v28, %v12071_v56 }
 0x447   : > { %vm8041_vm8 = vcmp.lt.s32.totalorder %v8040_v32, 0  ;;  %v4431_v24 = vand.u32 2139095040, %v12056_v17  ;;  %vm4423_vm9 = vcmp.eq.s32.totalorder %v12045_v48, 2  ;;  %v4276_v43 = vadd.s32 %v11986_v38, %v11993_v57  ;;  %v15063_v63 = vld [vmem:[#allocation21_spill] sm:$0xff] }
 0x448   : > { %v4291_v36 = vsel %vm8041_vm8, 0, %v8040_v32  ;;  %v1000_v25 = vsel %vm580_vm0, %v823_v59, %v15062_v3  ;;  %v4307_v12 = vsel %vm4222_vm1, %v4306_v39, %v12020_v31  ;;  %v4587_v55 = vmul.u32 %v4580_v15, %v4571_v0 }
 0x449   : > { %v4292_v42 = vsub.s32 32, %v4291_v36  ;;  %v4296_v21 = vsub.s32 4294967266, %v4291_v36  ;;  %v4432_v4 = vshrl.u32 %v4431_v24, 23  ;;  %v4293_v13 = vshll.u32 %v12035_v20, %v4291_v36 }
 0x44a   : > { %v8607_v19 = vpop.eup %8606  ;;  %vm4589_vm11 = vc.u32 %v12069_v49, %v12071_v56  ;;  %v4590_v38 = vadd.s32 1, %v12072_v16  ;;  %v4309_v33 = vsel %vm12061_vm4, 0, %v4307_v12  ;;  %v4428_v44 = vand.u32 2147483647, %v12056_v17 }
 0x44b   : > { %v8609_v57 = vpop.eup %8608  ;;  %v4424_v1 = vxor.u32 2147483648, %v8607_v19  ;;  %v4294_v62 = vshrl.u32 %v4276_v43, %v4292_v42  ;;  %v4297_v11 = vadd.s32 127, %v4296_v21  ;;  %v8046_v6 = vadd.s32 4294967169, %v4432_v4 }
 0x44c   : > { %v4421_v30 = vxor.u32 2147483648, %v8609_v57  ;;  %v4591_v31 = vsel %vm4589_vm11, %v4590_v38, %v12072_v16  ;;  %vm4416_vm12 = vweird.f32 %v11753_v27  ;;  %vm4419_vm15 = vcmp.lt.s32.totalorder %v12045_v48, 2 }
 0x44d   : > { %v4425_v20 = vsel %vm4423_vm9, %v4424_v1, %v8609_v57  ;;  %v4295_v61 = vor.u32 %v4294_v62, %v4293_v13  ;;  %v4298_v50 = vshll.u32 %v4297_v11, 23  ;;  %v4592_v53 = vadd.s32 %v4591_v31, %v4587_v55 }
 0x44e   : > { %v4422_v37 = vsel %vm4420_vm10, %v8607_v19, %v4421_v30  ;;  %v4438_v23 = vadd.s32 1, %v8046_v6  ;;  %v4313_v22 = vadd.s32 3, %v4309_v33  ;;  %v4435_v8 = vand.u32 8388607, %v4428_v44 }
 0x44f   : > { %v4426_v40 = vsel %vm4419_vm15, %v4422_v37, %v4425_v20  ;;  %v4299_v5 = vor.u32 4788187, %v4298_v50  ;;  %v4593_v60 = vadd.s32 536870912, %v4592_v53  ;;  %v12104_v15 = vmul.f32 %v12053_v29, %v1000_v25 }
 0x450   : > { %v4427_v54 = vsel %vm4416_vm12, nan, %v4426_v40  ;;  %vm4439_vm2 = vcmp.gt.s32.totalorder %v4438_v23, 0  ;;  %v4302_v18 = vcvt.s32.f32 %v4295_v61  ;;  %v12110_v28 = vand.u32 3, %v4313_v22 }
 0x451   : > { %7787 = vst [vmem:[%s9477_s9 + $0xf8] sm:$0xff] %v4427_v54  ;;  %v4300_v27 = vand.u32 2147483647, %v4299_v5  ;;  %v12107_v52 = vshrl.u32 %v4593_v60, 30  ;;  %v4440_v48 = vsel %vm4439_vm2, %v4438_v23, 0  ;;  %v4436_v51 = vor.u32 8388608, %v4435_v8 }
 0x452   : > { %v4442_v47 = vand.u32 31, %v4440_v48  ;;  %v12115_v16 = vsel %vm580_vm0, %v818_v35, %v15063_v63  ;;  %v12119_v43 = vshrl.u32 %v4440_v48, 5  ;;  %v4743_v36 = vand.u32 2139095040, %v12104_v15 }
 0x453   : > { %v4303_v32 = vmul.f32 %v4302_v18, %v4300_v27  ;;  %v4595_v39 = vshll.u32 %v12107_v52, 30  ;;  %vm4534_vm14 = vcmp.lt.s32.totalorder %v11927_v9, 0  ;;  %v4588_v10 = vadd.s32 %v12071_v56, %v12069_v49 }
 0x454   : > { %v4443_v59 = vsub.s32 32, %v4442_v47  ;;  %v4445_v3 = vshll.u32 %v14972_v41, %v4442_v47  ;;  %v4448_v42 = vshll.u32 %v14973_v34, %v4442_v47  ;;  %v4451_v19 = vshll.u32 %v14974_v14, %v4442_v47 }
 0x455   : > { %v4304_v0 = vxor.u32 2147483648, %v4303_v32  ;;  %v12117_v24 = vsub.s32 %v4592_v53, %v4595_v39  ;;  %v4454_v57 = vshll.u32 %v14975_v45, %v4442_v47  ;;  %v4457_v33 = vshll.u32 %v14976_v58, %v4442_v47 }
 0x456   : > { %v4446_v25 = vshrl.u32 %v14973_v34, %v4443_v59  ;;  %v4449_v21 = vshrl.u32 %v14974_v14, %v4443_v59  ;;  %v4452_v13 = vshrl.u32 %v14975_v45, %v4443_v59  ;;  %v4455_v1 = vshrl.u32 %v14976_v58, %v4443_v59 }
 0x457   : > { %v4305_v12 = vsel %vm4222_vm1, %v4304_v0, %v4303_v32  ;;  %v4598_v4 = vsub.s32 0, %v12117_v24  ;;  %v4458_v31 = vshrl.u32 %v14980_v46, %v4443_v59  ;;  %v12142_v61 = vshll.u32 %v4436_v51, 8 }
 0x458   : > { %v4308_v55 = vsel %vm12061_vm4, %v11849_v26, %v4305_v12  ;;  %v4447_v38 = vor.u32 %v4446_v25, %v4445_v3  ;;  %v4450_v11 = vor.u32 %v4449_v21, %v4448_v42  ;;  %v4453_v6 = vor.u32 %v4452_v13, %v4451_v19 }
 0x459   : > { %8610 = vcosq.f32 %v4308_v55  ;;  %v8051_v62 = vmin.u32 %v4598_v4, %v12117_v24  ;;  %v4456_v30 = vor.u32 %v4455_v1, %v4454_v57  ;;  %v4740_v50 = vand.u32 2147483647, %v12104_v15 }
 0x45a   : > { %8612 = vsinq.f32 %v4308_v55  ;;  %v4444_v53 = vshrl.u32 %v14972_v41, %v4443_v59  ;;  %v4459_v37 = vor.u32 %v4458_v31, %v4457_v33  ;;  %vm4460_vm13 = vcmp.lt.s32.totalorder %v12119_v43, 1 }
 0x45b   : > { %v4600_v20 = vclz %v8051_v62  ;;  %v4744_v23 = vshrl.u32 %v4743_v36, 23  ;;  %vm4319_vm1 = vcmp.eq.s32.totalorder %v12110_v28, 2  ;;  %vm4462_vm5 = vcmp.lt.s32.totalorder %v12119_v43, 3 }
 0x45c   : > { %vm4463_vm3 = vcmp.lt.s32.totalorder %v12119_v43, 4  ;;  %v4468_v49 = vsel %vm4460_vm13, %v4447_v38, %v4450_v11  ;;  %vm4316_vm4 = vcmp.eq.s32.totalorder %v12110_v28, 0  ;;  %v4472_v22 = vsel %vm4460_vm13, %v4450_v11, %v4453_v6 }
 0x45d   : > { %v8052_v40 = vadd.s32 4294967294, %v4600_v20  ;;  %v4465_v56 = vsel %vm4463_vm3, %v4453_v6, 2102212464  ;;  %v4469_v5 = vsel %vm4463_vm3, %v4456_v30, 920167782  ;;  %vm4315_vm6 = vcmp.lt.s32.totalorder %v12110_v28, 2 }
 0x45e   : > { %v4473_v60 = vsel %vm4463_vm3, %v4459_v37, 1326507024  ;;  %vm12158_vm7 = vcmp.le.f32.partialorder %v4532_v7, 0.7853982  ;;  %vm4461_vm8 = vcmp.lt.s32.totalorder %v12119_v43, 2  ;;  %v4470_v8 = vsel %vm4462_vm5, %v4453_v6, %v4469_v5 }
 0x45f   : > { %vm8053_vm10 = vcmp.lt.s32.totalorder %v8052_v40, 0  ;;  %v4474_v27 = vsel %vm4462_vm5, %v4456_v30, %v4473_v60  ;;  %vm4312_vm9 = vweird.f32 %v11849_v26  ;;  %v4618_v48 = vsub.s32 4, %v12107_v52 }
 0x460   : > { %v4603_v18 = vsel %vm8053_vm10, 0, %v8052_v40  ;;  %v4471_v7 = vsel %vm4461_vm8, %v4468_v49, %v4470_v8  ;;  %v4475_v35 = vsel %vm4461_vm8, %v4472_v22, %v4474_v27  ;;  %v4464_v39 = vsel %vm4460_vm13, %v4444_v53, %v4447_v38 }
 0x461   : > { %v4604_v47 = vsub.s32 32, %v4603_v18  ;;  %v4608_v32 = vsub.s32 4294967266, %v4603_v18  ;;  %v4466_v51 = vsel %vm4462_vm5, %v4450_v11, %v4465_v56  ;;  %v4605_v25 = vshll.u32 %v12117_v24, %v4603_v18 }
 0x462   : > { %v12178_v59 = vmul.u32.u64.low %v12142_v61, %v4475_v35  ;;  %v12179_v63 = vmul.u32.u64.high %v12142_v61, %v4475_v35, %v12178_v59  ;;  %v12182_v0 = vmul.u32.u64.low %v12142_v61, %v4471_v7  ;;  %v12183_v36 = vmul.u32.u64.high %v12142_v61, %v4471_v7, %v12182_v0 }
 0x463   : > { %v8611_v3 = vpop.eup %8610  ;;  %v4606_v42 = vshrl.u32 %v4588_v10, %v4604_v47  ;;  %v4609_v21 = vadd.s32 127, %v4608_v32  ;;  %v8058_v12 = vadd.s32 4294967169, %v4744_v23  ;;  %v4619_v13 = vsel %vm4534_vm14, %v4618_v48, %v12107_v52 }
 0x464   : > { %v8613_v4 = vpop.eup %8612  ;;  %v4320_v19 = vxor.u32 2147483648, %v8611_v3  ;;  %v4467_v55 = vsel %vm4461_vm8, %v4464_v39, %v4466_v51  ;;  %v12194_v38 = vand.u32 8388607, %v4740_v50  ;;  %vm4485_vm11 = vc.u32 %v12179_v63, %v12182_v0 }
 0x465   : > { %v4317_v57 = vxor.u32 2147483648, %v8613_v4  ;;  %v4607_v1 = vor.u32 %v4606_v42, %v4605_v25  ;;  %v4610_v62 = vshll.u32 %v4609_v21, 23  ;;  %v4750_v24 = vadd.s32 1, %v8058_v12 }
 0x466   : > { %v4321_v11 = vsel %vm4319_vm1, %v4320_v19, %v8613_v4  ;;  %v4486_v52 = vadd.s32 1, %v12183_v36  ;;  %v12203_v43 = vmul.f32 %v12053_v29, %v12115_v16  ;;  %v4483_v33 = vmul.u32 %v12142_v61, %v4467_v55 }
 0x467   : > { %v4318_v6 = vsel %vm4316_vm4, %v8611_v3, %v4317_v57  ;;  %v4611_v30 = vor.u32 4788187, %v4610_v62  ;;  %vm4751_vm12 = vcmp.gt.s32.totalorder %v4750_v24, 0  ;;  %v4621_v10 = vsel %vm12158_vm7, 0, %v4619_v13 }
 0x468   : > { %v4322_v31 = vsel %vm4315_vm6, %v4318_v6, %v4321_v11  ;;  %v4487_v20 = vsel %vm4485_vm11, %v4486_v52, %v12183_v36  ;;  %v4752_v53 = vsel %vm4751_vm12, %v4750_v24, 0  ;;  %v4614_v23 = vcvt.s32.f32 %v4607_v1 }
 0x469   : > { %v4323_v16 = vsel %vm4312_vm9, nan, %v4322_v31  ;;  %v4612_v37 = vand.u32 2147483647, %v4611_v30  ;;  %v4488_v40 = vadd.s32 %v4487_v20, %v4483_v33  ;;  %v4754_v49 = vand.u32 31, %v4752_v53 }
 0x46a   : > { %7786 = vst [vmem:[%s9477_s9 + $0xf0] sm:$0xff] %v4323_v16  ;;  %v4748_v5 = vor.u32 8388608, %v12194_v38  ;;  %v4625_v28 = vadd.s32 3, %v4621_v10  ;;  %v4753_v22 = vshrl.u32 %v4752_v53, 5  ;;  %v4639_v8 = vand.u32 2139095040, %v12203_v43 }
 0x46b   : > { %v4615_v56 = vmul.f32 %v4614_v23, %v4612_v37  ;;  %v4489_v61 = vadd.s32 536870912, %v4488_v40  ;;  %v4755_v60 = vsub.s32 32, %v4754_v49  ;;  %v4757_v26 = vshll.u32 %v14972_v41, %v4754_v49 }
 0x46c   : > { %v4760_v48 = vshll.u32 %v14973_v34, %v4754_v49  ;;  %v4763_v47 = vshll.u32 %v14974_v14, %v4754_v49  ;;  %v4766_v59 = vshll.u32 %v14975_v45, %v4754_v49  ;;  %v12234_v12 = vand.u32 3, %v4625_v28 }
 0x46d   : > { %v4616_v27 = vxor.u32 2147483648, %v4615_v56  ;;  %v12218_v18 = vshrl.u32 %v4489_v61, 30  ;;  %v4758_v7 = vshrl.u32 %v14973_v34, %v4755_v60  ;;  %v4761_v35 = vshrl.u32 %v14974_v14, %v4755_v60 }
 0x46e   : > { %v4764_v32 = vshrl.u32 %v14975_v45, %v4755_v60  ;;  %v4767_v36 = vshrl.u32 %v14976_v58, %v4755_v60  ;;  %v4769_v13 = vshll.u32 %v14976_v58, %v4754_v49  ;;  %v4770_v55 = vshrl.u32 %v14980_v46, %v4755_v60 }
 0x46f   : > { %v4617_v39 = vsel %vm4534_vm14, %v4616_v27, %v4615_v56  ;;  %v4491_v51 = vshll.u32 %v12218_v18, 30  ;;  %v4759_v25 = vor.u32 %v4758_v7, %v4757_v26  ;;  %v4762_v42 = vor.u32 %v4761_v35, %v4760_v48 }
 0x470   : > { %v4620_v3 = vsel %vm12158_vm7, %v11927_v9, %v4617_v39  ;;  %v4765_v21 = vor.u32 %v4764_v32, %v4763_v47  ;;  %v4768_v19 = vor.u32 %v4767_v36, %v4766_v59  ;;  %v4640_v38 = vshrl.u32 %v4639_v8, 23 }
 0x471   : > { %8614 = vcosq.f32 %v4620_v3  ;;  %v12236_v4 = vsub.s32 %v4488_v40, %v4491_v51  ;;  %vm4430_vm15 = vcmp.lt.s32.totalorder %v12056_v17, 0  ;;  %vm4772_vm2 = vcmp.lt.s32.totalorder %v4753_v22, 1 }
 0x472   : > { %8616 = vsinq.f32 %v4620_v3  ;;  %vm4774_vm14 = vcmp.lt.s32.totalorder %v4753_v22, 3  ;;  %vm4775_vm13 = vcmp.lt.s32.totalorder %v4753_v22, 4  ;;  %v4771_v57 = vor.u32 %v4770_v55, %v4769_v13 }
 0x473   : > { %v4494_v54 = vsub.s32 0, %v12236_v4  ;;  %v4777_v1 = vsel %vm4775_vm13, %v4765_v21, 2102212464  ;;  %v4780_v62 = vsel %vm4772_vm2, %v4759_v25, %v4762_v42  ;;  %v4781_v24 = vsel %vm4775_vm13, %v4768_v19, 920167782 }
 0x474   : > { %v4756_v52 = vshrl.u32 %v14972_v41, %v4755_v60  ;;  %vm4773_vm1 = vcmp.lt.s32.totalorder %v4753_v22, 2  ;;  %v4782_v6 = vsel %vm4774_vm14, %v4765_v21, %v4781_v24  ;;  %v4784_v33 = vsel %vm4772_vm2, %v4762_v42, %v4765_v21  ;;  %v15068_v24 = vld [vmem:[#allocation22_spill] sm:$0xff] }
 0x475   : > { %v8047_v11 = vmin.u32 %v4494_v54, %v12236_v4  ;;  %v4783_v30 = vsel %vm4773_vm1, %v4780_v62, %v4782_v6  ;;  %v4785_v31 = vsel %vm4775_vm13, %v4771_v57, 1326507024  ;;  %v4788_v10 = vshll.u32 %v4748_v5, 8 }
 0x476   : > { %vm4627_vm5 = vcmp.lt.s32.totalorder %v12234_v12, 2  ;;  %vm12251_vm3 = vcmp.le.f32.partialorder %v4428_v44, 0.7853982  ;;  %v4776_v16 = vsel %vm4772_vm2, %v4756_v52, %v4759_v25  ;;  %v4778_v37 = vsel %vm4774_vm14, %v4762_v42, %v4777_v1  ;;  %v833_v42 = vpop.permute.xlu1 %832 }
 0x477   : > { %v4496_v53 = vclz %v8047_v11  ;;  %v4636_v23 = vand.u32 2147483647, %v12203_v43  ;;  %vm4624_vm4 = vweird.f32 %v11927_v9  ;;  %v4514_v40 = vsub.s32 4, %v12218_v18 }
 0x478   : > { %v4786_v49 = vsel %vm4774_vm14, %v4768_v19, %v4785_v31  ;;  %v12261_v56 = vmul.u32.u64.low %v4788_v10, %v4783_v30  ;;  %v12262_v61 = vmul.u32.u64.high %v4788_v10, %v4783_v30, %v12261_v56  ;;  %vm4628_vm6 = vcmp.eq.s32.totalorder %v12234_v12, 0 }
 0x479   : > { %v8048_v44 = vadd.s32 4294967294, %v4496_v53  ;;  %v4787_v5 = vsel %vm4773_vm1, %v4784_v33, %v4786_v49  ;;  %v8054_v28 = vadd.s32 4294967169, %v4640_v38  ;;  %vm4631_vm7 = vcmp.eq.s32.totalorder %v12234_v12, 2 }
 0x47a   : > { %v4779_v60 = vsel %vm4773_vm1, %v4776_v16, %v4778_v37  ;;  %v12269_v8 = vmul.u32.u64.low %v4788_v10, %v4787_v5  ;;  %v12270_v27 = vmul.u32.u64.high %v4788_v10, %v4787_v5, %v12269_v8  ;;  %v4484_v48 = vadd.s32 %v12182_v0, %v12179_v63 }
 0x47b   : > { %v8615_v26 = vpop.eup %8614  ;;  %vm8049_vm10 = vcmp.lt.s32.totalorder %v8048_v44, 0  ;;  %v4643_v7 = vand.u32 8388607, %v4636_v23  ;;  %v4646_v35 = vadd.s32 1, %v8054_v28  ;;  %v4515_v22 = vsel %vm4430_vm15, %v4514_v40, %v12218_v18 }
 0x47c   : > { %v8617_v47 = vpop.eup %8616  ;;  %v4632_v32 = vxor.u32 2147483648, %v8615_v26  ;;  %v4499_v39 = vsel %vm8049_vm10, 0, %v8048_v44  ;;  %v4798_v51 = vadd.s32 1, %v12262_v61  ;;  %v4795_v25 = vmul.u32 %v4788_v10, %v4779_v60 }
 0x47d   : > { %v4629_v59 = vxor.u32 2147483648, %v8617_v47  ;;  %v4500_v36 = vsub.s32 32, %v4499_v39  ;;  %v4504_v3 = vsub.s32 4294967266, %v4499_v39  ;;  %v4501_v0 = vshll.u32 %v12236_v4, %v4499_v39 }
 0x47e   : > { %v4633_v63 = vsel %vm4631_vm7, %v4632_v32, %v8617_v47  ;;  %vm4797_vm8 = vc.u32 %v12270_v27, %v12261_v56  ;;  %vm4647_vm9 = vcmp.gt.s32.totalorder %v4646_v35, 0  ;;  %v4517_v38 = vsel %vm12251_vm3, 0, %v4515_v22 }
 0x47f   : > { %v4630_v18 = vsel %vm4628_vm6, %v8615_v26, %v4629_v59  ;;  %v4502_v21 = vshrl.u32 %v4484_v48, %v4500_v36  ;;  %v4505_v19 = vadd.s32 127, %v4504_v3  ;;  %v4799_v13 = vsel %vm4797_vm8, %v4798_v51, %v12262_v61 }
 0x480   : > { %v4634_v55 = vsel %vm4627_vm5, %v4630_v18, %v4633_v63  ;;  %v4800_v4 = vadd.s32 %v4799_v13, %v4795_v25  ;;  %v4648_v54 = vsel %vm4647_vm9, %v4646_v35, 0  ;;  %v1002_v11 = vsel %vm580_vm0, %v833_v42, %v15068_v24 }
 0x481   : > { %v4635_v57 = vsel %vm4624_vm4, nan, %v4634_v55  ;;  %v4503_v1 = vor.u32 %v4502_v21, %v4501_v0  ;;  %v4506_v62 = vshll.u32 %v4505_v19, 23  ;;  %v4650_v6 = vand.u32 31, %v4648_v54 }
 0x482   : > { %7789 = vst [vmem:[%s9477_s9 + $0x108] sm:$0xff] %v4635_v57  ;;  %v4801_v52 = vadd.s32 536870912, %v4800_v4  ;;  %v4521_v12 = vadd.s32 3, %v4517_v38  ;;  %v4644_v31 = vor.u32 8388608, %v4643_v7  ;;  %v12299_v53 = vmul.f32 %v12053_v29, %v1002_v11 }
 0x483   : > { %v4507_v30 = vor.u32 4788187, %v4506_v62  ;;  %v4651_v10 = vsub.s32 32, %v4650_v6  ;;  %v4510_v9 = vcvt.s32.f32 %v4503_v1  ;;  %v12301_v37 = vshrl.u32 %v4648_v54, 5  ;;  %v828_v62 = vpop.permute.xlu0 %827 }
 0x484   : > { %v4802_v33 = vshrl.u32 %v4801_v52, 30  ;;  %v4653_v40 = vshll.u32 %v14972_v41, %v4650_v6  ;;  %v4656_v44 = vshll.u32 %v14973_v34, %v4650_v6  ;;  %v4659_v5 = vshll.u32 %v14974_v14, %v4650_v6 }
 0x485   : > { %v4508_v16 = vand.u32 2147483647, %v4507_v30  ;;  %v4654_v61 = vshrl.u32 %v14973_v34, %v4651_v10  ;;  %v4657_v60 = vshrl.u32 %v14974_v14, %v4651_v10  ;;  %v4660_v8 = vshrl.u32 %v14975_v45, %v4651_v10 }
 0x486   : > { %v4803_v49 = vshll.u32 %v4802_v33, 30  ;;  %v4663_v26 = vshrl.u32 %v14976_v58, %v4651_v10  ;;  %v12310_v48 = vand.u32 3, %v4521_v12  ;;  %v4662_v35 = vshll.u32 %v14975_v45, %v4650_v6 }
 0x487   : > { %v4511_v28 = vmul.f32 %v4510_v9, %v4508_v16  ;;  %v4666_v47 = vshrl.u32 %v14980_v46, %v4651_v10  ;;  %vm4742_vm11 = vcmp.lt.s32.totalorder %v12104_v15, 0  ;;  %v4655_v39 = vor.u32 %v4654_v61, %v4653_v40  ;;  %v15071_v40 = vld [vmem:[#allocation23_spill] sm:$0xff] }
 0x488   : > { %v12312_v7 = vsub.s32 %v4800_v4, %v4803_v49  ;;  %v4658_v22 = vor.u32 %v4657_v60, %v4656_v44  ;;  %v4661_v51 = vor.u32 %v4660_v8, %v4659_v5  ;;  %v4664_v36 = vor.u32 %v4663_v26, %v4662_v35 }
 0x489   : > { %v4512_v32 = vxor.u32 2147483648, %v4511_v28  ;;  %v4665_v3 = vshll.u32 %v14976_v58, %v4650_v6  ;;  %v12319_v25 = vshll.u32 %v4644_v31, 8  ;;  %v4652_v0 = vshrl.u32 %v14972_v41, %v4651_v10 }
 0x48a   : > { %v4806_v59 = vsub.s32 0, %v12312_v7  ;;  %vm4668_vm12 = vcmp.lt.s32.totalorder %v12301_v37, 1  ;;  %v4951_v42 = vand.u32 2139095040, %v12299_v53  ;;  %vm4671_vm2 = vcmp.lt.s32.totalorder %v12301_v37, 4 }
 0x48b   : > { %v4513_v63 = vsel %vm4430_vm15, %v4512_v32, %v4511_v28  ;;  %v4667_v19 = vor.u32 %v4666_v47, %v4665_v3  ;;  %vm12333_vm14 = vcmp.le.f32.partialorder %v4740_v50, 0.7853982  ;;  %v4673_v55 = vsel %vm4671_vm2, %v4661_v51, 2102212464 }
 0x48c   : > { %v4516_v18 = vsel %vm12251_vm3, %v12056_v17, %v4513_v63  ;;  %v8059_v21 = vmin.u32 %v4806_v59, %v12312_v7  ;;  %v4676_v38 = vsel %vm4668_vm12, %v4655_v39, %v4658_v22  ;;  %v4677_v20 = vsel %vm4671_vm2, %v4664_v36, 920167782 }
 0x48d   : > { %8618 = vcosq.f32 %v4516_v18  ;;  %v4826_v54 = vsub.s32 4, %v4802_v33  ;;  %vm4670_vm15 = vcmp.lt.s32.totalorder %v12301_v37, 3  ;;  %vm4669_vm13 = vcmp.lt.s32.totalorder %v12301_v37, 2 }
 0x48e   : > { %8620 = vsinq.f32 %v4516_v18  ;;  %v4808_v4 = vclz %v8059_v21  ;;  %v4672_v50 = vsel %vm4668_vm12, %v4652_v0, %v4655_v39  ;;  %v4678_v57 = vsel %vm4670_vm15, %v4661_v51, %v4677_v20 }
 0x48f   : > { %v4680_v1 = vsel %vm4668_vm12, %v4658_v22, %v4661_v51  ;;  %v4674_v11 = vsel %vm4670_vm15, %v4658_v22, %v4673_v55  ;;  %v4679_v52 = vsel %vm4669_vm13, %v4676_v38, %v4678_v57  ;;  %v4681_v6 = vsel %vm4671_vm2, %v4667_v19, 1326507024 }
 0x490   : > { %v8060_v24 = vadd.s32 4294967294, %v4808_v4  ;;  %v4682_v30 = vsel %vm4670_vm15, %v4664_v36, %v4681_v6  ;;  %v12354_v12 = vmul.u32.u64.low %v12319_v25, %v4679_v52  ;;  %v12355_v31 = vmul.u32.u64.high %v12319_v25, %v4679_v52, %v12354_v12 }
 0x491   : > { %v4952_v10 = vshrl.u32 %v4951_v42, 23  ;;  %vm4524_vm1 = vcmp.eq.s32.totalorder %v12310_v48, 0  ;;  %v4827_v16 = vsel %vm4742_vm11, %v4826_v54, %v4802_v33  ;;  %v4683_v9 = vsel %vm4669_vm13, %v4680_v1, %v4682_v30 }
 0x492   : > { %vm8061_vm5 = vcmp.lt.s32.totalorder %v8060_v24, 0  ;;  %v1001_v49 = vsel %vm580_vm0, %v828_v62, %v15071_v40  ;;  %v12367_v44 = vmul.u32.u64.low %v12319_v25, %v4683_v9  ;;  %v12368_v5 = vmul.u32.u64.high %v12319_v25, %v4683_v9, %v12367_v44 }
 0x493   : > { %v4811_v61 = vsel %vm8061_vm5, 0, %v8060_v24  ;;  %v8066_v28 = vadd.s32 4294967169, %v4952_v10  ;;  %v4796_v60 = vadd.s32 %v12261_v56, %v12270_v27  ;;  %v4675_v33 = vsel %vm4669_vm13, %v4672_v50, %v4674_v11 }
 0x494   : > { %v4812_v8 = vsub.s32 32, %v4811_v61  ;;  %v4816_v26 = vsub.s32 4294967266, %v4811_v61  ;;  %v4694_v35 = vadd.s32 1, %v12355_v31  ;;  %v4948_v47 = vand.u32 2147483647, %v12299_v53 }
 0x495   : > { %v4958_v32 = vadd.s32 1, %v8066_v28  ;;  %v12377_v39 = vmul.f32 %v12053_v29, %v1001_v49  ;;  %v4813_v22 = vshll.u32 %v12312_v7, %v4811_v61  ;;  %v4829_v56 = vsel %vm12333_vm14, 0, %v4827_v16 }
 0x496   : > { %v4814_v51 = vshrl.u32 %v4796_v60, %v4812_v8  ;;  %v4817_v59 = vadd.s32 127, %v4816_v26  ;;  %vm4527_vm3 = vcmp.eq.s32.totalorder %v12310_v48, 2  ;;  %v4691_v37 = vmul.u32 %v12319_v25, %v4675_v33 }
 0x497   : > { %v8619_v27 = vpop.eup %8618  ;;  %vm4693_vm4 = vc.u32 %v12368_v5, %v12354_v12  ;;  %vm4959_vm6 = vcmp.gt.s32.totalorder %v4958_v32, 0  ;;  %v4833_v42 = vadd.s32 3, %v4829_v56  ;;  %v4955_v25 = vand.u32 8388607, %v4948_v47 }
 0x498   : > { %v8621_v36 = vpop.eup %8620  ;;  %v4528_v3 = vxor.u32 2147483648, %v8619_v27  ;;  %v4815_v29 = vor.u32 %v4814_v51, %v4813_v22  ;;  %v4818_v63 = vshll.u32 %v4817_v59, 23  ;;  %v4695_v7 = vsel %vm4693_vm4, %v4694_v35, %v12355_v31 }
 0x499   : > { %v4525_v0 = vxor.u32 2147483648, %v8621_v36  ;;  %v4696_v18 = vadd.s32 %v4695_v7, %v4691_v37  ;;  %v4960_v21 = vsel %vm4959_vm6, %v4958_v32, 0  ;;  %v4847_v38 = vand.u32 2139095040, %v12377_v39 }
 0x49a   : > { %v4529_v19 = vsel %vm4527_vm3, %v4528_v3, %v8621_v36  ;;  %v4819_v55 = vor.u32 4788187, %v4818_v63  ;;  %vm4523_vm7 = vcmp.lt.s32.totalorder %v12310_v48, 2  ;;  %v4962_v54 = vand.u32 31, %v4960_v21 }
 0x49b   : > { %v4526_v20 = vsel %vm4524_vm1, %v8619_v27, %v4525_v0  ;;  %v4697_v4 = vadd.s32 536870912, %v4696_v18  ;;  %vm4520_vm10 = vweird.f32 %v12056_v17  ;;  %v4822_v1 = vcvt.s32.f32 %v4815_v29 }
 0x49c   : > { %v4530_v50 = vsel %vm4523_vm7, %v4526_v20, %v4529_v19  ;;  %v4820_v57 = vand.u32 2147483647, %v4819_v55  ;;  %v4963_v11 = vsub.s32 32, %v4962_v54  ;;  %v12397_v6 = vand.u32 3, %v4833_v42 }
 0x49d   : > { %v4531_v62 = vsel %vm4520_vm10, nan, %v4530_v50  ;;  %v12394_v24 = vshrl.u32 %v4697_v4, 30  ;;  %v4956_v30 = vor.u32 8388608, %v4955_v25  ;;  %v4848_v31 = vshrl.u32 %v4847_v38, 23 }
 0x49e   : > { %7788 = vst [vmem:[%s9477_s9 + $0x100] sm:$0xff] %v4531_v62  ;;  %v4823_v52 = vmul.f32 %v4822_v1, %v4820_v57  ;;  %v4965_v10 = vshll.u32 %v14972_v41, %v4962_v54  ;;  %v4966_v16 = vshrl.u32 %v14973_v34, %v4963_v11  ;;  %v4968_v17 = vshll.u32 %v14973_v34, %v4962_v54 }
 0x49f   : > { %v4699_v48 = vshll.u32 %v12394_v24, 30  ;;  %v4969_v40 = vshrl.u32 %v14974_v14, %v4963_v11  ;;  %v4972_v49 = vshrl.u32 %v14975_v45, %v4963_v11  ;;  %v4975_v61 = vshrl.u32 %v14976_v58, %v4963_v11 }
 0x4a0   : > { %v4824_v9 = vxor.u32 2147483648, %v4823_v52  ;;  %v4961_v28 = vshrl.u32 %v4960_v21, 5  ;;  %v4971_v60 = vshll.u32 %v14974_v14, %v4962_v54  ;;  %v4974_v8 = vshll.u32 %v14975_v45, %v4962_v54 }
 0x4a1   : > { %v12406_v44 = vsub.s32 %v4696_v18, %v4699_v48  ;;  %v4967_v33 = vor.u32 %v4966_v16, %v4965_v10  ;;  %v4970_v35 = vor.u32 %v4969_v40, %v4968_v17  ;;  %v12412_v32 = vshll.u32 %v4956_v30, 8 }
 0x4a2   : > { %v4825_v26 = vsel %vm4742_vm11, %v4824_v9, %v4823_v52  ;;  %v4973_v59 = vor.u32 %v4972_v49, %v4971_v60  ;;  %v4976_v56 = vor.u32 %v4975_v61, %v4974_v8  ;;  %v4977_v27 = vshll.u32 %v14976_v58, %v4962_v54 }
 0x4a3   : > { %v4828_v22 = vsel %vm12333_vm14, %v12104_v15, %v4825_v26  ;;  %v4702_v51 = vsub.s32 0, %v12406_v44  ;;  %v4978_v37 = vshrl.u32 %v14980_v46, %v4963_v11  ;;  %v8062_v36 = vadd.s32 4294967169, %v4848_v31 }
 0x4a4   : > { %8622 = vcosq.f32 %v4828_v22  ;;  %vm4638_vm8 = vcmp.lt.s32.totalorder %v12203_v43, 0  ;;  %vm4980_vm9 = vcmp.lt.s32.totalorder %v4961_v28, 1  ;;  %vm4983_vm11 = vcmp.lt.s32.totalorder %v4961_v28, 4 }
 0x4a5   : > { %8624 = vsinq.f32 %v4828_v22  ;;  %v8055_v3 = vmin.u32 %v4702_v51, %v12406_v44  ;;  %v4979_v29 = vor.u32 %v4978_v37, %v4977_v27  ;;  %vm4981_vm12 = vcmp.lt.s32.totalorder %v4961_v28, 2 }
 0x4a6   : > { %v4988_v13 = vsel %vm4980_vm9, %v4967_v33, %v4970_v35  ;;  %v4989_v63 = vsel %vm4983_vm11, %v4976_v56, 920167782  ;;  %v4964_v0 = vshrl.u32 %v14972_v41, %v4963_v11  ;;  %vm4982_vm2 = vcmp.lt.s32.totalorder %v4961_v28, 3 }
 0x4a7   : > { %v4704_v7 = vclz %v8055_v3  ;;  %v4985_v42 = vsel %vm4983_vm11, %v4973_v59, 2102212464  ;;  %v4722_v18 = vsub.s32 4, %v12394_v24  ;;  %v4990_v21 = vsel %vm4982_vm2, %v4973_v59, %v4989_v63 }
 0x4a8   : > { %v4992_v19 = vsel %vm4980_vm9, %v4970_v35, %v4973_v59  ;;  %v4993_v55 = vsel %vm4983_vm11, %v4979_v29, 1326507024  ;;  %vm12428_vm14 = vcmp.le.f32.partialorder %v4636_v23, 0.7853982  ;;  %v4984_v20 = vsel %vm4980_vm9, %v4964_v0, %v4967_v33 }
 0x4a9   : > { %v8056_v38 = vadd.s32 4294967294, %v4704_v7  ;;  %v4991_v4 = vsel %vm4981_vm12, %v4988_v13, %v4990_v21  ;;  %v4994_v54 = vsel %vm4982_vm2, %v4976_v56, %v4993_v55  ;;  %v4986_v50 = vsel %vm4982_vm2, %v4970_v35, %v4985_v42 }
 0x4aa   : > { %v4995_v57 = vsel %vm4981_vm12, %v4992_v19, %v4994_v54  ;;  %v12436_v1 = vmul.u32.u64.low %v12412_v32, %v4991_v4  ;;  %v12437_v62 = vmul.u32.u64.high %v12412_v32, %v4991_v4, %v12436_v1  ;;  %vm4835_vm15 = vcmp.lt.s32.totalorder %v12397_v6, 2 }
 0x4ab   : > { %vm8057_vm13 = vcmp.lt.s32.totalorder %v8056_v38, 0  ;;  %v12442_v23 = vmul.u32.u64.low %v12412_v32, %v4995_v57  ;;  %v12443_v11 = vmul.u32.u64.high %v12412_v32, %v4995_v57, %v12442_v23  ;;  %vm4836_vm1 = vcmp.eq.s32.totalorder %v12397_v6, 0 }
 0x4ac   : > { %vm4839_vm5 = vcmp.eq.s32.totalorder %v12397_v6, 2  ;;  %v4707_v52 = vsel %vm8057_vm13, 0, %v8056_v38  ;;  %v4854_v30 = vadd.s32 1, %v8062_v36  ;;  %v4692_v31 = vadd.s32 %v12354_v12, %v12368_v5  ;;  %v843_v38 = vpop.permute.xlu1 %842 }
 0x4ad   : > { %v4708_v48 = vsub.s32 32, %v4707_v52  ;;  %v4712_v10 = vsub.s32 4294967266, %v4707_v52  ;;  %v4987_v16 = vsel %vm4981_vm12, %v4984_v20, %v4986_v50  ;;  %v4723_v9 = vsel %vm4638_vm8, %v4722_v18, %v12394_v24 }
 0x4ae   : > { %v8623_v17 = vpop.eup %8622  ;;  %v5006_v40 = vadd.s32 1, %v12437_v62  ;;  %v4844_v49 = vand.u32 2147483647, %v12377_v39  ;;  %vm4855_vm3 = vcmp.gt.s32.totalorder %v4854_v30, 0  ;;  %v4709_v8 = vshll.u32 %v12406_v44, %v4707_v52 }
 0x4af   : > { %v8625_v61 = vpop.eup %8624  ;;  %v4840_v60 = vxor.u32 2147483648, %v8623_v17  ;;  %v4710_v26 = vshrl.u32 %v4692_v31, %v4708_v48  ;;  %v4713_v12 = vadd.s32 127, %v4712_v10  ;;  %v5003_v28 = vmul.u32 %v12412_v32, %v4987_v16  ;;  %v15074_v10 = vld [vmem:[#allocation24_spill] sm:$0xff] }
 0x4b0   : > { %v4837_v5 = vxor.u32 2147483648, %v8625_v61  ;;  %vm5005_vm4 = vc.u32 %v12443_v11, %v12436_v1  ;;  %v4856_v33 = vsel %vm4855_vm3, %v4854_v30, 0  ;;  %v4725_v59 = vsel %vm12428_vm14, 0, %v4723_v9 }
 0x4b1   : > { %v4841_v24 = vsel %vm4839_vm5, %v4840_v60, %v8625_v61  ;;  %v4711_v35 = vor.u32 %v4710_v26, %v4709_v8  ;;  %v4714_v22 = vshll.u32 %v4713_v12, 23  ;;  %v5007_v51 = vsel %vm5005_vm4, %v5006_v40, %v12437_v62 }
 0x4b2   : > { %v4838_v44 = vsel %vm4836_vm1, %v8623_v17, %v4837_v5  ;;  %v5008_v56 = vadd.s32 %v5007_v51, %v5003_v28  ;;  %v4858_v32 = vand.u32 31, %v4856_v33  ;;  %vm4832_vm6 = vweird.f32 %v12104_v15  ;;  %v12503_v28 = vld [vmem:[%s14908_s2] ss:$0 sm:$0xff] }
 0x4b3   : > { %v4842_v27 = vsel %vm4835_vm15, %v4838_v44, %v4841_v24  ;;  %v4715_v37 = vor.u32 4788187, %v4714_v22  ;;  %v4718_v63 = vcvt.s32.f32 %v4711_v35  ;;  %v4729_v7 = vadd.s32 3, %v4725_v59 }
 0x4b4   : > { %v4843_v36 = vsel %vm4832_vm6, nan, %v4842_v27  ;;  %v5009_v3 = vadd.s32 536870912, %v5008_v56  ;;  %v4859_v29 = vsub.s32 32, %v4858_v32  ;;  %v4851_v42 = vand.u32 8388607, %v4844_v49 }
 0x4b5   : > { %7791 = vst [vmem:[%s9477_s9 + $0x118] sm:$0xff] %v4843_v36  ;;  %v4716_v13 = vand.u32 2147483647, %v4715_v37  ;;  %v4857_v18 = vshrl.u32 %v4856_v33, 5  ;;  %v4861_v4 = vshll.u32 %v14972_v41, %v4858_v32  ;;  %v4864_v54 = vshll.u32 %v14973_v34, %v4858_v32 }
 0x4b6   : > { %v12470_v0 = vshrl.u32 %v5009_v3, 30  ;;  %v4862_v21 = vshrl.u32 %v14973_v34, %v4859_v29  ;;  %v4865_v6 = vshrl.u32 %v14974_v14, %v4859_v29  ;;  %v4868_v19 = vshrl.u32 %v14975_v45, %v4859_v29 }
 0x4b7   : > { %v4719_v15 = vmul.f32 %v4718_v63, %v4716_v13  ;;  %v4871_v55 = vshrl.u32 %v14976_v58, %v4859_v29  ;;  %v4867_v50 = vshll.u32 %v14974_v14, %v4858_v32  ;;  %v4870_v62 = vshll.u32 %v14975_v45, %v4858_v32 }
 0x4b8   : > { %v5011_v20 = vshll.u32 %v12470_v0, 30  ;;  %v4873_v23 = vshll.u32 %v14976_v58, %v4858_v32  ;;  %v4874_v52 = vshrl.u32 %v14980_v46, %v4859_v29  ;;  %v4863_v31 = vor.u32 %v4862_v21, %v4861_v4  ;;  %v15077_v4 = vld [vmem:[#allocation25_spill] sm:$0xff] }
 0x4b9   : > { %v4720_v57 = vxor.u32 2147483648, %v4719_v15  ;;  %v4869_v48 = vor.u32 %v4868_v19, %v4867_v50  ;;  %v1004_v16 = vsel %vm580_vm0, %v843_v38, %v15074_v10  ;;  %v4866_v9 = vor.u32 %v4865_v6, %v4864_v54 }
 0x4ba   : > { %v12485_v30 = vsub.s32 %v5008_v56, %v5011_v20  ;;  %v4872_v40 = vor.u32 %v4871_v55, %v4870_v62  ;;  %v4875_v61 = vor.u32 %v4874_v52, %v4873_v23  ;;  %v12495_v8 = vand.u32 3, %v4729_v7 }
 0x4bb   : > { %v4721_v17 = vsel %vm4638_vm8, %v4720_v57, %v4719_v15  ;;  %v4852_v12 = vor.u32 8388608, %v4851_v42  ;;  %vm4950_vm7 = vcmp.lt.s32.totalorder %v12299_v53, 0  ;;  %v4860_v5 = vshrl.u32 %v14972_v41, %v4859_v29  ;;  %v838_v42 = vpop.permute.xlu0 %837 }
 0x4bc   : > { %v4724_v60 = vsel %vm12428_vm14, %v12203_v43, %v4721_v17  ;;  %v5014_v26 = vsub.s32 0, %v12485_v30  ;;  %vm4879_vm10 = vcmp.lt.s32.totalorder %v4857_v18, 4  ;;  %v12506_v33 = vmul.f32 %v12503_v28, %v1004_v16 }
 0x4bd   : > { %8626 = vcosq.f32 %v4724_v60  ;;  %vm4876_vm8 = vcmp.lt.s32.totalorder %v4857_v18, 1  ;;  %v4881_v24 = vsel %vm4879_vm10, %v4869_v48, 2102212464  ;;  %v4885_v22 = vsel %vm4879_vm10, %v4872_v40, 920167782 }
 0x4be   : > { %8628 = vsinq.f32 %v4724_v60  ;;  %v8067_v25 = vmin.u32 %v5014_v26, %v12485_v30  ;;  %v4884_v35 = vsel %vm4876_vm8, %v4863_v31, %v4866_v9  ;;  %v4888_v51 = vsel %vm4876_vm8, %v4866_v9, %v4869_v48 }
 0x4bf   : > { %v4889_v44 = vsel %vm4879_vm10, %v4875_v61, 1326507024  ;;  %vm12511_vm9 = vcmp.le.f32.partialorder %v4948_v47, 0.7853982  ;;  %vm4877_vm11 = vcmp.lt.s32.totalorder %v4857_v18, 2  ;;  %vm4878_vm12 = vcmp.lt.s32.totalorder %v4857_v18, 3 }
 0x4c0   : > { %v5016_v56 = vclz %v8067_v25  ;;  %v4892_v32 = vshll.u32 %v4852_v12, 8  ;;  %v4880_v27 = vsel %vm4876_vm8, %v4860_v5, %v4863_v31  ;;  %v4882_v37 = vsel %vm4878_vm12, %v4866_v9, %v4881_v24 }
 0x4c1   : > { %v4886_v36 = vsel %vm4878_vm12, %v4869_v48, %v4885_v22  ;;  %v4890_v3 = vsel %vm4878_vm12, %v4872_v40, %v4889_v44  ;;  %v5034_v13 = vsub.s32 4, %v12470_v0  ;;  %vm4732_vm2 = vcmp.eq.s32.totalorder %v12495_v8, 0 }
 0x4c2   : > { %v8068_v29 = vadd.s32 4294967294, %v5016_v56  ;;  %v4887_v63 = vsel %vm4877_vm11, %v4884_v35, %v4886_v36  ;;  %v4891_v7 = vsel %vm4877_vm11, %v4888_v51, %v4890_v3  ;;  %v4883_v19 = vsel %vm4877_vm11, %v4880_v27, %v4882_v37  ;;  %v853_v36 = vpop.permute.xlu1 %852 }
 0x4c3   : > { %v12518_v47 = vmul.u32.u64.low %v4892_v32, %v4891_v7  ;;  %v12519_v21 = vmul.u32.u64.high %v4892_v32, %v4891_v7, %v12518_v47  ;;  %v12521_v15 = vmul.u32.u64.low %v4892_v32, %v4887_v63  ;;  %v12522_v6 = vmul.u32.u64.high %v4892_v32, %v4887_v63, %v12521_v15 }
 0x4c4   : > { %vm8069_vm14 = vcmp.lt.s32.totalorder %v8068_v29, 0  ;;  %v5159_v55 = vand.u32 2139095040, %v12506_v33  ;;  %vm4735_vm15 = vcmp.eq.s32.totalorder %v12495_v8, 2  ;;  %v5004_v38 = vadd.s32 %v12436_v1, %v12443_v11  ;;  %v15078_v47 = vld [vmem:[#allocation26_spill] sm:$0xff] }
 0x4c5   : > { %v5019_v20 = vsel %vm8069_vm14, 0, %v8068_v29  ;;  %v1003_v54 = vsel %vm580_vm0, %v838_v42, %v15077_v4  ;;  %v5035_v62 = vsel %vm4950_vm7, %v5034_v13, %v12470_v0  ;;  %v4899_v31 = vmul.u32 %v4892_v32, %v4883_v19 }
 0x4c6   : > { %v5020_v50 = vsub.s32 32, %v5019_v20  ;;  %v5024_v57 = vsub.s32 4294967266, %v5019_v20  ;;  %v5160_v18 = vshrl.u32 %v5159_v55, 23  ;;  %v5021_v52 = vshll.u32 %v12485_v30, %v5019_v20 }
 0x4c7   : > { %v8627_v23 = vpop.eup %8626  ;;  %vm4901_vm13 = vc.u32 %v12519_v21, %v12521_v15  ;;  %v4902_v1 = vadd.s32 1, %v12522_v6  ;;  %v5037_v40 = vsel %vm12511_vm9, 0, %v5035_v62  ;;  %v5156_v61 = vand.u32 2147483647, %v12506_v33 }
 0x4c8   : > { %v8629_v11 = vpop.eup %8628  ;;  %v4736_v48 = vxor.u32 2147483648, %v8627_v23  ;;  %v5022_v10 = vshrl.u32 %v5004_v38, %v5020_v50  ;;  %v5025_v16 = vadd.s32 127, %v5024_v57  ;;  %v8074_v17 = vadd.s32 4294967169, %v5160_v18 }
 0x4c9   : > { %v4733_v9 = vxor.u32 2147483648, %v8629_v11  ;;  %v4903_v0 = vsel %vm4901_vm13, %v4902_v1, %v12522_v6  ;;  %vm4728_vm1 = vweird.f32 %v12203_v43  ;;  %vm4731_vm5 = vcmp.lt.s32.totalorder %v12495_v8, 2 }
 0x4ca   : > { %v4737_v30 = vsel %vm4735_vm15, %v4736_v48, %v8629_v11  ;;  %v5023_v60 = vor.u32 %v5022_v10, %v5021_v52  ;;  %v5026_v26 = vshll.u32 %v5025_v16, 23  ;;  %v4904_v12 = vadd.s32 %v4903_v0, %v4899_v31 }
 0x4cb   : > { %v4734_v5 = vsel %vm4732_vm2, %v8627_v23, %v4733_v9  ;;  %v5166_v25 = vadd.s32 1, %v8074_v17  ;;  %v5041_v22 = vadd.s32 3, %v5037_v40  ;;  %v5163_v56 = vand.u32 8388607, %v5156_v61 }
 0x4cc   : > { %v4738_v24 = vsel %vm4731_vm5, %v4734_v5, %v4737_v30  ;;  %v5027_v35 = vor.u32 4788187, %v5026_v26  ;;  %v4905_v51 = vadd.s32 536870912, %v4904_v12  ;;  %v12554_v32 = vmul.f32 %v12503_v28, %v1003_v54 }
 0x4cd   : > { %v4739_v44 = vsel %vm4728_vm1, nan, %v4738_v24  ;;  %vm5167_vm3 = vcmp.gt.s32.totalorder %v5166_v25, 0  ;;  %v5030_v27 = vcvt.s32.f32 %v5023_v60  ;;  %v12560_v63 = vand.u32 3, %v5041_v22 }
 0x4ce   : > { %7790 = vst [vmem:[%s9477_s9 + $0x110] sm:$0xff] %v4739_v44  ;;  %v5028_v43 = vand.u32 2147483647, %v5027_v35  ;;  %v12557_v37 = vshrl.u32 %v4905_v51, 30  ;;  %v5168_v8 = vsel %vm5167_vm3, %v5166_v25, 0  ;;  %v5164_v7 = vor.u32 8388608, %v5163_v56 }
 0x4cf   : > { %v5170_v3 = vand.u32 31, %v5168_v8  ;;  %v12565_v6 = vsel %vm580_vm0, %v853_v36, %v15078_v47  ;;  %v12569_v38 = vshrl.u32 %v5168_v8, 5  ;;  %v5055_v20 = vand.u32 2139095040, %v12554_v32 }
 0x4d0   : > { %v5031_v29 = vmul.f32 %v5030_v27, %v5028_v43  ;;  %v4907_v13 = vshll.u32 %v12557_v37, 30  ;;  %vm4846_vm4 = vcmp.lt.s32.totalorder %v12377_v39, 0  ;;  %v4900_v59 = vadd.s32 %v12521_v15, %v12519_v21 }
 0x4d1   : > { %v5171_v42 = vsub.s32 32, %v5170_v3  ;;  %v5173_v4 = vshll.u32 %v14972_v41, %v5170_v3  ;;  %v5176_v50 = vshll.u32 %v14973_v34, %v5170_v3  ;;  %v5179_v23 = vshll.u32 %v14974_v14, %v5170_v3 }
 0x4d2   : > { %v5032_v19 = vxor.u32 2147483648, %v5031_v29  ;;  %v12567_v55 = vsub.s32 %v4904_v12, %v4907_v13  ;;  %v5182_v11 = vshll.u32 %v14975_v45, %v5170_v3  ;;  %v5185_v40 = vshll.u32 %v14976_v58, %v5170_v3 }
 0x4d3   : > { %v5174_v54 = vshrl.u32 %v14973_v34, %v5171_v42  ;;  %v5177_v57 = vshrl.u32 %v14974_v14, %v5171_v42  ;;  %v5180_v52 = vshrl.u32 %v14975_v45, %v5171_v42  ;;  %v5183_v48 = vshrl.u32 %v14976_v58, %v5171_v42 }
 0x4d4   : > { %v5033_v62 = vsel %vm4950_vm7, %v5032_v19, %v5031_v29  ;;  %v4910_v18 = vsub.s32 0, %v12567_v55  ;;  %v5186_v0 = vshrl.u32 %v14980_v46, %v5171_v42  ;;  %v12592_v60 = vshll.u32 %v5164_v7, 8 }
 0x4d5   : > { %v5036_v31 = vsel %vm12511_vm9, %v12299_v53, %v5033_v62  ;;  %v5175_v1 = vor.u32 %v5174_v54, %v5173_v4  ;;  %v5178_v16 = vor.u32 %v5177_v57, %v5176_v50  ;;  %v5181_v17 = vor.u32 %v5180_v52, %v5179_v23 }
 0x4d6   : > { %8630 = vcosq.f32 %v5036_v31  ;;  %v8063_v10 = vmin.u32 %v4910_v18, %v12567_v55  ;;  %v5184_v9 = vor.u32 %v5183_v48, %v5182_v11  ;;  %v5052_v26 = vand.u32 2147483647, %v12554_v32 }
 0x4d7   : > { %8632 = vsinq.f32 %v5036_v31  ;;  %v5172_v12 = vshrl.u32 %v14972_v41, %v5171_v42  ;;  %v5187_v5 = vor.u32 %v5186_v0, %v5185_v40  ;;  %vm5188_vm6 = vcmp.lt.s32.totalorder %v12569_v38, 1 }
 0x4d8   : > { %v4912_v30 = vclz %v8063_v10  ;;  %v5056_v25 = vshrl.u32 %v5055_v20, 23  ;;  %vm5047_vm7 = vcmp.eq.s32.totalorder %v12560_v63, 2  ;;  %vm5190_vm10 = vcmp.lt.s32.totalorder %v12569_v38, 3 }
 0x4d9   : > { %vm5191_vm8 = vcmp.lt.s32.totalorder %v12569_v38, 4  ;;  %v5196_v21 = vsel %vm5188_vm6, %v5175_v1, %v5178_v16  ;;  %vm5044_vm9 = vcmp.eq.s32.totalorder %v12560_v63, 0  ;;  %v5200_v22 = vsel %vm5188_vm6, %v5178_v16, %v5181_v17 }
 0x4da   : > { %v8064_v24 = vadd.s32 4294967294, %v4912_v30  ;;  %v5193_v15 = vsel %vm5191_vm8, %v5181_v17, 2102212464  ;;  %v5197_v35 = vsel %vm5191_vm8, %v5184_v9, 920167782  ;;  %vm5043_vm11 = vcmp.lt.s32.totalorder %v12560_v63, 2 }
 0x4db   : > { %v5201_v51 = vsel %vm5191_vm8, %v5187_v5, 1326507024  ;;  %vm12608_vm12 = vcmp.le.f32.partialorder %v4844_v49, 0.7853982  ;;  %vm5189_vm14 = vcmp.lt.s32.totalorder %v12569_v38, 2  ;;  %v5198_v56 = vsel %vm5190_vm10, %v5181_v17, %v5197_v35 }
 0x4dc   : > { %vm8065_vm2 = vcmp.lt.s32.totalorder %v8064_v24, 0  ;;  %v5202_v43 = vsel %vm5190_vm10, %v5184_v9, %v5201_v51  ;;  %vm5040_vm15 = vweird.f32 %v12299_v53  ;;  %v4930_v8 = vsub.s32 4, %v12557_v37 }
 0x4dd   : > { %v4915_v27 = vsel %vm8065_vm2, 0, %v8064_v24  ;;  %v5199_v49 = vsel %vm5189_vm14, %v5196_v21, %v5198_v56  ;;  %v5203_v36 = vsel %vm5189_vm14, %v5200_v22, %v5202_v43  ;;  %v5192_v13 = vsel %vm5188_vm6, %v5172_v12, %v5175_v1 }
 0x4de   : > { %v4916_v3 = vsub.s32 32, %v4915_v27  ;;  %v4920_v29 = vsub.s32 4294967266, %v4915_v27  ;;  %v5194_v7 = vsel %vm5190_vm10, %v5178_v16, %v5193_v15  ;;  %v4917_v54 = vshll.u32 %v12567_v55, %v4915_v27 }
 0x4df   : > { %v12628_v42 = vmul.u32.u64.low %v12592_v60, %v5203_v36  ;;  %v12629_v47 = vmul.u32.u64.high %v12592_v60, %v5203_v36, %v12628_v42  ;;  %v12632_v19 = vmul.u32.u64.low %v12592_v60, %v5199_v49  ;;  %v12633_v20 = vmul.u32.u64.high %v12592_v60, %v5199_v49, %v12632_v19 }
 0x4e0   : > { %v8631_v4 = vpop.eup %8630  ;;  %v4918_v50 = vshrl.u32 %v4900_v59, %v4916_v3  ;;  %v4921_v57 = vadd.s32 127, %v4920_v29  ;;  %v8070_v62 = vadd.s32 4294967169, %v5056_v25  ;;  %v4931_v52 = vsel %vm4846_vm4, %v4930_v8, %v12557_v37 }
 0x4e1   : > { %v8633_v18 = vpop.eup %8632  ;;  %v5048_v23 = vxor.u32 2147483648, %v8631_v4  ;;  %v5195_v31 = vsel %vm5189_vm14, %v5192_v13, %v5194_v7  ;;  %v12644_v1 = vand.u32 8388607, %v5052_v26  ;;  %vm5213_vm13 = vc.u32 %v12629_v47, %v12632_v19 }
 0x4e2   : > { %v5045_v11 = vxor.u32 2147483648, %v8633_v18  ;;  %v4919_v48 = vor.u32 %v4918_v50, %v4917_v54  ;;  %v4922_v10 = vshll.u32 %v4921_v57, 23  ;;  %v5062_v55 = vadd.s32 1, %v8070_v62 }
 0x4e3   : > { %v5049_v16 = vsel %vm5047_vm7, %v5048_v23, %v8633_v18  ;;  %v5214_v37 = vadd.s32 1, %v12633_v20  ;;  %v12653_v38 = vmul.f32 %v12503_v28, %v12565_v6  ;;  %v5211_v40 = vmul.u32 %v12592_v60, %v5195_v31 }
 0x4e4   : > { %v5046_v17 = vsel %vm5044_vm9, %v8631_v4, %v5045_v11  ;;  %v4923_v9 = vor.u32 4788187, %v4922_v10  ;;  %vm5063_vm1 = vcmp.gt.s32.totalorder %v5062_v55, 0  ;;  %v4933_v59 = vsel %vm12608_vm12, 0, %v4931_v52 }
 0x4e5   : > { %v5050_v0 = vsel %vm5043_vm11, %v5046_v17, %v5049_v16  ;;  %v5215_v30 = vsel %vm5213_vm13, %v5214_v37, %v12633_v20  ;;  %v5064_v12 = vsel %vm5063_vm1, %v5062_v55, 0  ;;  %v4926_v25 = vcvt.s32.f32 %v4919_v48 }
 0x4e6   : > { %v5051_v6 = vsel %vm5040_vm15, nan, %v5050_v0  ;;  %v4924_v5 = vand.u32 2147483647, %v4923_v9  ;;  %v5216_v24 = vadd.s32 %v5215_v30, %v5211_v40  ;;  %v5066_v21 = vand.u32 31, %v5064_v12 }
 0x4e7   : > { %7793 = vst [vmem:[%s9477_s9 + $0x128] sm:$0xff] %v5051_v6  ;;  %v5060_v35 = vor.u32 8388608, %v12644_v1  ;;  %v4937_v63 = vadd.s32 3, %v4933_v59  ;;  %v5065_v22 = vshrl.u32 %v5064_v12, 5  ;;  %v5367_v56 = vand.u32 2139095040, %v12653_v38 }
 0x4e8   : > { %v4927_v15 = vmul.f32 %v4926_v25, %v4924_v5  ;;  %v5217_v60 = vadd.s32 536870912, %v5216_v24  ;;  %v5067_v51 = vsub.s32 32, %v5066_v21  ;;  %v5069_v53 = vshll.u32 %v14972_v41, %v5066_v21 }
 0x4e9   : > { %v5072_v8 = vshll.u32 %v14973_v34, %v5066_v21  ;;  %v5075_v3 = vshll.u32 %v14974_v14, %v5066_v21  ;;  %v5078_v42 = vshll.u32 %v14975_v45, %v5066_v21  ;;  %v12684_v62 = vand.u32 3, %v4937_v63 }
 0x4ea   : > { %v4928_v43 = vxor.u32 2147483648, %v4927_v15  ;;  %v12668_v27 = vshrl.u32 %v5217_v60, 30  ;;  %v5070_v49 = vshrl.u32 %v14973_v34, %v5067_v51  ;;  %v5073_v36 = vshrl.u32 %v14974_v14, %v5067_v51 }
 0x4eb   : > { %v5076_v29 = vshrl.u32 %v14975_v45, %v5067_v51  ;;  %v5079_v20 = vshrl.u32 %v14976_v58, %v5067_v51  ;;  %v5081_v52 = vshll.u32 %v14976_v58, %v5066_v21  ;;  %v5082_v31 = vshrl.u32 %v14980_v46, %v5067_v51 }
 0x4ec   : > { %v4929_v13 = vsel %vm4846_vm4, %v4928_v43, %v4927_v15  ;;  %v5219_v7 = vshll.u32 %v12668_v27, 30  ;;  %v5071_v54 = vor.u32 %v5070_v49, %v5069_v53  ;;  %v5074_v50 = vor.u32 %v5073_v36, %v5072_v8 }
 0x4ed   : > { %v4932_v4 = vsel %vm12608_vm12, %v12377_v39, %v4929_v13  ;;  %v5077_v57 = vor.u32 %v5076_v29, %v5075_v3  ;;  %v5080_v23 = vor.u32 %v5079_v20, %v5078_v42  ;;  %v5368_v1 = vshrl.u32 %v5367_v56, 23 }
 0x4ee   : > { %8634 = vcosq.f32 %v4932_v4  ;;  %v12686_v18 = vsub.s32 %v5216_v24, %v5219_v7  ;;  %vm5158_vm5 = vcmp.lt.s32.totalorder %v12506_v33, 0  ;;  %vm5084_vm3 = vcmp.lt.s32.totalorder %v5065_v22, 1 }
 0x4ef   : > { %8636 = vsinq.f32 %v4932_v4  ;;  %vm5086_vm4 = vcmp.lt.s32.totalorder %v5065_v22, 3  ;;  %vm5087_vm6 = vcmp.lt.s32.totalorder %v5065_v22, 4  ;;  %v5083_v11 = vor.u32 %v5082_v31, %v5081_v52 }
 0x4f0   : > { %v5222_v44 = vsub.s32 0, %v12686_v18  ;;  %v5089_v48 = vsel %vm5087_vm6, %v5077_v57, 2102212464  ;;  %v5092_v10 = vsel %vm5084_vm3, %v5071_v54, %v5074_v50  ;;  %v5093_v55 = vsel %vm5087_vm6, %v5080_v23, 920167782 }
 0x4f1   : > { %v5068_v37 = vshrl.u32 %v14972_v41, %v5067_v51  ;;  %vm5085_vm7 = vcmp.lt.s32.totalorder %v5065_v22, 2  ;;  %v5094_v17 = vsel %vm5086_vm4, %v5077_v57, %v5093_v55  ;;  %v5096_v40 = vsel %vm5084_vm3, %v5074_v50, %v5077_v57  ;;  %v15083_v55 = vld [vmem:[#allocation27_spill] sm:$0xff] }
 0x4f2   : > { %v8075_v16 = vmin.u32 %v5222_v44, %v12686_v18  ;;  %v5095_v9 = vsel %vm5085_vm7, %v5092_v10, %v5094_v17  ;;  %v5097_v0 = vsel %vm5087_vm6, %v5083_v11, 1326507024  ;;  %v5100_v59 = vshll.u32 %v5060_v35, 8 }
 0x4f3   : > { %vm4939_vm10 = vcmp.lt.s32.totalorder %v12684_v62, 2  ;;  %vm12701_vm8 = vcmp.le.f32.partialorder %v5156_v61, 0.7853982  ;;  %v5088_v6 = vsel %vm5084_vm3, %v5068_v37, %v5071_v54  ;;  %v5090_v5 = vsel %vm5086_vm4, %v5074_v50, %v5089_v48  ;;  %v848_v50 = vpop.permute.xlu0 %847 }
 0x4f4   : > { %v5224_v12 = vclz %v8075_v16  ;;  %v5364_v25 = vand.u32 2147483647, %v12653_v38  ;;  %vm4936_vm9 = vweird.f32 %v12377_v39  ;;  %v5242_v24 = vsub.s32 4, %v12668_v27 }
 0x4f5   : > { %v5098_v21 = vsel %vm5086_vm4, %v5080_v23, %v5097_v0  ;;  %v12711_v15 = vmul.u32.u64.low %v5100_v59, %v5095_v9  ;;  %v12712_v60 = vmul.u32.u64.high %v5100_v59, %v5095_v9, %v12711_v15  ;;  %vm4940_vm11 = vcmp.eq.s32.totalorder %v12684_v62, 0 }
 0x4f6   : > { %v8076_v61 = vadd.s32 4294967294, %v5224_v12  ;;  %v5099_v35 = vsel %vm5085_vm7, %v5096_v40, %v5098_v21  ;;  %v8082_v63 = vadd.s32 4294967169, %v5368_v1  ;;  %vm4943_vm12 = vcmp.eq.s32.totalorder %v12684_v62, 2 }
 0x4f7   : > { %v5091_v51 = vsel %vm5085_vm7, %v5088_v6, %v5090_v5  ;;  %v12719_v56 = vmul.u32.u64.low %v5100_v59, %v5099_v35  ;;  %v12720_v43 = vmul.u32.u64.high %v5100_v59, %v5099_v35, %v12719_v56  ;;  %v5212_v8 = vadd.s32 %v12632_v19, %v12629_v47 }
 0x4f8   : > { %v8635_v53 = vpop.eup %8634  ;;  %vm8077_vm2 = vcmp.lt.s32.totalorder %v8076_v61, 0  ;;  %v5371_v49 = vand.u32 8388607, %v5364_v25  ;;  %v5374_v36 = vadd.s32 1, %v8082_v63  ;;  %v5243_v22 = vsel %vm5158_vm5, %v5242_v24, %v12668_v27 }
 0x4f9   : > { %v8637_v3 = vpop.eup %8636  ;;  %v4944_v29 = vxor.u32 2147483648, %v8635_v53  ;;  %v5227_v13 = vsel %vm8077_vm2, 0, %v8076_v61  ;;  %v5110_v7 = vadd.s32 1, %v12712_v60  ;;  %v5107_v54 = vmul.u32 %v5100_v59, %v5091_v51 }
 0x4fa   : > { %v4941_v42 = vxor.u32 2147483648, %v8637_v3  ;;  %v5228_v20 = vsub.s32 32, %v5227_v13  ;;  %v5232_v4 = vsub.s32 4294967266, %v5227_v13  ;;  %v5229_v19 = vshll.u32 %v12686_v18, %v5227_v13 }
 0x4fb   : > { %v4945_v47 = vsel %vm4943_vm12, %v4944_v29, %v8637_v3  ;;  %vm5109_vm14 = vc.u32 %v12720_v43, %v12711_v15  ;;  %vm5375_vm15 = vcmp.gt.s32.totalorder %v5374_v36, 0  ;;  %v5245_v1 = vsel %vm12701_vm8, 0, %v5243_v22 }
 0x4fc   : > { %v4942_v27 = vsel %vm4940_vm11, %v8635_v53, %v4941_v42  ;;  %v5230_v57 = vshrl.u32 %v5212_v8, %v5228_v20  ;;  %v5233_v23 = vadd.s32 127, %v5232_v4  ;;  %v5111_v52 = vsel %vm5109_vm14, %v5110_v7, %v12712_v60 }
 0x4fd   : > { %v4946_v31 = vsel %vm4939_vm10, %v4942_v27, %v4945_v47  ;;  %v5112_v18 = vadd.s32 %v5111_v52, %v5107_v54  ;;  %v5376_v44 = vsel %vm5375_vm15, %v5374_v36, 0  ;;  %v1005_v16 = vsel %vm580_vm0, %v848_v50, %v15083_v55 }
 0x4fe   : > { %v4947_v11 = vsel %vm4936_vm9, nan, %v4946_v31  ;;  %v5231_v48 = vor.u32 %v5230_v57, %v5229_v19  ;;  %v5234_v10 = vshll.u32 %v5233_v23, 23  ;;  %v5378_v17 = vand.u32 31, %v5376_v44 }
 0x4ff   : > { %7792 = vst [vmem:[%s9477_s9 + $0x120] sm:$0xff] %v4947_v11  ;;  %v5113_v37 = vadd.s32 536870912, %v5112_v18  ;;  %v5249_v62 = vadd.s32 3, %v5245_v1  ;;  %v5372_v0 = vor.u32 8388608, %v5371_v49  ;;  %v12749_v12 = vmul.f32 %v12503_v28, %v1005_v16 }
 0x500   : > { %v5235_v9 = vor.u32 4788187, %v5234_v10  ;;  %v5379_v59 = vsub.s32 32, %v5378_v17  ;;  %v5238_v39 = vcvt.s32.f32 %v5231_v48  ;;  %v12751_v5 = vshrl.u32 %v5376_v44, 5  ;;  %v863_v10 = vpop.permute.xlu1 %862 }
 0x501   : > { %v5114_v40 = vshrl.u32 %v5113_v37, 30  ;;  %v5381_v24 = vshll.u32 %v14972_v41, %v5378_v17  ;;  %v5384_v61 = vshll.u32 %v14973_v34, %v5378_v17  ;;  %v5387_v35 = vshll.u32 %v14974_v14, %v5378_v17 }
 0x502   : > { %v5236_v6 = vand.u32 2147483647, %v5235_v9  ;;  %v5382_v60 = vshrl.u32 %v14973_v34, %v5379_v59  ;;  %v5385_v51 = vshrl.u32 %v14974_v14, %v5379_v59  ;;  %v5388_v56 = vshrl.u32 %v14975_v45, %v5379_v59 }
 0x503   : > { %v5115_v21 = vshll.u32 %v5114_v40, 30  ;;  %v5391_v53 = vshrl.u32 %v14976_v58, %v5379_v59  ;;  %v12760_v8 = vand.u32 3, %v5249_v62  ;;  %v5390_v36 = vshll.u32 %v14975_v45, %v5378_v17 }
 0x504   : > { %v5239_v63 = vmul.f32 %v5238_v39, %v5236_v6  ;;  %v5394_v3 = vshrl.u32 %v14980_v46, %v5379_v59  ;;  %vm5054_vm13 = vcmp.lt.s32.totalorder %v12554_v32, 0  ;;  %v5383_v13 = vor.u32 %v5382_v60, %v5381_v24  ;;  %v15086_v24 = vld [vmem:[#allocation28_spill] sm:$0xff] }
 0x505   : > { %v12762_v49 = vsub.s32 %v5112_v18, %v5115_v21  ;;  %v5386_v22 = vor.u32 %v5385_v51, %v5384_v61  ;;  %v5389_v7 = vor.u32 %v5388_v56, %v5387_v35  ;;  %v5392_v20 = vor.u32 %v5391_v53, %v5390_v36 }
 0x506   : > { %v5240_v29 = vxor.u32 2147483648, %v5239_v63  ;;  %v5393_v4 = vshll.u32 %v14976_v58, %v5378_v17  ;;  %v12769_v54 = vshll.u32 %v5372_v0, 8  ;;  %v5380_v19 = vshrl.u32 %v14972_v41, %v5379_v59 }
 0x507   : > { %v5118_v42 = vsub.s32 0, %v12762_v49  ;;  %vm5396_vm1 = vcmp.lt.s32.totalorder %v12751_v5, 1  ;;  %v5263_v50 = vand.u32 2139095040, %v12749_v12  ;;  %vm5399_vm3 = vcmp.lt.s32.totalorder %v12751_v5, 4 }
 0x508   : > { %v5241_v47 = vsel %vm5158_vm5, %v5240_v29, %v5239_v63  ;;  %v5395_v23 = vor.u32 %v5394_v3, %v5393_v4  ;;  %vm12783_vm4 = vcmp.le.f32.partialorder %v5052_v26, 0.7853982  ;;  %v5401_v31 = vsel %vm5399_vm3, %v5389_v7, 2102212464 }
 0x509   : > { %v5244_v27 = vsel %vm12701_vm8, %v12506_v33, %v5241_v47  ;;  %v8071_v57 = vmin.u32 %v5118_v42, %v12762_v49  ;;  %v5404_v1 = vsel %vm5396_vm1, %v5383_v13, %v5386_v22  ;;  %v5405_v30 = vsel %vm5399_vm3, %v5392_v20, 920167782 }
 0x50a   : > { %8638 = vcosq.f32 %v5244_v27  ;;  %v5138_v44 = vsub.s32 4, %v5114_v40  ;;  %vm5398_vm5 = vcmp.lt.s32.totalorder %v12751_v5, 3  ;;  %vm5397_vm6 = vcmp.lt.s32.totalorder %v12751_v5, 2 }
 0x50b   : > { %8640 = vsinq.f32 %v5244_v27  ;;  %v5120_v18 = vclz %v8071_v57  ;;  %v5400_v26 = vsel %vm5396_vm1, %v5380_v19, %v5383_v13  ;;  %v5406_v11 = vsel %vm5398_vm5, %v5389_v7, %v5405_v30 }
 0x50c   : > { %v5408_v48 = vsel %vm5396_vm1, %v5386_v22, %v5389_v7  ;;  %v5402_v16 = vsel %vm5398_vm5, %v5386_v22, %v5401_v31  ;;  %v5407_v37 = vsel %vm5397_vm6, %v5404_v1, %v5406_v11  ;;  %v5409_v17 = vsel %vm5399_vm3, %v5395_v23, 1326507024 }
 0x50d   : > { %v8072_v55 = vadd.s32 4294967294, %v5120_v18  ;;  %v5410_v9 = vsel %vm5398_vm5, %v5392_v20, %v5409_v17  ;;  %v12804_v62 = vmul.u32.u64.low %v12769_v54, %v5407_v37  ;;  %v12805_v0 = vmul.u32.u64.high %v12769_v54, %v5407_v37, %v12804_v62 }
 0x50e   : > { %v5264_v59 = vshrl.u32 %v5263_v50, 23  ;;  %vm5252_vm7 = vcmp.eq.s32.totalorder %v12760_v8, 0  ;;  %v5139_v6 = vsel %vm5054_vm13, %v5138_v44, %v5114_v40  ;;  %v5411_v39 = vsel %vm5397_vm6, %v5408_v48, %v5410_v9 }
 0x50f   : > { %vm8073_vm10 = vcmp.lt.s32.totalorder %v8072_v55, 0  ;;  %v1008_v21 = vsel %vm580_vm0, %v863_v10, %v15086_v24  ;;  %v12817_v61 = vmul.u32.u64.low %v12769_v54, %v5411_v39  ;;  %v12818_v35 = vmul.u32.u64.high %v12769_v54, %v5411_v39, %v12817_v61 }
 0x510   : > { %v5123_v60 = vsel %vm8073_vm10, 0, %v8072_v55  ;;  %v8078_v63 = vadd.s32 4294967169, %v5264_v59  ;;  %v5108_v51 = vadd.s32 %v12711_v15, %v12720_v43  ;;  %v5403_v40 = vsel %vm5397_vm6, %v5400_v26, %v5402_v16 }
 0x511   : > { %v5124_v56 = vsub.s32 32, %v5123_v60  ;;  %v5128_v53 = vsub.s32 4294967266, %v5123_v60  ;;  %v5422_v36 = vadd.s32 1, %v12805_v0  ;;  %v5260_v3 = vand.u32 2147483647, %v12749_v12 }
 0x512   : > { %v5270_v29 = vadd.s32 1, %v8078_v63  ;;  %v12827_v13 = vmul.f32 %v12503_v28, %v1008_v21  ;;  %v5125_v22 = vshll.u32 %v12762_v49, %v5123_v60  ;;  %v5141_v15 = vsel %vm12783_vm4, 0, %v5139_v6 }
 0x513   : > { %v5126_v7 = vshrl.u32 %v5108_v51, %v5124_v56  ;;  %v5129_v42 = vadd.s32 127, %v5128_v53  ;;  %vm5255_vm8 = vcmp.eq.s32.totalorder %v12760_v8, 2  ;;  %v5419_v5 = vmul.u32 %v12769_v54, %v5403_v40 }
 0x514   : > { %v8639_v43 = vpop.eup %8638  ;;  %vm5421_vm9 = vc.u32 %v12818_v35, %v12804_v62  ;;  %vm5271_vm11 = vcmp.gt.s32.totalorder %v5270_v29, 0  ;;  %v5145_v50 = vadd.s32 3, %v5141_v15  ;;  %v5267_v54 = vand.u32 8388607, %v5260_v3 }
 0x515   : > { %v8641_v20 = vpop.eup %8640  ;;  %v5256_v4 = vxor.u32 2147483648, %v8639_v43  ;;  %v5127_v28 = vor.u32 %v5126_v7, %v5125_v22  ;;  %v5130_v47 = vshll.u32 %v5129_v42, 23  ;;  %v5423_v49 = vsel %vm5421_vm9, %v5422_v36, %v12805_v0 }
 0x516   : > { %v5253_v19 = vxor.u32 2147483648, %v8641_v20  ;;  %v5424_v27 = vadd.s32 %v5423_v49, %v5419_v5  ;;  %v5272_v57 = vsel %vm5271_vm11, %v5270_v29, 0  ;;  %v5575_v1 = vand.u32 2139095040, %v12827_v13 }
 0x517   : > { %v5257_v23 = vsel %vm5255_vm8, %v5256_v4, %v8641_v20  ;;  %v5131_v31 = vor.u32 4788187, %v5130_v47  ;;  %vm5251_vm12 = vcmp.lt.s32.totalorder %v12760_v8, 2  ;;  %v5274_v44 = vand.u32 31, %v5272_v57 }
 0x518   : > { %v5254_v30 = vsel %vm5252_vm7, %v8639_v43, %v5253_v19  ;;  %v5425_v18 = vadd.s32 536870912, %v5424_v27  ;;  %vm5248_vm2 = vweird.f32 %v12506_v33  ;;  %v5134_v48 = vcvt.s32.f32 %v5127_v28 }
 0x519   : > { %v5258_v26 = vsel %vm5251_vm12, %v5254_v30, %v5257_v23  ;;  %v5132_v11 = vand.u32 2147483647, %v5131_v31  ;;  %v5275_v16 = vsub.s32 32, %v5274_v44  ;;  %v12847_v17 = vand.u32 3, %v5145_v50 }
 0x51a   : > { %v5259_v10 = vsel %vm5248_vm2, nan, %v5258_v26  ;;  %v12844_v55 = vshrl.u32 %v5425_v18, 30  ;;  %v5268_v9 = vor.u32 8388608, %v5267_v54  ;;  %v5576_v0 = vshrl.u32 %v5575_v1, 23 }
 0x51b   : > { %7795 = vst [vmem:[%s9477_s9 + $0x138] sm:$0xff] %v5259_v10  ;;  %v5135_v37 = vmul.f32 %v5134_v48, %v5132_v11  ;;  %v5277_v59 = vshll.u32 %v14972_v41, %v5274_v44  ;;  %v5278_v6 = vshrl.u32 %v14973_v34, %v5275_v16  ;;  %v5280_v33 = vshll.u32 %v14973_v34, %v5274_v44 }
 0x51c   : > { %v5427_v8 = vshll.u32 %v12844_v55, 30  ;;  %v5281_v24 = vshrl.u32 %v14974_v14, %v5275_v16  ;;  %v5284_v21 = vshrl.u32 %v14975_v45, %v5275_v16  ;;  %v5287_v60 = vshrl.u32 %v14976_v58, %v5275_v16 }
 0x51d   : > { %v5136_v39 = vxor.u32 2147483648, %v5135_v37  ;;  %v5273_v63 = vshrl.u32 %v5272_v57, 5  ;;  %v5283_v51 = vshll.u32 %v14974_v14, %v5274_v44  ;;  %v5286_v56 = vshll.u32 %v14975_v45, %v5274_v44 }
 0x51e   : > { %v12856_v61 = vsub.s32 %v5424_v27, %v5427_v8  ;;  %v5279_v40 = vor.u32 %v5278_v6, %v5277_v59  ;;  %v5282_v36 = vor.u32 %v5281_v24, %v5280_v33  ;;  %v12862_v29 = vshll.u32 %v5268_v9, 8 }
 0x51f   : > { %v5137_v53 = vsel %vm5054_vm13, %v5136_v39, %v5135_v37  ;;  %v5285_v42 = vor.u32 %v5284_v21, %v5283_v51  ;;  %v5288_v15 = vor.u32 %v5287_v60, %v5286_v56  ;;  %v5289_v43 = vshll.u32 %v14976_v58, %v5274_v44 }
 0x520   : > { %v5140_v22 = vsel %vm12783_vm4, %v12554_v32, %v5137_v53  ;;  %v5430_v7 = vsub.s32 0, %v12856_v61  ;;  %v5290_v5 = vshrl.u32 %v14980_v46, %v5275_v16  ;;  %v8090_v20 = vadd.s32 4294967169, %v5576_v0 }
 0x521   : > { %8642 = vcosq.f32 %v5140_v22  ;;  %vm5366_vm14 = vcmp.lt.s32.totalorder %v12653_v38, 0  ;;  %vm5292_vm15 = vcmp.lt.s32.totalorder %v5273_v63, 1  ;;  %vm5295_vm13 = vcmp.lt.s32.totalorder %v5273_v63, 4 }
 0x522   : > { %8644 = vsinq.f32 %v5140_v22  ;;  %v8083_v4 = vmin.u32 %v5430_v7, %v12856_v61  ;;  %v5291_v28 = vor.u32 %v5290_v5, %v5289_v43  ;;  %vm5293_vm1 = vcmp.lt.s32.totalorder %v5273_v63, 2 }
 0x523   : > { %v5300_v52 = vsel %vm5292_vm15, %v5279_v40, %v5282_v36  ;;  %v5301_v47 = vsel %vm5295_vm13, %v5288_v15, 920167782  ;;  %v5276_v19 = vshrl.u32 %v14972_v41, %v5275_v16  ;;  %vm5294_vm3 = vcmp.lt.s32.totalorder %v5273_v63, 3 }
 0x524   : > { %v5432_v49 = vclz %v8083_v4  ;;  %v5297_v50 = vsel %vm5295_vm13, %v5285_v42, 2102212464  ;;  %v5450_v27 = vsub.s32 4, %v12844_v55  ;;  %v5302_v57 = vsel %vm5294_vm3, %v5285_v42, %v5301_v47 }
 0x525   : > { %v5304_v23 = vsel %vm5292_vm15, %v5282_v36, %v5285_v42  ;;  %v5305_v31 = vsel %vm5295_vm13, %v5291_v28, 1326507024  ;;  %vm12878_vm4 = vcmp.le.f32.partialorder %v5364_v25, 0.7853982  ;;  %v5296_v30 = vsel %vm5292_vm15, %v5276_v19, %v5279_v40 }
 0x526   : > { %v8084_v1 = vadd.s32 4294967294, %v5432_v49  ;;  %v5303_v18 = vsel %vm5293_vm1, %v5300_v52, %v5302_v57  ;;  %v5306_v44 = vsel %vm5294_vm3, %v5288_v15, %v5305_v31  ;;  %v5298_v26 = vsel %vm5294_vm3, %v5282_v36, %v5297_v50 }
 0x527   : > { %v5307_v11 = vsel %vm5293_vm1, %v5304_v23, %v5306_v44  ;;  %v12886_v48 = vmul.u32.u64.low %v12862_v29, %v5303_v18  ;;  %v12887_v10 = vmul.u32.u64.high %v12862_v29, %v5303_v18, %v12886_v48  ;;  %vm5147_vm5 = vcmp.lt.s32.totalorder %v12847_v17, 2 }
 0x528   : > { %vm8085_vm6 = vcmp.lt.s32.totalorder %v8084_v1, 0  ;;  %v12892_v25 = vmul.u32.u64.low %v12862_v29, %v5307_v11  ;;  %v12893_v16 = vmul.u32.u64.high %v12862_v29, %v5307_v11, %v12892_v25  ;;  %vm5148_vm7 = vcmp.eq.s32.totalorder %v12847_v17, 0 }
 0x529   : > { %vm5151_vm10 = vcmp.eq.s32.totalorder %v12847_v17, 2  ;;  %v5435_v37 = vsel %vm8085_vm6, 0, %v8084_v1  ;;  %v5582_v9 = vadd.s32 1, %v8090_v20  ;;  %v5420_v0 = vadd.s32 %v12804_v62, %v12818_v35  ;;  %v858_v1 = vpop.permute.xlu0 %857 }
 0x52a   : > { %v5436_v8 = vsub.s32 32, %v5435_v37  ;;  %v5440_v59 = vsub.s32 4294967266, %v5435_v37  ;;  %v5299_v6 = vsel %vm5293_vm1, %v5296_v30, %v5298_v26  ;;  %v5451_v39 = vsel %vm5366_vm14, %v5450_v27, %v12844_v55 }
 0x52b   : > { %v8643_v33 = vpop.eup %8642  ;;  %v5318_v24 = vadd.s32 1, %v12887_v10  ;;  %v5572_v21 = vand.u32 2147483647, %v12827_v13  ;;  %vm5583_vm8 = vcmp.gt.s32.totalorder %v5582_v9, 0  ;;  %v5437_v56 = vshll.u32 %v12856_v61, %v5435_v37 }
 0x52c   : > { %v8645_v60 = vpop.eup %8644  ;;  %v5152_v51 = vxor.u32 2147483648, %v8643_v33  ;;  %v5438_v53 = vshrl.u32 %v5420_v0, %v5436_v8  ;;  %v5441_v62 = vadd.s32 127, %v5440_v59  ;;  %v5315_v63 = vmul.u32 %v12862_v29, %v5299_v6  ;;  %v15089_v59 = vld [vmem:[#allocation29_spill] sm:$0xff] }
 0x52d   : > { %v5149_v35 = vxor.u32 2147483648, %v8645_v60  ;;  %vm5317_vm9 = vc.u32 %v12893_v16, %v12886_v48  ;;  %v5584_v40 = vsel %vm5583_vm8, %v5582_v9, 0  ;;  %v5453_v42 = vsel %vm12878_vm4, 0, %v5451_v39 }
 0x52e   : > { %v5153_v55 = vsel %vm5151_vm10, %v5152_v51, %v8645_v60  ;;  %v5439_v36 = vor.u32 %v5438_v53, %v5437_v56  ;;  %v5442_v22 = vshll.u32 %v5441_v62, 23  ;;  %v5319_v7 = vsel %vm5317_vm9, %v5318_v24, %v12887_v10 }
 0x52f   : > { %v5150_v61 = vsel %vm5148_vm7, %v8643_v33, %v5149_v35  ;;  %v5320_v15 = vadd.s32 %v5319_v7, %v5315_v63  ;;  %v5586_v29 = vand.u32 31, %v5584_v40  ;;  %vm5144_vm11 = vweird.f32 %v12554_v32  ;;  %v12953_v63 = vld [vmem:[%s14908_s2] ss:$0 sm:$0xff] }
 0x530   : > { %v5154_v43 = vsel %vm5147_vm5, %v5150_v61, %v5153_v55  ;;  %v5443_v5 = vor.u32 4788187, %v5442_v22  ;;  %v5446_v47 = vcvt.s32.f32 %v5439_v36  ;;  %v5457_v49 = vadd.s32 3, %v5453_v42 }
 0x531   : > { %v5155_v20 = vsel %vm5144_vm11, nan, %v5154_v43  ;;  %v5321_v4 = vadd.s32 536870912, %v5320_v15  ;;  %v5587_v28 = vsub.s32 32, %v5586_v29  ;;  %v5579_v50 = vand.u32 8388607, %v5572_v21 }
 0x532   : > { %7794 = vst [vmem:[%s9477_s9 + $0x130] sm:$0xff] %v5155_v20  ;;  %v5444_v52 = vand.u32 2147483647, %v5443_v5  ;;  %v5585_v27 = vshrl.u32 %v5584_v40, 5  ;;  %v5589_v18 = vshll.u32 %v14972_v41, %v5586_v29  ;;  %v5592_v44 = vshll.u32 %v14973_v34, %v5586_v29 }
 0x533   : > { %v12920_v19 = vshrl.u32 %v5321_v4, 30  ;;  %v5590_v57 = vshrl.u32 %v14973_v34, %v5587_v28  ;;  %v5593_v17 = vshrl.u32 %v14974_v14, %v5587_v28  ;;  %v5596_v23 = vshrl.u32 %v14975_v45, %v5587_v28 }
 0x534   : > { %v5447_v32 = vmul.f32 %v5446_v47, %v5444_v52  ;;  %v5599_v31 = vshrl.u32 %v14976_v58, %v5587_v28  ;;  %v5595_v26 = vshll.u32 %v14974_v14, %v5586_v29  ;;  %v5598_v10 = vshll.u32 %v14975_v45, %v5586_v29 }
 0x535   : > { %v5323_v30 = vshll.u32 %v12920_v19, 30  ;;  %v5601_v25 = vshll.u32 %v14976_v58, %v5586_v29  ;;  %v5602_v37 = vshrl.u32 %v14980_v46, %v5587_v28  ;;  %v5591_v0 = vor.u32 %v5590_v57, %v5589_v18  ;;  %v15092_v18 = vld [vmem:[#allocation30_spill] sm:$0xff] }
 0x536   : > { %v5448_v11 = vxor.u32 2147483648, %v5447_v32  ;;  %v5597_v8 = vor.u32 %v5596_v23, %v5595_v26  ;;  %v1007_v6 = vsel %vm580_vm0, %v858_v1, %v15089_v59  ;;  %v5594_v39 = vor.u32 %v5593_v17, %v5592_v44 }
 0x537   : > { %v12935_v9 = vsub.s32 %v5320_v15, %v5323_v30  ;;  %v5600_v24 = vor.u32 %v5599_v31, %v5598_v10  ;;  %v5603_v60 = vor.u32 %v5602_v37, %v5601_v25  ;;  %v12945_v56 = vand.u32 3, %v5457_v49 }
 0x538   : > { %v5449_v33 = vsel %vm5366_vm14, %v5448_v11, %v5447_v32  ;;  %v5580_v62 = vor.u32 8388608, %v5579_v50  ;;  %vm5262_vm12 = vcmp.lt.s32.totalorder %v12749_v12, 0  ;;  %v5588_v35 = vshrl.u32 %v14972_v41, %v5587_v28  ;;  %v873_v50 = vpop.permute.xlu1 %872 }
 0x539   : > { %v5452_v51 = vsel %vm12878_vm4, %v12653_v38, %v5449_v33  ;;  %v5326_v53 = vsub.s32 0, %v12935_v9  ;;  %vm5607_vm2 = vcmp.lt.s32.totalorder %v5585_v27, 4  ;;  %v12956_v40 = vmul.f32 %v12953_v63, %v1007_v6 }
 0x53a   : > { %8646 = vcosq.f32 %v5452_v51  ;;  %vm5604_vm14 = vcmp.lt.s32.totalorder %v5585_v27, 1  ;;  %v5609_v55 = vsel %vm5607_vm2, %v5597_v8, 2102212464  ;;  %v5613_v22 = vsel %vm5607_vm2, %v5600_v24, 920167782 }
 0x53b   : > { %8648 = vsinq.f32 %v5452_v51  ;;  %v8079_v54 = vmin.u32 %v5326_v53, %v12935_v9  ;;  %v5612_v36 = vsel %vm5604_vm14, %v5591_v0, %v5594_v39  ;;  %v5616_v7 = vsel %vm5604_vm14, %v5594_v39, %v5597_v8 }
 0x53c   : > { %v5617_v61 = vsel %vm5607_vm2, %v5603_v60, 1326507024  ;;  %vm12961_vm15 = vcmp.le.f32.partialorder %v5260_v3, 0.7853982  ;;  %vm5605_vm13 = vcmp.lt.s32.totalorder %v5585_v27, 2  ;;  %vm5606_vm1 = vcmp.lt.s32.totalorder %v5585_v27, 3 }
 0x53d   : > { %v5328_v15 = vclz %v8079_v54  ;;  %v5620_v29 = vshll.u32 %v5580_v62, 8  ;;  %v5608_v43 = vsel %vm5604_vm14, %v5588_v35, %v5591_v0  ;;  %v5610_v5 = vsel %vm5606_vm1, %v5594_v39, %v5609_v55 }
 0x53e   : > { %v5614_v20 = vsel %vm5606_vm1, %v5597_v8, %v5613_v22  ;;  %v5618_v4 = vsel %vm5606_vm1, %v5600_v24, %v5617_v61  ;;  %v5346_v52 = vsub.s32 4, %v12920_v19  ;;  %vm5460_vm3 = vcmp.eq.s32.totalorder %v12945_v56, 0 }
 0x53f   : > { %v8080_v28 = vadd.s32 4294967294, %v5328_v15  ;;  %v5615_v47 = vsel %vm5605_vm13, %v5612_v36, %v5614_v20  ;;  %v5619_v49 = vsel %vm5605_vm13, %v5616_v7, %v5618_v4  ;;  %v5611_v23 = vsel %vm5605_vm13, %v5608_v43, %v5610_v5  ;;  %v868_v20 = vpop.permute.xlu0 %867 }
 0x540   : > { %v12968_v3 = vmul.u32.u64.low %v5620_v29, %v5619_v49  ;;  %v12969_v57 = vmul.u32.u64.high %v5620_v29, %v5619_v49, %v12968_v3  ;;  %v12971_v32 = vmul.u32.u64.low %v5620_v29, %v5615_v47  ;;  %v12972_v17 = vmul.u32.u64.high %v5620_v29, %v5615_v47, %v12971_v32 }
 0x541   : > { %vm8081_vm4 = vcmp.lt.s32.totalorder %v8080_v28, 0  ;;  %v5471_v31 = vand.u32 2139095040, %v12956_v40  ;;  %vm5463_vm5 = vcmp.eq.s32.totalorder %v12945_v56, 2  ;;  %v5316_v1 = vadd.s32 %v12886_v48, %v12893_v16  ;;  %v15093_v3 = vld [vmem:[#allocation31_spill] sm:$0xff] }
 0x542   : > { %v5331_v30 = vsel %vm8081_vm4, 0, %v8080_v28  ;;  %v1010_v44 = vsel %vm580_vm0, %v873_v50, %v15092_v18  ;;  %v5347_v10 = vsel %vm5262_vm12, %v5346_v52, %v12920_v19  ;;  %v5627_v0 = vmul.u32 %v5620_v29, %v5611_v23 }
 0x543   : > { %v5332_v26 = vsub.s32 32, %v5331_v30  ;;  %v5336_v11 = vsub.s32 4294967266, %v5331_v30  ;;  %v5472_v27 = vshrl.u32 %v5471_v31, 23  ;;  %v5333_v37 = vshll.u32 %v12935_v9, %v5331_v30 }
 0x544   : > { %v8647_v25 = vpop.eup %8646  ;;  %vm5629_vm6 = vc.u32 %v12969_v57, %v12971_v32  ;;  %v5630_v48 = vadd.s32 1, %v12972_v17  ;;  %v5349_v24 = vsel %vm12961_vm15, 0, %v5347_v10  ;;  %v5468_v60 = vand.u32 2147483647, %v12956_v40 }
 0x545   : > { %v8649_v16 = vpop.eup %8648  ;;  %v5464_v8 = vxor.u32 2147483648, %v8647_v25  ;;  %v5334_v59 = vshrl.u32 %v5316_v1, %v5332_v26  ;;  %v5337_v6 = vadd.s32 127, %v5336_v11  ;;  %v8086_v33 = vadd.s32 4294967169, %v5472_v27 }
 0x546   : > { %v5461_v39 = vxor.u32 2147483648, %v8649_v16  ;;  %v5631_v19 = vsel %vm5629_vm6, %v5630_v48, %v12972_v17  ;;  %vm5456_vm7 = vweird.f32 %v12653_v38  ;;  %vm5459_vm10 = vcmp.lt.s32.totalorder %v12945_v56, 2 }
 0x547   : > { %v5465_v9 = vsel %vm5463_vm5, %v5464_v8, %v8649_v16  ;;  %v5335_v51 = vor.u32 %v5334_v59, %v5333_v37  ;;  %v5338_v53 = vshll.u32 %v5337_v6, 23  ;;  %v5632_v62 = vadd.s32 %v5631_v19, %v5627_v0 }
 0x548   : > { %v5462_v35 = vsel %vm5460_vm3, %v8647_v25, %v5461_v39  ;;  %v5478_v54 = vadd.s32 1, %v8086_v33  ;;  %v5353_v22 = vadd.s32 3, %v5349_v24  ;;  %v5475_v15 = vand.u32 8388607, %v5468_v60 }
 0x549   : > { %v5466_v55 = vsel %vm5459_vm10, %v5462_v35, %v5465_v9  ;;  %v5339_v36 = vor.u32 4788187, %v5338_v53  ;;  %v5633_v7 = vadd.s32 536870912, %v5632_v62  ;;  %v13004_v29 = vmul.f32 %v12953_v63, %v1010_v44 }
 0x54a   : > { %v5467_v61 = vsel %vm5456_vm7, nan, %v5466_v55  ;;  %vm5479_vm8 = vcmp.gt.s32.totalorder %v5478_v54, 0  ;;  %v5342_v43 = vcvt.s32.f32 %v5335_v51  ;;  %v13010_v47 = vand.u32 3, %v5353_v22 }
 0x54b   : > { %7797 = vst [vmem:[%s9477_s9 + $0x148] sm:$0xff] %v5467_v61  ;;  %v5340_v38 = vand.u32 2147483647, %v5339_v36  ;;  %v13007_v5 = vshrl.u32 %v5633_v7, 30  ;;  %v5480_v56 = vsel %vm5479_vm8, %v5478_v54, 0  ;;  %v5476_v49 = vor.u32 8388608, %v5475_v15 }
 0x54c   : > { %v5482_v4 = vand.u32 31, %v5480_v56  ;;  %v13015_v17 = vsel %vm580_vm0, %v868_v20, %v15093_v3  ;;  %v13019_v1 = vshrl.u32 %v5480_v56, 5  ;;  %v5783_v30 = vand.u32 2139095040, %v13004_v29 }
 0x54d   : > { %v5343_v28 = vmul.f32 %v5342_v43, %v5340_v38  ;;  %v5635_v52 = vshll.u32 %v13007_v5, 30  ;;  %vm5574_vm9 = vcmp.lt.s32.totalorder %v12827_v13, 0  ;;  %v5628_v42 = vadd.s32 %v12971_v32, %v12969_v57 }
 0x54e   : > { %v5483_v50 = vsub.s32 32, %v5482_v4  ;;  %v5485_v18 = vshll.u32 %v14972_v41, %v5482_v4  ;;  %v5488_v26 = vshll.u32 %v14973_v34, %v5482_v4  ;;  %v5491_v25 = vshll.u32 %v14974_v14, %v5482_v4 }
 0x54f   : > { %v5344_v23 = vxor.u32 2147483648, %v5343_v28  ;;  %v13017_v31 = vsub.s32 %v5632_v62, %v5635_v52  ;;  %v5494_v16 = vshll.u32 %v14975_v45, %v5482_v4  ;;  %v5497_v24 = vshll.u32 %v14976_v58, %v5482_v4 }
 0x550   : > { %v5486_v44 = vshrl.u32 %v14973_v34, %v5483_v50  ;;  %v5489_v11 = vshrl.u32 %v14974_v14, %v5483_v50  ;;  %v5492_v37 = vshrl.u32 %v14975_v45, %v5483_v50  ;;  %v5495_v8 = vshrl.u32 %v14976_v58, %v5483_v50 }
 0x551   : > { %v5345_v10 = vsel %vm5262_vm12, %v5344_v23, %v5343_v28  ;;  %v5638_v27 = vsub.s32 0, %v13017_v31  ;;  %v5498_v19 = vshrl.u32 %v14980_v46, %v5483_v50  ;;  %v13042_v51 = vshll.u32 %v5476_v49, 8 }
 0x552   : > { %v5348_v0 = vsel %vm12961_vm15, %v12749_v12, %v5345_v10  ;;  %v5487_v48 = vor.u32 %v5486_v44, %v5485_v18  ;;  %v5490_v6 = vor.u32 %v5489_v11, %v5488_v26  ;;  %v5493_v33 = vor.u32 %v5492_v37, %v5491_v25 }
 0x553   : > { %8650 = vcosq.f32 %v5348_v0  ;;  %v8091_v59 = vmin.u32 %v5638_v27, %v13017_v31  ;;  %v5496_v39 = vor.u32 %v5495_v8, %v5494_v16  ;;  %v5780_v53 = vand.u32 2147483647, %v13004_v29 }
 0x554   : > { %8652 = vsinq.f32 %v5348_v0  ;;  %v5484_v62 = vshrl.u32 %v14972_v41, %v5483_v50  ;;  %v5499_v35 = vor.u32 %v5498_v19, %v5497_v24  ;;  %vm5500_vm11 = vcmp.lt.s32.totalorder %v13019_v1, 1 }
 0x555   : > { %v5640_v9 = vclz %v8091_v59  ;;  %v5784_v54 = vshrl.u32 %v5783_v30, 23  ;;  %vm5359_vm12 = vcmp.eq.s32.totalorder %v13010_v47, 2  ;;  %vm5502_vm2 = vcmp.lt.s32.totalorder %v13019_v1, 3 }
 0x556   : > { %vm5503_vm14 = vcmp.lt.s32.totalorder %v13019_v1, 4  ;;  %v5508_v57 = vsel %vm5500_vm11, %v5487_v48, %v5490_v6  ;;  %vm5356_vm15 = vcmp.eq.s32.totalorder %v13010_v47, 0  ;;  %v5512_v22 = vsel %vm5500_vm11, %v5490_v6, %v5493_v33 }
 0x557   : > { %v8092_v55 = vadd.s32 4294967294, %v5640_v9  ;;  %v5505_v32 = vsel %vm5503_vm14, %v5493_v33, 2102212464  ;;  %v5509_v36 = vsel %vm5503_vm14, %v5496_v39, 920167782  ;;  %vm5355_vm13 = vcmp.lt.s32.totalorder %v13010_v47, 2 }
 0x558   : > { %v5513_v7 = vsel %vm5503_vm14, %v5499_v35, 1326507024  ;;  %vm13058_vm1 = vcmp.le.f32.partialorder %v5572_v21, 0.7853982  ;;  %vm5501_vm4 = vcmp.lt.s32.totalorder %v13019_v1, 2  ;;  %v5510_v15 = vsel %vm5502_vm2, %v5493_v33, %v5509_v36 }
 0x559   : > { %vm8093_vm3 = vcmp.lt.s32.totalorder %v8092_v55, 0  ;;  %v5514_v38 = vsel %vm5502_vm2, %v5496_v39, %v5513_v7  ;;  %vm5352_vm5 = vweird.f32 %v12749_v12  ;;  %v5658_v56 = vsub.s32 4, %v13007_v5 }
 0x55a   : > { %v5643_v43 = vsel %vm8093_vm3, 0, %v8092_v55  ;;  %v5511_v21 = vsel %vm5501_vm4, %v5508_v57, %v5510_v15  ;;  %v5515_v20 = vsel %vm5501_vm4, %v5512_v22, %v5514_v38  ;;  %v5504_v52 = vsel %vm5500_vm11, %v5484_v62, %v5487_v48 }
 0x55b   : > { %v5644_v4 = vsub.s32 32, %v5643_v43  ;;  %v5648_v28 = vsub.s32 4294967266, %v5643_v43  ;;  %v5506_v49 = vsel %vm5502_vm2, %v5490_v6, %v5505_v32  ;;  %v5645_v44 = vshll.u32 %v13017_v31, %v5643_v43 }
 0x55c   : > { %v13078_v50 = vmul.u32.u64.low %v13042_v51, %v5515_v20  ;;  %v13079_v3 = vmul.u32.u64.high %v13042_v51, %v5515_v20, %v13078_v50  ;;  %v13082_v23 = vmul.u32.u64.low %v13042_v51, %v5511_v21  ;;  %v13083_v30 = vmul.u32.u64.high %v13042_v51, %v5511_v21, %v13082_v23 }
 0x55d   : > { %v8651_v18 = vpop.eup %8650  ;;  %v5646_v26 = vshrl.u32 %v5628_v42, %v5644_v4  ;;  %v5649_v11 = vadd.s32 127, %v5648_v28  ;;  %v8098_v10 = vadd.s32 4294967169, %v5784_v54  ;;  %v5659_v37 = vsel %vm5574_vm9, %v5658_v56, %v13007_v5 }
 0x55e   : > { %v8653_v27 = vpop.eup %8652  ;;  %v5360_v25 = vxor.u32 2147483648, %v8651_v18  ;;  %v5507_v0 = vsel %vm5501_vm4, %v5504_v52, %v5506_v49  ;;  %v13094_v48 = vand.u32 8388607, %v5780_v53  ;;  %vm5525_vm6 = vc.u32 %v13079_v3, %v13082_v23 }
 0x55f   : > { %v5357_v16 = vxor.u32 2147483648, %v8653_v27  ;;  %v5647_v8 = vor.u32 %v5646_v26, %v5645_v44  ;;  %v5650_v59 = vshll.u32 %v5649_v11, 23  ;;  %v5790_v31 = vadd.s32 1, %v8098_v10 }
 0x560   : > { %v5361_v6 = vsel %vm5359_vm12, %v5360_v25, %v8653_v27  ;;  %v5526_v5 = vadd.s32 1, %v13083_v30  ;;  %v13103_v1 = vmul.f32 %v12953_v63, %v13015_v17  ;;  %v5523_v24 = vmul.u32 %v13042_v51, %v5507_v0 }
 0x561   : > { %v5358_v33 = vsel %vm5356_vm15, %v8651_v18, %v5357_v16  ;;  %v5651_v39 = vor.u32 4788187, %v5650_v59  ;;  %vm5791_vm7 = vcmp.gt.s32.totalorder %v5790_v31, 0  ;;  %v5661_v42 = vsel %vm13058_vm1, 0, %v5659_v37 }
 0x562   : > { %v5362_v19 = vsel %vm5355_vm13, %v5358_v33, %v5361_v6  ;;  %v5527_v9 = vsel %vm5525_vm6, %v5526_v5, %v13083_v30  ;;  %v5792_v62 = vsel %vm5791_vm7, %v5790_v31, 0  ;;  %v5654_v54 = vcvt.s32.f32 %v5647_v8 }
 0x563   : > { %v5363_v17 = vsel %vm5352_vm5, nan, %v5362_v19  ;;  %v5652_v35 = vand.u32 2147483647, %v5651_v39  ;;  %v5528_v55 = vadd.s32 %v5527_v9, %v5523_v24  ;;  %v5794_v57 = vand.u32 31, %v5792_v62 }
 0x564   : > { %7796 = vst [vmem:[%s9477_s9 + $0x140] sm:$0xff] %v5363_v17  ;;  %v5788_v36 = vor.u32 8388608, %v13094_v48  ;;  %v5665_v47 = vadd.s32 3, %v5661_v42  ;;  %v5793_v22 = vshrl.u32 %v5792_v62, 5  ;;  %v5679_v15 = vand.u32 2139095040, %v13103_v1 }
 0x565   : > { %v5655_v32 = vmul.f32 %v5654_v54, %v5652_v35  ;;  %v5529_v51 = vadd.s32 536870912, %v5528_v55  ;;  %v5795_v7 = vsub.s32 32, %v5794_v57  ;;  %v5797_v12 = vshll.u32 %v14972_v41, %v5794_v57 }
 0x566   : > { %v5800_v56 = vshll.u32 %v14973_v34, %v5794_v57  ;;  %v5803_v4 = vshll.u32 %v14974_v14, %v5794_v57  ;;  %v5806_v50 = vshll.u32 %v14975_v45, %v5794_v57  ;;  %v13134_v10 = vand.u32 3, %v5665_v47 }
 0x567   : > { %v5656_v38 = vxor.u32 2147483648, %v5655_v32  ;;  %v13118_v43 = vshrl.u32 %v5529_v51, 30  ;;  %v5798_v21 = vshrl.u32 %v14973_v34, %v5795_v7  ;;  %v5801_v20 = vshrl.u32 %v14974_v14, %v5795_v7 }
 0x568   : > { %v5804_v28 = vshrl.u32 %v14975_v45, %v5795_v7  ;;  %v5807_v30 = vshrl.u32 %v14976_v58, %v5795_v7  ;;  %v5809_v37 = vshll.u32 %v14976_v58, %v5794_v57  ;;  %v5810_v0 = vshrl.u32 %v14980_v46, %v5795_v7 }
 0x569   : > { %v5657_v52 = vsel %vm5574_vm9, %v5656_v38, %v5655_v32  ;;  %v5531_v49 = vshll.u32 %v13118_v43, 30  ;;  %v5799_v44 = vor.u32 %v5798_v21, %v5797_v12  ;;  %v5802_v26 = vor.u32 %v5801_v20, %v5800_v56 }
 0x56a   : > { %v5660_v18 = vsel %vm13058_vm1, %v12827_v13, %v5657_v52  ;;  %v5805_v11 = vor.u32 %v5804_v28, %v5803_v4  ;;  %v5808_v25 = vor.u32 %v5807_v30, %v5806_v50  ;;  %v5680_v48 = vshrl.u32 %v5679_v15, 23 }
 0x56b   : > { %8654 = vcosq.f32 %v5660_v18  ;;  %v13136_v27 = vsub.s32 %v5528_v55, %v5531_v49  ;;  %vm5470_vm10 = vcmp.lt.s32.totalorder %v12956_v40, 0  ;;  %vm5812_vm8 = vcmp.lt.s32.totalorder %v5793_v22, 1 }
 0x56c   : > { %8656 = vsinq.f32 %v5660_v18  ;;  %vm5814_vm9 = vcmp.lt.s32.totalorder %v5793_v22, 3  ;;  %vm5815_vm11 = vcmp.lt.s32.totalorder %v5793_v22, 4  ;;  %v5811_v16 = vor.u32 %v5810_v0, %v5809_v37 }
 0x56d   : > { %v5534_v61 = vsub.s32 0, %v13136_v27  ;;  %v5817_v8 = vsel %vm5815_vm11, %v5805_v11, 2102212464  ;;  %v5820_v59 = vsel %vm5812_vm8, %v5799_v44, %v5802_v26  ;;  %v5821_v31 = vsel %vm5815_vm11, %v5808_v25, 920167782 }
 0x56e   : > { %v5796_v5 = vshrl.u32 %v14972_v41, %v5795_v7  ;;  %vm5813_vm12 = vcmp.lt.s32.totalorder %v5793_v22, 2  ;;  %v5822_v33 = vsel %vm5814_vm9, %v5805_v11, %v5821_v31  ;;  %v5824_v24 = vsel %vm5812_vm8, %v5802_v26, %v5805_v11  ;;  %v15098_v31 = vld [vmem:[#allocation32_spill] sm:$0xff] }
 0x56f   : > { %v8087_v6 = vmin.u32 %v5534_v61, %v13136_v27  ;;  %v5823_v39 = vsel %vm5813_vm12, %v5820_v59, %v5822_v33  ;;  %v5825_v19 = vsel %vm5815_vm11, %v5811_v16, 1326507024  ;;  %v5828_v42 = vshll.u32 %v5788_v36, 8 }
 0x570   : > { %vm5667_vm2 = vcmp.lt.s32.totalorder %v13134_v10, 2  ;;  %vm13151_vm14 = vcmp.le.f32.partialorder %v5468_v60, 0.7853982  ;;  %v5816_v17 = vsel %vm5812_vm8, %v5796_v5, %v5799_v44  ;;  %v5818_v35 = vsel %vm5814_vm9, %v5802_v26, %v5817_v8  ;;  %v883_v26 = vpop.permute.xlu1 %882 }
 0x571   : > { %v5536_v62 = vclz %v8087_v6  ;;  %v5676_v54 = vand.u32 2147483647, %v13103_v1  ;;  %vm5664_vm15 = vweird.f32 %v12827_v13  ;;  %v5554_v55 = vsub.s32 4, %v13118_v43 }
 0x572   : > { %v5826_v57 = vsel %vm5814_vm9, %v5808_v25, %v5825_v19  ;;  %v13161_v32 = vmul.u32.u64.low %v5828_v42, %v5823_v39  ;;  %v13162_v51 = vmul.u32.u64.high %v5828_v42, %v5823_v39, %v13161_v32  ;;  %vm5668_vm13 = vcmp.eq.s32.totalorder %v13134_v10, 0 }
 0x573   : > { %v8088_v60 = vadd.s32 4294967294, %v5536_v62  ;;  %v5827_v36 = vsel %vm5813_vm12, %v5824_v24, %v5826_v57  ;;  %v8094_v47 = vadd.s32 4294967169, %v5680_v48  ;;  %vm5671_vm1 = vcmp.eq.s32.totalorder %v13134_v10, 2 }
 0x574   : > { %v5819_v7 = vsel %vm5813_vm12, %v5816_v17, %v5818_v35  ;;  %v13169_v15 = vmul.u32.u64.low %v5828_v42, %v5827_v36  ;;  %v13170_v38 = vmul.u32.u64.high %v5828_v42, %v5827_v36, %v13169_v15  ;;  %v5524_v56 = vadd.s32 %v13082_v23, %v13079_v3 }
 0x575   : > { %v8655_v12 = vpop.eup %8654  ;;  %vm8089_vm3 = vcmp.lt.s32.totalorder %v8088_v60, 0  ;;  %v5683_v21 = vand.u32 8388607, %v5676_v54  ;;  %v5686_v20 = vadd.s32 1, %v8094_v47  ;;  %v5555_v22 = vsel %vm5470_vm10, %v5554_v55, %v13118_v43 }
 0x576   : > { %v8657_v4 = vpop.eup %8656  ;;  %v5672_v28 = vxor.u32 2147483648, %v8655_v12  ;;  %v5539_v52 = vsel %vm8089_vm3, 0, %v8088_v60  ;;  %v5838_v49 = vadd.s32 1, %v13162_v51  ;;  %v5835_v44 = vmul.u32 %v5828_v42, %v5819_v7 }
 0x577   : > { %v5669_v50 = vxor.u32 2147483648, %v8657_v4  ;;  %v5540_v30 = vsub.s32 32, %v5539_v52  ;;  %v5544_v18 = vsub.s32 4294967266, %v5539_v52  ;;  %v5541_v23 = vshll.u32 %v13136_v27, %v5539_v52 }
 0x578   : > { %v5673_v3 = vsel %vm5671_vm1, %v5672_v28, %v8657_v4  ;;  %vm5837_vm4 = vc.u32 %v13170_v38, %v13161_v32  ;;  %vm5687_vm5 = vcmp.gt.s32.totalorder %v5686_v20, 0  ;;  %v5557_v48 = vsel %vm13151_vm14, 0, %v5555_v22 }
 0x579   : > { %v5670_v43 = vsel %vm5668_vm13, %v8655_v12, %v5669_v50  ;;  %v5542_v11 = vshrl.u32 %v5524_v56, %v5540_v30  ;;  %v5545_v25 = vadd.s32 127, %v5544_v18  ;;  %v5839_v37 = vsel %vm5837_vm4, %v5838_v49, %v13162_v51 }
 0x57a   : > { %v5674_v0 = vsel %vm5667_vm2, %v5670_v43, %v5673_v3  ;;  %v5840_v27 = vadd.s32 %v5839_v37, %v5835_v44  ;;  %v5688_v61 = vsel %vm5687_vm5, %v5686_v20, 0  ;;  %v1012_v6 = vsel %vm580_vm0, %v883_v26, %v15098_v31 }
 0x57b   : > { %v5675_v16 = vsel %vm5664_vm15, nan, %v5674_v0  ;;  %v5543_v8 = vor.u32 %v5542_v11, %v5541_v23  ;;  %v5546_v59 = vshll.u32 %v5545_v25, 23  ;;  %v5690_v33 = vand.u32 31, %v5688_v61 }
 0x57c   : > { %7799 = vst [vmem:[%s9477_s9 + $0x158] sm:$0xff] %v5675_v16  ;;  %v5841_v5 = vadd.s32 536870912, %v5840_v27  ;;  %v5561_v10 = vadd.s32 3, %v5557_v48  ;;  %v5684_v19 = vor.u32 8388608, %v5683_v21  ;;  %v13199_v62 = vmul.f32 %v12953_v63, %v1012_v6 }
 0x57d   : > { %v5547_v39 = vor.u32 4788187, %v5546_v59  ;;  %v5691_v42 = vsub.s32 32, %v5690_v33  ;;  %v5550_v13 = vcvt.s32.f32 %v5543_v8  ;;  %v13201_v35 = vshrl.u32 %v5688_v61, 5  ;;  %v878_v59 = vpop.permute.xlu0 %877 }
 0x57e   : > { %v5842_v24 = vshrl.u32 %v5841_v5, 30  ;;  %v5693_v55 = vshll.u32 %v14972_v41, %v5690_v33  ;;  %v5696_v60 = vshll.u32 %v14973_v34, %v5690_v33  ;;  %v5699_v36 = vshll.u32 %v14974_v14, %v5690_v33 }
 0x57f   : > { %v5548_v17 = vand.u32 2147483647, %v5547_v39  ;;  %v5694_v51 = vshrl.u32 %v14973_v34, %v5691_v42  ;;  %v5697_v7 = vshrl.u32 %v14974_v14, %v5691_v42  ;;  %v5700_v15 = vshrl.u32 %v14975_v45, %v5691_v42 }
 0x580   : > { %v5843_v57 = vshll.u32 %v5842_v24, 30  ;;  %v5703_v12 = vshrl.u32 %v14976_v58, %v5691_v42  ;;  %v13210_v56 = vand.u32 3, %v5561_v10  ;;  %v5702_v20 = vshll.u32 %v14975_v45, %v5690_v33 }
 0x581   : > { %v5551_v47 = vmul.f32 %v5550_v13, %v5548_v17  ;;  %v5706_v4 = vshrl.u32 %v14980_v46, %v5691_v42  ;;  %vm5782_vm6 = vcmp.lt.s32.totalorder %v13004_v29, 0  ;;  %v5695_v52 = vor.u32 %v5694_v51, %v5693_v55  ;;  %v15101_v55 = vld [vmem:[#allocation33_spill] sm:$0xff] }
 0x582   : > { %v13212_v21 = vsub.s32 %v5840_v27, %v5843_v57  ;;  %v5698_v22 = vor.u32 %v5697_v7, %v5696_v60  ;;  %v5701_v49 = vor.u32 %v5700_v15, %v5699_v36  ;;  %v5704_v30 = vor.u32 %v5703_v12, %v5702_v20 }
 0x583   : > { %v5552_v28 = vxor.u32 2147483648, %v5551_v47  ;;  %v5705_v18 = vshll.u32 %v14976_v58, %v5690_v33  ;;  %v13219_v44 = vshll.u32 %v5684_v19, 8  ;;  %v5692_v23 = vshrl.u32 %v14972_v41, %v5691_v42 }
 0x584   : > { %v5846_v50 = vsub.s32 0, %v13212_v21  ;;  %vm5708_vm7 = vcmp.lt.s32.totalorder %v13201_v35, 1  ;;  %v5991_v26 = vand.u32 2139095040, %v13199_v62  ;;  %vm5711_vm8 = vcmp.lt.s32.totalorder %v13201_v35, 4 }
 0x585   : > { %v5553_v3 = vsel %vm5470_vm10, %v5552_v28, %v5551_v47  ;;  %v5707_v25 = vor.u32 %v5706_v4, %v5705_v18  ;;  %vm13233_vm9 = vcmp.le.f32.partialorder %v5780_v53, 0.7853982  ;;  %v5713_v0 = vsel %vm5711_vm8, %v5701_v49, 2102212464 }
 0x586   : > { %v5556_v43 = vsel %vm13151_vm14, %v12956_v40, %v5553_v3  ;;  %v8099_v11 = vmin.u32 %v5846_v50, %v13212_v21  ;;  %v5716_v48 = vsel %vm5708_vm7, %v5695_v52, %v5698_v22  ;;  %v5717_v9 = vsel %vm5711_vm8, %v5704_v30, 920167782 }
 0x587   : > { %8658 = vcosq.f32 %v5556_v43  ;;  %v5866_v61 = vsub.s32 4, %v5842_v24  ;;  %vm5710_vm10 = vcmp.lt.s32.totalorder %v13201_v35, 3  ;;  %vm5709_vm11 = vcmp.lt.s32.totalorder %v13201_v35, 2 }
 0x588   : > { %8660 = vsinq.f32 %v5556_v43  ;;  %v5848_v27 = vclz %v8099_v11  ;;  %v5712_v53 = vsel %vm5708_vm7, %v5692_v23, %v5695_v52  ;;  %v5718_v16 = vsel %vm5710_vm10, %v5701_v49, %v5717_v9 }
 0x589   : > { %v5720_v8 = vsel %vm5708_vm7, %v5698_v22, %v5701_v49  ;;  %v5714_v6 = vsel %vm5710_vm10, %v5698_v22, %v5713_v0  ;;  %v5719_v5 = vsel %vm5709_vm11, %v5716_v48, %v5718_v16  ;;  %v5721_v33 = vsel %vm5711_vm8, %v5707_v25, 1326507024 }
 0x58a   : > { %v8100_v31 = vadd.s32 4294967294, %v5848_v27  ;;  %v5722_v39 = vsel %vm5710_vm10, %v5704_v30, %v5721_v33  ;;  %v13254_v10 = vmul.u32.u64.low %v13219_v44, %v5719_v5  ;;  %v13255_v19 = vmul.u32.u64.high %v13219_v44, %v5719_v5, %v13254_v10 }
 0x58b   : > { %v5992_v42 = vshrl.u32 %v5991_v26, 23  ;;  %vm5564_vm12 = vcmp.eq.s32.totalorder %v13210_v56, 0  ;;  %v5867_v17 = vsel %vm5782_vm6, %v5866_v61, %v5842_v24  ;;  %v5723_v13 = vsel %vm5709_vm11, %v5720_v8, %v5722_v39 }
 0x58c   : > { %vm8101_vm2 = vcmp.lt.s32.totalorder %v8100_v31, 0  ;;  %v1011_v57 = vsel %vm580_vm0, %v878_v59, %v15101_v55  ;;  %v13267_v60 = vmul.u32.u64.low %v13219_v44, %v5723_v13  ;;  %v13268_v36 = vmul.u32.u64.high %v13219_v44, %v5723_v13, %v13267_v60 }
 0x58d   : > { %v5851_v51 = vsel %vm8101_vm2, 0, %v8100_v31  ;;  %v8106_v47 = vadd.s32 4294967169, %v5992_v42  ;;  %v5836_v7 = vadd.s32 %v13161_v32, %v13170_v38  ;;  %v5715_v24 = vsel %vm5709_vm11, %v5712_v53, %v5714_v6 }
 0x58e   : > { %v5852_v15 = vsub.s32 32, %v5851_v51  ;;  %v5856_v12 = vsub.s32 4294967266, %v5851_v51  ;;  %v5734_v20 = vadd.s32 1, %v13255_v19  ;;  %v5988_v4 = vand.u32 2147483647, %v13199_v62 }
 0x58f   : > { %v5998_v28 = vadd.s32 1, %v8106_v47  ;;  %v13277_v52 = vmul.f32 %v12953_v63, %v1011_v57  ;;  %v5853_v22 = vshll.u32 %v13212_v21, %v5851_v51  ;;  %v5869_v32 = vsel %vm13233_vm9, 0, %v5867_v17 }
 0x590   : > { %v5854_v49 = vshrl.u32 %v5836_v7, %v5852_v15  ;;  %v5857_v50 = vadd.s32 127, %v5856_v12  ;;  %vm5567_vm14 = vcmp.eq.s32.totalorder %v13210_v56, 2  ;;  %v5731_v35 = vmul.u32 %v13219_v44, %v5715_v24 }
 0x591   : > { %v8659_v38 = vpop.eup %8658  ;;  %vm5733_vm15 = vc.u32 %v13268_v36, %v13254_v10  ;;  %vm5999_vm13 = vcmp.gt.s32.totalorder %v5998_v28, 0  ;;  %v5873_v26 = vadd.s32 3, %v5869_v32  ;;  %v5995_v44 = vand.u32 8388607, %v5988_v4 }
 0x592   : > { %v8661_v30 = vpop.eup %8660  ;;  %v5568_v18 = vxor.u32 2147483648, %v8659_v38  ;;  %v5855_v63 = vor.u32 %v5854_v49, %v5853_v22  ;;  %v5858_v3 = vshll.u32 %v5857_v50, 23  ;;  %v5735_v21 = vsel %vm5733_vm15, %v5734_v20, %v13255_v19 }
 0x593   : > { %v5565_v23 = vxor.u32 2147483648, %v8661_v30  ;;  %v5736_v43 = vadd.s32 %v5735_v21, %v5731_v35  ;;  %v6000_v11 = vsel %vm5999_vm13, %v5998_v28, 0  ;;  %v5887_v48 = vand.u32 2139095040, %v13277_v52 }
 0x594   : > { %v5569_v25 = vsel %vm5567_vm14, %v5568_v18, %v8661_v30  ;;  %v5859_v0 = vor.u32 4788187, %v5858_v3  ;;  %vm5563_vm1 = vcmp.lt.s32.totalorder %v13210_v56, 2  ;;  %v6002_v61 = vand.u32 31, %v6000_v11 }
 0x595   : > { %v5566_v9 = vsel %vm5564_vm12, %v8659_v38, %v5565_v23  ;;  %v5737_v27 = vadd.s32 536870912, %v5736_v43  ;;  %vm5560_vm3 = vweird.f32 %v12956_v40  ;;  %v5862_v8 = vcvt.s32.f32 %v5855_v63 }
 0x596   : > { %v5570_v53 = vsel %vm5563_vm1, %v5566_v9, %v5569_v25  ;;  %v5860_v16 = vand.u32 2147483647, %v5859_v0  ;;  %v6003_v6 = vsub.s32 32, %v6002_v61  ;;  %v13297_v33 = vand.u32 3, %v5873_v26 }
 0x597   : > { %v5571_v59 = vsel %vm5560_vm3, nan, %v5570_v53  ;;  %v13294_v31 = vshrl.u32 %v5737_v27, 30  ;;  %v5996_v39 = vor.u32 8388608, %v5995_v44  ;;  %v5888_v19 = vshrl.u32 %v5887_v48, 23 }
 0x598   : > { %7798 = vst [vmem:[%s9477_s9 + $0x150] sm:$0xff] %v5571_v59  ;;  %v5863_v5 = vmul.f32 %v5862_v8, %v5860_v16  ;;  %v6005_v42 = vshll.u32 %v14972_v41, %v6002_v61  ;;  %v6006_v17 = vshrl.u32 %v14973_v34, %v6003_v6  ;;  %v6008_v40 = vshll.u32 %v14973_v34, %v6002_v61 }
 0x599   : > { %v5739_v56 = vshll.u32 %v13294_v31, 30  ;;  %v6009_v55 = vshrl.u32 %v14974_v14, %v6003_v6  ;;  %v6012_v57 = vshrl.u32 %v14975_v45, %v6003_v6  ;;  %v6015_v51 = vshrl.u32 %v14976_v58, %v6003_v6 }
 0x59a   : > { %v5864_v13 = vxor.u32 2147483648, %v5863_v5  ;;  %v6001_v47 = vshrl.u32 %v6000_v11, 5  ;;  %v6011_v7 = vshll.u32 %v14974_v14, %v6002_v61  ;;  %v6014_v15 = vshll.u32 %v14975_v45, %v6002_v61 }
 0x59b   : > { %v13306_v60 = vsub.s32 %v5736_v43, %v5739_v56  ;;  %v6007_v24 = vor.u32 %v6006_v17, %v6005_v42  ;;  %v6010_v20 = vor.u32 %v6009_v55, %v6008_v40  ;;  %v13312_v28 = vshll.u32 %v5996_v39, 8 }
 0x59c   : > { %v5865_v12 = vsel %vm5782_vm6, %v5864_v13, %v5863_v5  ;;  %v6013_v50 = vor.u32 %v6012_v57, %v6011_v7  ;;  %v6016_v32 = vor.u32 %v6015_v51, %v6014_v15  ;;  %v6017_v38 = vshll.u32 %v14976_v58, %v6002_v61 }
 0x59d   : > { %v5868_v22 = vsel %vm13233_vm9, %v13004_v29, %v5865_v12  ;;  %v5742_v49 = vsub.s32 0, %v13306_v60  ;;  %v6018_v35 = vshrl.u32 %v14980_v46, %v6003_v6  ;;  %v8102_v30 = vadd.s32 4294967169, %v5888_v19 }
 0x59e   : > { %8662 = vcosq.f32 %v5868_v22  ;;  %vm5678_vm4 = vcmp.lt.s32.totalorder %v13103_v1, 0  ;;  %vm6020_vm5 = vcmp.lt.s32.totalorder %v6001_v47, 1  ;;  %vm6023_vm6 = vcmp.lt.s32.totalorder %v6001_v47, 4 }
 0x59f   : > { %8664 = vsinq.f32 %v5868_v22  ;;  %v8095_v18 = vmin.u32 %v5742_v49, %v13306_v60  ;;  %v6019_v63 = vor.u32 %v6018_v35, %v6017_v38  ;;  %vm6021_vm7 = vcmp.lt.s32.totalorder %v6001_v47, 2 }
 0x5a0   : > { %v6028_v37 = vsel %vm6020_vm5, %v6007_v24, %v6010_v20  ;;  %v6029_v3 = vsel %vm6023_vm6, %v6016_v32, 920167782  ;;  %v6004_v23 = vshrl.u32 %v14972_v41, %v6003_v6  ;;  %vm6022_vm8 = vcmp.lt.s32.totalorder %v6001_v47, 3 }
 0x5a1   : > { %v5744_v21 = vclz %v8095_v18  ;;  %v6025_v26 = vsel %vm6023_vm6, %v6013_v50, 2102212464  ;;  %v5762_v43 = vsub.s32 4, %v13294_v31  ;;  %v6030_v11 = vsel %vm6022_vm8, %v6013_v50, %v6029_v3 }
 0x5a2   : > { %v6032_v25 = vsel %vm6020_vm5, %v6010_v20, %v6013_v50  ;;  %v6033_v0 = vsel %vm6023_vm6, %v6019_v63, 1326507024  ;;  %vm13328_vm9 = vcmp.le.f32.partialorder %v5676_v54, 0.7853982  ;;  %v6024_v9 = vsel %vm6020_vm5, %v6004_v23, %v6007_v24 }
 0x5a3   : > { %v8096_v48 = vadd.s32 4294967294, %v5744_v21  ;;  %v6031_v27 = vsel %vm6021_vm7, %v6028_v37, %v6030_v11  ;;  %v6034_v61 = vsel %vm6022_vm8, %v6016_v32, %v6033_v0  ;;  %v6026_v53 = vsel %vm6022_vm8, %v6010_v20, %v6025_v26 }
 0x5a4   : > { %v6035_v16 = vsel %vm6021_vm7, %v6032_v25, %v6034_v61  ;;  %v13336_v8 = vmul.u32.u64.low %v13312_v28, %v6031_v27  ;;  %v13337_v59 = vmul.u32.u64.high %v13312_v28, %v6031_v27, %v13336_v8  ;;  %vm5875_vm10 = vcmp.lt.s32.totalorder %v13297_v33, 2 }
 0x5a5   : > { %vm8097_vm11 = vcmp.lt.s32.totalorder %v8096_v48, 0  ;;  %v13342_v54 = vmul.u32.u64.low %v13312_v28, %v6035_v16  ;;  %v13343_v6 = vmul.u32.u64.high %v13312_v28, %v6035_v16, %v13342_v54  ;;  %vm5876_vm12 = vcmp.eq.s32.totalorder %v13297_v33, 0 }
 0x5a6   : > { %vm5879_vm2 = vcmp.eq.s32.totalorder %v13297_v33, 2  ;;  %v5747_v5 = vsel %vm8097_vm11, 0, %v8096_v48  ;;  %v5894_v39 = vadd.s32 1, %v8102_v30  ;;  %v5732_v19 = vadd.s32 %v13254_v10, %v13268_v36  ;;  %v893_v48 = vpop.permute.xlu1 %892 }
 0x5a7   : > { %v5748_v56 = vsub.s32 32, %v5747_v5  ;;  %v5752_v42 = vsub.s32 4294967266, %v5747_v5  ;;  %v6027_v17 = vsel %vm6021_vm7, %v6024_v9, %v6026_v53  ;;  %v5763_v13 = vsel %vm5678_vm4, %v5762_v43, %v13294_v31 }
 0x5a8   : > { %v8663_v40 = vpop.eup %8662  ;;  %v6046_v55 = vadd.s32 1, %v13337_v59  ;;  %v5884_v57 = vand.u32 2147483647, %v13277_v52  ;;  %vm5895_vm14 = vcmp.gt.s32.totalorder %v5894_v39, 0  ;;  %v5749_v15 = vshll.u32 %v13306_v60, %v5747_v5 }
 0x5a9   : > { %v8665_v51 = vpop.eup %8664  ;;  %v5880_v7 = vxor.u32 2147483648, %v8663_v40  ;;  %v5750_v12 = vshrl.u32 %v5732_v19, %v5748_v56  ;;  %v5753_v10 = vadd.s32 127, %v5752_v42  ;;  %v6043_v47 = vmul.u32 %v13312_v28, %v6027_v17  ;;  %v15104_v42 = vld [vmem:[#allocation34_spill] sm:$0xff] }
 0x5aa   : > { %v5877_v36 = vxor.u32 2147483648, %v8665_v51  ;;  %vm6045_vm15 = vc.u32 %v13343_v6, %v13336_v8  ;;  %v5896_v24 = vsel %vm5895_vm14, %v5894_v39, 0  ;;  %v5765_v50 = vsel %vm13328_vm9, 0, %v5763_v13 }
 0x5ab   : > { %v5881_v31 = vsel %vm5879_vm2, %v5880_v7, %v8665_v51  ;;  %v5751_v20 = vor.u32 %v5750_v12, %v5749_v15  ;;  %v5754_v22 = vshll.u32 %v5753_v10, 23  ;;  %v6047_v49 = vsel %vm6045_vm15, %v6046_v55, %v13337_v59 }
 0x5ac   : > { %v5878_v60 = vsel %vm5876_vm12, %v8663_v40, %v5877_v36  ;;  %v6048_v32 = vadd.s32 %v6047_v49, %v6043_v47  ;;  %v5898_v28 = vand.u32 31, %v5896_v24  ;;  %vm5872_vm13 = vweird.f32 %v13004_v29  ;;  %v13403_v47 = vld [vmem:[%s14908_s2] ss:$0 sm:$0xff] }
 0x5ad   : > { %v5882_v38 = vsel %vm5875_vm10, %v5878_v60, %v5881_v31  ;;  %v5755_v35 = vor.u32 4788187, %v5754_v22  ;;  %v5758_v3 = vcvt.s32.f32 %v5751_v20  ;;  %v5769_v21 = vadd.s32 3, %v5765_v50 }
 0x5ae   : > { %v5883_v30 = vsel %vm5872_vm13, nan, %v5882_v38  ;;  %v6049_v18 = vadd.s32 536870912, %v6048_v32  ;;  %v5899_v63 = vsub.s32 32, %v5898_v28  ;;  %v5891_v26 = vand.u32 8388607, %v5884_v57 }
 0x5af   : > { %7801 = vst [vmem:[%s9477_s9 + $0x168] sm:$0xff] %v5883_v30  ;;  %v5756_v37 = vand.u32 2147483647, %v5755_v35  ;;  %v5897_v43 = vshrl.u32 %v5896_v24, 5  ;;  %v5901_v27 = vshll.u32 %v14972_v41, %v5898_v28  ;;  %v5904_v61 = vshll.u32 %v14973_v34, %v5898_v28 }
 0x5b0   : > { %v13370_v23 = vshrl.u32 %v6049_v18, 30  ;;  %v5902_v11 = vshrl.u32 %v14973_v34, %v5899_v63  ;;  %v5905_v33 = vshrl.u32 %v14974_v14, %v5899_v63  ;;  %v5908_v25 = vshrl.u32 %v14975_v45, %v5899_v63 }
 0x5b1   : > { %v5759_v29 = vmul.f32 %v5758_v3, %v5756_v37  ;;  %v5911_v0 = vshrl.u32 %v14976_v58, %v5899_v63  ;;  %v5907_v53 = vshll.u32 %v14974_v14, %v5898_v28  ;;  %v5910_v59 = vshll.u32 %v14975_v45, %v5898_v28 }
 0x5b2   : > { %v6051_v9 = vshll.u32 %v13370_v23, 30  ;;  %v5913_v54 = vshll.u32 %v14976_v58, %v5898_v28  ;;  %v5914_v5 = vshrl.u32 %v14980_v46, %v5899_v63  ;;  %v5903_v19 = vor.u32 %v5902_v11, %v5901_v27  ;;  %v15107_v27 = vld [vmem:[#allocation35_spill] sm:$0xff] }
 0x5b3   : > { %v5760_v16 = vxor.u32 2147483648, %v5759_v29  ;;  %v5909_v56 = vor.u32 %v5908_v25, %v5907_v53  ;;  %v1014_v17 = vsel %vm580_vm0, %v893_v48, %v15104_v42  ;;  %v5906_v13 = vor.u32 %v5905_v33, %v5904_v61 }
 0x5b4   : > { %v13385_v39 = vsub.s32 %v6048_v32, %v6051_v9  ;;  %v5912_v55 = vor.u32 %v5911_v0, %v5910_v59  ;;  %v5915_v51 = vor.u32 %v5914_v5, %v5913_v54  ;;  %v13395_v15 = vand.u32 3, %v5769_v21 }
 0x5b5   : > { %v5761_v40 = vsel %vm5678_vm4, %v5760_v16, %v5759_v29  ;;  %v5892_v10 = vor.u32 8388608, %v5891_v26  ;;  %vm5990_vm1 = vcmp.lt.s32.totalorder %v13199_v62, 0  ;;  %v5900_v36 = vshrl.u32 %v14972_v41, %v5899_v63  ;;  %v888_v26 = vpop.permute.xlu0 %887 }
 0x5b6   : > { %v5764_v7 = vsel %vm13328_vm9, %v13103_v1, %v5761_v40  ;;  %v6054_v12 = vsub.s32 0, %v13385_v39  ;;  %vm5919_vm3 = vcmp.lt.s32.totalorder %v5897_v43, 4  ;;  %v13406_v24 = vmul.f32 %v13403_v47, %v1014_v17 }
 0x5b7   : > { %8666 = vcosq.f32 %v5764_v7  ;;  %vm5916_vm4 = vcmp.lt.s32.totalorder %v5897_v43, 1  ;;  %v5921_v31 = vsel %vm5919_vm3, %v5909_v56, 2102212464  ;;  %v5925_v22 = vsel %vm5919_vm3, %v5912_v55, 920167782 }
 0x5b8   : > { %8668 = vsinq.f32 %v5764_v7  ;;  %v8107_v44 = vmin.u32 %v6054_v12, %v13385_v39  ;;  %v5924_v20 = vsel %vm5916_vm4, %v5903_v19, %v5906_v13  ;;  %v5928_v49 = vsel %vm5916_vm4, %v5906_v13, %v5909_v56 }
 0x5b9   : > { %v5929_v60 = vsel %vm5919_vm3, %v5915_v51, 1326507024  ;;  %vm13411_vm5 = vcmp.le.f32.partialorder %v5988_v4, 0.7853982  ;;  %vm5917_vm6 = vcmp.lt.s32.totalorder %v5897_v43, 2  ;;  %vm5918_vm7 = vcmp.lt.s32.totalorder %v5897_v43, 3 }
 0x5ba   : > { %v6056_v32 = vclz %v8107_v44  ;;  %v5932_v28 = vshll.u32 %v5892_v10, 8  ;;  %v5920_v38 = vsel %vm5916_vm4, %v5900_v36, %v5903_v19  ;;  %v5922_v35 = vsel %vm5918_vm7, %v5906_v13, %v5921_v31 }
 0x5bb   : > { %v5926_v30 = vsel %vm5918_vm7, %v5909_v56, %v5925_v22  ;;  %v5930_v18 = vsel %vm5918_vm7, %v5912_v55, %v5929_v60  ;;  %v6074_v37 = vsub.s32 4, %v13370_v23  ;;  %vm5772_vm8 = vcmp.eq.s32.totalorder %v13395_v15, 0 }
 0x5bc   : > { %v8108_v63 = vadd.s32 4294967294, %v6056_v32  ;;  %v5927_v3 = vsel %vm5917_vm6, %v5924_v20, %v5926_v30  ;;  %v5931_v21 = vsel %vm5917_vm6, %v5928_v49, %v5930_v18  ;;  %v5923_v25 = vsel %vm5917_vm6, %v5920_v38, %v5922_v35  ;;  %v903_v30 = vpop.permute.xlu1 %902 }
 0x5bd   : > { %v13418_v4 = vmul.u32.u64.low %v5932_v28, %v5931_v21  ;;  %v13419_v11 = vmul.u32.u64.high %v5932_v28, %v5931_v21, %v13418_v4  ;;  %v13421_v29 = vmul.u32.u64.low %v5932_v28, %v5927_v3  ;;  %v13422_v33 = vmul.u32.u64.high %v5932_v28, %v5927_v3, %v13421_v29 }
 0x5be   : > { %vm8109_vm9 = vcmp.lt.s32.totalorder %v8108_v63, 0  ;;  %v6199_v0 = vand.u32 2139095040, %v13406_v24  ;;  %vm5775_vm10 = vcmp.eq.s32.totalorder %v13395_v15, 2  ;;  %v6044_v48 = vadd.s32 %v13336_v8, %v13343_v6  ;;  %v15108_v4 = vld [vmem:[#allocation36_spill] sm:$0xff] }
 0x5bf   : > { %v6059_v9 = vsel %vm8109_vm9, 0, %v8108_v63  ;;  %v1013_v61 = vsel %vm580_vm0, %v888_v26, %v15107_v27  ;;  %v6075_v59 = vsel %vm5990_vm1, %v6074_v37, %v13370_v23  ;;  %v5939_v19 = vmul.u32 %v5932_v28, %v5923_v25 }
 0x5c0   : > { %v6060_v53 = vsub.s32 32, %v6059_v9  ;;  %v6064_v16 = vsub.s32 4294967266, %v6059_v9  ;;  %v6200_v43 = vshrl.u32 %v6199_v0, 23  ;;  %v6061_v5 = vshll.u32 %v13385_v39, %v6059_v9 }
 0x5c1   : > { %v8667_v54 = vpop.eup %8666  ;;  %vm5941_vm11 = vc.u32 %v13419_v11, %v13421_v29  ;;  %v5942_v8 = vadd.s32 1, %v13422_v33  ;;  %v6077_v55 = vsel %vm13411_vm5, 0, %v6075_v59  ;;  %v6196_v51 = vand.u32 2147483647, %v13406_v24 }
 0x5c2   : > { %v8669_v6 = vpop.eup %8668  ;;  %v5776_v56 = vxor.u32 2147483648, %v8667_v54  ;;  %v6062_v42 = vshrl.u32 %v6044_v48, %v6060_v53  ;;  %v6065_v17 = vadd.s32 127, %v6064_v16  ;;  %v8114_v40 = vadd.s32 4294967169, %v6200_v43 }
 0x5c3   : > { %v5773_v13 = vxor.u32 2147483648, %v8669_v6  ;;  %v5943_v23 = vsel %vm5941_vm11, %v5942_v8, %v13422_v33  ;;  %vm5768_vm12 = vweird.f32 %v13103_v1  ;;  %vm5771_vm2 = vcmp.lt.s32.totalorder %v13395_v15, 2 }
 0x5c4   : > { %v5777_v39 = vsel %vm5775_vm10, %v5776_v56, %v8669_v6  ;;  %v6063_v7 = vor.u32 %v6062_v42, %v6061_v5  ;;  %v6066_v12 = vshll.u32 %v6065_v17, 23  ;;  %v5944_v10 = vadd.s32 %v5943_v23, %v5939_v19 }
 0x5c5   : > { %v5774_v36 = vsel %vm5772_vm8, %v8667_v54, %v5773_v13  ;;  %v6206_v44 = vadd.s32 1, %v8114_v40  ;;  %v6081_v22 = vadd.s32 3, %v6077_v55  ;;  %v6203_v32 = vand.u32 8388607, %v6196_v51 }
 0x5c6   : > { %v5778_v31 = vsel %vm5771_vm2, %v5774_v36, %v5777_v39  ;;  %v6067_v20 = vor.u32 4788187, %v6066_v12  ;;  %v5945_v49 = vadd.s32 536870912, %v5944_v10  ;;  %v13454_v28 = vmul.f32 %v13403_v47, %v1013_v61 }
 0x5c7   : > { %v5779_v60 = vsel %vm5768_vm12, nan, %v5778_v31  ;;  %vm6207_vm14 = vcmp.gt.s32.totalorder %v6206_v44, 0  ;;  %v6070_v38 = vcvt.s32.f32 %v6063_v7  ;;  %v13460_v3 = vand.u32 3, %v6081_v22 }
 0x5c8   : > { %7800 = vst [vmem:[%s9477_s9 + $0x160] sm:$0xff] %v5779_v60  ;;  %v6068_v1 = vand.u32 2147483647, %v6067_v20  ;;  %v13457_v35 = vshrl.u32 %v5945_v49, 30  ;;  %v6208_v15 = vsel %vm6207_vm14, %v6206_v44, 0  ;;  %v6204_v21 = vor.u32 8388608, %v6203_v32 }
 0x5c9   : > { %v6210_v18 = vand.u32 31, %v6208_v15  ;;  %v13465_v33 = vsel %vm580_vm0, %v903_v30, %v15108_v4  ;;  %v13469_v48 = vshrl.u32 %v6208_v15, 5  ;;  %v6095_v9 = vand.u32 2139095040, %v13454_v28 }
 0x5ca   : > { %v6071_v63 = vmul.f32 %v6070_v38, %v6068_v1  ;;  %v5947_v37 = vshll.u32 %v13457_v35, 30  ;;  %vm5886_vm15 = vcmp.lt.s32.totalorder %v13277_v52, 0  ;;  %v5940_v50 = vadd.s32 %v13421_v29, %v13419_v11 }
 0x5cb   : > { %v6211_v26 = vsub.s32 32, %v6210_v18  ;;  %v6213_v27 = vshll.u32 %v14972_v41, %v6210_v18  ;;  %v6216_v53 = vshll.u32 %v14973_v34, %v6210_v18  ;;  %v6219_v54 = vshll.u32 %v14974_v14, %v6210_v18 }
 0x5cc   : > { %v6072_v25 = vxor.u32 2147483648, %v6071_v63  ;;  %v13467_v0 = vsub.s32 %v5944_v10, %v5947_v37  ;;  %v6222_v6 = vshll.u32 %v14975_v45, %v6210_v18  ;;  %v6225_v55 = vshll.u32 %v14976_v58, %v6210_v18 }
 0x5cd   : > { %v6214_v61 = vshrl.u32 %v14973_v34, %v6211_v26  ;;  %v6217_v16 = vshrl.u32 %v14974_v14, %v6211_v26  ;;  %v6220_v5 = vshrl.u32 %v14975_v45, %v6211_v26  ;;  %v6223_v56 = vshrl.u32 %v14976_v58, %v6211_v26 }
 0x5ce   : > { %v6073_v59 = vsel %vm5990_vm1, %v6072_v25, %v6071_v63  ;;  %v5950_v43 = vsub.s32 0, %v13467_v0  ;;  %v6226_v23 = vshrl.u32 %v14980_v46, %v6211_v26  ;;  %v13492_v7 = vshll.u32 %v6204_v21, 8 }
 0x5cf   : > { %v6076_v19 = vsel %vm13411_vm5, %v13199_v62, %v6073_v59  ;;  %v6215_v8 = vor.u32 %v6214_v61, %v6213_v27  ;;  %v6218_v17 = vor.u32 %v6217_v16, %v6216_v53  ;;  %v6221_v40 = vor.u32 %v6220_v5, %v6219_v54 }
 0x5d0   : > { %8670 = vcosq.f32 %v6076_v19  ;;  %v8103_v42 = vmin.u32 %v5950_v43, %v13467_v0  ;;  %v6224_v13 = vor.u32 %v6223_v56, %v6222_v6  ;;  %v6092_v12 = vand.u32 2147483647, %v13454_v28 }
 0x5d1   : > { %8672 = vsinq.f32 %v6076_v19  ;;  %v6212_v10 = vshrl.u32 %v14972_v41, %v6211_v26  ;;  %v6227_v36 = vor.u32 %v6226_v23, %v6225_v55  ;;  %vm6228_vm13 = vcmp.lt.s32.totalorder %v13469_v48, 1 }
 0x5d2   : > { %v5952_v39 = vclz %v8103_v42  ;;  %v6096_v44 = vshrl.u32 %v6095_v9, 23  ;;  %vm6087_vm1 = vcmp.eq.s32.totalorder %v13460_v3, 2  ;;  %vm6230_vm3 = vcmp.lt.s32.totalorder %v13469_v48, 3 }
 0x5d3   : > { %vm6231_vm4 = vcmp.lt.s32.totalorder %v13469_v48, 4  ;;  %v6236_v11 = vsel %vm6228_vm13, %v6215_v8, %v6218_v17  ;;  %vm6084_vm5 = vcmp.eq.s32.totalorder %v13460_v3, 0  ;;  %v6240_v22 = vsel %vm6228_vm13, %v6218_v17, %v6221_v40 }
 0x5d4   : > { %v8104_v31 = vadd.s32 4294967294, %v5952_v39  ;;  %v6233_v29 = vsel %vm6231_vm4, %v6221_v40, 2102212464  ;;  %v6237_v20 = vsel %vm6231_vm4, %v6224_v13, 920167782  ;;  %vm6083_vm6 = vcmp.lt.s32.totalorder %v13460_v3, 2 }
 0x5d5   : > { %v6241_v49 = vsel %vm6231_vm4, %v6227_v36, 1326507024  ;;  %vm13508_vm7 = vcmp.le.f32.partialorder %v5884_v57, 0.7853982  ;;  %vm6229_vm9 = vcmp.lt.s32.totalorder %v13469_v48, 2  ;;  %v6238_v32 = vsel %vm6230_vm3, %v6221_v40, %v6237_v20 }
 0x5d6   : > { %vm8105_vm8 = vcmp.lt.s32.totalorder %v8104_v31, 0  ;;  %v6242_v1 = vsel %vm6230_vm3, %v6224_v13, %v6241_v49  ;;  %vm6080_vm10 = vweird.f32 %v13199_v62  ;;  %v5970_v15 = vsub.s32 4, %v13457_v35 }
 0x5d7   : > { %v5955_v38 = vsel %vm8105_vm8, 0, %v8104_v31  ;;  %v6239_v57 = vsel %vm6229_vm9, %v6236_v11, %v6238_v32  ;;  %v6243_v30 = vsel %vm6229_vm9, %v6240_v22, %v6242_v1  ;;  %v6232_v37 = vsel %vm6228_vm13, %v6212_v10, %v6215_v8 }
 0x5d8   : > { %v5956_v18 = vsub.s32 32, %v5955_v38  ;;  %v5960_v63 = vsub.s32 4294967266, %v5955_v38  ;;  %v6234_v21 = vsel %vm6230_vm3, %v6218_v17, %v6233_v29  ;;  %v5957_v61 = vshll.u32 %v13467_v0, %v5955_v38 }
 0x5d9   : > { %v13528_v26 = vmul.u32.u64.low %v13492_v7, %v6243_v30  ;;  %v13529_v4 = vmul.u32.u64.high %v13492_v7, %v6243_v30, %v13528_v26  ;;  %v13532_v25 = vmul.u32.u64.low %v13492_v7, %v6239_v57  ;;  %v13533_v9 = vmul.u32.u64.high %v13492_v7, %v6239_v57, %v13532_v25 }
 0x5da   : > { %v8671_v27 = vpop.eup %8670  ;;  %v5958_v53 = vshrl.u32 %v5940_v50, %v5956_v18  ;;  %v5961_v16 = vadd.s32 127, %v5960_v63  ;;  %v8110_v59 = vadd.s32 4294967169, %v6096_v44  ;;  %v5971_v5 = vsel %vm5886_vm15, %v5970_v15, %v13457_v35 }
 0x5db   : > { %v8673_v43 = vpop.eup %8672  ;;  %v6088_v54 = vxor.u32 2147483648, %v8671_v27  ;;  %v6235_v19 = vsel %vm6229_vm9, %v6232_v37, %v6234_v21  ;;  %v13544_v8 = vand.u32 8388607, %v6092_v12  ;;  %vm6253_vm11 = vc.u32 %v13529_v4, %v13532_v25 }
 0x5dc   : > { %v6085_v6 = vxor.u32 2147483648, %v8673_v43  ;;  %v5959_v56 = vor.u32 %v5958_v53, %v5957_v61  ;;  %v5962_v42 = vshll.u32 %v5961_v16, 23  ;;  %v6102_v0 = vadd.s32 1, %v8110_v59 }
 0x5dd   : > { %v6089_v17 = vsel %vm6087_vm1, %v6088_v54, %v8673_v43  ;;  %v6254_v35 = vadd.s32 1, %v13533_v9  ;;  %v13553_v48 = vmul.f32 %v13403_v47, %v13465_v33  ;;  %v6251_v55 = vmul.u32 %v13492_v7, %v6235_v19 }
 0x5de   : > { %v6086_v40 = vsel %vm6084_vm5, %v8671_v27, %v6085_v6  ;;  %v5963_v13 = vor.u32 4788187, %v5962_v42  ;;  %vm6103_vm12 = vcmp.gt.s32.totalorder %v6102_v0, 0  ;;  %v5973_v50 = vsel %vm13508_vm7, 0, %v5971_v5 }
 0x5df   : > { %v6090_v23 = vsel %vm6083_vm6, %v6086_v40, %v6089_v17  ;;  %v6255_v39 = vsel %vm6253_vm11, %v6254_v35, %v13533_v9  ;;  %v6104_v10 = vsel %vm6103_vm12, %v6102_v0, 0  ;;  %v5966_v44 = vcvt.s32.f32 %v5959_v56 }
 0x5e0   : > { %v6091_v33 = vsel %vm6080_vm10, nan, %v6090_v23  ;;  %v5964_v36 = vand.u32 2147483647, %v5963_v13  ;;  %v6256_v31 = vadd.s32 %v6255_v39, %v6251_v55  ;;  %v6106_v11 = vand.u32 31, %v6104_v10 }
 0x5e1   : > { %7803 = vst [vmem:[%s9477_s9 + $0x178] sm:$0xff] %v6091_v33  ;;  %v6100_v20 = vor.u32 8388608, %v13544_v8  ;;  %v5977_v3 = vadd.s32 3, %v5973_v50  ;;  %v6105_v22 = vshrl.u32 %v6104_v10, 5  ;;  %v6407_v32 = vand.u32 2139095040, %v13553_v48 }
 0x5e2   : > { %v5967_v29 = vmul.f32 %v5966_v44, %v5964_v36  ;;  %v6257_v7 = vadd.s32 536870912, %v6256_v31  ;;  %v6107_v49 = vsub.s32 32, %v6106_v11  ;;  %v6109_v62 = vshll.u32 %v14972_v41, %v6106_v11 }
 0x5e3   : > { %v6112_v15 = vshll.u32 %v14973_v34, %v6106_v11  ;;  %v6115_v18 = vshll.u32 %v14974_v14, %v6106_v11  ;;  %v6118_v26 = vshll.u32 %v14975_v45, %v6106_v11  ;;  %v13584_v59 = vand.u32 3, %v5977_v3 }
 0x5e4   : > { %v5968_v1 = vxor.u32 2147483648, %v5967_v29  ;;  %v13568_v38 = vshrl.u32 %v6257_v7, 30  ;;  %v6110_v57 = vshrl.u32 %v14973_v34, %v6107_v49  ;;  %v6113_v30 = vshrl.u32 %v14974_v14, %v6107_v49 }
 0x5e5   : > { %v6116_v63 = vshrl.u32 %v14975_v45, %v6107_v49  ;;  %v6119_v9 = vshrl.u32 %v14976_v58, %v6107_v49  ;;  %v6121_v5 = vshll.u32 %v14976_v58, %v6106_v11  ;;  %v6122_v19 = vshrl.u32 %v14980_v46, %v6107_v49 }
 0x5e6   : > { %v5969_v37 = vsel %vm5886_vm15, %v5968_v1, %v5967_v29  ;;  %v6259_v21 = vshll.u32 %v13568_v38, 30  ;;  %v6111_v61 = vor.u32 %v6110_v57, %v6109_v62  ;;  %v6114_v53 = vor.u32 %v6113_v30, %v6112_v15 }
 0x5e7   : > { %v5972_v27 = vsel %vm13508_vm7, %v13277_v52, %v5969_v37  ;;  %v6117_v16 = vor.u32 %v6116_v63, %v6115_v18  ;;  %v6120_v54 = vor.u32 %v6119_v9, %v6118_v26  ;;  %v6408_v8 = vshrl.u32 %v6407_v32, 23 }
 0x5e8   : > { %8674 = vcosq.f32 %v5972_v27  ;;  %v13586_v43 = vsub.s32 %v6256_v31, %v6259_v21  ;;  %vm6198_vm2 = vcmp.lt.s32.totalorder %v13406_v24, 0  ;;  %vm6124_vm14 = vcmp.lt.s32.totalorder %v6105_v22, 1 }
 0x5e9   : > { %8676 = vsinq.f32 %v5972_v27  ;;  %vm6126_vm15 = vcmp.lt.s32.totalorder %v6105_v22, 3  ;;  %vm6127_vm13 = vcmp.lt.s32.totalorder %v6105_v22, 4  ;;  %v6123_v6 = vor.u32 %v6122_v19, %v6121_v5 }
 0x5ea   : > { %v6262_v60 = vsub.s32 0, %v13586_v43  ;;  %v6129_v56 = vsel %vm6127_vm13, %v6117_v16, 2102212464  ;;  %v6132_v42 = vsel %vm6124_vm14, %v6111_v61, %v6114_v53  ;;  %v6133_v0 = vsel %vm6127_vm13, %v6120_v54, 920167782 }
 0x5eb   : > { %v6108_v35 = vshrl.u32 %v14972_v41, %v6107_v49  ;;  %vm6125_vm1 = vcmp.lt.s32.totalorder %v6105_v22, 2  ;;  %v6134_v40 = vsel %vm6126_vm15, %v6117_v16, %v6133_v0  ;;  %v6136_v55 = vsel %vm6124_vm14, %v6114_v53, %v6117_v16  ;;  %v15113_v0 = vld [vmem:[#allocation37_spill] sm:$0xff] }
 0x5ec   : > { %v8115_v17 = vmin.u32 %v6262_v60, %v13586_v43  ;;  %v6135_v13 = vsel %vm6125_vm1, %v6132_v42, %v6134_v40  ;;  %v6137_v23 = vsel %vm6127_vm13, %v6123_v6, 1326507024  ;;  %v6140_v50 = vshll.u32 %v6100_v20, 8 }
 0x5ed   : > { %vm5979_vm3 = vcmp.lt.s32.totalorder %v13584_v59, 2  ;;  %vm13601_vm4 = vcmp.le.f32.partialorder %v6196_v51, 0.7853982  ;;  %v6128_v33 = vsel %vm6124_vm14, %v6108_v35, %v6111_v61  ;;  %v6130_v36 = vsel %vm6126_vm15, %v6114_v53, %v6129_v56  ;;  %v898_v53 = vpop.permute.xlu0 %897 }
 0x5ee   : > { %v6264_v10 = vclz %v8115_v17  ;;  %v6404_v44 = vand.u32 2147483647, %v13553_v48  ;;  %vm5976_vm5 = vweird.f32 %v13277_v52  ;;  %v6282_v31 = vsub.s32 4, %v13568_v38 }
 0x5ef   : > { %v6138_v11 = vsel %vm6126_vm15, %v6120_v54, %v6137_v23  ;;  %v13611_v29 = vmul.u32.u64.low %v6140_v50, %v6135_v13  ;;  %v13612_v7 = vmul.u32.u64.high %v6140_v50, %v6135_v13, %v13611_v29  ;;  %vm5980_vm6 = vcmp.eq.s32.totalorder %v13584_v59, 0 }
 0x5f0   : > { %v8116_v51 = vadd.s32 4294967294, %v6264_v10  ;;  %v6139_v20 = vsel %vm6125_vm1, %v6136_v55, %v6138_v11  ;;  %v8122_v3 = vadd.s32 4294967169, %v6408_v8  ;;  %vm5983_vm7 = vcmp.eq.s32.totalorder %v13584_v59, 2 }
 0x5f1   : > { %v6131_v49 = vsel %vm6125_vm1, %v6128_v33, %v6130_v36  ;;  %v13619_v32 = vmul.u32.u64.low %v6140_v50, %v6139_v20  ;;  %v13620_v1 = vmul.u32.u64.high %v6140_v50, %v6139_v20, %v13619_v32  ;;  %v6252_v15 = vadd.s32 %v13532_v25, %v13529_v4 }
 0x5f2   : > { %v8675_v62 = vpop.eup %8674  ;;  %vm8117_vm8 = vcmp.lt.s32.totalorder %v8116_v51, 0  ;;  %v6411_v57 = vand.u32 8388607, %v6404_v44  ;;  %v6414_v30 = vadd.s32 1, %v8122_v3  ;;  %v6283_v22 = vsel %vm6198_vm2, %v6282_v31, %v13568_v38 }
 0x5f3   : > { %v8677_v18 = vpop.eup %8676  ;;  %v5984_v63 = vxor.u32 2147483648, %v8675_v62  ;;  %v6267_v37 = vsel %vm8117_vm8, 0, %v8116_v51  ;;  %v6150_v21 = vadd.s32 1, %v13612_v7  ;;  %v6147_v61 = vmul.u32 %v6140_v50, %v6131_v49 }
 0x5f4   : > { %v5981_v26 = vxor.u32 2147483648, %v8677_v18  ;;  %v6268_v9 = vsub.s32 32, %v6267_v37  ;;  %v6272_v27 = vsub.s32 4294967266, %v6267_v37  ;;  %v6269_v25 = vshll.u32 %v13586_v43, %v6267_v37 }
 0x5f5   : > { %v5985_v4 = vsel %vm5983_vm7, %v5984_v63, %v8677_v18  ;;  %vm6149_vm9 = vc.u32 %v13620_v1, %v13611_v29  ;;  %vm6415_vm10 = vcmp.gt.s32.totalorder %v6414_v30, 0  ;;  %v6285_v8 = vsel %vm13601_vm4, 0, %v6283_v22 }
 0x5f6   : > { %v5982_v38 = vsel %vm5980_vm6, %v8675_v62, %v5981_v26  ;;  %v6270_v16 = vshrl.u32 %v6252_v15, %v6268_v9  ;;  %v6273_v54 = vadd.s32 127, %v6272_v27  ;;  %v6151_v5 = vsel %vm6149_vm9, %v6150_v21, %v13612_v7 }
 0x5f7   : > { %v5986_v19 = vsel %vm5979_vm3, %v5982_v38, %v5985_v4  ;;  %v6152_v43 = vadd.s32 %v6151_v5, %v6147_v61  ;;  %v6416_v60 = vsel %vm6415_vm10, %v6414_v30, 0  ;;  %v1015_v17 = vsel %vm580_vm0, %v898_v53, %v15113_v0 }
 0x5f8   : > { %v5987_v6 = vsel %vm5976_vm5, nan, %v5986_v19  ;;  %v6271_v56 = vor.u32 %v6270_v16, %v6269_v25  ;;  %v6274_v42 = vshll.u32 %v6273_v54, 23  ;;  %v6418_v40 = vand.u32 31, %v6416_v60 }
 0x5f9   : > { %7802 = vst [vmem:[%s9477_s9 + $0x170] sm:$0xff] %v5987_v6  ;;  %v6153_v35 = vadd.s32 536870912, %v6152_v43  ;;  %v6289_v59 = vadd.s32 3, %v6285_v8  ;;  %v6412_v23 = vor.u32 8388608, %v6411_v57  ;;  %v13649_v10 = vmul.f32 %v13403_v47, %v1015_v17 }
 0x5fa   : > { %v6275_v13 = vor.u32 4788187, %v6274_v42  ;;  %v6419_v50 = vsub.s32 32, %v6418_v40  ;;  %v6278_v52 = vcvt.s32.f32 %v6271_v56  ;;  %v13651_v36 = vshrl.u32 %v6416_v60, 5  ;;  %v913_v42 = vpop.permute.xlu1 %912 }
 0x5fb   : > { %v6154_v55 = vshrl.u32 %v6153_v35, 30  ;;  %v6421_v31 = vshll.u32 %v14972_v41, %v6418_v40  ;;  %v6424_v51 = vshll.u32 %v14973_v34, %v6418_v40  ;;  %v6427_v20 = vshll.u32 %v14974_v14, %v6418_v40 }
 0x5fc   : > { %v6276_v33 = vand.u32 2147483647, %v6275_v13  ;;  %v6422_v7 = vshrl.u32 %v14973_v34, %v6419_v50  ;;  %v6425_v49 = vshrl.u32 %v14974_v14, %v6419_v50  ;;  %v6428_v32 = vshrl.u32 %v14975_v45, %v6419_v50 }
 0x5fd   : > { %v6155_v11 = vshll.u32 %v6154_v55, 30  ;;  %v6431_v62 = vshrl.u32 %v14976_v58, %v6419_v50  ;;  %v13660_v15 = vand.u32 3, %v6289_v59  ;;  %v6430_v30 = vshll.u32 %v14975_v45, %v6418_v40 }
 0x5fe   : > { %v6279_v3 = vmul.f32 %v6278_v52, %v6276_v33  ;;  %v6434_v18 = vshrl.u32 %v14980_v46, %v6419_v50  ;;  %vm6094_vm11 = vcmp.lt.s32.totalorder %v13454_v28, 0  ;;  %v6423_v37 = vor.u32 %v6422_v7, %v6421_v31  ;;  %v15116_v31 = vld [vmem:[#allocation38_spill] sm:$0xff] }
 0x5ff   : > { %v13662_v57 = vsub.s32 %v6152_v43, %v6155_v11  ;;  %v6426_v22 = vor.u32 %v6425_v49, %v6424_v51  ;;  %v6429_v21 = vor.u32 %v6428_v32, %v6427_v20  ;;  %v6432_v9 = vor.u32 %v6431_v62, %v6430_v30 }
 0x600   : > { %v6280_v63 = vxor.u32 2147483648, %v6279_v3  ;;  %v6433_v27 = vshll.u32 %v14976_v58, %v6418_v40  ;;  %v13669_v61 = vshll.u32 %v6412_v23, 8  ;;  %v6420_v25 = vshrl.u32 %v14972_v41, %v6419_v50 }
 0x601   : > { %v6158_v26 = vsub.s32 0, %v13662_v57  ;;  %vm6436_vm12 = vcmp.lt.s32.totalorder %v13651_v36, 1  ;;  %v6303_v53 = vand.u32 2139095040, %v13649_v10  ;;  %vm6439_vm14 = vcmp.lt.s32.totalorder %v13651_v36, 4 }
 0x602   : > { %v6281_v4 = vsel %vm6198_vm2, %v6280_v63, %v6279_v3  ;;  %v6435_v54 = vor.u32 %v6434_v18, %v6433_v27  ;;  %vm13683_vm15 = vcmp.le.f32.partialorder %v6092_v12, 0.7853982  ;;  %v6441_v19 = vsel %vm6439_vm14, %v6429_v21, 2102212464 }
 0x603   : > { %v6284_v38 = vsel %vm13601_vm4, %v13406_v24, %v6281_v4  ;;  %v8111_v16 = vmin.u32 %v6158_v26, %v13662_v57  ;;  %v6444_v8 = vsel %vm6436_vm12, %v6423_v37, %v6426_v22  ;;  %v6445_v39 = vsel %vm6439_vm14, %v6432_v9, 920167782 }
 0x604   : > { %8678 = vcosq.f32 %v6284_v38  ;;  %v6178_v60 = vsub.s32 4, %v6154_v55  ;;  %vm6438_vm2 = vcmp.lt.s32.totalorder %v13651_v36, 3  ;;  %vm6437_vm13 = vcmp.lt.s32.totalorder %v13651_v36, 2 }
 0x605   : > { %8680 = vsinq.f32 %v6284_v38  ;;  %v6160_v43 = vclz %v8111_v16  ;;  %v6440_v12 = vsel %vm6436_vm12, %v6420_v25, %v6423_v37  ;;  %v6446_v6 = vsel %vm6438_vm2, %v6429_v21, %v6445_v39 }
 0x606   : > { %v6448_v56 = vsel %vm6436_vm12, %v6426_v22, %v6429_v21  ;;  %v6442_v17 = vsel %vm6438_vm2, %v6426_v22, %v6441_v19  ;;  %v6447_v35 = vsel %vm6437_vm13, %v6444_v8, %v6446_v6  ;;  %v6449_v40 = vsel %vm6439_vm14, %v6435_v54, 1326507024 }
 0x607   : > { %v8112_v0 = vadd.s32 4294967294, %v6160_v43  ;;  %v6450_v13 = vsel %vm6438_vm2, %v6432_v9, %v6449_v40  ;;  %v13704_v59 = vmul.u32.u64.low %v13669_v61, %v6447_v35  ;;  %v13705_v23 = vmul.u32.u64.high %v13669_v61, %v6447_v35, %v13704_v59 }
 0x608   : > { %v6304_v50 = vshrl.u32 %v6303_v53, 23  ;;  %vm6292_vm1 = vcmp.eq.s32.totalorder %v13660_v15, 0  ;;  %v6179_v33 = vsel %vm6094_vm11, %v6178_v60, %v6154_v55  ;;  %v6451_v52 = vsel %vm6437_vm13, %v6448_v56, %v6450_v13 }
 0x609   : > { %vm8113_vm3 = vcmp.lt.s32.totalorder %v8112_v0, 0  ;;  %v1018_v11 = vsel %vm580_vm0, %v913_v42, %v15116_v31  ;;  %v13717_v51 = vmul.u32.u64.low %v13669_v61, %v6451_v52  ;;  %v13718_v20 = vmul.u32.u64.high %v13669_v61, %v6451_v52, %v13717_v51 }
 0x60a   : > { %v6163_v7 = vsel %vm8113_vm3, 0, %v8112_v0  ;;  %v8118_v3 = vadd.s32 4294967169, %v6304_v50  ;;  %v6148_v49 = vadd.s32 %v13611_v29, %v13620_v1  ;;  %v6443_v55 = vsel %vm6437_vm13, %v6440_v12, %v6442_v17 }
 0x60b   : > { %v6164_v32 = vsub.s32 32, %v6163_v7  ;;  %v6168_v62 = vsub.s32 4294967266, %v6163_v7  ;;  %v6462_v30 = vadd.s32 1, %v13705_v23  ;;  %v6300_v18 = vand.u32 2147483647, %v13649_v10 }
 0x60c   : > { %v6310_v63 = vadd.s32 1, %v8118_v3  ;;  %v13727_v37 = vmul.f32 %v13403_v47, %v1018_v11  ;;  %v6165_v22 = vshll.u32 %v13662_v57, %v6163_v7  ;;  %v6181_v29 = vsel %vm13683_vm15, 0, %v6179_v33 }
 0x60d   : > { %v6166_v21 = vshrl.u32 %v6148_v49, %v6164_v32  ;;  %v6169_v26 = vadd.s32 127, %v6168_v62  ;;  %vm6295_vm4 = vcmp.eq.s32.totalorder %v13660_v15, 2  ;;  %v6459_v36 = vmul.u32 %v13669_v61, %v6443_v55 }
 0x60e   : > { %v8679_v1 = vpop.eup %8678  ;;  %vm6461_vm5 = vc.u32 %v13718_v20, %v13704_v59  ;;  %vm6311_vm6 = vcmp.gt.s32.totalorder %v6310_v63, 0  ;;  %v6185_v53 = vadd.s32 3, %v6181_v29  ;;  %v6307_v61 = vand.u32 8388607, %v6300_v18 }
 0x60f   : > { %v8681_v9 = vpop.eup %8680  ;;  %v6296_v27 = vxor.u32 2147483648, %v8679_v1  ;;  %v6167_v47 = vor.u32 %v6166_v21, %v6165_v22  ;;  %v6170_v4 = vshll.u32 %v6169_v26, 23  ;;  %v6463_v57 = vsel %vm6461_vm5, %v6462_v30, %v13705_v23 }
 0x610   : > { %v6293_v25 = vxor.u32 2147483648, %v8681_v9  ;;  %v6464_v38 = vadd.s32 %v6463_v57, %v6459_v36  ;;  %v6312_v16 = vsel %vm6311_vm6, %v6310_v63, 0  ;;  %v6615_v8 = vand.u32 2139095040, %v13727_v37 }
 0x611   : > { %v6297_v54 = vsel %vm6295_vm4, %v6296_v27, %v8681_v9  ;;  %v6171_v19 = vor.u32 4788187, %v6170_v4  ;;  %vm6291_vm7 = vcmp.lt.s32.totalorder %v13660_v15, 2  ;;  %v6314_v60 = vand.u32 31, %v6312_v16 }
 0x612   : > { %v6294_v39 = vsel %vm6292_vm1, %v8679_v1, %v6293_v25  ;;  %v6465_v43 = vadd.s32 536870912, %v6464_v38  ;;  %vm6288_vm8 = vweird.f32 %v13406_v24  ;;  %v6174_v56 = vcvt.s32.f32 %v6167_v47 }
 0x613   : > { %v6298_v12 = vsel %vm6291_vm7, %v6294_v39, %v6297_v54  ;;  %v6172_v6 = vand.u32 2147483647, %v6171_v19  ;;  %v6315_v17 = vsub.s32 32, %v6314_v60  ;;  %v13747_v40 = vand.u32 3, %v6185_v53 }
 0x614   : > { %v6299_v42 = vsel %vm6288_vm8, nan, %v6298_v12  ;;  %v13744_v0 = vshrl.u32 %v6465_v43, 30  ;;  %v6308_v13 = vor.u32 8388608, %v6307_v61  ;;  %v6616_v23 = vshrl.u32 %v6615_v8, 23 }
 0x615   : > { %7805 = vst [vmem:[%s9477_s9 + $0x188] sm:$0xff] %v6299_v42  ;;  %v6175_v35 = vmul.f32 %v6174_v56, %v6172_v6  ;;  %v6317_v50 = vshll.u32 %v14972_v41, %v6314_v60  ;;  %v6318_v33 = vshrl.u32 %v14973_v34, %v6315_v17  ;;  %v6320_v24 = vshll.u32 %v14973_v34, %v6314_v60 }
 0x616   : > { %v6467_v15 = vshll.u32 %v13744_v0, 30  ;;  %v6321_v31 = vshrl.u32 %v14974_v14, %v6315_v17  ;;  %v6324_v11 = vshrl.u32 %v14975_v45, %v6315_v17  ;;  %v6327_v7 = vshrl.u32 %v14976_v58, %v6315_v17 }
 0x617   : > { %v6176_v52 = vxor.u32 2147483648, %v6175_v35  ;;  %v6313_v3 = vshrl.u32 %v6312_v16, 5  ;;  %v6323_v49 = vshll.u32 %v14974_v14, %v6314_v60  ;;  %v6326_v32 = vshll.u32 %v14975_v45, %v6314_v60 }
 0x618   : > { %v13756_v51 = vsub.s32 %v6464_v38, %v6467_v15  ;;  %v6319_v55 = vor.u32 %v6318_v33, %v6317_v50  ;;  %v6322_v30 = vor.u32 %v6321_v31, %v6320_v24  ;;  %v13762_v63 = vshll.u32 %v6308_v13, 8 }
 0x619   : > { %v6177_v62 = vsel %vm6094_vm11, %v6176_v52, %v6175_v35  ;;  %v6325_v26 = vor.u32 %v6324_v11, %v6323_v49  ;;  %v6328_v29 = vor.u32 %v6327_v7, %v6326_v32  ;;  %v6329_v1 = vshll.u32 %v14976_v58, %v6314_v60 }
 0x61a   : > { %v6180_v22 = vsel %vm13683_vm15, %v13454_v28, %v6177_v62  ;;  %v6470_v21 = vsub.s32 0, %v13756_v51  ;;  %v6330_v36 = vshrl.u32 %v14980_v46, %v6315_v17  ;;  %v8130_v9 = vadd.s32 4294967169, %v6616_v23 }
 0x61b   : > { %8682 = vcosq.f32 %v6180_v22  ;;  %vm6406_vm9 = vcmp.lt.s32.totalorder %v13553_v48, 0  ;;  %vm6332_vm10 = vcmp.lt.s32.totalorder %v6313_v3, 1  ;;  %vm6335_vm11 = vcmp.lt.s32.totalorder %v6313_v3, 4 }
 0x61c   : > { %8684 = vsinq.f32 %v6180_v22  ;;  %v8123_v27 = vmin.u32 %v6470_v21, %v13756_v51  ;;  %v6331_v47 = vor.u32 %v6330_v36, %v6329_v1  ;;  %vm6333_vm12 = vcmp.lt.s32.totalorder %v6313_v3, 2 }
 0x61d   : > { %v6340_v5 = vsel %vm6332_vm10, %v6319_v55, %v6322_v30  ;;  %v6341_v4 = vsel %vm6335_vm11, %v6328_v29, 920167782  ;;  %v6316_v25 = vshrl.u32 %v14972_v41, %v6315_v17  ;;  %vm6334_vm14 = vcmp.lt.s32.totalorder %v6313_v3, 3 }
 0x61e   : > { %v6472_v57 = vclz %v8123_v27  ;;  %v6337_v53 = vsel %vm6335_vm11, %v6325_v26, 2102212464  ;;  %v6490_v38 = vsub.s32 4, %v13744_v0  ;;  %v6342_v16 = vsel %vm6334_vm14, %v6325_v26, %v6341_v4 }
 0x61f   : > { %v6344_v54 = vsel %vm6332_vm10, %v6322_v30, %v6325_v26  ;;  %v6345_v19 = vsel %vm6335_vm11, %v6331_v47, 1326507024  ;;  %vm13778_vm15 = vcmp.le.f32.partialorder %v6404_v44, 0.7853982  ;;  %v6336_v39 = vsel %vm6332_vm10, %v6316_v25, %v6319_v55 }
 0x620   : > { %v8124_v8 = vadd.s32 4294967294, %v6472_v57  ;;  %v6343_v43 = vsel %vm6333_vm12, %v6340_v5, %v6342_v16  ;;  %v6346_v60 = vsel %vm6334_vm14, %v6328_v29, %v6345_v19  ;;  %v6338_v12 = vsel %vm6334_vm14, %v6322_v30, %v6337_v53 }
 0x621   : > { %v6347_v6 = vsel %vm6333_vm12, %v6344_v54, %v6346_v60  ;;  %v13786_v56 = vmul.u32.u64.low %v13762_v63, %v6343_v43  ;;  %v13787_v42 = vmul.u32.u64.high %v13762_v63, %v6343_v43, %v13786_v56  ;;  %vm6187_vm2 = vcmp.lt.s32.totalorder %v13747_v40, 2 }
 0x622   : > { %vm8125_vm13 = vcmp.lt.s32.totalorder %v8124_v8, 0  ;;  %v13792_v44 = vmul.u32.u64.low %v13762_v63, %v6347_v6  ;;  %v13793_v17 = vmul.u32.u64.high %v13762_v63, %v6347_v6, %v13792_v44  ;;  %vm6188_vm1 = vcmp.eq.s32.totalorder %v13747_v40, 0 }
 0x623   : > { %vm6191_vm3 = vcmp.eq.s32.totalorder %v13747_v40, 2  ;;  %v6475_v35 = vsel %vm8125_vm13, 0, %v8124_v8  ;;  %v6622_v13 = vadd.s32 1, %v8130_v9  ;;  %v6460_v23 = vadd.s32 %v13704_v59, %v13718_v20  ;;  %v908_v8 = vpop.permute.xlu0 %907 }
 0x624   : > { %v6476_v15 = vsub.s32 32, %v6475_v35  ;;  %v6480_v50 = vsub.s32 4294967266, %v6475_v35  ;;  %v6339_v33 = vsel %vm6333_vm12, %v6336_v39, %v6338_v12  ;;  %v6491_v52 = vsel %vm6406_vm9, %v6490_v38, %v13744_v0 }
 0x625   : > { %v8683_v24 = vpop.eup %8682  ;;  %v6358_v31 = vadd.s32 1, %v13787_v42  ;;  %v6612_v11 = vand.u32 2147483647, %v13727_v37  ;;  %vm6623_vm4 = vcmp.gt.s32.totalorder %v6622_v13, 0  ;;  %v6477_v32 = vshll.u32 %v13756_v51, %v6475_v35 }
 0x626   : > { %v8685_v7 = vpop.eup %8684  ;;  %v6192_v49 = vxor.u32 2147483648, %v8683_v24  ;;  %v6478_v62 = vshrl.u32 %v6460_v23, %v6476_v15  ;;  %v6481_v59 = vadd.s32 127, %v6480_v50  ;;  %v6355_v3 = vmul.u32 %v13762_v63, %v6339_v33  ;;  %v15119_v50 = vld [vmem:[#allocation39_spill] sm:$0xff] }
 0x627   : > { %v6189_v20 = vxor.u32 2147483648, %v8685_v7  ;;  %vm6357_vm5 = vc.u32 %v13793_v17, %v13786_v56  ;;  %v6624_v55 = vsel %vm6623_vm4, %v6622_v13, 0  ;;  %v6493_v26 = vsel %vm13778_vm15, 0, %v6491_v52 }
 0x628   : > { %v6193_v0 = vsel %vm6191_vm3, %v6192_v49, %v8685_v7  ;;  %v6479_v30 = vor.u32 %v6478_v62, %v6477_v32  ;;  %v6482_v22 = vshll.u32 %v6481_v59, 23  ;;  %v6359_v21 = vsel %vm6357_vm5, %v6358_v31, %v13787_v42 }
 0x629   : > { %v6190_v51 = vsel %vm6188_vm1, %v8683_v24, %v6189_v20  ;;  %v6360_v29 = vadd.s32 %v6359_v21, %v6355_v3  ;;  %v6626_v63 = vand.u32 31, %v6624_v55  ;;  %vm6184_vm6 = vweird.f32 %v13454_v28  ;;  %v13853_v3 = vld [vmem:[%s14908_s2] ss:$0 sm:$0xff] }
 0x62a   : > { %v6194_v1 = vsel %vm6187_vm2, %v6190_v51, %v6193_v0  ;;  %v6483_v36 = vor.u32 4788187, %v6482_v22  ;;  %v6486_v4 = vcvt.s32.f32 %v6479_v30  ;;  %v6497_v57 = vadd.s32 3, %v6493_v26 }
 0x62b   : > { %v6195_v9 = vsel %vm6184_vm6, nan, %v6194_v1  ;;  %v6361_v27 = vadd.s32 536870912, %v6360_v29  ;;  %v6627_v47 = vsub.s32 32, %v6626_v63  ;;  %v6619_v53 = vand.u32 8388607, %v6612_v11 }
 0x62c   : > { %7804 = vst [vmem:[%s9477_s9 + $0x180] sm:$0xff] %v6195_v9  ;;  %v6484_v5 = vand.u32 2147483647, %v6483_v36  ;;  %v6625_v38 = vshrl.u32 %v6624_v55, 5  ;;  %v6629_v43 = vshll.u32 %v14972_v41, %v6626_v63  ;;  %v6632_v60 = vshll.u32 %v14973_v34, %v6626_v63 }
 0x62d   : > { %v13820_v25 = vshrl.u32 %v6361_v27, 30  ;;  %v6630_v16 = vshrl.u32 %v14973_v34, %v6627_v47  ;;  %v6633_v40 = vshrl.u32 %v14974_v14, %v6627_v47  ;;  %v6636_v54 = vshrl.u32 %v14975_v45, %v6627_v47 }
 0x62e   : > { %v6487_v28 = vmul.f32 %v6486_v4, %v6484_v5  ;;  %v6639_v19 = vshrl.u32 %v14976_v58, %v6627_v47  ;;  %v6635_v12 = vshll.u32 %v14974_v14, %v6626_v63  ;;  %v6638_v42 = vshll.u32 %v14975_v45, %v6626_v63 }
 0x62f   : > { %v6363_v39 = vshll.u32 %v13820_v25, 30  ;;  %v6641_v44 = vshll.u32 %v14976_v58, %v6626_v63  ;;  %v6642_v35 = vshrl.u32 %v14980_v46, %v6627_v47  ;;  %v6631_v23 = vor.u32 %v6630_v16, %v6629_v43  ;;  %v15122_v43 = vld [vmem:[#allocation40_spill] sm:$0xff] }
 0x630   : > { %v6488_v6 = vxor.u32 2147483648, %v6487_v28  ;;  %v6637_v15 = vor.u32 %v6636_v54, %v6635_v12  ;;  %v1017_v33 = vsel %vm580_vm0, %v908_v8, %v15119_v50  ;;  %v6634_v52 = vor.u32 %v6633_v40, %v6632_v60 }
 0x631   : > { %v13835_v13 = vsub.s32 %v6360_v29, %v6363_v39  ;;  %v6640_v31 = vor.u32 %v6639_v19, %v6638_v42  ;;  %v6643_v7 = vor.u32 %v6642_v35, %v6641_v44  ;;  %v13845_v32 = vand.u32 3, %v6497_v57 }
 0x632   : > { %v6489_v24 = vsel %vm6406_vm9, %v6488_v6, %v6487_v28  ;;  %v6620_v59 = vor.u32 8388608, %v6619_v53  ;;  %vm6302_vm7 = vcmp.lt.s32.totalorder %v13649_v10, 0  ;;  %v6628_v20 = vshrl.u32 %v14972_v41, %v6627_v47  ;;  %v923_v53 = vpop.permute.xlu1 %922 }
 0x633   : > { %v6492_v49 = vsel %vm13778_vm15, %v13553_v48, %v6489_v24  ;;  %v6366_v62 = vsub.s32 0, %v13835_v13  ;;  %vm6647_vm8 = vcmp.lt.s32.totalorder %v6625_v38, 4  ;;  %v13856_v55 = vmul.f32 %v13853_v3, %v1017_v33 }
 0x634   : > { %8686 = vcosq.f32 %v6492_v49  ;;  %vm6644_vm9 = vcmp.lt.s32.totalorder %v6625_v38, 1  ;;  %v6649_v0 = vsel %vm6647_vm8, %v6637_v15, 2102212464  ;;  %v6653_v22 = vsel %vm6647_vm8, %v6640_v31, 920167782 }
 0x635   : > { %8688 = vsinq.f32 %v6492_v49  ;;  %v8119_v61 = vmin.u32 %v6366_v62, %v13835_v13  ;;  %v6652_v30 = vsel %vm6644_vm9, %v6631_v23, %v6634_v52  ;;  %v6656_v21 = vsel %vm6644_vm9, %v6634_v52, %v6637_v15 }
 0x636   : > { %v6657_v51 = vsel %vm6647_vm8, %v6643_v7, 1326507024  ;;  %vm13861_vm10 = vcmp.le.f32.partialorder %v6300_v18, 0.7853982  ;;  %vm6645_vm11 = vcmp.lt.s32.totalorder %v6625_v38, 2  ;;  %vm6646_vm12 = vcmp.lt.s32.totalorder %v6625_v38, 3 }
 0x637   : > { %v6368_v29 = vclz %v8119_v61  ;;  %v6660_v63 = vshll.u32 %v6620_v59, 8  ;;  %v6648_v1 = vsel %vm6644_vm9, %v6628_v20, %v6631_v23  ;;  %v6650_v36 = vsel %vm6646_vm12, %v6634_v52, %v6649_v0 }
 0x638   : > { %v6654_v9 = vsel %vm6646_vm12, %v6637_v15, %v6653_v22  ;;  %v6658_v27 = vsel %vm6646_vm12, %v6640_v31, %v6657_v51  ;;  %v6386_v5 = vsub.s32 4, %v13820_v25  ;;  %vm6500_vm14 = vcmp.eq.s32.totalorder %v13845_v32, 0 }
 0x639   : > { %v8120_v47 = vadd.s32 4294967294, %v6368_v29  ;;  %v6655_v4 = vsel %vm6645_vm11, %v6652_v30, %v6654_v9  ;;  %v6659_v57 = vsel %vm6645_vm11, %v6656_v21, %v6658_v27  ;;  %v6651_v54 = vsel %vm6645_vm11, %v6648_v1, %v6650_v36  ;;  %v918_v9 = vpop.permute.xlu0 %917 }
 0x63a   : > { %v13868_v18 = vmul.u32.u64.low %v6660_v63, %v6659_v57  ;;  %v13869_v16 = vmul.u32.u64.high %v6660_v63, %v6659_v57, %v13868_v18  ;;  %v13871_v28 = vmul.u32.u64.low %v6660_v63, %v6655_v4  ;;  %v13872_v40 = vmul.u32.u64.high %v6660_v63, %v6655_v4, %v13871_v28 }
 0x63b   : > { %vm8121_vm15 = vcmp.lt.s32.totalorder %v8120_v47, 0  ;;  %v6511_v19 = vand.u32 2139095040, %v13856_v55  ;;  %vm6503_vm2 = vcmp.eq.s32.totalorder %v13845_v32, 2  ;;  %v6356_v8 = vadd.s32 %v13786_v56, %v13793_v17  ;;  %v15123_v18 = vld [vmem:[#allocation41_spill] sm:$0xff] }
 0x63c   : > { %v6371_v39 = vsel %vm8121_vm15, 0, %v8120_v47  ;;  %v1020_v60 = vsel %vm580_vm0, %v923_v53, %v15122_v43  ;;  %v6387_v42 = vsel %vm6302_vm7, %v6386_v5, %v13820_v25  ;;  %v6667_v23 = vmul.u32 %v6660_v63, %v6651_v54 }
 0x63d   : > { %v6372_v12 = vsub.s32 32, %v6371_v39  ;;  %v6376_v6 = vsub.s32 4294967266, %v6371_v39  ;;  %v6512_v38 = vshrl.u32 %v6511_v19, 23  ;;  %v6373_v35 = vshll.u32 %v13835_v13, %v6371_v39 }
 0x63e   : > { %v8687_v44 = vpop.eup %8686  ;;  %vm6669_vm13 = vc.u32 %v13869_v16, %v13871_v28  ;;  %v6670_v56 = vadd.s32 1, %v13872_v40  ;;  %v6389_v31 = vsel %vm13861_vm10, 0, %v6387_v42  ;;  %v6508_v7 = vand.u32 2147483647, %v13856_v55 }
 0x63f   : > { %v8689_v17 = vpop.eup %8688  ;;  %v6504_v15 = vxor.u32 2147483648, %v8687_v44  ;;  %v6374_v50 = vshrl.u32 %v6356_v8, %v6372_v12  ;;  %v6377_v33 = vadd.s32 127, %v6376_v6  ;;  %v8126_v24 = vadd.s32 4294967169, %v6512_v38 }
 0x640   : > { %v6501_v52 = vxor.u32 2147483648, %v8689_v17  ;;  %v6671_v25 = vsel %vm6669_vm13, %v6670_v56, %v13872_v40  ;;  %vm6496_vm1 = vweird.f32 %v13553_v48  ;;  %vm6499_vm3 = vcmp.lt.s32.totalorder %v13845_v32, 2 }
 0x641   : > { %v6505_v13 = vsel %vm6503_vm2, %v6504_v15, %v8689_v17  ;;  %v6375_v49 = vor.u32 %v6374_v50, %v6373_v35  ;;  %v6378_v62 = vshll.u32 %v6377_v33, 23  ;;  %v6672_v59 = vadd.s32 %v6671_v25, %v6667_v23 }
 0x642   : > { %v6502_v20 = vsel %vm6500_vm14, %v8687_v44, %v6501_v52  ;;  %v6518_v61 = vadd.s32 1, %v8126_v24  ;;  %v6393_v22 = vadd.s32 3, %v6389_v31  ;;  %v6515_v29 = vand.u32 8388607, %v6508_v7 }
 0x643   : > { %v6506_v0 = vsel %vm6499_vm3, %v6502_v20, %v6505_v13  ;;  %v6379_v30 = vor.u32 4788187, %v6378_v62  ;;  %v6673_v21 = vadd.s32 536870912, %v6672_v59  ;;  %v13904_v63 = vmul.f32 %v13853_v3, %v1020_v60 }
 0x644   : > { %v6507_v51 = vsel %vm6496_vm1, nan, %v6506_v0  ;;  %vm6519_vm4 = vcmp.gt.s32.totalorder %v6518_v61, 0  ;;  %v6382_v1 = vcvt.s32.f32 %v6375_v49  ;;  %v13910_v4 = vand.u32 3, %v6393_v22 }
 0x645   : > { %7807 = vst [vmem:[%s9477_s9 + $0x198] sm:$0xff] %v6507_v51  ;;  %v6380_v48 = vand.u32 2147483647, %v6379_v30  ;;  %v13907_v36 = vshrl.u32 %v6673_v21, 30  ;;  %v6520_v32 = vsel %vm6519_vm4, %v6518_v61, 0  ;;  %v6516_v57 = vor.u32 8388608, %v6515_v29 }
 0x646   : > { %v6522_v27 = vand.u32 31, %v6520_v32  ;;  %v13915_v40 = vsel %vm580_vm0, %v918_v9, %v15123_v18  ;;  %v13919_v8 = vshrl.u32 %v6520_v32, 5  ;;  %v6823_v39 = vand.u32 2139095040, %v13904_v63 }
 0x647   : > { %v6383_v47 = vmul.f32 %v6382_v1, %v6380_v48  ;;  %v6675_v5 = vshll.u32 %v13907_v36, 30  ;;  %vm6614_vm5 = vcmp.lt.s32.totalorder %v13727_v37, 0  ;;  %v6668_v26 = vadd.s32 %v13871_v28, %v13869_v16 }
 0x648   : > { %v6523_v53 = vsub.s32 32, %v6522_v27  ;;  %v6525_v43 = vshll.u32 %v14972_v41, %v6522_v27  ;;  %v6528_v12 = vshll.u32 %v14973_v34, %v6522_v27  ;;  %v6531_v44 = vshll.u32 %v14974_v14, %v6522_v27 }
 0x649   : > { %v6384_v54 = vxor.u32 2147483648, %v6383_v47  ;;  %v13917_v19 = vsub.s32 %v6672_v59, %v6675_v5  ;;  %v6534_v17 = vshll.u32 %v14975_v45, %v6522_v27  ;;  %v6537_v31 = vshll.u32 %v14976_v58, %v6522_v27 }
 0x64a   : > { %v6526_v60 = vshrl.u32 %v14973_v34, %v6523_v53  ;;  %v6529_v6 = vshrl.u32 %v14974_v14, %v6523_v53  ;;  %v6532_v35 = vshrl.u32 %v14975_v45, %v6523_v53  ;;  %v6535_v15 = vshrl.u32 %v14976_v58, %v6523_v53 }
 0x64b   : > { %v6385_v42 = vsel %vm6302_vm7, %v6384_v54, %v6383_v47  ;;  %v6678_v38 = vsub.s32 0, %v13917_v19  ;;  %v6538_v25 = vshrl.u32 %v14980_v46, %v6523_v53  ;;  %v13942_v49 = vshll.u32 %v6516_v57, 8 }
 0x64c   : > { %v6388_v23 = vsel %vm13861_vm10, %v13649_v10, %v6385_v42  ;;  %v6527_v56 = vor.u32 %v6526_v60, %v6525_v43  ;;  %v6530_v33 = vor.u32 %v6529_v6, %v6528_v12  ;;  %v6533_v24 = vor.u32 %v6532_v35, %v6531_v44 }
 0x64d   : > { %8690 = vcosq.f32 %v6388_v23  ;;  %v8131_v50 = vmin.u32 %v6678_v38, %v13917_v19  ;;  %v6536_v52 = vor.u32 %v6535_v15, %v6534_v17  ;;  %v6820_v62 = vand.u32 2147483647, %v13904_v63 }
 0x64e   : > { %8692 = vsinq.f32 %v6388_v23  ;;  %v6524_v59 = vshrl.u32 %v14972_v41, %v6523_v53  ;;  %v6539_v20 = vor.u32 %v6538_v25, %v6537_v31  ;;  %vm6540_vm6 = vcmp.lt.s32.totalorder %v13919_v8, 1 }
 0x64f   : > { %v6680_v13 = vclz %v8131_v50  ;;  %v6824_v61 = vshrl.u32 %v6823_v39, 23  ;;  %vm6399_vm7 = vcmp.eq.s32.totalorder %v13910_v4, 2  ;;  %vm6542_vm8 = vcmp.lt.s32.totalorder %v13919_v8, 3 }
 0x650   : > { %vm6543_vm9 = vcmp.lt.s32.totalorder %v13919_v8, 4  ;;  %v6548_v16 = vsel %vm6540_vm6, %v6527_v56, %v6530_v33  ;;  %vm6396_vm10 = vcmp.eq.s32.totalorder %v13910_v4, 0  ;;  %v6552_v22 = vsel %vm6540_vm6, %v6530_v33, %v6533_v24 }
 0x651   : > { %v8132_v0 = vadd.s32 4294967294, %v6680_v13  ;;  %v6545_v28 = vsel %vm6543_vm9, %v6533_v24, 2102212464  ;;  %v6549_v30 = vsel %vm6543_vm9, %v6536_v52, 920167782  ;;  %vm6395_vm11 = vcmp.lt.s32.totalorder %v13910_v4, 2 }
 0x652   : > { %v6553_v21 = vsel %vm6543_vm9, %v6539_v20, 1326507024  ;;  %vm13958_vm12 = vcmp.le.f32.partialorder %v6612_v11, 0.7853982  ;;  %vm6541_vm15 = vcmp.lt.s32.totalorder %v13919_v8, 2  ;;  %v6550_v29 = vsel %vm6542_vm8, %v6533_v24, %v6549_v30 }
 0x653   : > { %vm8133_vm14 = vcmp.lt.s32.totalorder %v8132_v0, 0  ;;  %v6554_v48 = vsel %vm6542_vm8, %v6536_v52, %v6553_v21  ;;  %vm6392_vm2 = vweird.f32 %v13649_v10  ;;  %v6698_v32 = vsub.s32 4, %v13907_v36 }
 0x654   : > { %v6683_v1 = vsel %vm8133_vm14, 0, %v8132_v0  ;;  %v6551_v11 = vsel %vm6541_vm15, %v6548_v16, %v6550_v29  ;;  %v6555_v9 = vsel %vm6541_vm15, %v6552_v22, %v6554_v48  ;;  %v6544_v5 = vsel %vm6540_vm6, %v6524_v59, %v6527_v56 }
 0x655   : > { %v6684_v27 = vsub.s32 32, %v6683_v1  ;;  %v6688_v47 = vsub.s32 4294967266, %v6683_v1  ;;  %v6546_v57 = vsel %vm6542_vm8, %v6530_v33, %v6545_v28  ;;  %v6685_v60 = vshll.u32 %v13917_v19, %v6683_v1 }
 0x656   : > { %v13978_v53 = vmul.u32.u64.low %v13942_v49, %v6555_v9  ;;  %v13979_v18 = vmul.u32.u64.high %v13942_v49, %v6555_v9, %v13978_v53  ;;  %v13982_v54 = vmul.u32.u64.low %v13942_v49, %v6551_v11  ;;  %v13983_v39 = vmul.u32.u64.high %v13942_v49, %v6551_v11, %v13982_v54 }
 0x657   : > { %v8691_v43 = vpop.eup %8690  ;;  %v6686_v12 = vshrl.u32 %v6668_v26, %v6684_v27  ;;  %v6689_v6 = vadd.s32 127, %v6688_v47  ;;  %v8138_v42 = vadd.s32 4294967169, %v6824_v61  ;;  %v6699_v35 = vsel %vm6614_vm5, %v6698_v32, %v13907_v36 }
 0x658   : > { %v8693_v38 = vpop.eup %8692  ;;  %v6400_v44 = vxor.u32 2147483648, %v8691_v43  ;;  %v6547_v23 = vsel %vm6541_vm15, %v6544_v5, %v6546_v57  ;;  %v13994_v56 = vand.u32 8388607, %v6820_v62  ;;  %vm6565_vm13 = vc.u32 %v13979_v18, %v13982_v54 }
 0x659   : > { %v6397_v17 = vxor.u32 2147483648, %v8693_v38  ;;  %v6687_v15 = vor.u32 %v6686_v12, %v6685_v60  ;;  %v6690_v50 = vshll.u32 %v6689_v6, 23  ;;  %v6830_v19 = vadd.s32 1, %v8138_v42 }
 0x65a   : > { %v6401_v33 = vsel %vm6399_vm7, %v6400_v44, %v8693_v38  ;;  %v6566_v36 = vadd.s32 1, %v13983_v39  ;;  %v14003_v8 = vmul.f32 %v13853_v3, %v13915_v40  ;;  %v6563_v31 = vmul.u32 %v13942_v49, %v6547_v23 }
 0x65b   : > { %v6398_v24 = vsel %vm6396_vm10, %v8691_v43, %v6397_v17  ;;  %v6691_v52 = vor.u32 4788187, %v6690_v50  ;;  %vm6831_vm1 = vcmp.gt.s32.totalorder %v6830_v19, 0  ;;  %v6701_v26 = vsel %vm13958_vm12, 0, %v6699_v35 }
 0x65c   : > { %v6402_v25 = vsel %vm6395_vm11, %v6398_v24, %v6401_v33  ;;  %v6567_v13 = vsel %vm6565_vm13, %v6566_v36, %v13983_v39  ;;  %v6832_v59 = vsel %vm6831_vm1, %v6830_v19, 0  ;;  %v6694_v61 = vcvt.s32.f32 %v6687_v15 }
 0x65d   : > { %v6403_v40 = vsel %vm6392_vm2, nan, %v6402_v25  ;;  %v6692_v20 = vand.u32 2147483647, %v6691_v52  ;;  %v6568_v0 = vadd.s32 %v6567_v13, %v6563_v31  ;;  %v6834_v16 = vand.u32 31, %v6832_v59 }
 0x65e   : > { %7806 = vst [vmem:[%s9477_s9 + $0x190] sm:$0xff] %v6403_v40  ;;  %v6828_v30 = vor.u32 8388608, %v13994_v56  ;;  %v6705_v4 = vadd.s32 3, %v6701_v26  ;;  %v6833_v22 = vshrl.u32 %v6832_v59, 5  ;;  %v6719_v29 = vand.u32 2139095040, %v14003_v8 }
 0x65f   : > { %v6695_v28 = vmul.f32 %v6694_v61, %v6692_v20  ;;  %v6569_v49 = vadd.s32 536870912, %v6568_v0  ;;  %v6835_v21 = vsub.s32 32, %v6834_v16  ;;  %v6837_v10 = vshll.u32 %v14972_v41, %v6834_v16 }
 0x660   : > { %v6840_v32 = vshll.u32 %v14973_v34, %v6834_v16  ;;  %v6843_v27 = vshll.u32 %v14974_v14, %v6834_v16  ;;  %v6846_v53 = vshll.u32 %v14975_v45, %v6834_v16  ;;  %v14034_v42 = vand.u32 3, %v6705_v4 }
 0x661   : > { %v6696_v48 = vxor.u32 2147483648, %v6695_v28  ;;  %v14018_v1 = vshrl.u32 %v6569_v49, 30  ;;  %v6838_v11 = vshrl.u32 %v14973_v34, %v6835_v21  ;;  %v6841_v9 = vshrl.u32 %v14974_v14, %v6835_v21 }
 0x662   : > { %v6844_v47 = vshrl.u32 %v14975_v45, %v6835_v21  ;;  %v6847_v39 = vshrl.u32 %v14976_v58, %v6835_v21  ;;  %v6849_v35 = vshll.u32 %v14976_v58, %v6834_v16  ;;  %v6850_v23 = vshrl.u32 %v14980_v46, %v6835_v21 }
 0x663   : > { %v6697_v5 = vsel %vm6614_vm5, %v6696_v48, %v6695_v28  ;;  %v6571_v57 = vshll.u32 %v14018_v1, 30  ;;  %v6839_v60 = vor.u32 %v6838_v11, %v6837_v10  ;;  %v6842_v12 = vor.u32 %v6841_v9, %v6840_v32 }
 0x664   : > { %v6700_v43 = vsel %vm13958_vm12, %v13727_v37, %v6697_v5  ;;  %v6845_v6 = vor.u32 %v6844_v47, %v6843_v27  ;;  %v6848_v44 = vor.u32 %v6847_v39, %v6846_v53  ;;  %v6720_v56 = vshrl.u32 %v6719_v29, 23 }
 0x665   : > { %8694 = vcosq.f32 %v6700_v43  ;;  %v14036_v38 = vsub.s32 %v6568_v0, %v6571_v57  ;;  %vm6510_vm3 = vcmp.lt.s32.totalorder %v13856_v55, 0  ;;  %vm6852_vm4 = vcmp.lt.s32.totalorder %v6833_v22, 1 }
 0x666   : > { %8696 = vsinq.f32 %v6700_v43  ;;  %vm6854_vm5 = vcmp.lt.s32.totalorder %v6833_v22, 3  ;;  %vm6855_vm6 = vcmp.lt.s32.totalorder %v6833_v22, 4  ;;  %v6851_v17 = vor.u32 %v6850_v23, %v6849_v35 }
 0x667   : > { %v6574_v51 = vsub.s32 0, %v14036_v38  ;;  %v6857_v15 = vsel %vm6855_vm6, %v6845_v6, 2102212464  ;;  %v6860_v50 = vsel %vm6852_vm4, %v6839_v60, %v6842_v12  ;;  %v6861_v19 = vsel %vm6855_vm6, %v6848_v44, 920167782 }
 0x668   : > { %v6836_v36 = vshrl.u32 %v14972_v41, %v6835_v21  ;;  %vm6853_vm7 = vcmp.lt.s32.totalorder %v6833_v22, 2  ;;  %v6862_v24 = vsel %vm6854_vm5, %v6845_v6, %v6861_v19  ;;  %v6864_v31 = vsel %vm6852_vm4, %v6842_v12, %v6845_v6  ;;  %v15128_v19 = vld [vmem:[#allocation42_spill] sm:$0xff] }
 0x669   : > { %v8127_v33 = vmin.u32 %v6574_v51, %v14036_v38  ;;  %v6863_v52 = vsel %vm6853_vm7, %v6860_v50, %v6862_v24  ;;  %v6865_v25 = vsel %vm6855_vm6, %v6851_v17, 1326507024  ;;  %v6868_v26 = vshll.u32 %v6828_v30, 8 }
 0x66a   : > { %vm6707_vm8 = vcmp.lt.s32.totalorder %v14034_v42, 2  ;;  %vm14051_vm9 = vcmp.le.f32.partialorder %v6508_v7, 0.7853982  ;;  %v6856_v40 = vsel %vm6852_vm4, %v6836_v36, %v6839_v60  ;;  %v6858_v20 = vsel %vm6854_vm5, %v6842_v12, %v6857_v15  ;;  %v933_v12 = vpop.permute.xlu1 %932 }
 0x66b   : > { %v6576_v59 = vclz %v8127_v33  ;;  %v6716_v61 = vand.u32 2147483647, %v14003_v8  ;;  %vm6704_vm10 = vweird.f32 %v13727_v37  ;;  %v6594_v0 = vsub.s32 4, %v14018_v1 }
 0x66c   : > { %v6866_v16 = vsel %vm6854_vm5, %v6848_v44, %v6865_v25  ;;  %v14061_v28 = vmul.u32.u64.low %v6868_v26, %v6863_v52  ;;  %v14062_v49 = vmul.u32.u64.high %v6868_v26, %v6863_v52, %v14061_v28  ;;  %vm6708_vm11 = vcmp.eq.s32.totalorder %v14034_v42, 0 }
 0x66d   : > { %v8128_v7 = vadd.s32 4294967294, %v6576_v59  ;;  %v6867_v30 = vsel %vm6853_vm7, %v6864_v31, %v6866_v16  ;;  %v8134_v4 = vadd.s32 4294967169, %v6720_v56  ;;  %vm6711_vm12 = vcmp.eq.s32.totalorder %v14034_v42, 2 }
 0x66e   : > { %v6859_v21 = vsel %vm6853_vm7, %v6856_v40, %v6858_v20  ;;  %v14069_v29 = vmul.u32.u64.low %v6868_v26, %v6867_v30  ;;  %v14070_v48 = vmul.u32.u64.high %v6868_v26, %v6867_v30, %v14069_v29  ;;  %v6564_v32 = vadd.s32 %v13982_v54, %v13979_v18 }
 0x66f   : > { %v8695_v10 = vpop.eup %8694  ;;  %vm8129_vm14 = vcmp.lt.s32.totalorder %v8128_v7, 0  ;;  %v6723_v11 = vand.u32 8388607, %v6716_v61  ;;  %v6726_v9 = vadd.s32 1, %v8134_v4  ;;  %v6595_v22 = vsel %vm6510_vm3, %v6594_v0, %v14018_v1 }
 0x670   : > { %v8697_v27 = vpop.eup %8696  ;;  %v6712_v47 = vxor.u32 2147483648, %v8695_v10  ;;  %v6579_v5 = vsel %vm8129_vm14, 0, %v8128_v7  ;;  %v6878_v57 = vadd.s32 1, %v14062_v49  ;;  %v6875_v60 = vmul.u32 %v6868_v26, %v6859_v21 }
 0x671   : > { %v6709_v53 = vxor.u32 2147483648, %v8697_v27  ;;  %v6580_v39 = vsub.s32 32, %v6579_v5  ;;  %v6584_v43 = vsub.s32 4294967266, %v6579_v5  ;;  %v6581_v54 = vshll.u32 %v14036_v38, %v6579_v5 }
 0x672   : > { %v6713_v18 = vsel %vm6711_vm12, %v6712_v47, %v8697_v27  ;;  %vm6877_vm15 = vc.u32 %v14070_v48, %v14061_v28  ;;  %vm6727_vm2 = vcmp.gt.s32.totalorder %v6726_v9, 0  ;;  %v6597_v56 = vsel %vm14051_vm9, 0, %v6595_v22 }
 0x673   : > { %v6710_v1 = vsel %vm6708_vm11, %v8695_v10, %v6709_v53  ;;  %v6582_v6 = vshrl.u32 %v6564_v32, %v6580_v39  ;;  %v6585_v44 = vadd.s32 127, %v6584_v43  ;;  %v6879_v35 = vsel %vm6877_vm15, %v6878_v57, %v14062_v49 }
 0x674   : > { %v6714_v23 = vsel %vm6707_vm8, %v6710_v1, %v6713_v18  ;;  %v6880_v38 = vadd.s32 %v6879_v35, %v6875_v60  ;;  %v6728_v51 = vsel %vm6727_vm2, %v6726_v9, 0  ;;  %v1022_v33 = vsel %vm580_vm0, %v933_v12, %v15128_v19 }
 0x675   : > { %v6715_v17 = vsel %vm6704_vm10, nan, %v6714_v23  ;;  %v6583_v15 = vor.u32 %v6582_v6, %v6581_v54  ;;  %v6586_v50 = vshll.u32 %v6585_v44, 23  ;;  %v6730_v24 = vand.u32 31, %v6728_v51 }
 0x676   : > { %7809 = vst [vmem:[%s9477_s9 + $0x1a8] sm:$0xff] %v6715_v17  ;;  %v6881_v36 = vadd.s32 536870912, %v6880_v38  ;;  %v6601_v42 = vadd.s32 3, %v6597_v56  ;;  %v6724_v25 = vor.u32 8388608, %v6723_v11  ;;  %v14099_v59 = vmul.f32 %v13853_v3, %v1022_v33 }
 0x677   : > { %v6587_v52 = vor.u32 4788187, %v6586_v50  ;;  %v6731_v26 = vsub.s32 32, %v6730_v24  ;;  %v6590_v37 = vcvt.s32.f32 %v6583_v15  ;;  %v14101_v20 = vshrl.u32 %v6728_v51, 5  ;;  %v928_v50 = vpop.permute.xlu0 %927 }
 0x678   : > { %v6882_v31 = vshrl.u32 %v6881_v36, 30  ;;  %v6733_v0 = vshll.u32 %v14972_v41, %v6730_v24  ;;  %v6736_v7 = vshll.u32 %v14973_v34, %v6730_v24  ;;  %v6739_v30 = vshll.u32 %v14974_v14, %v6730_v24 }
 0x679   : > { %v6588_v40 = vand.u32 2147483647, %v6587_v52  ;;  %v6734_v49 = vshrl.u32 %v14973_v34, %v6731_v26  ;;  %v6737_v21 = vshrl.u32 %v14974_v14, %v6731_v26  ;;  %v6740_v29 = vshrl.u32 %v14975_v45, %v6731_v26 }
 0x67a   : > { %v6883_v16 = vshll.u32 %v6882_v31, 30  ;;  %v6743_v10 = vshrl.u32 %v14976_v58, %v6731_v26  ;;  %v14110_v32 = vand.u32 3, %v6601_v42  ;;  %v6742_v9 = vshll.u32 %v14975_v45, %v6730_v24 }
 0x67b   : > { %v6591_v4 = vmul.f32 %v6590_v37, %v6588_v40  ;;  %v6746_v27 = vshrl.u32 %v14980_v46, %v6731_v26  ;;  %vm6822_vm13 = vcmp.lt.s32.totalorder %v13904_v63, 0  ;;  %v6735_v5 = vor.u32 %v6734_v49, %v6733_v0  ;;  %v15131_v0 = vld [vmem:[#allocation43_spill] sm:$0xff] }
 0x67c   : > { %v14112_v11 = vsub.s32 %v6880_v38, %v6883_v16  ;;  %v6738_v22 = vor.u32 %v6737_v21, %v6736_v7  ;;  %v6741_v57 = vor.u32 %v6740_v29, %v6739_v30  ;;  %v6744_v39 = vor.u32 %v6743_v10, %v6742_v9 }
 0x67d   : > { %v6592_v47 = vxor.u32 2147483648, %v6591_v4  ;;  %v6745_v43 = vshll.u32 %v14976_v58, %v6730_v24  ;;  %v14119_v60 = vshll.u32 %v6724_v25, 8  ;;  %v6732_v54 = vshrl.u32 %v14972_v41, %v6731_v26 }
 0x67e   : > { %v6886_v53 = vsub.s32 0, %v14112_v11  ;;  %vm6748_vm1 = vcmp.lt.s32.totalorder %v14101_v20, 1  ;;  %v7031_v12 = vand.u32 2139095040, %v14099_v59  ;;  %vm6751_vm4 = vcmp.lt.s32.totalorder %v14101_v20, 4 }
 0x67f   : > { %v6593_v18 = vsel %vm6510_vm3, %v6592_v47, %v6591_v4  ;;  %v6747_v44 = vor.u32 %v6746_v27, %v6745_v43  ;;  %vm14133_vm5 = vcmp.le.f32.partialorder %v6820_v62, 0.7853982  ;;  %v6753_v23 = vsel %vm6751_vm4, %v6741_v57, 2102212464 }
 0x680   : > { %v6596_v1 = vsel %vm14051_vm9, %v13856_v55, %v6593_v18  ;;  %v8139_v6 = vmin.u32 %v6886_v53, %v14112_v11  ;;  %v6756_v56 = vsel %vm6748_vm1, %v6735_v5, %v6738_v22  ;;  %v6757_v13 = vsel %vm6751_vm4, %v6744_v39, 920167782 }
 0x681   : > { %8698 = vcosq.f32 %v6596_v1  ;;  %v6906_v51 = vsub.s32 4, %v6882_v31  ;;  %vm6750_vm3 = vcmp.lt.s32.totalorder %v14101_v20, 3  ;;  %vm6749_vm6 = vcmp.lt.s32.totalorder %v14101_v20, 2 }
 0x682   : > { %8700 = vsinq.f32 %v6596_v1  ;;  %v6888_v38 = vclz %v8139_v6  ;;  %v6752_v62 = vsel %vm6748_vm1, %v6732_v54, %v6735_v5  ;;  %v6758_v17 = vsel %vm6750_vm3, %v6741_v57, %v6757_v13 }
 0x683   : > { %v6760_v15 = vsel %vm6748_vm1, %v6738_v22, %v6741_v57  ;;  %v6754_v33 = vsel %vm6750_vm3, %v6738_v22, %v6753_v23  ;;  %v6759_v36 = vsel %vm6749_vm6, %v6756_v56, %v6758_v17  ;;  %v6761_v24 = vsel %vm6751_vm4, %v6747_v44, 1326507024 }
 0x684   : > { %v8140_v19 = vadd.s32 4294967294, %v6888_v38  ;;  %v6762_v52 = vsel %vm6750_vm3, %v6744_v39, %v6761_v24  ;;  %v14154_v42 = vmul.u32.u64.low %v14119_v60, %v6759_v36  ;;  %v14155_v25 = vmul.u32.u64.high %v14119_v60, %v6759_v36, %v14154_v42 }
 0x685   : > { %v7032_v26 = vshrl.u32 %v7031_v12, 23  ;;  %vm6604_vm7 = vcmp.eq.s32.totalorder %v14110_v32, 0  ;;  %v6907_v40 = vsel %vm6822_vm13, %v6906_v51, %v6882_v31  ;;  %v6763_v37 = vsel %vm6749_vm6, %v6760_v15, %v6762_v52 }
 0x686   : > { %vm8141_vm8 = vcmp.lt.s32.totalorder %v8140_v19, 0  ;;  %v1021_v16 = vsel %vm580_vm0, %v928_v50, %v15131_v0  ;;  %v14167_v7 = vmul.u32.u64.low %v14119_v60, %v6763_v37  ;;  %v14168_v30 = vmul.u32.u64.high %v14119_v60, %v6763_v37, %v14167_v7 }
 0x687   : > { %v6891_v49 = vsel %vm8141_vm8, 0, %v8140_v19  ;;  %v8146_v4 = vadd.s32 4294967169, %v7032_v26  ;;  %v6876_v21 = vadd.s32 %v14061_v28, %v14070_v48  ;;  %v6755_v31 = vsel %vm6749_vm6, %v6752_v62, %v6754_v33 }
 0x688   : > { %v6892_v29 = vsub.s32 32, %v6891_v49  ;;  %v6896_v10 = vsub.s32 4294967266, %v6891_v49  ;;  %v6774_v9 = vadd.s32 1, %v14155_v25  ;;  %v7028_v27 = vand.u32 2147483647, %v14099_v59 }
 0x689   : > { %v7038_v47 = vadd.s32 1, %v8146_v4  ;;  %v14177_v5 = vmul.f32 %v13853_v3, %v1021_v16  ;;  %v6893_v22 = vshll.u32 %v14112_v11, %v6891_v49  ;;  %v6909_v28 = vsel %vm14133_vm5, 0, %v6907_v40 }
 0x68a   : > { %v6894_v57 = vshrl.u32 %v6876_v21, %v6892_v29  ;;  %v6897_v53 = vadd.s32 127, %v6896_v10  ;;  %vm6607_vm9 = vcmp.eq.s32.totalorder %v14110_v32, 2  ;;  %v6771_v20 = vmul.u32 %v14119_v60, %v6755_v31 }
 0x68b   : > { %v8699_v48 = vpop.eup %8698  ;;  %vm6773_vm10 = vc.u32 %v14168_v30, %v14154_v42  ;;  %vm7039_vm11 = vcmp.gt.s32.totalorder %v7038_v47, 0  ;;  %v6913_v12 = vadd.s32 3, %v6909_v28  ;;  %v7035_v60 = vand.u32 8388607, %v7028_v27 }
 0x68c   : > { %v8701_v39 = vpop.eup %8700  ;;  %v6608_v43 = vxor.u32 2147483648, %v8699_v48  ;;  %v6895_v3 = vor.u32 %v6894_v57, %v6893_v22  ;;  %v6898_v18 = vshll.u32 %v6897_v53, 23  ;;  %v6775_v11 = vsel %vm6773_vm10, %v6774_v9, %v14155_v25 }
 0x68d   : > { %v6605_v54 = vxor.u32 2147483648, %v8701_v39  ;;  %v6776_v1 = vadd.s32 %v6775_v11, %v6771_v20  ;;  %v7040_v6 = vsel %vm7039_vm11, %v7038_v47, 0  ;;  %v6927_v56 = vand.u32 2139095040, %v14177_v5 }
 0x68e   : > { %v6609_v44 = vsel %vm6607_vm9, %v6608_v43, %v8701_v39  ;;  %v6899_v23 = vor.u32 4788187, %v6898_v18  ;;  %vm6603_vm12 = vcmp.lt.s32.totalorder %v14110_v32, 2  ;;  %v7042_v51 = vand.u32 31, %v7040_v6 }
 0x68f   : > { %v6606_v13 = vsel %vm6604_vm7, %v8699_v48, %v6605_v54  ;;  %v6777_v38 = vadd.s32 536870912, %v6776_v1  ;;  %vm6600_vm14 = vweird.f32 %v13856_v55  ;;  %v6902_v15 = vcvt.s32.f32 %v6895_v3 }
 0x690   : > { %v6610_v62 = vsel %vm6603_vm12, %v6606_v13, %v6609_v44  ;;  %v6900_v17 = vand.u32 2147483647, %v6899_v23  ;;  %v7043_v33 = vsub.s32 32, %v7042_v51  ;;  %v14197_v24 = vand.u32 3, %v6913_v12 }
 0x691   : > { %v6611_v50 = vsel %vm6600_vm14, nan, %v6610_v62  ;;  %v14194_v19 = vshrl.u32 %v6777_v38, 30  ;;  %v7036_v52 = vor.u32 8388608, %v7035_v60  ;;  %v6928_v25 = vshrl.u32 %v6927_v56, 23 }
 0x692   : > { %7808 = vst [vmem:[%s9477_s9 + $0x1a0] sm:$0xff] %v6611_v50  ;;  %v6903_v36 = vmul.f32 %v6902_v15, %v6900_v17  ;;  %v7045_v26 = vshll.u32 %v14972_v41, %v7042_v51  ;;  %v7046_v40 = vshrl.u32 %v14973_v34, %v7043_v33  ;;  %v7048_v55 = vshll.u32 %v14973_v34, %v7042_v51 }
 0x693   : > { %v6779_v32 = vshll.u32 %v14194_v19, 30  ;;  %v7049_v0 = vshrl.u32 %v14974_v14, %v7043_v33  ;;  %v7052_v16 = vshrl.u32 %v14975_v45, %v7043_v33  ;;  %v7055_v49 = vshrl.u32 %v14976_v58, %v7043_v33 }
 0x694   : > { %v6904_v37 = vxor.u32 2147483648, %v6903_v36  ;;  %v7041_v4 = vshrl.u32 %v7040_v6, 5  ;;  %v7051_v21 = vshll.u32 %v14974_v14, %v7042_v51  ;;  %v7054_v29 = vshll.u32 %v14975_v45, %v7042_v51 }
 0x695   : > { %v14206_v7 = vsub.s32 %v6776_v1, %v6779_v32  ;;  %v7047_v31 = vor.u32 %v7046_v40, %v7045_v26  ;;  %v7050_v9 = vor.u32 %v7049_v0, %v7048_v55  ;;  %v14212_v47 = vshll.u32 %v7036_v52, 8 }
 0x696   : > { %v6905_v10 = vsel %vm6822_vm13, %v6904_v37, %v6903_v36  ;;  %v7053_v53 = vor.u32 %v7052_v16, %v7051_v21  ;;  %v7056_v28 = vor.u32 %v7055_v49, %v7054_v29  ;;  %v7057_v48 = vshll.u32 %v14976_v58, %v7042_v51 }
 0x697   : > { %v6908_v22 = vsel %vm14133_vm5, %v13904_v63, %v6905_v10  ;;  %v6782_v57 = vsub.s32 0, %v14206_v7  ;;  %v7058_v20 = vshrl.u32 %v14980_v46, %v7043_v33  ;;  %v8142_v39 = vadd.s32 4294967169, %v6928_v25 }
 0x698   : > { %8702 = vcosq.f32 %v6908_v22  ;;  %vm6718_vm15 = vcmp.lt.s32.totalorder %v14003_v8, 0  ;;  %vm7060_vm2 = vcmp.lt.s32.totalorder %v7041_v4, 1  ;;  %vm7063_vm13 = vcmp.lt.s32.totalorder %v7041_v4, 4 }
 0x699   : > { %8704 = vsinq.f32 %v6908_v22  ;;  %v8135_v43 = vmin.u32 %v6782_v57, %v14206_v7  ;;  %v7059_v3 = vor.u32 %v7058_v20, %v7057_v48  ;;  %vm7061_vm1 = vcmp.lt.s32.totalorder %v7041_v4, 2 }
 0x69a   : > { %v7068_v35 = vsel %vm7060_vm2, %v7047_v31, %v7050_v9  ;;  %v7069_v18 = vsel %vm7063_vm13, %v7056_v28, 920167782  ;;  %v7044_v54 = vshrl.u32 %v14972_v41, %v7043_v33  ;;  %vm7062_vm4 = vcmp.lt.s32.totalorder %v7041_v4, 3 }
 0x69b   : > { %v6784_v11 = vclz %v8135_v43  ;;  %v7065_v12 = vsel %vm7063_vm13, %v7053_v53, 2102212464  ;;  %v6802_v1 = vsub.s32 4, %v14194_v19  ;;  %v7070_v6 = vsel %vm7062_vm4, %v7053_v53, %v7069_v18 }
 0x69c   : > { %v7072_v44 = vsel %vm7060_vm2, %v7050_v9, %v7053_v53  ;;  %v7073_v23 = vsel %vm7063_vm13, %v7059_v3, 1326507024  ;;  %vm14228_vm5 = vcmp.le.f32.partialorder %v6716_v61, 0.7853982  ;;  %v7064_v13 = vsel %vm7060_vm2, %v7044_v54, %v7047_v31 }
 0x69d   : > { %v8136_v56 = vadd.s32 4294967294, %v6784_v11  ;;  %v7071_v38 = vsel %vm7061_vm1, %v7068_v35, %v7070_v6  ;;  %v7074_v51 = vsel %vm7062_vm4, %v7056_v28, %v7073_v23  ;;  %v7066_v62 = vsel %vm7062_vm4, %v7050_v9, %v7065_v12 }
 0x69e   : > { %v7075_v17 = vsel %vm7061_vm1, %v7072_v44, %v7074_v51  ;;  %v14236_v15 = vmul.u32.u64.low %v14212_v47, %v7071_v38  ;;  %v14237_v50 = vmul.u32.u64.high %v14212_v47, %v7071_v38, %v14236_v15  ;;  %vm6915_vm3 = vcmp.lt.s32.totalorder %v14197_v24, 2 }
 0x69f   : > { %vm8137_vm6 = vcmp.lt.s32.totalorder %v8136_v56, 0  ;;  %v14242_v61 = vmul.u32.u64.low %v14212_v47, %v7075_v17  ;;  %v14243_v33 = vmul.u32.u64.high %v14212_v47, %v7075_v17, %v14242_v61  ;;  %vm6916_vm7 = vcmp.eq.s32.totalorder %v14197_v24, 0 }
 0x6a0   : > { %vm6919_vm8 = vcmp.eq.s32.totalorder %v14197_v24, 2  ;;  %v6787_v36 = vsel %vm8137_vm6, 0, %v8136_v56  ;;  %v6934_v52 = vadd.s32 1, %v8142_v39  ;;  %v6772_v25 = vadd.s32 %v14154_v42, %v14168_v30  ;;  %v943_v56 = vpop.permute.xlu1 %942 }
 0x6a1   : > { %v6788_v32 = vsub.s32 32, %v6787_v36  ;;  %v6792_v26 = vsub.s32 4294967266, %v6787_v36  ;;  %v7067_v40 = vsel %vm7061_vm1, %v7064_v13, %v7066_v62  ;;  %v6803_v37 = vsel %vm6718_vm15, %v6802_v1, %v14194_v19 }
 0x6a2   : > { %v8703_v55 = vpop.eup %8702  ;;  %v7086_v0 = vadd.s32 1, %v14237_v50  ;;  %v6924_v16 = vand.u32 2147483647, %v14177_v5  ;;  %vm6935_vm9 = vcmp.gt.s32.totalorder %v6934_v52, 0  ;;  %v6789_v29 = vshll.u32 %v14206_v7, %v6787_v36 }
 0x6a3   : > { %v8705_v49 = vpop.eup %8704  ;;  %v6920_v21 = vxor.u32 2147483648, %v8703_v55  ;;  %v6790_v10 = vshrl.u32 %v6772_v25, %v6788_v32  ;;  %v6793_v42 = vadd.s32 127, %v6792_v26  ;;  %v7083_v4 = vmul.u32 %v14212_v47, %v7067_v40  ;;  %v15134_v26 = vld [vmem:[#allocation44_spill] sm:$0xff] }
 0x6a4   : > { %v6917_v30 = vxor.u32 2147483648, %v8705_v49  ;;  %vm7085_vm10 = vc.u32 %v14243_v33, %v14236_v15  ;;  %v6936_v31 = vsel %vm6935_vm9, %v6934_v52, 0  ;;  %v6805_v53 = vsel %vm14228_vm5, 0, %v6803_v37 }
 0x6a5   : > { %v6921_v19 = vsel %vm6919_vm8, %v6920_v21, %v8705_v49  ;;  %v6791_v9 = vor.u32 %v6790_v10, %v6789_v29  ;;  %v6794_v22 = vshll.u32 %v6793_v42, 23  ;;  %v7087_v57 = vsel %vm7085_vm10, %v7086_v0, %v14237_v50 }
 0x6a6   : > { %v6918_v7 = vsel %vm6916_vm7, %v8703_v55, %v6917_v30  ;;  %v7088_v28 = vadd.s32 %v7087_v57, %v7083_v4  ;;  %v6938_v47 = vand.u32 31, %v6936_v31  ;;  %vm6912_vm11 = vweird.f32 %v13904_v63  ;;  %v14303_v4 = vld [vmem:[%s14908_s2] ss:$0 sm:$0xff] }
 0x6a7   : > { %v6922_v48 = vsel %vm6915_vm3, %v6918_v7, %v6921_v19  ;;  %v6795_v20 = vor.u32 4788187, %v6794_v22  ;;  %v6798_v18 = vcvt.s32.f32 %v6791_v9  ;;  %v6809_v11 = vadd.s32 3, %v6805_v53 }
 0x6a8   : > { %v6923_v39 = vsel %vm6912_vm11, nan, %v6922_v48  ;;  %v7089_v43 = vadd.s32 536870912, %v7088_v28  ;;  %v6939_v3 = vsub.s32 32, %v6938_v47  ;;  %v6931_v12 = vand.u32 8388607, %v6924_v16 }
 0x6a9   : > { %7811 = vst [vmem:[%s9477_s9 + $0x1b8] sm:$0xff] %v6923_v39  ;;  %v6796_v35 = vand.u32 2147483647, %v6795_v20  ;;  %v6937_v1 = vshrl.u32 %v6936_v31, 5  ;;  %v6941_v38 = vshll.u32 %v14972_v41, %v6938_v47  ;;  %v6944_v51 = vshll.u32 %v14973_v34, %v6938_v47 }
 0x6aa   : > { %v14270_v54 = vshrl.u32 %v7089_v43, 30  ;;  %v6942_v6 = vshrl.u32 %v14973_v34, %v6939_v3  ;;  %v6945_v24 = vshrl.u32 %v14974_v14, %v6939_v3  ;;  %v6948_v44 = vshrl.u32 %v14975_v45, %v6939_v3 }
 0x6ab   : > { %v6799_v63 = vmul.f32 %v6798_v18, %v6796_v35  ;;  %v6951_v23 = vshrl.u32 %v14976_v58, %v6939_v3  ;;  %v6947_v62 = vshll.u32 %v14974_v14, %v6938_v47  ;;  %v6950_v50 = vshll.u32 %v14975_v45, %v6938_v47 }
 0x6ac   : > { %v7091_v13 = vshll.u32 %v14270_v54, 30  ;;  %v6953_v61 = vshll.u32 %v14976_v58, %v6938_v47  ;;  %v6954_v36 = vshrl.u32 %v14980_v46, %v6939_v3  ;;  %v6943_v25 = vor.u32 %v6942_v6, %v6941_v38  ;;  %v15137_v38 = vld [vmem:[#allocation45_spill] sm:$0xff] }
 0x6ad   : > { %v6800_v17 = vxor.u32 2147483648, %v6799_v63  ;;  %v6949_v32 = vor.u32 %v6948_v44, %v6947_v62  ;;  %v1024_v40 = vsel %vm580_vm0, %v943_v56, %v15134_v26  ;;  %v6946_v37 = vor.u32 %v6945_v24, %v6944_v51 }
 0x6ae   : > { %v14285_v52 = vsub.s32 %v7088_v28, %v7091_v13  ;;  %v6952_v0 = vor.u32 %v6951_v23, %v6950_v50  ;;  %v6955_v49 = vor.u32 %v6954_v36, %v6953_v61  ;;  %v14295_v29 = vand.u32 3, %v6809_v11 }
 0x6af   : > { %v6801_v55 = vsel %vm6718_vm15, %v6800_v17, %v6799_v63  ;;  %v6932_v42 = vor.u32 8388608, %v6931_v12  ;;  %vm7030_vm12 = vcmp.lt.s32.totalorder %v14099_v59, 0  ;;  %v6940_v30 = vshrl.u32 %v14972_v41, %v6939_v3  ;;  %v938_v12 = vpop.permute.xlu0 %937 }
 0x6b0   : > { %v6804_v21 = vsel %vm14228_vm5, %v14003_v8, %v6801_v55  ;;  %v7094_v10 = vsub.s32 0, %v14285_v52  ;;  %vm6959_vm14 = vcmp.lt.s32.totalorder %v6937_v1, 4  ;;  %v14306_v31 = vmul.f32 %v14303_v4, %v1024_v40 }
 0x6b1   : > { %8706 = vcosq.f32 %v6804_v21  ;;  %vm6956_vm15 = vcmp.lt.s32.totalorder %v6937_v1, 1  ;;  %v6961_v19 = vsel %vm6959_vm14, %v6949_v32, 2102212464  ;;  %v6965_v22 = vsel %vm6959_vm14, %v6952_v0, 920167782 }
 0x6b2   : > { %8708 = vsinq.f32 %v6804_v21  ;;  %v8147_v60 = vmin.u32 %v7094_v10, %v14285_v52  ;;  %v6964_v9 = vsel %vm6956_vm15, %v6943_v25, %v6946_v37  ;;  %v6968_v57 = vsel %vm6956_vm15, %v6946_v37, %v6949_v32 }
 0x6b3   : > { %v6969_v7 = vsel %vm6959_vm14, %v6955_v49, 1326507024  ;;  %vm14311_vm2 = vcmp.le.f32.partialorder %v7028_v27, 0.7853982  ;;  %vm6957_vm13 = vcmp.lt.s32.totalorder %v6937_v1, 2  ;;  %vm6958_vm1 = vcmp.lt.s32.totalorder %v6937_v1, 3 }
 0x6b4   : > { %v7096_v28 = vclz %v8147_v60  ;;  %v6972_v47 = vshll.u32 %v6932_v42, 8  ;;  %v6960_v48 = vsel %vm6956_vm15, %v6940_v30, %v6943_v25  ;;  %v6962_v20 = vsel %vm6958_vm1, %v6946_v37, %v6961_v19 }
 0x6b5   : > { %v6966_v39 = vsel %vm6958_vm1, %v6949_v32, %v6965_v22  ;;  %v6970_v43 = vsel %vm6958_vm1, %v6952_v0, %v6969_v7  ;;  %v7114_v35 = vsub.s32 4, %v14270_v54  ;;  %vm6812_vm4 = vcmp.eq.s32.totalorder %v14295_v29, 0 }
 0x6b6   : > { %v8148_v3 = vadd.s32 4294967294, %v7096_v28  ;;  %v6967_v18 = vsel %vm6957_vm13, %v6964_v9, %v6966_v39  ;;  %v6971_v11 = vsel %vm6957_vm13, %v6968_v57, %v6970_v43  ;;  %v6963_v44 = vsel %vm6957_vm13, %v6960_v48, %v6962_v20  ;;  %v953_v39 = vpop.permute.xlu1 %952 }
 0x6b7   : > { %v14318_v27 = vmul.u32.u64.low %v6972_v47, %v6971_v11  ;;  %v14319_v6 = vmul.u32.u64.high %v6972_v47, %v6971_v11, %v14318_v27  ;;  %v14321_v63 = vmul.u32.u64.low %v6972_v47, %v6967_v18  ;;  %v14322_v24 = vmul.u32.u64.high %v6972_v47, %v6967_v18, %v14321_v63 }
 0x6b8   : > { %vm8149_vm5 = vcmp.lt.s32.totalorder %v8148_v3, 0  ;;  %v7239_v23 = vand.u32 2139095040, %v14306_v31  ;;  %vm6815_vm3 = vcmp.eq.s32.totalorder %v14295_v29, 2  ;;  %v7084_v56 = vadd.s32 %v14236_v15, %v14243_v33  ;;  %v15138_v27 = vld [vmem:[#allocation46_spill] sm:$0xff] }
 0x6b9   : > { %v7099_v13 = vsel %vm8149_vm5, 0, %v8148_v3  ;;  %v1023_v51 = vsel %vm580_vm0, %v938_v12, %v15137_v38  ;;  %v7115_v50 = vsel %vm7030_vm12, %v7114_v35, %v14270_v54  ;;  %v6979_v25 = vmul.u32 %v6972_v47, %v6963_v44 }
 0x6ba   : > { %v7100_v62 = vsub.s32 32, %v7099_v13  ;;  %v7104_v17 = vsub.s32 4294967266, %v7099_v13  ;;  %v7240_v1 = vshrl.u32 %v7239_v23, 23  ;;  %v7101_v36 = vshll.u32 %v14285_v52, %v7099_v13 }
 0x6bb   : > { %v8707_v61 = vpop.eup %8706  ;;  %vm6981_vm6 = vc.u32 %v14319_v6, %v14321_v63  ;;  %v6982_v15 = vadd.s32 1, %v14322_v24  ;;  %v7117_v0 = vsel %vm14311_vm2, 0, %v7115_v50  ;;  %v7236_v49 = vand.u32 2147483647, %v14306_v31 }
 0x6bc   : > { %v8709_v33 = vpop.eup %8708  ;;  %v6816_v32 = vxor.u32 2147483648, %v8707_v61  ;;  %v7102_v26 = vshrl.u32 %v7084_v56, %v7100_v62  ;;  %v7105_v40 = vadd.s32 127, %v7104_v17  ;;  %v8154_v55 = vadd.s32 4294967169, %v7240_v1 }
 0x6bd   : > { %v6813_v37 = vxor.u32 2147483648, %v8709_v33  ;;  %v6983_v54 = vsel %vm6981_vm6, %v6982_v15, %v14322_v24  ;;  %vm6808_vm7 = vweird.f32 %v14003_v8  ;;  %vm6811_vm8 = vcmp.lt.s32.totalorder %v14295_v29, 2 }
 0x6be   : > { %v6817_v52 = vsel %vm6815_vm3, %v6816_v32, %v8709_v33  ;;  %v7103_v21 = vor.u32 %v7102_v26, %v7101_v36  ;;  %v7106_v10 = vshll.u32 %v7105_v40, 23  ;;  %v6984_v42 = vadd.s32 %v6983_v54, %v6979_v25 }
 0x6bf   : > { %v6814_v30 = vsel %vm6812_vm4, %v8707_v61, %v6813_v37  ;;  %v7246_v60 = vadd.s32 1, %v8154_v55  ;;  %v7121_v22 = vadd.s32 3, %v7117_v0  ;;  %v7243_v28 = vand.u32 8388607, %v7236_v49 }
 0x6c0   : > { %v6818_v19 = vsel %vm6811_vm8, %v6814_v30, %v6817_v52  ;;  %v7107_v9 = vor.u32 4788187, %v7106_v10  ;;  %v6985_v57 = vadd.s32 536870912, %v6984_v42  ;;  %v14354_v47 = vmul.f32 %v14303_v4, %v1023_v51 }
 0x6c1   : > { %v6819_v7 = vsel %vm6808_vm7, nan, %v6818_v19  ;;  %vm7247_vm9 = vcmp.gt.s32.totalorder %v7246_v60, 0  ;;  %v7110_v48 = vcvt.s32.f32 %v7103_v21  ;;  %v14360_v18 = vand.u32 3, %v7121_v22 }
 0x6c2   : > { %7810 = vst [vmem:[%s9477_s9 + $0x1b0] sm:$0xff] %v6819_v7  ;;  %v7108_v8 = vand.u32 2147483647, %v7107_v9  ;;  %v14357_v20 = vshrl.u32 %v6985_v57, 30  ;;  %v7248_v29 = vsel %vm7247_vm9, %v7246_v60, 0  ;;  %v7244_v11 = vor.u32 8388608, %v7243_v28 }
 0x6c3   : > { %v7250_v43 = vand.u32 31, %v7248_v29  ;;  %v14365_v24 = vsel %vm580_vm0, %v953_v39, %v15138_v27  ;;  %v14369_v56 = vshrl.u32 %v7248_v29, 5  ;;  %v7135_v13 = vand.u32 2139095040, %v14354_v47 }
 0x6c4   : > { %v7111_v3 = vmul.f32 %v7110_v48, %v7108_v8  ;;  %v6987_v35 = vshll.u32 %v14357_v20, 30  ;;  %vm6926_vm10 = vcmp.lt.s32.totalorder %v14177_v5, 0  ;;  %v6980_v53 = vadd.s32 %v14321_v63, %v14319_v6 }
 0x6c5   : > { %v7251_v12 = vsub.s32 32, %v7250_v43  ;;  %v7253_v38 = vshll.u32 %v14972_v41, %v7250_v43  ;;  %v7256_v62 = vshll.u32 %v14973_v34, %v7250_v43  ;;  %v7259_v61 = vshll.u32 %v14974_v14, %v7250_v43 }
 0x6c6   : > { %v7112_v44 = vxor.u32 2147483648, %v7111_v3  ;;  %v14367_v23 = vsub.s32 %v6984_v42, %v6987_v35  ;;  %v7262_v33 = vshll.u32 %v14975_v45, %v7250_v43  ;;  %v7265_v0 = vshll.u32 %v14976_v58, %v7250_v43 }
 0x6c7   : > { %v7254_v51 = vshrl.u32 %v14973_v34, %v7251_v12  ;;  %v7257_v17 = vshrl.u32 %v14974_v14, %v7251_v12  ;;  %v7260_v36 = vshrl.u32 %v14975_v45, %v7251_v12  ;;  %v7263_v32 = vshrl.u32 %v14976_v58, %v7251_v12 }
 0x6c8   : > { %v7113_v50 = vsel %vm7030_vm12, %v7112_v44, %v7111_v3  ;;  %v6990_v1 = vsub.s32 0, %v14367_v23  ;;  %v7266_v54 = vshrl.u32 %v14980_v46, %v7251_v12  ;;  %v14392_v21 = vshll.u32 %v7244_v11, 8 }
 0x6c9   : > { %v7116_v25 = vsel %vm14311_vm2, %v14099_v59, %v7113_v50  ;;  %v7255_v15 = vor.u32 %v7254_v51, %v7253_v38  ;;  %v7258_v40 = vor.u32 %v7257_v17, %v7256_v62  ;;  %v7261_v55 = vor.u32 %v7260_v36, %v7259_v61 }
 0x6ca   : > { %8710 = vcosq.f32 %v7116_v25  ;;  %v8143_v26 = vmin.u32 %v6990_v1, %v14367_v23  ;;  %v7264_v37 = vor.u32 %v7263_v32, %v7262_v33  ;;  %v7132_v10 = vand.u32 2147483647, %v14354_v47 }
 0x6cb   : > { %8712 = vsinq.f32 %v7116_v25  ;;  %v7252_v42 = vshrl.u32 %v14972_v41, %v7251_v12  ;;  %v7267_v30 = vor.u32 %v7266_v54, %v7265_v0  ;;  %vm7268_vm11 = vcmp.lt.s32.totalorder %v14369_v56, 1 }
 0x6cc   : > { %v6992_v52 = vclz %v8143_v26  ;;  %v7136_v60 = vshrl.u32 %v7135_v13, 23  ;;  %vm7127_vm12 = vcmp.eq.s32.totalorder %v14360_v18, 2  ;;  %vm7270_vm14 = vcmp.lt.s32.totalorder %v14369_v56, 3 }
 0x6cd   : > { %vm7271_vm15 = vcmp.lt.s32.totalorder %v14369_v56, 4  ;;  %v7276_v6 = vsel %vm7268_vm11, %v7255_v15, %v7258_v40  ;;  %vm7124_vm2 = vcmp.eq.s32.totalorder %v14360_v18, 0  ;;  %v7280_v22 = vsel %vm7268_vm11, %v7258_v40, %v7261_v55 }
 0x6ce   : > { %v8144_v19 = vadd.s32 4294967294, %v6992_v52  ;;  %v7273_v63 = vsel %vm7271_vm15, %v7261_v55, 2102212464  ;;  %v7277_v9 = vsel %vm7271_vm15, %v7264_v37, 920167782  ;;  %vm7123_vm13 = vcmp.lt.s32.totalorder %v14360_v18, 2 }
 0x6cf   : > { %v7281_v57 = vsel %vm7271_vm15, %v7267_v30, 1326507024  ;;  %vm14408_vm1 = vcmp.le.f32.partialorder %v6924_v16, 0.7853982  ;;  %vm7269_vm5 = vcmp.lt.s32.totalorder %v14369_v56, 2  ;;  %v7278_v28 = vsel %vm7270_vm14, %v7261_v55, %v7277_v9 }
 0x6d0   : > { %vm8145_vm4 = vcmp.lt.s32.totalorder %v8144_v19, 0  ;;  %v7282_v8 = vsel %vm7270_vm14, %v7264_v37, %v7281_v57  ;;  %vm7120_vm3 = vweird.f32 %v14099_v59  ;;  %v7010_v29 = vsub.s32 4, %v14357_v20 }
 0x6d1   : > { %v6995_v48 = vsel %vm8145_vm4, 0, %v8144_v19  ;;  %v7279_v16 = vsel %vm7269_vm5, %v7276_v6, %v7278_v28  ;;  %v7283_v39 = vsel %vm7269_vm5, %v7280_v22, %v7282_v8  ;;  %v7272_v35 = vsel %vm7268_vm11, %v7252_v42, %v7255_v15 }
 0x6d2   : > { %v6996_v43 = vsub.s32 32, %v6995_v48  ;;  %v7000_v3 = vsub.s32 4294967266, %v6995_v48  ;;  %v7274_v11 = vsel %vm7270_vm14, %v7258_v40, %v7273_v63  ;;  %v6997_v51 = vshll.u32 %v14367_v23, %v6995_v48 }
 0x6d3   : > { %v14428_v12 = vmul.u32.u64.low %v14392_v21, %v7283_v39  ;;  %v14429_v27 = vmul.u32.u64.high %v14392_v21, %v7283_v39, %v14428_v12  ;;  %v14432_v44 = vmul.u32.u64.low %v14392_v21, %v7279_v16  ;;  %v14433_v13 = vmul.u32.u64.high %v14392_v21, %v7279_v16, %v14432_v44 }
 0x6d4   : > { %v8711_v38 = vpop.eup %8710  ;;  %v6998_v62 = vshrl.u32 %v6980_v53, %v6996_v43  ;;  %v7001_v17 = vadd.s32 127, %v7000_v3  ;;  %v8150_v50 = vadd.s32 4294967169, %v7136_v60  ;;  %v7011_v36 = vsel %vm6926_vm10, %v7010_v29, %v14357_v20 }
 0x6d5   : > { %v8713_v1 = vpop.eup %8712  ;;  %v7128_v61 = vxor.u32 2147483648, %v8711_v38  ;;  %v7275_v25 = vsel %vm7269_vm5, %v7272_v35, %v7274_v11  ;;  %v14444_v15 = vand.u32 8388607, %v7132_v10  ;;  %vm7293_vm6 = vc.u32 %v14429_v27, %v14432_v44 }
 0x6d6   : > { %v7125_v33 = vxor.u32 2147483648, %v8713_v1  ;;  %v6999_v32 = vor.u32 %v6998_v62, %v6997_v51  ;;  %v7002_v26 = vshll.u32 %v7001_v17, 23  ;;  %v7142_v23 = vadd.s32 1, %v8150_v50 }
 0x6d7   : > { %v7129_v40 = vsel %vm7127_vm12, %v7128_v61, %v8713_v1  ;;  %v7294_v20 = vadd.s32 1, %v14433_v13  ;;  %v14453_v56 = vmul.f32 %v14303_v4, %v14365_v24  ;;  %v7291_v0 = vmul.u32 %v14392_v21, %v7275_v25 }
 0x6d8   : > { %v7126_v55 = vsel %vm7124_vm2, %v8711_v38, %v7125_v33  ;;  %v7003_v37 = vor.u32 4788187, %v7002_v26  ;;  %vm7143_vm7 = vcmp.gt.s32.totalorder %v7142_v23, 0  ;;  %v7013_v53 = vsel %vm14408_vm1, 0, %v7011_v36 }
 0x6d9   : > { %v7130_v54 = vsel %vm7123_vm13, %v7126_v55, %v7129_v40  ;;  %v7295_v52 = vsel %vm7293_vm6, %v7294_v20, %v14433_v13  ;;  %v7144_v42 = vsel %vm7143_vm7, %v7142_v23, 0  ;;  %v7006_v60 = vcvt.s32.f32 %v6999_v32 }
 0x6da   : > { %v7131_v24 = vsel %vm7120_vm3, nan, %v7130_v54  ;;  %v7004_v30 = vand.u32 2147483647, %v7003_v37  ;;  %v7296_v19 = vadd.s32 %v7295_v52, %v7291_v0  ;;  %v7146_v6 = vand.u32 31, %v7144_v42 }
 0x6db   : > { %7813 = vst [vmem:[%s9477_s9 + $0x1c8] sm:$0xff] %v7131_v24  ;;  %v7140_v9 = vor.u32 8388608, %v14444_v15  ;;  %v7017_v18 = vadd.s32 3, %v7013_v53  ;;  %v7145_v22 = vshrl.u32 %v7144_v42, 5  ;;  %v7447_v28 = vand.u32 2139095040, %v14453_v56 }
 0x6dc   : > { %v7007_v63 = vmul.f32 %v7006_v60, %v7004_v30  ;;  %v7297_v21 = vadd.s32 536870912, %v7296_v19  ;;  %v7147_v57 = vsub.s32 32, %v7146_v6  ;;  %v7149_v59 = vshll.u32 %v14972_v41, %v7146_v6 }
 0x6dd   : > { %v7152_v29 = vshll.u32 %v14973_v34, %v7146_v6  ;;  %v7155_v43 = vshll.u32 %v14974_v14, %v7146_v6  ;;  %v7158_v12 = vshll.u32 %v14975_v45, %v7146_v6  ;;  %v14484_v50 = vand.u32 3, %v7017_v18 }
 0x6de   : > { %v7008_v8 = vxor.u32 2147483648, %v7007_v63  ;;  %v14468_v48 = vshrl.u32 %v7297_v21, 30  ;;  %v7150_v16 = vshrl.u32 %v14973_v34, %v7147_v57  ;;  %v7153_v39 = vshrl.u32 %v14974_v14, %v7147_v57 }
 0x6df   : > { %v7156_v3 = vshrl.u32 %v14975_v45, %v7147_v57  ;;  %v7159_v13 = vshrl.u32 %v14976_v58, %v7147_v57  ;;  %v7161_v36 = vshll.u32 %v14976_v58, %v7146_v6  ;;  %v7162_v25 = vshrl.u32 %v14980_v46, %v7147_v57 }
 0x6e0   : > { %v7009_v35 = vsel %vm6926_vm10, %v7008_v8, %v7007_v63  ;;  %v7299_v11 = vshll.u32 %v14468_v48, 30  ;;  %v7151_v51 = vor.u32 %v7150_v16, %v7149_v59  ;;  %v7154_v62 = vor.u32 %v7153_v39, %v7152_v29 }
 0x6e1   : > { %v7012_v38 = vsel %vm14408_vm1, %v14177_v5, %v7009_v35  ;;  %v7157_v17 = vor.u32 %v7156_v3, %v7155_v43  ;;  %v7160_v61 = vor.u32 %v7159_v13, %v7158_v12  ;;  %v7448_v15 = vshrl.u32 %v7447_v28, 23 }
 0x6e2   : > { %8714 = vcosq.f32 %v7012_v38  ;;  %v14486_v1 = vsub.s32 %v7296_v19, %v7299_v11  ;;  %vm7238_vm8 = vcmp.lt.s32.totalorder %v14306_v31, 0  ;;  %vm7164_vm9 = vcmp.lt.s32.totalorder %v7145_v22, 1 }
 0x6e3   : > { %8716 = vsinq.f32 %v7012_v38  ;;  %vm7166_vm10 = vcmp.lt.s32.totalorder %v7145_v22, 3  ;;  %vm7167_vm11 = vcmp.lt.s32.totalorder %v7145_v22, 4  ;;  %v7163_v33 = vor.u32 %v7162_v25, %v7161_v36 }
 0x6e4   : > { %v7302_v7 = vsub.s32 0, %v14486_v1  ;;  %v7169_v32 = vsel %vm7167_vm11, %v7157_v17, 2102212464  ;;  %v7172_v26 = vsel %vm7164_vm9, %v7151_v51, %v7154_v62  ;;  %v7173_v23 = vsel %vm7167_vm11, %v7160_v61, 920167782 }
 0x6e5   : > { %v7148_v20 = vshrl.u32 %v14972_v41, %v7147_v57  ;;  %vm7165_vm12 = vcmp.lt.s32.totalorder %v7145_v22, 2  ;;  %v7174_v55 = vsel %vm7166_vm10, %v7157_v17, %v7173_v23  ;;  %v7176_v0 = vsel %vm7164_vm9, %v7154_v62, %v7157_v17  ;;  %v15143_v23 = vld [vmem:[#allocation47_spill] sm:$0xff] }
 0x6e6   : > { %v8155_v40 = vmin.u32 %v7302_v7, %v14486_v1  ;;  %v7175_v37 = vsel %vm7165_vm12, %v7172_v26, %v7174_v55  ;;  %v7177_v54 = vsel %vm7167_vm11, %v7163_v33, 1326507024  ;;  %v7180_v53 = vshll.u32 %v7140_v9, 8 }
 0x6e7   : > { %vm7019_vm14 = vcmp.lt.s32.totalorder %v14484_v50, 2  ;;  %vm14501_vm15 = vcmp.le.f32.partialorder %v7236_v49, 0.7853982  ;;  %v7168_v24 = vsel %vm7164_vm9, %v7148_v20, %v7151_v51  ;;  %v7170_v30 = vsel %vm7166_vm10, %v7154_v62, %v7169_v32  ;;  %v948_v62 = vpop.permute.xlu0 %947 }
 0x6e8   : > { %v7304_v42 = vclz %v8155_v40  ;;  %v7444_v60 = vand.u32 2147483647, %v14453_v56  ;;  %vm7016_vm2 = vweird.f32 %v14177_v5  ;;  %v7322_v19 = vsub.s32 4, %v14468_v48 }
 0x6e9   : > { %v7178_v6 = vsel %vm7166_vm10, %v7160_v61, %v7177_v54  ;;  %v14511_v63 = vmul.u32.u64.low %v7180_v53, %v7175_v37  ;;  %v14512_v21 = vmul.u32.u64.high %v7180_v53, %v7175_v37, %v14511_v63  ;;  %vm7020_vm13 = vcmp.eq.s32.totalorder %v14484_v50, 0 }
 0x6ea   : > { %v8156_v49 = vadd.s32 4294967294, %v7304_v42  ;;  %v7179_v9 = vsel %vm7165_vm12, %v7176_v0, %v7178_v6  ;;  %v8162_v18 = vadd.s32 4294967169, %v7448_v15  ;;  %vm7023_vm1 = vcmp.eq.s32.totalorder %v14484_v50, 2 }
 0x6eb   : > { %v7171_v57 = vsel %vm7165_vm12, %v7168_v24, %v7170_v30  ;;  %v14519_v28 = vmul.u32.u64.low %v7180_v53, %v7179_v9  ;;  %v14520_v8 = vmul.u32.u64.high %v7180_v53, %v7179_v9, %v14519_v28  ;;  %v7292_v29 = vadd.s32 %v14432_v44, %v14429_v27 }
 0x6ec   : > { %v8715_v59 = vpop.eup %8714  ;;  %vm8157_vm4 = vcmp.lt.s32.totalorder %v8156_v49, 0  ;;  %v7451_v16 = vand.u32 8388607, %v7444_v60  ;;  %v7454_v39 = vadd.s32 1, %v8162_v18  ;;  %v7323_v22 = vsel %vm7238_vm8, %v7322_v19, %v14468_v48 }
 0x6ed   : > { %v8717_v43 = vpop.eup %8716  ;;  %v7024_v3 = vxor.u32 2147483648, %v8715_v59  ;;  %v7307_v35 = vsel %vm8157_vm4, 0, %v8156_v49  ;;  %v7190_v11 = vadd.s32 1, %v14512_v21  ;;  %v7187_v51 = vmul.u32 %v7180_v53, %v7171_v57 }
 0x6ee   : > { %v7021_v12 = vxor.u32 2147483648, %v8717_v43  ;;  %v7308_v13 = vsub.s32 32, %v7307_v35  ;;  %v7312_v38 = vsub.s32 4294967266, %v7307_v35  ;;  %v7309_v44 = vshll.u32 %v14486_v1, %v7307_v35 }
 0x6ef   : > { %v7025_v27 = vsel %vm7023_vm1, %v7024_v3, %v8717_v43  ;;  %vm7189_vm5 = vc.u32 %v14520_v8, %v14511_v63  ;;  %vm7455_vm3 = vcmp.gt.s32.totalorder %v7454_v39, 0  ;;  %v7325_v15 = vsel %vm14501_vm15, 0, %v7323_v22 }
 0x6f0   : > { %v7022_v48 = vsel %vm7020_vm13, %v8715_v59, %v7021_v12  ;;  %v7310_v17 = vshrl.u32 %v7292_v29, %v7308_v13  ;;  %v7313_v61 = vadd.s32 127, %v7312_v38  ;;  %v7191_v36 = vsel %vm7189_vm5, %v7190_v11, %v14512_v21 }
 0x6f1   : > { %v7026_v25 = vsel %vm7019_vm14, %v7022_v48, %v7025_v27  ;;  %v7192_v1 = vadd.s32 %v7191_v36, %v7187_v51  ;;  %v7456_v7 = vsel %vm7455_vm3, %v7454_v39, 0  ;;  %v1025_v40 = vsel %vm580_vm0, %v948_v62, %v15143_v23 }
 0x6f2   : > { %v7027_v33 = vsel %vm7016_vm2, nan, %v7026_v25  ;;  %v7311_v32 = vor.u32 %v7310_v17, %v7309_v44  ;;  %v7314_v26 = vshll.u32 %v7313_v61, 23  ;;  %v7458_v55 = vand.u32 31, %v7456_v7 }
 0x6f3   : > { %7812 = vst [vmem:[%s9477_s9 + $0x1c0] sm:$0xff] %v7027_v33  ;;  %v7193_v20 = vadd.s32 536870912, %v7192_v1  ;;  %v7329_v50 = vadd.s32 3, %v7325_v15  ;;  %v7452_v54 = vor.u32 8388608, %v7451_v16  ;;  %v14549_v42 = vmul.f32 %v14303_v4, %v1025_v40 }
 0x6f4   : > { %v7315_v37 = vor.u32 4788187, %v7314_v26  ;;  %v7459_v53 = vsub.s32 32, %v7458_v55  ;;  %v7318_v5 = vcvt.s32.f32 %v7311_v32  ;;  %v14551_v30 = vshrl.u32 %v7456_v7, 5  ;;  %v963_v26 = vpop.permute.xlu1 %962 }
 0x6f5   : > { %v7194_v0 = vshrl.u32 %v7193_v20, 30  ;;  %v7461_v19 = vshll.u32 %v14972_v41, %v7458_v55  ;;  %v7464_v49 = vshll.u32 %v14973_v34, %v7458_v55  ;;  %v7467_v9 = vshll.u32 %v14974_v14, %v7458_v55 }
 0x6f6   : > { %v7316_v24 = vand.u32 2147483647, %v7315_v37  ;;  %v7462_v21 = vshrl.u32 %v14973_v34, %v7459_v53  ;;  %v7465_v57 = vshrl.u32 %v14974_v14, %v7459_v53  ;;  %v7468_v28 = vshrl.u32 %v14975_v45, %v7459_v53 }
 0x6f7   : > { %v7195_v6 = vshll.u32 %v7194_v0, 30  ;;  %v7471_v59 = vshrl.u32 %v14976_v58, %v7459_v53  ;;  %v14560_v29 = vand.u32 3, %v7329_v50  ;;  %v7470_v39 = vshll.u32 %v14975_v45, %v7458_v55 }
 0x6f8   : > { %v7319_v18 = vmul.f32 %v7318_v5, %v7316_v24  ;;  %v7474_v43 = vshrl.u32 %v14980_v46, %v7459_v53  ;;  %vm7134_vm6 = vcmp.lt.s32.totalorder %v14354_v47, 0  ;;  %v7463_v35 = vor.u32 %v7462_v21, %v7461_v19  ;;  %v15146_v19 = vld [vmem:[#allocation48_spill] sm:$0xff] }
 0x6f9   : > { %v14562_v16 = vsub.s32 %v7192_v1, %v7195_v6  ;;  %v7466_v22 = vor.u32 %v7465_v57, %v7464_v49  ;;  %v7469_v11 = vor.u32 %v7468_v28, %v7467_v9  ;;  %v7472_v13 = vor.u32 %v7471_v59, %v7470_v39 }
 0x6fa   : > { %v7320_v3 = vxor.u32 2147483648, %v7319_v18  ;;  %v7473_v38 = vshll.u32 %v14976_v58, %v7458_v55  ;;  %v14569_v51 = vshll.u32 %v7452_v54, 8  ;;  %v7460_v44 = vshrl.u32 %v14972_v41, %v7459_v53 }
 0x6fb   : > { %v7198_v12 = vsub.s32 0, %v14562_v16  ;;  %vm7476_vm7 = vcmp.lt.s32.totalorder %v14551_v30, 1  ;;  %v7343_v62 = vand.u32 2139095040, %v14549_v42  ;;  %vm7479_vm9 = vcmp.lt.s32.totalorder %v14551_v30, 4 }
 0x6fc   : > { %v7321_v27 = vsel %vm7238_vm8, %v7320_v3, %v7319_v18  ;;  %v7475_v61 = vor.u32 %v7474_v43, %v7473_v38  ;;  %vm14583_vm10 = vcmp.le.f32.partialorder %v7132_v10, 0.7853982  ;;  %v7481_v25 = vsel %vm7479_vm9, %v7469_v11, 2102212464 }
 0x6fd   : > { %v7324_v48 = vsel %vm14501_vm15, %v14306_v31, %v7321_v27  ;;  %v8151_v17 = vmin.u32 %v7198_v12, %v14562_v16  ;;  %v7484_v15 = vsel %vm7476_vm7, %v7463_v35, %v7466_v22  ;;  %v7485_v52 = vsel %vm7479_vm9, %v7472_v13, 920167782 }
 0x6fe   : > { %8718 = vcosq.f32 %v7324_v48  ;;  %v7218_v7 = vsub.s32 4, %v7194_v0  ;;  %vm7478_vm8 = vcmp.lt.s32.totalorder %v14551_v30, 3  ;;  %vm7477_vm11 = vcmp.lt.s32.totalorder %v14551_v30, 2 }
 0x6ff   : > { %8720 = vsinq.f32 %v7324_v48  ;;  %v7200_v1 = vclz %v8151_v17  ;;  %v7480_v10 = vsel %vm7476_vm7, %v7460_v44, %v7463_v35  ;;  %v7486_v33 = vsel %vm7478_vm8, %v7469_v11, %v7485_v52 }
 0x700   : > { %v7488_v32 = vsel %vm7476_vm7, %v7466_v22, %v7469_v11  ;;  %v7482_v40 = vsel %vm7478_vm8, %v7466_v22, %v7481_v25  ;;  %v7487_v20 = vsel %vm7477_vm11, %v7484_v15, %v7486_v33  ;;  %v7489_v55 = vsel %vm7479_vm9, %v7475_v61, 1326507024 }
 0x701   : > { %v8152_v23 = vadd.s32 4294967294, %v7200_v1  ;;  %v7490_v37 = vsel %vm7478_vm8, %v7472_v13, %v7489_v55  ;;  %v14604_v50 = vmul.u32.u64.low %v14569_v51, %v7487_v20  ;;  %v14605_v54 = vmul.u32.u64.high %v14569_v51, %v7487_v20, %v14604_v50 }
 0x702   : > { %v7344_v53 = vshrl.u32 %v7343_v62, 23  ;;  %vm7332_vm12 = vcmp.eq.s32.totalorder %v14560_v29, 0  ;;  %v7219_v24 = vsel %vm7134_vm6, %v7218_v7, %v7194_v0  ;;  %v7491_v5 = vsel %vm7477_vm11, %v7488_v32, %v7490_v37 }
 0x703   : > { %vm8153_vm14 = vcmp.lt.s32.totalorder %v8152_v23, 0  ;;  %v1028_v6 = vsel %vm580_vm0, %v963_v26, %v15146_v19  ;;  %v14617_v49 = vmul.u32.u64.low %v14569_v51, %v7491_v5  ;;  %v14618_v9 = vmul.u32.u64.high %v14569_v51, %v7491_v5, %v14617_v49 }
 0x704   : > { %v7203_v21 = vsel %vm8153_vm14, 0, %v8152_v23  ;;  %v8158_v18 = vadd.s32 4294967169, %v7344_v53  ;;  %v7188_v57 = vadd.s32 %v14511_v63, %v14520_v8  ;;  %v7483_v0 = vsel %vm7477_vm11, %v7480_v10, %v7482_v40 }
 0x705   : > { %v7204_v28 = vsub.s32 32, %v7203_v21  ;;  %v7208_v59 = vsub.s32 4294967266, %v7203_v21  ;;  %v7502_v39 = vadd.s32 1, %v14605_v54  ;;  %v7340_v43 = vand.u32 2147483647, %v14549_v42 }
 0x706   : > { %v7350_v3 = vadd.s32 1, %v8158_v18  ;;  %v14627_v35 = vmul.f32 %v14303_v4, %v1028_v6  ;;  %v7205_v22 = vshll.u32 %v14562_v16, %v7203_v21  ;;  %v7221_v63 = vsel %vm14583_vm10, 0, %v7219_v24 }
 0x707   : > { %v7206_v11 = vshrl.u32 %v7188_v57, %v7204_v28  ;;  %v7209_v12 = vadd.s32 127, %v7208_v59  ;;  %vm7335_vm15 = vcmp.eq.s32.totalorder %v14560_v29, 2  ;;  %v7499_v30 = vmul.u32 %v14569_v51, %v7483_v0 }
 0x708   : > { %v8719_v8 = vpop.eup %8718  ;;  %vm7501_vm2 = vc.u32 %v14618_v9, %v14604_v50  ;;  %vm7351_vm13 = vcmp.gt.s32.totalorder %v7350_v3, 0  ;;  %v7225_v62 = vadd.s32 3, %v7221_v63  ;;  %v7347_v51 = vand.u32 8388607, %v7340_v43 }
 0x709   : > { %v8721_v13 = vpop.eup %8720  ;;  %v7336_v38 = vxor.u32 2147483648, %v8719_v8  ;;  %v7207_v4 = vor.u32 %v7206_v11, %v7205_v22  ;;  %v7210_v27 = vshll.u32 %v7209_v12, 23  ;;  %v7503_v16 = vsel %vm7501_vm2, %v7502_v39, %v14605_v54 }
 0x70a   : > { %v7333_v44 = vxor.u32 2147483648, %v8721_v13  ;;  %v7504_v48 = vadd.s32 %v7503_v16, %v7499_v30  ;;  %v7352_v17 = vsel %vm7351_vm13, %v7350_v3, 0  ;;  %v7655_v15 = vand.u32 2139095040, %v14627_v35 }
 0x70b   : > { %v7337_v61 = vsel %vm7335_vm15, %v7336_v38, %v8721_v13  ;;  %v7211_v25 = vor.u32 4788187, %v7210_v27  ;;  %vm7331_vm1 = vcmp.lt.s32.totalorder %v14560_v29, 2  ;;  %v7354_v7 = vand.u32 31, %v7352_v17 }
 0x70c   : > { %v7334_v52 = vsel %vm7332_vm12, %v8719_v8, %v7333_v44  ;;  %v7505_v1 = vadd.s32 536870912, %v7504_v48  ;;  %vm7328_vm4 = vweird.f32 %v14306_v31  ;;  %v7214_v32 = vcvt.s32.f32 %v7207_v4 }
 0x70d   : > { %v7338_v10 = vsel %vm7331_vm1, %v7334_v52, %v7337_v61  ;;  %v7212_v33 = vand.u32 2147483647, %v7211_v25  ;;  %v7355_v40 = vsub.s32 32, %v7354_v7  ;;  %v14647_v55 = vand.u32 3, %v7225_v62 }
 0x70e   : > { %v7339_v26 = vsel %vm7328_vm4, nan, %v7338_v10  ;;  %v14644_v23 = vshrl.u32 %v7505_v1, 30  ;;  %v7348_v37 = vor.u32 8388608, %v7347_v51  ;;  %v7656_v54 = vshrl.u32 %v7655_v15, 23 }
 0x70f   : > { %7815 = vst [vmem:[%s9477_s9 + $0x1d8] sm:$0xff] %v7339_v26  ;;  %v7215_v20 = vmul.f32 %v7214_v32, %v7212_v33  ;;  %v7357_v53 = vshll.u32 %v14972_v41, %v7354_v7  ;;  %v7358_v24 = vshrl.u32 %v14973_v34, %v7355_v40  ;;  %v7360_v31 = vshll.u32 %v14973_v34, %v7354_v7 }
 0x710   : > { %v7507_v29 = vshll.u32 %v14644_v23, 30  ;;  %v7361_v19 = vshrl.u32 %v14974_v14, %v7355_v40  ;;  %v7364_v6 = vshrl.u32 %v14975_v45, %v7355_v40  ;;  %v7367_v21 = vshrl.u32 %v14976_v58, %v7355_v40 }
 0x711   : > { %v7216_v5 = vxor.u32 2147483648, %v7215_v20  ;;  %v7353_v18 = vshrl.u32 %v7352_v17, 5  ;;  %v7363_v57 = vshll.u32 %v14974_v14, %v7354_v7  ;;  %v7366_v28 = vshll.u32 %v14975_v45, %v7354_v7 }
 0x712   : > { %v14656_v49 = vsub.s32 %v7504_v48, %v7507_v29  ;;  %v7359_v0 = vor.u32 %v7358_v24, %v7357_v53  ;;  %v7362_v39 = vor.u32 %v7361_v19, %v7360_v31  ;;  %v14662_v3 = vshll.u32 %v7348_v37, 8 }
 0x713   : > { %v7217_v59 = vsel %vm7134_vm6, %v7216_v5, %v7215_v20  ;;  %v7365_v12 = vor.u32 %v7364_v6, %v7363_v57  ;;  %v7368_v63 = vor.u32 %v7367_v21, %v7366_v28  ;;  %v7369_v8 = vshll.u32 %v14976_v58, %v7354_v7 }
 0x714   : > { %v7220_v22 = vsel %vm14583_vm10, %v14354_v47, %v7217_v59  ;;  %v7510_v11 = vsub.s32 0, %v14656_v49  ;;  %v7370_v30 = vshrl.u32 %v14980_v46, %v7355_v40  ;;  %v8170_v13 = vadd.s32 4294967169, %v7656_v54 }
 0x715   : > { %8722 = vcosq.f32 %v7220_v22  ;;  %vm7446_vm5 = vcmp.lt.s32.totalorder %v14453_v56, 0  ;;  %vm7372_vm3 = vcmp.lt.s32.totalorder %v7353_v18, 1  ;;  %vm7375_vm6 = vcmp.lt.s32.totalorder %v7353_v18, 4 }
 0x716   : > { %8724 = vsinq.f32 %v7220_v22  ;;  %v8163_v38 = vmin.u32 %v7510_v11, %v14656_v49  ;;  %v7371_v4 = vor.u32 %v7370_v30, %v7369_v8  ;;  %vm7373_vm7 = vcmp.lt.s32.totalorder %v7353_v18, 2 }
 0x717   : > { %v7380_v36 = vsel %vm7372_vm3, %v7359_v0, %v7362_v39  ;;  %v7381_v27 = vsel %vm7375_vm6, %v7368_v63, 920167782  ;;  %v7356_v44 = vshrl.u32 %v14972_v41, %v7355_v40  ;;  %vm7374_vm9 = vcmp.lt.s32.totalorder %v7353_v18, 3 }
 0x718   : > { %v7512_v16 = vclz %v8163_v38  ;;  %v7377_v62 = vsel %vm7375_vm6, %v7365_v12, 2102212464  ;;  %v7530_v48 = vsub.s32 4, %v14644_v23  ;;  %v7382_v17 = vsel %vm7374_vm9, %v7365_v12, %v7381_v27 }
 0x719   : > { %v7384_v61 = vsel %vm7372_vm3, %v7362_v39, %v7365_v12  ;;  %v7385_v25 = vsel %vm7375_vm6, %v7371_v4, 1326507024  ;;  %vm14678_vm10 = vcmp.le.f32.partialorder %v7444_v60, 0.7853982  ;;  %v7376_v52 = vsel %vm7372_vm3, %v7356_v44, %v7359_v0 }
 0x71a   : > { %v8164_v15 = vadd.s32 4294967294, %v7512_v16  ;;  %v7383_v1 = vsel %vm7373_vm7, %v7380_v36, %v7382_v17  ;;  %v7386_v7 = vsel %vm7374_vm9, %v7368_v63, %v7385_v25  ;;  %v7378_v10 = vsel %vm7374_vm9, %v7362_v39, %v7377_v62 }
 0x71b   : > { %v7387_v33 = vsel %vm7373_vm7, %v7384_v61, %v7386_v7  ;;  %v14686_v32 = vmul.u32.u64.low %v14662_v3, %v7383_v1  ;;  %v14687_v26 = vmul.u32.u64.high %v14662_v3, %v7383_v1, %v14686_v32  ;;  %vm7227_vm8 = vcmp.lt.s32.totalorder %v14647_v55, 2 }
 0x71c   : > { %vm8165_vm11 = vcmp.lt.s32.totalorder %v8164_v15, 0  ;;  %v14692_v60 = vmul.u32.u64.low %v14662_v3, %v7387_v33  ;;  %v14693_v40 = vmul.u32.u64.high %v14662_v3, %v7387_v33, %v14692_v60  ;;  %vm7228_vm12 = vcmp.eq.s32.totalorder %v14647_v55, 0 }
 0x71d   : > { %vm7231_vm14 = vcmp.eq.s32.totalorder %v14647_v55, 2  ;;  %v7515_v20 = vsel %vm8165_vm11, 0, %v8164_v15  ;;  %v7662_v37 = vadd.s32 1, %v8170_v13  ;;  %v7500_v54 = vadd.s32 %v14604_v50, %v14618_v9  ;;  %v958_v15 = vpop.permute.xlu0 %957 }
 0x71e   : > { %v7516_v29 = vsub.s32 32, %v7515_v20  ;;  %v7520_v53 = vsub.s32 4294967266, %v7515_v20  ;;  %v7379_v24 = vsel %vm7373_vm7, %v7376_v52, %v7378_v10  ;;  %v7531_v5 = vsel %vm7446_vm5, %v7530_v48, %v14644_v23 }
 0x71f   : > { %v8723_v31 = vpop.eup %8722  ;;  %v7398_v19 = vadd.s32 1, %v14687_v26  ;;  %v7652_v6 = vand.u32 2147483647, %v14627_v35  ;;  %vm7663_vm15 = vcmp.gt.s32.totalorder %v7662_v37, 0  ;;  %v7517_v28 = vshll.u32 %v14656_v49, %v7515_v20 }
 0x720   : > { %v8725_v21 = vpop.eup %8724  ;;  %v7232_v57 = vxor.u32 2147483648, %v8723_v31  ;;  %v7518_v59 = vshrl.u32 %v7500_v54, %v7516_v29  ;;  %v7521_v50 = vadd.s32 127, %v7520_v53  ;;  %v7395_v18 = vmul.u32 %v14662_v3, %v7379_v24  ;;  %v15149_v53 = vld [vmem:[#allocation49_spill] sm:$0xff] }
 0x721   : > { %v7229_v9 = vxor.u32 2147483648, %v8725_v21  ;;  %vm7397_vm2 = vc.u32 %v14693_v40, %v14686_v32  ;;  %v7664_v0 = vsel %vm7663_vm15, %v7662_v37, 0  ;;  %v7533_v12 = vsel %vm14678_vm10, 0, %v7531_v5 }
 0x722   : > { %v7233_v23 = vsel %vm7231_vm14, %v7232_v57, %v8725_v21  ;;  %v7519_v39 = vor.u32 %v7518_v59, %v7517_v28  ;;  %v7522_v22 = vshll.u32 %v7521_v50, 23  ;;  %v7399_v11 = vsel %vm7397_vm2, %v7398_v19, %v14687_v26 }
 0x723   : > { %v7230_v49 = vsel %vm7228_vm12, %v8723_v31, %v7229_v9  ;;  %v7400_v63 = vadd.s32 %v7399_v11, %v7395_v18  ;;  %v7666_v3 = vand.u32 31, %v7664_v0  ;;  %vm7224_vm13 = vweird.f32 %v14354_v47 }
 0x724   : > { %v7234_v8 = vsel %vm7227_vm8, %v7230_v49, %v7233_v23  ;;  %v7523_v30 = vor.u32 4788187, %v7522_v22  ;;  %v7526_v27 = vcvt.s32.f32 %v7519_v39  ;;  %v7537_v16 = vadd.s32 3, %v7533_v12 }
 0x725   : > { %v7235_v13 = vsel %vm7224_vm13, nan, %v7234_v8  ;;  %v7401_v38 = vadd.s32 536870912, %v7400_v63  ;;  %v7667_v4 = vsub.s32 32, %v7666_v3  ;;  %v7659_v62 = vand.u32 8388607, %v7652_v6 }
 0x726   : > { %7814 = vst [vmem:[%s9477_s9 + $0x1d0] sm:$0xff] %v7235_v13  ;;  %v7524_v36 = vand.u32 2147483647, %v7523_v30  ;;  %v7665_v48 = vshrl.u32 %v7664_v0, 5  ;;  %v7669_v1 = vshll.u32 %v14972_v41, %v7666_v3  ;;  %v7672_v7 = vshll.u32 %v14973_v34, %v7666_v3 }
 0x727   : > { %v14720_v44 = vshrl.u32 %v7401_v38, 30  ;;  %v7670_v17 = vshrl.u32 %v14973_v34, %v7667_v4  ;;  %v7673_v55 = vshrl.u32 %v14974_v14, %v7667_v4  ;;  %v7676_v61 = vshrl.u32 %v14975_v45, %v7667_v4 }
 0x728   : > { %v7527_v47 = vmul.f32 %v7526_v27, %v7524_v36  ;;  %v7679_v25 = vshrl.u32 %v14976_v58, %v7667_v4  ;;  %v7675_v10 = vshll.u32 %v14974_v14, %v7666_v3  ;;  %v7678_v26 = vshll.u32 %v14975_v45, %v7666_v3 }
 0x729   : > { %v7403_v52 = vshll.u32 %v14720_v44, 30  ;;  %v7681_v60 = vshll.u32 %v14976_v58, %v7666_v3  ;;  %v7682_v20 = vshrl.u32 %v14980_v46, %v7667_v4  ;;  %v7671_v54 = vor.u32 %v7670_v17, %v7669_v1 }
 0x72a   : > { %v7528_v33 = vxor.u32 2147483648, %v7527_v47  ;;  %v7677_v29 = vor.u32 %v7676_v61, %v7675_v10  ;;  %v1027_v24 = vsel %vm580_vm0, %v958_v15, %v15149_v53  ;;  %v7674_v5 = vor.u32 %v7673_v55, %v7672_v7 }
 0x72b   : > { %v14735_v37 = vsub.s32 %v7400_v63, %v7403_v52  ;;  %v7680_v19 = vor.u32 %v7679_v25, %v7678_v26  ;;  %v7683_v21 = vor.u32 %v7682_v20, %v7681_v60  ;;  %v14745_v28 = vand.u32 3, %v7537_v16 }
 0x72c   : > { %v7529_v31 = vsel %vm7446_vm5, %v7528_v33, %v7527_v47  ;;  %v7660_v50 = vor.u32 8388608, %v7659_v62  ;;  %v7668_v9 = vshrl.u32 %v14972_v41, %v7667_v4  ;;  %vm7687_vm1 = vcmp.lt.s32.totalorder %v7665_v48, 4 }
 0x72d   : > { %v7532_v57 = vsel %vm14678_vm10, %v14453_v56, %v7529_v31  ;;  %v7406_v59 = vsub.s32 0, %v14735_v37  ;;  %v14752_v18 = vmul.f32 %v8753_v2, %v1027_v24  ;;  %vm7684_vm0 = vcmp.lt.s32.totalorder %v7665_v48, 1 }
 0x72e   : > { %8726 = vcosq.f32 %v7532_v57  ;;  %v7689_v51 = vsel %vm7687_vm1, %v7677_v29, 2102212464  ;;  %v7692_v23 = vsel %vm7684_vm0, %v7671_v54, %v7674_v5  ;;  %v7693_v39 = vsel %vm7687_vm1, %v7680_v19, 920167782 }
 0x72f   : > { %8728 = vsinq.f32 %v7532_v57  ;;  %v8159_v0 = vmin.u32 %v7406_v59, %v14735_v37  ;;  %v7696_v22 = vsel %vm7684_vm0, %v7674_v5, %v7677_v29  ;;  %v7697_v11 = vsel %vm7687_vm1, %v7683_v21, 1326507024 }
 0x730   : > { %vm7685_vm4 = vcmp.lt.s32.totalorder %v7665_v48, 2  ;;  %vm7686_vm5 = vcmp.lt.s32.totalorder %v7665_v48, 3  ;;  %v7700_v12 = vshll.u32 %v7660_v50, 8  ;;  %v7688_v63 = vsel %vm7684_vm0, %v7668_v9, %v7671_v54 }
 0x731   : > { %v7408_v49 = vclz %v8159_v0  ;;  %v7690_v3 = vsel %vm7686_vm5, %v7674_v5, %v7689_v51  ;;  %v7694_v8 = vsel %vm7686_vm5, %v7677_v29, %v7693_v39  ;;  %v7698_v30 = vsel %vm7686_vm5, %v7680_v19, %v7697_v11 }
 0x732   : > { %v7695_v38 = vsel %vm7685_vm4, %v7692_v23, %v7694_v8  ;;  %v7699_v4 = vsel %vm7685_vm4, %v7696_v22, %v7698_v30  ;;  %v7691_v17 = vsel %vm7685_vm4, %v7688_v63, %v7690_v3  ;;  %v7551_v47 = vand.u32 2139095040, %v14752_v18 }
 0x733   : > { %v8160_v13 = vadd.s32 4294967294, %v7408_v49  ;;  %v14755_v36 = vmul.u32.u64.low %v7700_v12, %v7699_v4  ;;  %v14756_v27 = vmul.u32.u64.high %v7700_v12, %v7699_v4, %v14755_v36  ;;  %vm7540_vm6 = vcmp.eq.s32.totalorder %v14745_v28, 0 }
 0x734   : > { %v14758_v16 = vmul.u32.u64.low %v7700_v12, %v7695_v38  ;;  %v14759_v62 = vmul.u32.u64.high %v7700_v12, %v7695_v38, %v14758_v16  ;;  %vm7342_vm7 = vcmp.lt.s32.totalorder %v14549_v42, 0  ;;  %v7426_v55 = vsub.s32 4, %v14720_v44 }
 0x735   : > { %vm8161_vm3 = vcmp.lt.s32.totalorder %v8160_v13, 0  ;;  %v7396_v61 = vadd.s32 %v14686_v32, %v14693_v40  ;;  %v7552_v52 = vshrl.u32 %v7551_v47, 23  ;;  %v7707_v10 = vmul.u32 %v7700_v12, %v7691_v17 }
 0x736   : > { %v7411_v48 = vsel %vm8161_vm3, 0, %v8160_v13  ;;  %vm7709_vm9 = vc.u32 %v14756_v27, %v14758_v16  ;;  %v7710_v33 = vadd.s32 1, %v14759_v62  ;;  %vm7543_vm10 = vcmp.eq.s32.totalorder %v14745_v28, 2 }
 0x737   : > { %v7412_v25 = vsub.s32 32, %v7411_v48  ;;  %v7416_v15 = vsub.s32 4294967266, %v7411_v48  ;;  %v7413_v7 = vshll.u32 %v14735_v37, %v7411_v48  ;;  %v8166_v29 = vadd.s32 4294967169, %v7552_v52 }
 0x738   : > { %v8727_v1 = vpop.eup %8726  ;;  %v7427_v32 = vsel %vm7342_vm7, %v7426_v55, %v14720_v44  ;;  %v7711_v40 = vsel %vm7709_vm9, %v7710_v33, %v14759_v62  ;;  %vm7536_vm8 = vweird.f32 %v14453_v56  ;;  %vm7539_vm11 = vcmp.lt.s32.totalorder %v14745_v28, 2 }
 0x739   : > { %v8729_v26 = vpop.eup %8728  ;;  %v7544_v60 = vxor.u32 2147483648, %v8727_v1  ;;  %v7414_v20 = vshrl.u32 %v7396_v61, %v7412_v25  ;;  %v7417_v54 = vadd.s32 127, %v7416_v15  ;;  %v7712_v5 = vadd.s32 %v7711_v40, %v7707_v10 }
 0x73a   : > { %v7541_v53 = vxor.u32 2147483648, %v8729_v26  ;;  %v7558_v21 = vadd.s32 1, %v8166_v29  ;;  %vm14783_vm12 = vcmp.le.f32.partialorder %v7340_v43, 0.7853982  ;;  %v7548_v56 = vand.u32 2147483647, %v14752_v18 }
 0x73b   : > { %v7545_v37 = vsel %vm7543_vm10, %v7544_v60, %v8729_v26  ;;  %v7415_v24 = vor.u32 %v7414_v20, %v7413_v7  ;;  %v7418_v31 = vshll.u32 %v7417_v54, 23  ;;  %v7713_v50 = vadd.s32 536870912, %v7712_v5 }
 0x73c   : > { %v7542_v19 = vsel %vm7540_vm6, %v8727_v1, %v7541_v53  ;;  %v7429_v2 = vsel %vm14783_vm12, 0, %v7427_v32  ;;  %vm7559_vm14 = vcmp.gt.s32.totalorder %v7558_v21, 0  ;;  %v7555_v3 = vand.u32 8388607, %v7548_v56 }
 0x73d   : > { %v7546_v57 = vsel %vm7539_vm11, %v7542_v19, %v7545_v37  ;;  %v7419_v59 = vor.u32 4788187, %v7418_v31  ;;  %v7422_v0 = vcvt.s32.f32 %v7415_v24  ;;  %v14791_v51 = vshrl.u32 %v7713_v50, 30 }
 0x73e   : > { %v7547_v9 = vsel %vm7536_vm8, nan, %v7546_v57  ;;  %v7560_v23 = vsel %vm7559_vm14, %v7558_v21, 0  ;;  %v7433_v11 = vadd.s32 3, %v7429_v2  ;;  %v7708_v33 = vadd.s32 %v14758_v16, %v14756_v27 }
 0x73f   : > { %7817 = vst [vmem:[%s9477_s9 + $0x1e8] sm:$0xff] %v7547_v9  ;;  %v7420_v28 = vand.u32 2147483647, %v7419_v59  ;;  %v7562_v39 = vand.u32 31, %v7560_v23  ;;  %v7715_v22 = vshll.u32 %v14791_v51, 30  ;;  %v7561_v8 = vshrl.u32 %v7560_v23, 5 }
 0x740   : > { %v7434_v10 = vand.u32 3, %v7433_v11  ;;  %v7556_v60 = vor.u32 8388608, %v7555_v3  ;;  %vm7654_vm9 = vcmp.lt.s32.totalorder %v14627_v35, 0  ;;  %vm7653_vm10 = vcmp.le.f32.partialorder %v7652_v6, 0.7853982 }
 0x741   : > { %v7423_v43 = vmul.f32 %v7422_v0, %v7420_v28  ;;  %v7563_v49 = vsub.s32 32, %v7562_v39  ;;  %v14794_v63 = vsub.s32 %v7712_v5, %v7715_v22  ;;  %v7565_v30 = vshll.u32 %v14972_v41, %v7562_v39 }
 0x742   : > { %v7568_v38 = vshll.u32 %v14973_v34, %v7562_v39  ;;  %v7571_v17 = vshll.u32 %v14974_v14, %v7562_v39  ;;  %v7574_v61 = vshll.u32 %v14975_v45, %v7562_v39  ;;  %vm7580_vm15 = vcmp.lt.s32.totalorder %v7561_v8, 1 }
 0x743   : > { %v7424_v12 = vxor.u32 2147483648, %v7423_v43  ;;  %v7566_v13 = vshrl.u32 %v14973_v34, %v7563_v49  ;;  %v7569_v4 = vshrl.u32 %v14974_v14, %v7563_v49  ;;  %v7718_v62 = vsub.s32 0, %v14794_v63 }
 0x744   : > { %v7572_v47 = vshrl.u32 %v14975_v45, %v7563_v49  ;;  %v7575_v34 = vshrl.u32 %v14976_v58, %v7563_v49  ;;  %v7577_v14 = vshll.u32 %v14976_v58, %v7562_v39  ;;  %v7578_v7 = vshrl.u32 %v14980_v46, %v7563_v49 }
 0x745   : > { %v7425_v36 = vsel %vm7342_vm7, %v7424_v12, %v7423_v43  ;;  %v7567_v55 = vor.u32 %v7566_v13, %v7565_v30  ;;  %v8171_v25 = vmin.u32 %v7718_v62, %v14794_v63  ;;  %v7570_v15 = vor.u32 %v7569_v4, %v7568_v38 }
 0x746   : > { %v7428_v48 = vsel %vm14783_vm12, %v14549_v42, %v7425_v36  ;;  %v7573_v52 = vor.u32 %v7572_v47, %v7571_v17  ;;  %v7576_v1 = vor.u32 %v7575_v34, %v7574_v61  ;;  %v7564_v45 = vshrl.u32 %v14972_v41, %v7563_v49 }
 0x747   : > { %8730 = vcosq.f32 %v7428_v48  ;;  %v7720_v26 = vclz %v8171_v25  ;;  %v7579_v20 = vor.u32 %v7578_v7, %v7577_v14  ;;  %vm7582_vm2 = vcmp.lt.s32.totalorder %v7561_v8, 3 }
 0x748   : > { %8732 = vsinq.f32 %v7428_v48  ;;  %vm7583_vm13 = vcmp.lt.s32.totalorder %v7561_v8, 4  ;;  %v7588_v29 = vsel %vm7580_vm15, %v7567_v55, %v7570_v15  ;;  %v7592_v58 = vsel %vm7580_vm15, %v7570_v15, %v7573_v52 }
 0x749   : > { %v8172_v54 = vadd.s32 4294967294, %v7720_v26  ;;  %v7585_v53 = vsel %vm7583_vm13, %v7573_v52, 2102212464  ;;  %v7589_v32 = vsel %vm7583_vm13, %v7576_v1, 920167782  ;;  %vm7581_vm0 = vcmp.lt.s32.totalorder %v7561_v8, 2 }
 0x74a   : > { %v7593_v46 = vsel %vm7583_vm13, %v7579_v20, 1326507024  ;;  %v7590_v27 = vsel %vm7582_vm2, %v7573_v52, %v7589_v32  ;;  %v7596_v24 = vshll.u32 %v7556_v60, 8  ;;  %v7584_v19 = vsel %vm7580_vm15, %v7564_v45, %v7567_v55 }
 0x74b   : > { %vm8173_vm1 = vcmp.lt.s32.totalorder %v8172_v54, 0  ;;  %v7594_v16 = vsel %vm7582_vm2, %v7576_v1, %v7593_v46  ;;  %v7591_v41 = vsel %vm7581_vm0, %v7588_v29, %v7590_v27  ;;  %v7586_v21 = vsel %vm7582_vm2, %v7570_v15, %v7585_v53 }
 0x74c   : > { %v7723_v40 = vsel %vm8173_vm1, 0, %v8172_v54  ;;  %v7595_v37 = vsel %vm7581_vm0, %v7592_v58, %v7594_v16  ;;  %v14829_v59 = vmul.u32.u64.low %v7596_v24, %v7591_v41  ;;  %v14830_v50 = vmul.u32.u64.high %v7596_v24, %v7591_v41, %v14829_v59 }
 0x74d   : > { %v7724_v31 = vsub.s32 32, %v7723_v40  ;;  %v7728_v5 = vsub.s32 4294967266, %v7723_v40  ;;  %v14826_v57 = vmul.u32.u64.low %v7596_v24, %v7595_v37  ;;  %v14827_v44 = vmul.u32.u64.high %v7596_v24, %v7595_v37, %v14826_v57 }
 0x74e   : > { %v7725_v2 = vshll.u32 %v14794_v63, %v7723_v40  ;;  %v7587_v43 = vsel %vm7581_vm0, %v7584_v19, %v7586_v21  ;;  %vm7439_vm4 = vcmp.eq.s32.totalorder %v7434_v10, 2  ;;  %vm7436_vm5 = vcmp.eq.s32.totalorder %v7434_v10, 0 }
 0x74f   : > { %v7726_v28 = vshrl.u32 %v7708_v33, %v7724_v31  ;;  %v7729_v0 = vadd.s32 127, %v7728_v5  ;;  %vm7605_vm3 = vc.u32 %v14827_v44, %v14829_v59  ;;  %v7606_v3 = vadd.s32 1, %v14830_v50 }
 0x750   : > { %vm7435_vm6 = vcmp.lt.s32.totalorder %v7434_v10, 2  ;;  %v7603_v13 = vmul.u32 %v7596_v24, %v7587_v43  ;;  %vm7432_vm7 = vweird.f32 %v14549_v42  ;;  %v7738_v47 = vsub.s32 4, %v14791_v51 }
 0x751   : > { %v8731_v9 = vpop.eup %8730  ;;  %v7727_v11 = vor.u32 %v7726_v28, %v7725_v2  ;;  %v7730_v49 = vshll.u32 %v7729_v0, 23  ;;  %v7607_v8 = vsel %vm7605_vm3, %v7606_v3, %v14830_v50  ;;  %v7604_v53 = vadd.s32 %v14829_v59, %v14827_v44 }
 0x752   : > { %v8733_v23 = vpop.eup %8732  ;;  %v7440_v39 = vxor.u32 2147483648, %v8731_v9  ;;  %v7608_v17 = vadd.s32 %v7607_v8, %v7603_v13  ;;  %v7739_v25 = vsel %vm7654_vm9, %v7738_v47, %v14791_v51  ;;  %vm7744_vm15 = vweird.f32 %v14627_v35 }
 0x753   : > { %v7437_v22 = vxor.u32 2147483648, %v8733_v23  ;;  %v7731_v63 = vor.u32 4788187, %v7730_v49  ;;  %v7734_v62 = vcvt.s32.f32 %v7727_v11  ;;  %v7741_v1 = vsel %vm7653_vm10, 0, %v7739_v25 }
 0x754   : > { %v7441_v12 = vsel %vm7439_vm4, %v7440_v39, %v8733_v23  ;;  %v7609_v55 = vadd.s32 536870912, %v7608_v17  ;;  %v7745_v10 = vadd.s32 3, %v7741_v1  ;;  %vm7550_vm2 = vcmp.lt.s32.totalorder %v14752_v18, 0 }
 0x755   : > { %v7438_v30 = vsel %vm7436_vm5, %v8731_v9, %v7437_v22  ;;  %v7732_v36 = vand.u32 2147483647, %v7731_v63  ;;  %vm7549_vm13 = vcmp.le.f32.partialorder %v7548_v56, 0.7853982  ;;  %vm7640_vm5 = vweird.f32 %v14752_v18 }
 0x756   : > { %v7442_v38 = vsel %vm7435_vm6, %v7438_v30, %v7441_v12  ;;  %v7610_v34 = vshrl.u32 %v7609_v55, 30  ;;  %v7746_v60 = vand.u32 3, %v7745_v10 }
 0x757   : > { %v7443_v4 = vsel %vm7432_vm7, nan, %v7442_v38  ;;  %v7735_v48 = vmul.f32 %v7734_v62, %v7732_v36 }
 0x758   : > { %7816 = vst [vmem:[%s9477_s9 + $0x1e0] sm:$0xff] %v7443_v4  ;;  %v7611_v15 = vshll.u32 %v7610_v34, 30  ;;  %vm7751_vm11 = vcmp.eq.s32.totalorder %v7746_v60, 2  ;;  %vm7747_vm12 = vcmp.lt.s32.totalorder %v7746_v60, 2  ;;  %vm7748_vm14 = vcmp.eq.s32.totalorder %v7746_v60, 0 }
 0x759   : > { %v7736_v61 = vxor.u32 2147483648, %v7735_v48  ;;  %v7634_v59 = vsub.s32 4, %v7610_v34 }
 0x75a   : > { %v7612_v14 = vsub.s32 %v7608_v17, %v7611_v15 }
 0x75b   : > { %v7737_v42 = vsel %vm7654_vm9, %v7736_v61, %v7735_v48 }
 0x75c   : > { %v7740_v52 = vsel %vm7653_vm10, %v14627_v35, %v7737_v42  ;;  %v7614_v7 = vsub.s32 0, %v7612_v14  ;;  %v7635_v35 = vsel %vm7550_vm2, %v7634_v59, %v7610_v34 }
 0x75d   : > { %8734 = vcosq.f32 %v7740_v52  ;;  %v7637_v28 = vsel %vm7549_vm13, 0, %v7635_v35 }
 0x75e   : > { %8736 = vsinq.f32 %v7740_v52  ;;  %v8167_v33 = vmin.u32 %v7614_v7, %v7612_v14  ;;  %v7641_v0 = vadd.s32 3, %v7637_v28 }
 0x760   : > { %v7616_v26 = vclz %v8167_v33  ;;  %v7642_v23 = vand.u32 3, %v7641_v0 }
 0x762   : > { %v8168_v45 = vadd.s32 4294967294, %v7616_v26  ;;  %vm7647_vm1 = vcmp.eq.s32.totalorder %v7642_v23, 2  ;;  %vm7644_vm0 = vcmp.eq.s32.totalorder %v7642_v23, 0  ;;  %vm7643_vm4 = vcmp.lt.s32.totalorder %v7642_v23, 2 }
 0x764   : > { %vm8169_vm8 = vcmp.lt.s32.totalorder %v8168_v45, 0 }
 0x765   : > { %v7619_v6 = vsel %vm8169_vm8, 0, %v8168_v45 }
 0x766   : > { %v7620_v32 = vsub.s32 32, %v7619_v6  ;;  %v7624_v58 = vsub.s32 4294967266, %v7619_v6  ;;  %v7621_v16 = vshll.u32 %v7612_v14, %v7619_v6 }
 0x767   : > { %v8735_v20 = vpop.eup %8734 }
 0x768   : > { %v8737_v51 = vpop.eup %8736  ;;  %v7752_v54 = vxor.u32 2147483648, %v8735_v20  ;;  %v7622_v40 = vshrl.u32 %v7604_v53, %v7620_v32  ;;  %v7625_v41 = vadd.s32 127, %v7624_v58 }
 0x769   : > { %v7749_v29 = vxor.u32 2147483648, %v8737_v51 }
 0x76a   : > { %v7753_v46 = vsel %vm7751_vm11, %v7752_v54, %v8737_v51  ;;  %v7623_v31 = vor.u32 %v7622_v40, %v7621_v16  ;;  %v7626_v5 = vshll.u32 %v7625_v41, 23 }
 0x76b   : > { %v7750_v27 = vsel %vm7748_vm14, %v8735_v20, %v7749_v29 }
 0x76c   : > { %v7754_v37 = vsel %vm7747_vm12, %v7750_v27, %v7753_v46  ;;  %v7627_v19 = vor.u32 4788187, %v7626_v5  ;;  %v7630_v57 = vcvt.s32.f32 %v7623_v31 }
 0x76d   : > { %v7755_v24 = vsel %vm7744_vm15, nan, %v7754_v37 }
 0x76e   : > { %7819 = vst [vmem:[%s9477_s9 + $0x1f8] sm:$0xff] %v7755_v24  ;;  %v7628_v21 = vand.u32 2147483647, %v7627_v19 }
 0x770   : > { %v7631_v44 = vmul.f32 %v7630_v57, %v7628_v21 }
 0x772   : > { %v7632_v50 = vxor.u32 2147483648, %v7631_v44 }
 0x774   : > { %v7633_v9 = vsel %vm7550_vm2, %v7632_v50, %v7631_v44 }
 0x775   : > { %v7636_v2 = vsel %vm7549_vm13, %v14752_v18, %v7633_v9 }
 0x776   : > { %8738 = vcosq.f32 %v7636_v2 }
 0x777   : > { %8740 = vsinq.f32 %v7636_v2 }
 0x780   : > { %v8739_v39 = vpop.eup %8738 }
 0x781   : > { %v8741_v43 = vpop.eup %8740  ;;  %v7648_v22 = vxor.u32 2147483648, %v8739_v39 }
 0x782   : > { %v7645_v11 = vxor.u32 2147483648, %v8741_v43 }
 0x783   : > { %v7649_v56 = vsel %vm7647_vm1, %v7648_v22, %v8741_v43 }
 0x784   : > { %v7646_v49 = vsel %vm7644_vm0, %v8739_v39, %v7645_v11 }
 0x785   : > { %v7650_v12 = vsel %vm7643_vm4, %v7646_v49, %v7649_v56 }
 0x786   : > { %v7651_v3 = vsel %vm7640_vm5, nan, %v7650_v12 }
 0x787   : > { %7818 = vst [vmem:[%s9477_s9 + $0x1f0] sm:$0xff] %v7651_v3 }
 0x788   : > { %8767 = shalt.err (!%p8764_p3)
}
 0x789   : > { %s8768_s7 = scalar_lea.hbm %s14857_s4, 8192  ;;  %s8772_s17 = scalar_lea.hbm %s14909_s3, 24576 }
 0x78a   : > { %p8769_p4 = scmp.ne.s32.totalorder %s14857_s4, %s8768_s7  ;;  %p8773_p9 = scmp.lt.u32.totalorder %s14857_s4, %s14909_s3 }
 0x78b   : > { %p8774_p10 = scmp.lt.u32.totalorder %s8772_s17, %s8768_s7  ;;  %p8776_p12 = scmp.lt.u32.totalorder %s8768_s7, %s14857_s4 }
 0x78c   : > { %p8770_p7 = pnand %p8769_p4, %p8886_p5 }
 0x78d   : > { %p8775_p11 = por %p8774_p10, %p8773_p9 }
 0x78e   : > { %p8771_p8 = pneg %p8770_p7 }
 0x78f   : > { %p8777_p13 = por %p8776_p12, %p8775_p11 }
 0x791   : > { %p8778_p0 = pnand %p8777_p13, %p8771_p8 }
 0x793   : > { %8781 = shalt.err (!%p8778_p0)
}
 0x794   : > { %s8826_s24 = smov 128   ;;  %s8827_s25 = smov 8  }
 0x795   : > { %8436 = dma.vmem_to_hbm [thread:$0]  (%p8886_p5), %s14859_s28, 8192, %s14857_s4, %s14865_s16, %s8826_s24, %s8826_s24, %s8827_s25  }
 0x796 PF: > { %p8442_p1 = scmp.ge.s32.totalorder %s8816_s15, 2  ;;  %s7849_s26 = sand.u32 1, %s8804_s12  }
 0x797   : > { %s7850_s27 = scalar_lea.sflag [#allocation3], %s7849_s26 }
 0x798   : > { %p8439_p2 = pnand %p8442_p1, %p8890_p6 }
 0x79a   : > { %8799 = dma.done.wait (!%p8439_p2), %s7850_s27, 8192  }
 0x79b   : > { %8801 = vsyncadd (!%p8439_p2), %s7850_s27, 4294959104  ;;  %p13_p3 = scmp.ge.s32.totalorder %s8873_s18, 5   ;;  %s15152_s12 = smov %s8808_s13 }
 0x79c   : > { %s15153_s13 = smov %s8812_s14  ;;  %s15154_s14 = smov %s8884_s21 }
 0x79d   : > { %s15155_s15 = smov %s8873_s18  ;;  %15 = sbr.rel (!%p13_p3) target bundleno = 3 (0x3), region = 70 }
 0x7a4   :  { %7855 = vsyncpa [#allocation3], 1 }
 0x7a5   :  { %7857 = vsyncpa [#allocation3 + $0x1], 1 }

</bundles_post_ra>
